<compile_context>
chip_gen: v7x
topology: tpu7x:2x2x1
jax: 0.10.0
libtpu: 0.0.40
codegen_flags: <defaults>
</compile_context>

<pallas_src>
import functools

import numpy as np
import jax
import jax.numpy as jnp
from jax.experimental import pallas as pl
from jax.experimental.pallas import tpu as pltpu


# ---------------------------------------------------------------------------
# Host-side constant builders (run once in __init__ / once per batch size)
# ---------------------------------------------------------------------------

def _make_gather(hin, win, hout, wout, stride):
    """(9, hout*wout, hin*win) 0/1 matrices.  Tap t = 3*di + dj selects input
    pixel (stride*oh + di - 1, stride*ow + dj - 1) for output pixel (oh, ow)
    of a 3x3 'same' (pad=1) convolution; out-of-bounds entries stay zero."""
    g = np.zeros((9, hout * wout, hin * win), np.float32)
    for di in range(3):
        for dj in range(3):
            t = di * 3 + dj
            for oh in range(hout):
                ih = oh * stride + di - 1
                if not 0 <= ih < hin:
                    continue
                for ow in range(wout):
                    iw = ow * stride + dj - 1
                    if 0 <= iw < win:
                        g[t, oh * wout + ow, ih * win + iw] = 1.0
    return g


def _make_upsample(h, w):
    """(4*h*w, h*w) 0/1 matrix implementing nearest-neighbour x2 upsampling."""
    u = np.zeros((4 * h * w, h * w), np.float32)
    for qh in range(2 * h):
        for qw in range(2 * w):
            u[qh * (2 * w) + qw, (qh // 2) * w + (qw // 2)] = 1.0
    return u


def _prune_taps(g_np, *w_np):
    """Drop conv taps whose gather matrix is entirely zero (fully OOB taps)."""
    keep = [t for t in range(g_np.shape[0]) if np.any(g_np[t])]
    if len(keep) == g_np.shape[0]:
        return (g_np,) + w_np
    idx = np.asarray(keep)
    return (g_np[idx],) + tuple(w[idx] for w in w_np)


def _fuse_gather(g_np):
    """(T, Pout, Pin) -> (Pout, T*Pin): G_hat = hstack_t(G_t), so the conv
    becomes ONE gather matmul over the tap-stacked channel-mix operand."""
    t, pout, pin = g_np.shape
    return np.transpose(g_np, (1, 0, 2)).reshape(pout, t * pin)


def _block_diag(w, batch):
    """(..., ci, co) -> (..., B*ci, B*co): the same block repeated down the
    diagonal, so ONE matmul applies the per-sample channel mix to the whole
    batch stacked along the lane axis."""
    ci, co = w.shape[-2], w.shape[-1]
    eye = jnp.eye(batch, dtype=w.dtype)
    out = w[..., None, :, None, :] * eye[:, None, :, None]
    return out.reshape(w.shape[:-2] + (batch * ci, batch * co))


def _fold_bn(w, bias, bn, eps=1e-5):
    """Fold inference BatchNorm into conv weight (k,k,cin,cout) and bias."""
    gamma, beta, mean, var = bn
    s = gamma / jnp.sqrt(var + eps)
    return w * s, (bias - mean) * s + beta


def _conv_init(key, k, cin, cout):
    w = jax.random.normal(key, (k, k, cin, cout), jnp.float32) / np.sqrt(k * k * cin)
    b = jnp.zeros((cout,), jnp.float32)
    return w, b


def _bn_init(key, c):
    k1, k2, k3 = jax.random.split(key, 3)
    gamma = 1.0 + 0.1 * jax.random.normal(k1, (c,), jnp.float32)
    beta = 0.1 * jax.random.normal(k2, (c,), jnp.float32)
    mean = 0.1 * jax.random.normal(k3, (c,), jnp.float32)
    var = 0.5 * jnp.ones((c,), jnp.float32)
    return gamma, beta, mean, var


# ---------------------------------------------------------------------------
# Fused Pallas kernel: whole network, whole batch (stacked in lanes), one step
# ---------------------------------------------------------------------------

def _build_kernel(return_global, return_grid):
    bf16 = jnp.bfloat16
    f32 = jnp.float32

    def kernel(*refs):
        it = iter(refs)
        patches_ref = next(it)
        w_st, b_st = next(it), next(it)
        enc = [(next(it), next(it), next(it)) for _ in range(4)]
        w_fc = b_fc = None
        dec = None
        w_h = b_h = None
        if return_global:
            w_fc, b_fc = next(it), next(it)
        if return_grid:
            dec = [tuple(next(it) for _ in range(5)) for _ in range(3)]
            w_h, b_h = next(it), next(it)
        fc_ref = next(it) if return_global else None
        feat_ref = next(it) if return_grid else None

        def mm(a, b):
            return jnp.dot(a.astype(bf16), b.astype(bf16),
                           preferred_element_type=f32)

        def gather_conv(mixes, g_ref, b_ref):
            # ONE wide gather matmul over the tap-stacked channel-mix operand.
            stacked = jnp.concatenate(mixes, axis=0)        # (T*P_in, B*Cout)
            y = jnp.dot(g_ref[...], stacked, preferred_element_type=f32)
            return jnp.maximum(y + b_ref[...], 0.0)          # f32 epilogue

        def conv(x, g_ref, w_ref, b_ref):
            # y = relu( G_hat @ vstack_t(x @ W_t) + b )  (3x3 conv, BN folded)
            xb = x.astype(bf16)
            mixes = [mm(xb, w_ref[t]).astype(bf16)
                     for t in range(w_ref.shape[0])]
            return gather_conv(mixes, g_ref, b_ref)

        def conv2(x_up, x_skip, g_ref, wa_ref, wb_ref, b_ref):
            # conv(concat([x_up, x_skip], ch)) == per-tap Wa-mix + Wb-mix.
            ub, sb = x_up.astype(bf16), x_skip.astype(bf16)
            mixes = [(mm(ub, wa_ref[t]) + mm(sb, wb_ref[t])).astype(bf16)
                     for t in range(wa_ref.shape[0])]
            return gather_conv(mixes, g_ref, b_ref)

        def upsample(x, u_ref):
            if u_ref.shape[1] == 1:     # nearest-x2 of a 1x1 map == broadcast
                return jnp.broadcast_to(x, (u_ref.shape[0], x.shape[1]))
            return jnp.dot(u_ref[...], x.astype(bf16),
                           preferred_element_type=f32)

        # ------------------------------ encoder ---------------------------
        # stem (stride-2 conv): single fused (P, B*9*cin) @ block-diag matmul.
        f = jnp.maximum(mm(patches_ref[...], w_st[...]) + b_st[...], 0.0)
        feats = []
        for g_ref, w_ref, b_ref in enc:            # layer1..layer4 (stride 2)
            f = conv(f, g_ref, w_ref, b_ref)
            feats.append(f)
        f1, f2, f3, f4 = feats

        # --------------------------- global feature -----------------------
        if return_global:
            pooled = jnp.mean(f4, axis=0, keepdims=True)     # global avg pool
            fc_ref[...] = (mm(pooled, w_fc[...]) + b_fc[...]).astype(fc_ref.dtype)

        # --------------------------- grid feature -------------------------
        if return_grid:
            d = f4
            for (u_ref, g_ref, wa_ref, wb_ref, b_ref), skip in zip(
                    dec, (f3, f2, f1)):
                # TODO(synk): for large maps replace the stride-1 gather
                # matmuls with pltpu.roll taps + boundary masks (XLU path).
                d = conv2(upsample(d, u_ref), skip,
                          g_ref, wa_ref, wb_ref, b_ref)
            feat_ref[...] = (mm(d, w_h[...]) + b_h[...]).astype(feat_ref.dtype)

    return kernel


def _forward_impl(prep, map_inputs, *, return_global, return_grid,
                  out_hw, global_dim, grid_dim):
    n, cin, h, w = map_inputs.shape
    ho, wo = h // 2, w // 2

    # Stem im2col in the batch-in-lanes layout:
    #   rows = stem-output pixel, cols = (batch, tap, channel)   (batch-major).
    # TODO(synk): build the stem taps in-kernel with shifted slices for large
    # maps to avoid this 9x patch round trip through HBM.
    x = jnp.transpose(map_inputs.astype(jnp.float32), (0, 2, 3, 1))
    xp = jnp.pad(x, ((0, 0), (1, 1), (1, 1), (0, 0)))
    taps = [xp[:, di:di + h:2, dj:dj + w:2, :]
            for di in range(3) for dj in range(3)]
    patches = jnp.stack(taps, axis=3)                    # (B, ho, wo, 9, cin)
    patches = jnp.transpose(patches, (1, 2, 0, 3, 4)).reshape(
        ho * wo, n * 9 * cin).astype(jnp.bfloat16)

    out_shapes = []
    if return_global:
        out_shapes.append(jax.ShapeDtypeStruct((1, n * global_dim), jnp.float32))
    if return_grid:
        hg, wg = out_hw
        out_shapes.append(
            jax.ShapeDtypeStruct((hg * wg, n * grid_dim), jnp.float32))

    outs = pl.pallas_call(
        _build_kernel(return_global, return_grid),
        out_shape=tuple(out_shapes),
        compiler_params=pltpu.CompilerParams(
            vmem_limit_bytes=48 * 1024 * 1024),
    )(patches, *prep)

    oi = 0
    fc_out = None
    feat_map_out = None
    if return_global:
        fc_out = outs[oi].reshape(n, global_dim)
        oi += 1
    if return_grid:
        hg, wg = out_hw
        feat_map_out = jnp.transpose(
            outs[oi].reshape(hg, wg, n, grid_dim), (2, 3, 0, 1))  # -> NCHW
    return fc_out, feat_map_out


# ---------------------------------------------------------------------------
# MapEncoder
# ---------------------------------------------------------------------------

class MapEncoderPallas:
    """fc_out (global feature) + feat_map_out (grid feature), like MapEncoder."""

    def __init__(self, input_image_shape=(3, 32, 32),
                 global_feature_dim=16, grid_feature_dim=8,
                 key=jax.random.PRNGKey(42)):
        self.return_global_feat = global_feature_dim is not None
        self.return_grid_feat = grid_feature_dim is not None
        self.input_image_shape = input_image_shape
        self.global_feature_dim = global_feature_dim
        self.grid_feature_dim = grid_feature_dim
        cin, H, W = input_image_shape
        assert H % 32 == 0 and W % 32 == 0, "spatial dims must be multiples of 32"
        chans = [8, 8, 16, 32, 64]                      # stem, layer1..layer4
        self.encoder_feat_scales = [1 / 4, 1 / 8, 1 / 16, 1 / 32]

        keys = jax.random.split(key, 32)
        ki = iter(range(32))

        def conv_block(k, ci, co):
            w, b = _conv_init(keys[next(ki)], k, ci, co)
            bn = _bn_init(keys[next(ki)], co)
            return (w, b, bn)

        stem = conv_block(3, cin, chans[0])
        enc_blocks = [conv_block(3, chans[0], chans[1]),
                      conv_block(3, chans[1], chans[2]),
                      conv_block(3, chans[2], chans[3]),
                      conv_block(3, chans[3], chans[4])]

        if self.return_global_feat:
            fc_w = (jax.random.normal(keys[next(ki)],
                                      (chans[4], global_feature_dim),
                                      jnp.float32) / np.sqrt(chans[4]))
            fc_b = 0.01 * jax.random.normal(keys[next(ki)],
                                            (global_feature_dim,), jnp.float32)

        if self.return_grid_feat:
            dec_blocks = [conv_block(3, chans[4] + chans[3], 32),
                          conv_block(3, 32 + chans[2], 16),
                          conv_block(3, 16 + chans[1], 16)]
            head_w = (jax.random.normal(keys[next(ki)],
                                        (16, grid_feature_dim),
                                        jnp.float32) / np.sqrt(16))
            head_b = 0.01 * jax.random.normal(keys[next(ki)],
                                              (grid_feature_dim,), jnp.float32)

        # ------- one-time (batch-independent) prep: BN fold + gather build ----
        bf = jnp.bfloat16
        spat = [(H // 2, W // 2), (H // 4, W // 4), (H // 8, W // 8),
                (H // 16, W // 16), (H // 32, W // 32)]
        gather_bytes = 0

        w0, b0 = _fold_bn(*stem)
        self._stem = (w0.reshape(9 * cin, chans[0]), b0)

        self._enc = []
        for li, blk in enumerate(enc_blocks):           # stride-2 conv layers
            (hin, win), (hout, wout) = spat[li], spat[li + 1]
            wf, bias = _fold_bn(*blk)
            ci, co = wf.shape[2], wf.shape[3]
            g = _make_gather(hin, win, hout, wout, stride=2)
            g, wt = _prune_taps(g, np.asarray(wf.reshape(9, ci, co)))
            g_hat = _fuse_gather(g)
            gather_bytes += g_hat.size * 2
            self._enc.append((jnp.asarray(g_hat, bf), jnp.asarray(wt), bias))

        if self.return_global_feat:
            self._fc = (fc_w, fc_b)

        if self.return_grid_feat:
            self._dec = []
            cups = [chans[4], 32, 16]
            cskips = [chans[3], chans[2], chans[1]]
            lo_spat = [spat[4], spat[3], spat[2]]       # before x2 upsample
            hi_spat = [spat[3], spat[2], spat[1]]       # decoder conv res
            for si, blk in enumerate(dec_blocks):
                wf, bias = _fold_bn(*blk)
                co = wf.shape[3]
                cup, csk = cups[si], cskips[si]
                hl, wl = lo_spat[si]
                hh, wh_ = hi_spat[si]
                u = _make_upsample(hl, wl)
                g = _make_gather(hh, wh_, hh, wh_, stride=1)
                wa = np.asarray(wf[:, :, :cup, :].reshape(9, cup, co))
                wb = np.asarray(wf[:, :, cup:, :].reshape(9, csk, co))
                g, wa, wb = _prune_taps(g, wa, wb)
                g_hat = _fuse_gather(g)
                gather_bytes += g_hat.size * 2 + u.size * 2
                self._dec.append((jnp.asarray(u, bf), jnp.asarray(g_hat, bf),
                                  jnp.asarray(wa), jnp.asarray(wb), bias))
            self._head = (head_w, head_b)

        # VMEM guard: the 0/1 gather matrices scale ~O((H*W)^2) and hit v7x's
        # 64 MiB VMEM first as the map resolution grows.
        # TODO(synk): switch to roll/shifted-slice taps above this size.
        if gather_bytes > 20 * 1024 * 1024:
            raise NotImplementedError(
                f"gather matrices need {gather_bytes / 2**20:.1f} MiB VMEM; "
                "use roll/strided-slice taps for maps this large")

        self._prep_cache = {}
        self._forward = jax.jit(functools.partial(
            _forward_impl,
            return_global=self.return_global_feat,
            return_grid=self.return_grid_feat,
            out_hw=(H // 4, W // 4),
            global_dim=global_feature_dim,
            grid_dim=grid_feature_dim))

    # ---- per-batch-size weight prep (block-diag lane stacking), cached ------
    def _prepare(self, batch):
        if batch in self._prep_cache:
            return self._prep_cache[batch]
        bf = jnp.bfloat16
        f32 = jnp.float32

        def bias_t(b):
            return jnp.tile(b, batch).reshape(1, -1).astype(f32)

        prep = []
        w0, b0 = self._stem
        prep += [_block_diag(w0, batch).astype(bf), bias_t(b0)]
        for g_hat, wt, b in self._enc:
            prep += [g_hat, _block_diag(wt, batch).astype(bf), bias_t(b)]
        if self.return_global_feat:
            fw, fb = self._fc
            prep += [_block_diag(fw, batch).astype(bf), bias_t(fb)]
        if self.return_grid_feat:
            for u, g_hat, wa, wb, b in self._dec:
                prep += [u, g_hat,
                         _block_diag(wa, batch).astype(bf),
                         _block_diag(wb, batch).astype(bf), bias_t(b)]
            hw_, hb = self._head
            prep += [_block_diag(hw_, batch).astype(bf), bias_t(hb)]
        prep = tuple(prep)
        self._prep_cache[batch] = prep
        return prep

    def feat_map_out_dim(self, H, W):
        s = self.encoder_feat_scales[-4]
        return (H * s, W * s)

    def __call__(self, map_inputs, encoder_feats=None):
        # TODO(synk): the precomputed-`encoder_feats` override path of the
        # original MapEncoder is not routed through the fused kernel.
        if not (self.return_global_feat or self.return_grid_feat):
            return None, None
        prep = self._prepare(map_inputs.shape[0])
        return self._forward(prep, map_inputs)


if __name__ == "__main__":
    key = jax.random.PRNGKey(0)
    k_in, k_params = jax.random.split(key)

    batch, cin, H, W = 2, 3, 32, 32
    map_inputs = jax.random.normal(k_in, (batch, cin, H, W), jnp.float32)

    model = MapEncoderPallas(input_image_shape=(cin, H, W),
                             global_feature_dim=16,
                             grid_feature_dim=8,
                             key=k_params)

    fc_out, feat_map_out = model(map_inputs)
    jax.block_until_ready(fc_out)
    jax.block_until_ready(feat_map_out)

    assert fc_out.shape == (batch, 16)
    assert feat_map_out.shape == (batch, 8, H // 4, W // 4)
    assert bool(jnp.all(jnp.isfinite(fc_out)))
    assert bool(jnp.all(jnp.isfinite(feat_map_out)))
    print("KERNEL_OK")
</pallas_src>

<mosaic_0001>
module attributes {stable_mosaic.version = 11 : i64} {
  func.func @kernel(%arg0: memref<256x54xbf16, #tpu.memory_space<vmem>>, %arg1: memref<54x16xbf16, #tpu.memory_space<vmem>>, %arg2: memref<1x16xf32, #tpu.memory_space<vmem>>, %arg3: memref<64x2304xbf16, #tpu.memory_space<vmem>>, %arg4: memref<9x16x16xbf16, #tpu.memory_space<vmem>>, %arg5: memref<1x16xf32, #tpu.memory_space<vmem>>, %arg6: memref<16x576xbf16, #tpu.memory_space<vmem>>, %arg7: memref<9x16x32xbf16, #tpu.memory_space<vmem>>, %arg8: memref<1x32xf32, #tpu.memory_space<vmem>>, %arg9: memref<4x144xbf16, #tpu.memory_space<vmem>>, %arg10: memref<9x32x64xbf16, #tpu.memory_space<vmem>>, %arg11: memref<1x64xf32, #tpu.memory_space<vmem>>, %arg12: memref<1x16xbf16, #tpu.memory_space<vmem>>, %arg13: memref<4x64x128xbf16, #tpu.memory_space<vmem>>, %arg14: memref<1x128xf32, #tpu.memory_space<vmem>>, %arg15: memref<128x32xbf16, #tpu.memory_space<vmem>>, %arg16: memref<1x32xf32, #tpu.memory_space<vmem>>, %arg17: memref<4x1xbf16, #tpu.memory_space<vmem>>, %arg18: memref<4x36xbf16, #tpu.memory_space<vmem>>, %arg19: memref<9x128x64xbf16, #tpu.memory_space<vmem>>, %arg20: memref<9x64x64xbf16, #tpu.memory_space<vmem>>, %arg21: memref<1x64xf32, #tpu.memory_space<vmem>>, %arg22: memref<16x4xbf16, #tpu.memory_space<vmem>>, %arg23: memref<16x144xbf16, #tpu.memory_space<vmem>>, %arg24: memref<9x64x32xbf16, #tpu.memory_space<vmem>>, %arg25: memref<9x32x32xbf16, #tpu.memory_space<vmem>>, %arg26: memref<1x32xf32, #tpu.memory_space<vmem>>, %arg27: memref<64x16xbf16, #tpu.memory_space<vmem>>, %arg28: memref<64x576xbf16, #tpu.memory_space<vmem>>, %arg29: memref<9x32x32xbf16, #tpu.memory_space<vmem>>, %arg30: memref<9x16x32xbf16, #tpu.memory_space<vmem>>, %arg31: memref<1x32xf32, #tpu.memory_space<vmem>>, %arg32: memref<32x16xbf16, #tpu.memory_space<vmem>>, %arg33: memref<1x16xf32, #tpu.memory_space<vmem>>, %arg34: memref<1x32xf32, #tpu.memory_space<vmem>>, %arg35: memref<64x16xf32, #tpu.memory_space<vmem>>) attributes {dimension_semantics = [], scalar_prefetch = 0 : i64, scratch_operands = 0 : i64, tpu.core_type = #tpu.core_type<tc>} {
    %c0 = arith.constant 0 : index
    %c0_0 = arith.constant 0 : index
    %0 = vector.load %arg0[%c0, %c0_0] : memref<256x54xbf16, #tpu.memory_space<vmem>>, vector<256x54xbf16>
    %c0_1 = arith.constant 0 : index
    %c0_2 = arith.constant 0 : index
    %1 = vector.load %arg1[%c0_1, %c0_2] : memref<54x16xbf16, #tpu.memory_space<vmem>>, vector<54x16xbf16>
    %cst = arith.constant dense<0.000000e+00> : vector<256x16xf32>
    %2 = tpu.matmul %0, %1, %cst {dimension_numbers = #tpu.dot_dimension_numbers<[1], [0], [0], [1], [0, 0, 1, 1], [], []>} : vector<256x54xbf16>, vector<54x16xbf16>, vector<256x16xf32> -> vector<256x16xf32>
    %c0_3 = arith.constant 0 : index
    %c0_4 = arith.constant 0 : index
    %3 = vector.load %arg2[%c0_3, %c0_4] : memref<1x16xf32, #tpu.memory_space<vmem>>, vector<1x16xf32>
    %4 = vector.broadcast %3 : vector<1x16xf32> to vector<256x16xf32>
    %5 = arith.addf %2, %4 : vector<256x16xf32>
    %cst_5 = arith.constant 0.000000e+00 : f32
    %6 = vector.broadcast %cst_5 : f32 to vector<256x16xf32>
    %7 = arith.maximumf %5, %6 : vector<256x16xf32>
    %8 = arith.truncf %7 : vector<256x16xf32> to vector<256x16xbf16>
    %c0_6 = arith.constant 0 : index
    %c0_7 = arith.constant 0 : index
    %c0_8 = arith.constant 0 : index
    %9 = vector.load %arg4[%c0_6, %c0_7, %c0_8] : memref<9x16x16xbf16, #tpu.memory_space<vmem>>, vector<1x16x16xbf16>
    %10 = vector.shape_cast %9 : vector<1x16x16xbf16> to vector<16x16xbf16>
    %cst_9 = arith.constant dense<0.000000e+00> : vector<256x16xf32>
    %11 = tpu.matmul %8, %10, %cst_9 {dimension_numbers = #tpu.dot_dimension_numbers<[1], [0], [0], [1], [0, 0, 1, 1], [], []>} : vector<256x16xbf16>, vector<16x16xbf16>, vector<256x16xf32> -> vector<256x16xf32>
    %12 = arith.truncf %11 : vector<256x16xf32> to vector<256x16xbf16>
    %c1 = arith.constant 1 : index
    %c0_10 = arith.constant 0 : index
    %c0_11 = arith.constant 0 : index
    %13 = vector.load %arg4[%c1, %c0_10, %c0_11] : memref<9x16x16xbf16, #tpu.memory_space<vmem>>, vector<1x16x16xbf16>
    %14 = vector.shape_cast %13 : vector<1x16x16xbf16> to vector<16x16xbf16>
    %cst_12 = arith.constant dense<0.000000e+00> : vector<256x16xf32>
    %15 = tpu.matmul %8, %14, %cst_12 {dimension_numbers = #tpu.dot_dimension_numbers<[1], [0], [0], [1], [0, 0, 1, 1], [], []>} : vector<256x16xbf16>, vector<16x16xbf16>, vector<256x16xf32> -> vector<256x16xf32>
    %16 = arith.truncf %15 : vector<256x16xf32> to vector<256x16xbf16>
    %c2 = arith.constant 2 : index
    %c0_13 = arith.constant 0 : index
    %c0_14 = arith.constant 0 : index
    %17 = vector.load %arg4[%c2, %c0_13, %c0_14] : memref<9x16x16xbf16, #tpu.memory_space<vmem>>, vector<1x16x16xbf16>
    %18 = vector.shape_cast %17 : vector<1x16x16xbf16> to vector<16x16xbf16>
    %cst_15 = arith.constant dense<0.000000e+00> : vector<256x16xf32>
    %19 = tpu.matmul %8, %18, %cst_15 {dimension_numbers = #tpu.dot_dimension_numbers<[1], [0], [0], [1], [0, 0, 1, 1], [], []>} : vector<256x16xbf16>, vector<16x16xbf16>, vector<256x16xf32> -> vector<256x16xf32>
    %20 = arith.truncf %19 : vector<256x16xf32> to vector<256x16xbf16>
    %c3 = arith.constant 3 : index
    %c0_16 = arith.constant 0 : index
    %c0_17 = arith.constant 0 : index
    %21 = vector.load %arg4[%c3, %c0_16, %c0_17] : memref<9x16x16xbf16, #tpu.memory_space<vmem>>, vector<1x16x16xbf16>
    %22 = vector.shape_cast %21 : vector<1x16x16xbf16> to vector<16x16xbf16>
    %cst_18 = arith.constant dense<0.000000e+00> : vector<256x16xf32>
    %23 = tpu.matmul %8, %22, %cst_18 {dimension_numbers = #tpu.dot_dimension_numbers<[1], [0], [0], [1], [0, 0, 1, 1], [], []>} : vector<256x16xbf16>, vector<16x16xbf16>, vector<256x16xf32> -> vector<256x16xf32>
    %24 = arith.truncf %23 : vector<256x16xf32> to vector<256x16xbf16>
    %c4 = arith.constant 4 : index
    %c0_19 = arith.constant 0 : index
    %c0_20 = arith.constant 0 : index
    %25 = vector.load %arg4[%c4, %c0_19, %c0_20] : memref<9x16x16xbf16, #tpu.memory_space<vmem>>, vector<1x16x16xbf16>
    %26 = vector.shape_cast %25 : vector<1x16x16xbf16> to vector<16x16xbf16>
    %cst_21 = arith.constant dense<0.000000e+00> : vector<256x16xf32>
    %27 = tpu.matmul %8, %26, %cst_21 {dimension_numbers = #tpu.dot_dimension_numbers<[1], [0], [0], [1], [0, 0, 1, 1], [], []>} : vector<256x16xbf16>, vector<16x16xbf16>, vector<256x16xf32> -> vector<256x16xf32>
    %28 = arith.truncf %27 : vector<256x16xf32> to vector<256x16xbf16>
    %c5 = arith.constant 5 : index
    %c0_22 = arith.constant 0 : index
    %c0_23 = arith.constant 0 : index
    %29 = vector.load %arg4[%c5, %c0_22, %c0_23] : memref<9x16x16xbf16, #tpu.memory_space<vmem>>, vector<1x16x16xbf16>
    %30 = vector.shape_cast %29 : vector<1x16x16xbf16> to vector<16x16xbf16>
    %cst_24 = arith.constant dense<0.000000e+00> : vector<256x16xf32>
    %31 = tpu.matmul %8, %30, %cst_24 {dimension_numbers = #tpu.dot_dimension_numbers<[1], [0], [0], [1], [0, 0, 1, 1], [], []>} : vector<256x16xbf16>, vector<16x16xbf16>, vector<256x16xf32> -> vector<256x16xf32>
    %32 = arith.truncf %31 : vector<256x16xf32> to vector<256x16xbf16>
    %c6 = arith.constant 6 : index
    %c0_25 = arith.constant 0 : index
    %c0_26 = arith.constant 0 : index
    %33 = vector.load %arg4[%c6, %c0_25, %c0_26] : memref<9x16x16xbf16, #tpu.memory_space<vmem>>, vector<1x16x16xbf16>
    %34 = vector.shape_cast %33 : vector<1x16x16xbf16> to vector<16x16xbf16>
    %cst_27 = arith.constant dense<0.000000e+00> : vector<256x16xf32>
    %35 = tpu.matmul %8, %34, %cst_27 {dimension_numbers = #tpu.dot_dimension_numbers<[1], [0], [0], [1], [0, 0, 1, 1], [], []>} : vector<256x16xbf16>, vector<16x16xbf16>, vector<256x16xf32> -> vector<256x16xf32>
    %36 = arith.truncf %35 : vector<256x16xf32> to vector<256x16xbf16>
    %c7 = arith.constant 7 : index
    %c0_28 = arith.constant 0 : index
    %c0_29 = arith.constant 0 : index
    %37 = vector.load %arg4[%c7, %c0_28, %c0_29] : memref<9x16x16xbf16, #tpu.memory_space<vmem>>, vector<1x16x16xbf16>
    %38 = vector.shape_cast %37 : vector<1x16x16xbf16> to vector<16x16xbf16>
    %cst_30 = arith.constant dense<0.000000e+00> : vector<256x16xf32>
    %39 = tpu.matmul %8, %38, %cst_30 {dimension_numbers = #tpu.dot_dimension_numbers<[1], [0], [0], [1], [0, 0, 1, 1], [], []>} : vector<256x16xbf16>, vector<16x16xbf16>, vector<256x16xf32> -> vector<256x16xf32>
    %40 = arith.truncf %39 : vector<256x16xf32> to vector<256x16xbf16>
    %c8 = arith.constant 8 : index
    %c0_31 = arith.constant 0 : index
    %c0_32 = arith.constant 0 : index
    %41 = vector.load %arg4[%c8, %c0_31, %c0_32] : memref<9x16x16xbf16, #tpu.memory_space<vmem>>, vector<1x16x16xbf16>
    %42 = vector.shape_cast %41 : vector<1x16x16xbf16> to vector<16x16xbf16>
    %cst_33 = arith.constant dense<0.000000e+00> : vector<256x16xf32>
    %43 = tpu.matmul %8, %42, %cst_33 {dimension_numbers = #tpu.dot_dimension_numbers<[1], [0], [0], [1], [0, 0, 1, 1], [], []>} : vector<256x16xbf16>, vector<16x16xbf16>, vector<256x16xf32> -> vector<256x16xf32>
    %44 = arith.truncf %43 : vector<256x16xf32> to vector<256x16xbf16>
    %45 = tpu.concatenate %12, %16, %20, %24, %28, %32, %36, %40, %44 in 0 : vector<256x16xbf16>, vector<256x16xbf16>, vector<256x16xbf16>, vector<256x16xbf16>, vector<256x16xbf16>, vector<256x16xbf16>, vector<256x16xbf16>, vector<256x16xbf16>, vector<256x16xbf16> -> vector<2304x16xbf16>
    %c0_34 = arith.constant 0 : index
    %c0_35 = arith.constant 0 : index
    %46 = vector.load %arg3[%c0_34, %c0_35] : memref<64x2304xbf16, #tpu.memory_space<vmem>>, vector<64x2304xbf16>
    %cst_36 = arith.constant dense<0.000000e+00> : vector<64x16xf32>
    %47 = tpu.matmul %46, %45, %cst_36 {dimension_numbers = #tpu.dot_dimension_numbers<[1], [0], [0], [1], [0, 0, 1, 1], [], []>} : vector<64x2304xbf16>, vector<2304x16xbf16>, vector<64x16xf32> -> vector<64x16xf32>
    %c0_37 = arith.constant 0 : index
    %c0_38 = arith.constant 0 : index
    %48 = vector.load %arg5[%c0_37, %c0_38] : memref<1x16xf32, #tpu.memory_space<vmem>>, vector<1x16xf32>
    %49 = vector.broadcast %48 : vector<1x16xf32> to vector<64x16xf32>
    %50 = arith.addf %47, %49 : vector<64x16xf32>
    %cst_39 = arith.constant 0.000000e+00 : f32
    %51 = vector.broadcast %cst_39 : f32 to vector<64x16xf32>
    %52 = arith.maximumf %50, %51 : vector<64x16xf32>
    %53 = arith.truncf %52 : vector<64x16xf32> to vector<64x16xbf16>
    %c0_40 = arith.constant 0 : index
    %c0_41 = arith.constant 0 : index
    %c0_42 = arith.constant 0 : index
    %54 = vector.load %arg7[%c0_40, %c0_41, %c0_42] : memref<9x16x32xbf16, #tpu.memory_space<vmem>>, vector<1x16x32xbf16>
    %55 = vector.shape_cast %54 : vector<1x16x32xbf16> to vector<16x32xbf16>
    %cst_43 = arith.constant dense<0.000000e+00> : vector<64x32xf32>
    %56 = tpu.matmul %53, %55, %cst_43 {dimension_numbers = #tpu.dot_dimension_numbers<[1], [0], [0], [1], [0, 0, 1, 1], [], []>} : vector<64x16xbf16>, vector<16x32xbf16>, vector<64x32xf32> -> vector<64x32xf32>
    %57 = arith.truncf %56 : vector<64x32xf32> to vector<64x32xbf16>
    %c1_44 = arith.constant 1 : index
    %c0_45 = arith.constant 0 : index
    %c0_46 = arith.constant 0 : index
    %58 = vector.load %arg7[%c1_44, %c0_45, %c0_46] : memref<9x16x32xbf16, #tpu.memory_space<vmem>>, vector<1x16x32xbf16>
    %59 = vector.shape_cast %58 : vector<1x16x32xbf16> to vector<16x32xbf16>
    %cst_47 = arith.constant dense<0.000000e+00> : vector<64x32xf32>
    %60 = tpu.matmul %53, %59, %cst_47 {dimension_numbers = #tpu.dot_dimension_numbers<[1], [0], [0], [1], [0, 0, 1, 1], [], []>} : vector<64x16xbf16>, vector<16x32xbf16>, vector<64x32xf32> -> vector<64x32xf32>
    %61 = arith.truncf %60 : vector<64x32xf32> to vector<64x32xbf16>
    %c2_48 = arith.constant 2 : index
    %c0_49 = arith.constant 0 : index
    %c0_50 = arith.constant 0 : index
    %62 = vector.load %arg7[%c2_48, %c0_49, %c0_50] : memref<9x16x32xbf16, #tpu.memory_space<vmem>>, vector<1x16x32xbf16>
    %63 = vector.shape_cast %62 : vector<1x16x32xbf16> to vector<16x32xbf16>
    %cst_51 = arith.constant dense<0.000000e+00> : vector<64x32xf32>
    %64 = tpu.matmul %53, %63, %cst_51 {dimension_numbers = #tpu.dot_dimension_numbers<[1], [0], [0], [1], [0, 0, 1, 1], [], []>} : vector<64x16xbf16>, vector<16x32xbf16>, vector<64x32xf32> -> vector<64x32xf32>
    %65 = arith.truncf %64 : vector<64x32xf32> to vector<64x32xbf16>
    %c3_52 = arith.constant 3 : index
    %c0_53 = arith.constant 0 : index
    %c0_54 = arith.constant 0 : index
    %66 = vector.load %arg7[%c3_52, %c0_53, %c0_54] : memref<9x16x32xbf16, #tpu.memory_space<vmem>>, vector<1x16x32xbf16>
    %67 = vector.shape_cast %66 : vector<1x16x32xbf16> to vector<16x32xbf16>
    %cst_55 = arith.constant dense<0.000000e+00> : vector<64x32xf32>
    %68 = tpu.matmul %53, %67, %cst_55 {dimension_numbers = #tpu.dot_dimension_numbers<[1], [0], [0], [1], [0, 0, 1, 1], [], []>} : vector<64x16xbf16>, vector<16x32xbf16>, vector<64x32xf32> -> vector<64x32xf32>
    %69 = arith.truncf %68 : vector<64x32xf32> to vector<64x32xbf16>
    %c4_56 = arith.constant 4 : index
    %c0_57 = arith.constant 0 : index
    %c0_58 = arith.constant 0 : index
    %70 = vector.load %arg7[%c4_56, %c0_57, %c0_58] : memref<9x16x32xbf16, #tpu.memory_space<vmem>>, vector<1x16x32xbf16>
    %71 = vector.shape_cast %70 : vector<1x16x32xbf16> to vector<16x32xbf16>
    %cst_59 = arith.constant dense<0.000000e+00> : vector<64x32xf32>
    %72 = tpu.matmul %53, %71, %cst_59 {dimension_numbers = #tpu.dot_dimension_numbers<[1], [0], [0], [1], [0, 0, 1, 1], [], []>} : vector<64x16xbf16>, vector<16x32xbf16>, vector<64x32xf32> -> vector<64x32xf32>
    %73 = arith.truncf %72 : vector<64x32xf32> to vector<64x32xbf16>
    %c5_60 = arith.constant 5 : index
    %c0_61 = arith.constant 0 : index
    %c0_62 = arith.constant 0 : index
    %74 = vector.load %arg7[%c5_60, %c0_61, %c0_62] : memref<9x16x32xbf16, #tpu.memory_space<vmem>>, vector<1x16x32xbf16>
    %75 = vector.shape_cast %74 : vector<1x16x32xbf16> to vector<16x32xbf16>
    %cst_63 = arith.constant dense<0.000000e+00> : vector<64x32xf32>
    %76 = tpu.matmul %53, %75, %cst_63 {dimension_numbers = #tpu.dot_dimension_numbers<[1], [0], [0], [1], [0, 0, 1, 1], [], []>} : vector<64x16xbf16>, vector<16x32xbf16>, vector<64x32xf32> -> vector<64x32xf32>
    %77 = arith.truncf %76 : vector<64x32xf32> to vector<64x32xbf16>
    %c6_64 = arith.constant 6 : index
    %c0_65 = arith.constant 0 : index
    %c0_66 = arith.constant 0 : index
    %78 = vector.load %arg7[%c6_64, %c0_65, %c0_66] : memref<9x16x32xbf16, #tpu.memory_space<vmem>>, vector<1x16x32xbf16>
    %79 = vector.shape_cast %78 : vector<1x16x32xbf16> to vector<16x32xbf16>
    %cst_67 = arith.constant dense<0.000000e+00> : vector<64x32xf32>
    %80 = tpu.matmul %53, %79, %cst_67 {dimension_numbers = #tpu.dot_dimension_numbers<[1], [0], [0], [1], [0, 0, 1, 1], [], []>} : vector<64x16xbf16>, vector<16x32xbf16>, vector<64x32xf32> -> vector<64x32xf32>
    %81 = arith.truncf %80 : vector<64x32xf32> to vector<64x32xbf16>
    %c7_68 = arith.constant 7 : index
    %c0_69 = arith.constant 0 : index
    %c0_70 = arith.constant 0 : index
    %82 = vector.load %arg7[%c7_68, %c0_69, %c0_70] : memref<9x16x32xbf16, #tpu.memory_space<vmem>>, vector<1x16x32xbf16>
    %83 = vector.shape_cast %82 : vector<1x16x32xbf16> to vector<16x32xbf16>
    %cst_71 = arith.constant dense<0.000000e+00> : vector<64x32xf32>
    %84 = tpu.matmul %53, %83, %cst_71 {dimension_numbers = #tpu.dot_dimension_numbers<[1], [0], [0], [1], [0, 0, 1, 1], [], []>} : vector<64x16xbf16>, vector<16x32xbf16>, vector<64x32xf32> -> vector<64x32xf32>
    %85 = arith.truncf %84 : vector<64x32xf32> to vector<64x32xbf16>
    %c8_72 = arith.constant 8 : index
    %c0_73 = arith.constant 0 : index
    %c0_74 = arith.constant 0 : index
    %86 = vector.load %arg7[%c8_72, %c0_73, %c0_74] : memref<9x16x32xbf16, #tpu.memory_space<vmem>>, vector<1x16x32xbf16>
    %87 = vector.shape_cast %86 : vector<1x16x32xbf16> to vector<16x32xbf16>
    %cst_75 = arith.constant dense<0.000000e+00> : vector<64x32xf32>
    %88 = tpu.matmul %53, %87, %cst_75 {dimension_numbers = #tpu.dot_dimension_numbers<[1], [0], [0], [1], [0, 0, 1, 1], [], []>} : vector<64x16xbf16>, vector<16x32xbf16>, vector<64x32xf32> -> vector<64x32xf32>
    %89 = arith.truncf %88 : vector<64x32xf32> to vector<64x32xbf16>
    %90 = tpu.concatenate %57, %61, %65, %69, %73, %77, %81, %85, %89 in 0 : vector<64x32xbf16>, vector<64x32xbf16>, vector<64x32xbf16>, vector<64x32xbf16>, vector<64x32xbf16>, vector<64x32xbf16>, vector<64x32xbf16>, vector<64x32xbf16>, vector<64x32xbf16> -> vector<576x32xbf16>
    %c0_76 = arith.constant 0 : index
    %c0_77 = arith.constant 0 : index
    %91 = vector.load %arg6[%c0_76, %c0_77] : memref<16x576xbf16, #tpu.memory_space<vmem>>, vector<16x576xbf16>
    %cst_78 = arith.constant dense<0.000000e+00> : vector<16x32xf32>
    %92 = tpu.matmul %91, %90, %cst_78 {dimension_numbers = #tpu.dot_dimension_numbers<[1], [0], [0], [1], [0, 0, 1, 1], [], []>} : vector<16x576xbf16>, vector<576x32xbf16>, vector<16x32xf32> -> vector<16x32xf32>
    %c0_79 = arith.constant 0 : index
    %c0_80 = arith.constant 0 : index
    %93 = vector.load %arg8[%c0_79, %c0_80] : memref<1x32xf32, #tpu.memory_space<vmem>>, vector<1x32xf32>
    %94 = vector.broadcast %93 : vector<1x32xf32> to vector<16x32xf32>
    %95 = arith.addf %92, %94 : vector<16x32xf32>
    %cst_81 = arith.constant 0.000000e+00 : f32
    %96 = vector.broadcast %cst_81 : f32 to vector<16x32xf32>
    %97 = arith.maximumf %95, %96 : vector<16x32xf32>
    %98 = arith.truncf %97 : vector<16x32xf32> to vector<16x32xbf16>
    %c0_82 = arith.constant 0 : index
    %c0_83 = arith.constant 0 : index
    %c0_84 = arith.constant 0 : index
    %99 = vector.load %arg10[%c0_82, %c0_83, %c0_84] : memref<9x32x64xbf16, #tpu.memory_space<vmem>>, vector<1x32x64xbf16>
    %100 = vector.shape_cast %99 : vector<1x32x64xbf16> to vector<32x64xbf16>
    %cst_85 = arith.constant dense<0.000000e+00> : vector<16x64xf32>
    %101 = tpu.matmul %98, %100, %cst_85 {dimension_numbers = #tpu.dot_dimension_numbers<[1], [0], [0], [1], [0, 0, 1, 1], [], []>} : vector<16x32xbf16>, vector<32x64xbf16>, vector<16x64xf32> -> vector<16x64xf32>
    %102 = arith.truncf %101 : vector<16x64xf32> to vector<16x64xbf16>
    %c1_86 = arith.constant 1 : index
    %c0_87 = arith.constant 0 : index
    %c0_88 = arith.constant 0 : index
    %103 = vector.load %arg10[%c1_86, %c0_87, %c0_88] : memref<9x32x64xbf16, #tpu.memory_space<vmem>>, vector<1x32x64xbf16>
    %104 = vector.shape_cast %103 : vector<1x32x64xbf16> to vector<32x64xbf16>
    %cst_89 = arith.constant dense<0.000000e+00> : vector<16x64xf32>
    %105 = tpu.matmul %98, %104, %cst_89 {dimension_numbers = #tpu.dot_dimension_numbers<[1], [0], [0], [1], [0, 0, 1, 1], [], []>} : vector<16x32xbf16>, vector<32x64xbf16>, vector<16x64xf32> -> vector<16x64xf32>
    %106 = arith.truncf %105 : vector<16x64xf32> to vector<16x64xbf16>
    %c2_90 = arith.constant 2 : index
    %c0_91 = arith.constant 0 : index
    %c0_92 = arith.constant 0 : index
    %107 = vector.load %arg10[%c2_90, %c0_91, %c0_92] : memref<9x32x64xbf16, #tpu.memory_space<vmem>>, vector<1x32x64xbf16>
    %108 = vector.shape_cast %107 : vector<1x32x64xbf16> to vector<32x64xbf16>
    %cst_93 = arith.constant dense<0.000000e+00> : vector<16x64xf32>
    %109 = tpu.matmul %98, %108, %cst_93 {dimension_numbers = #tpu.dot_dimension_numbers<[1], [0], [0], [1], [0, 0, 1, 1], [], []>} : vector<16x32xbf16>, vector<32x64xbf16>, vector<16x64xf32> -> vector<16x64xf32>
    %110 = arith.truncf %109 : vector<16x64xf32> to vector<16x64xbf16>
    %c3_94 = arith.constant 3 : index
    %c0_95 = arith.constant 0 : index
    %c0_96 = arith.constant 0 : index
    %111 = vector.load %arg10[%c3_94, %c0_95, %c0_96] : memref<9x32x64xbf16, #tpu.memory_space<vmem>>, vector<1x32x64xbf16>
    %112 = vector.shape_cast %111 : vector<1x32x64xbf16> to vector<32x64xbf16>
    %cst_97 = arith.constant dense<0.000000e+00> : vector<16x64xf32>
    %113 = tpu.matmul %98, %112, %cst_97 {dimension_numbers = #tpu.dot_dimension_numbers<[1], [0], [0], [1], [0, 0, 1, 1], [], []>} : vector<16x32xbf16>, vector<32x64xbf16>, vector<16x64xf32> -> vector<16x64xf32>
    %114 = arith.truncf %113 : vector<16x64xf32> to vector<16x64xbf16>
    %c4_98 = arith.constant 4 : index
    %c0_99 = arith.constant 0 : index
    %c0_100 = arith.constant 0 : index
    %115 = vector.load %arg10[%c4_98, %c0_99, %c0_100] : memref<9x32x64xbf16, #tpu.memory_space<vmem>>, vector<1x32x64xbf16>
    %116 = vector.shape_cast %115 : vector<1x32x64xbf16> to vector<32x64xbf16>
    %cst_101 = arith.constant dense<0.000000e+00> : vector<16x64xf32>
    %117 = tpu.matmul %98, %116, %cst_101 {dimension_numbers = #tpu.dot_dimension_numbers<[1], [0], [0], [1], [0, 0, 1, 1], [], []>} : vector<16x32xbf16>, vector<32x64xbf16>, vector<16x64xf32> -> vector<16x64xf32>
    %118 = arith.truncf %117 : vector<16x64xf32> to vector<16x64xbf16>
    %c5_102 = arith.constant 5 : index
    %c0_103 = arith.constant 0 : index
    %c0_104 = arith.constant 0 : index
    %119 = vector.load %arg10[%c5_102, %c0_103, %c0_104] : memref<9x32x64xbf16, #tpu.memory_space<vmem>>, vector<1x32x64xbf16>
    %120 = vector.shape_cast %119 : vector<1x32x64xbf16> to vector<32x64xbf16>
    %cst_105 = arith.constant dense<0.000000e+00> : vector<16x64xf32>
    %121 = tpu.matmul %98, %120, %cst_105 {dimension_numbers = #tpu.dot_dimension_numbers<[1], [0], [0], [1], [0, 0, 1, 1], [], []>} : vector<16x32xbf16>, vector<32x64xbf16>, vector<16x64xf32> -> vector<16x64xf32>
    %122 = arith.truncf %121 : vector<16x64xf32> to vector<16x64xbf16>
    %c6_106 = arith.constant 6 : index
    %c0_107 = arith.constant 0 : index
    %c0_108 = arith.constant 0 : index
    %123 = vector.load %arg10[%c6_106, %c0_107, %c0_108] : memref<9x32x64xbf16, #tpu.memory_space<vmem>>, vector<1x32x64xbf16>
    %124 = vector.shape_cast %123 : vector<1x32x64xbf16> to vector<32x64xbf16>
    %cst_109 = arith.constant dense<0.000000e+00> : vector<16x64xf32>
    %125 = tpu.matmul %98, %124, %cst_109 {dimension_numbers = #tpu.dot_dimension_numbers<[1], [0], [0], [1], [0, 0, 1, 1], [], []>} : vector<16x32xbf16>, vector<32x64xbf16>, vector<16x64xf32> -> vector<16x64xf32>
    %126 = arith.truncf %125 : vector<16x64xf32> to vector<16x64xbf16>
    %c7_110 = arith.constant 7 : index
    %c0_111 = arith.constant 0 : index
    %c0_112 = arith.constant 0 : index
    %127 = vector.load %arg10[%c7_110, %c0_111, %c0_112] : memref<9x32x64xbf16, #tpu.memory_space<vmem>>, vector<1x32x64xbf16>
    %128 = vector.shape_cast %127 : vector<1x32x64xbf16> to vector<32x64xbf16>
    %cst_113 = arith.constant dense<0.000000e+00> : vector<16x64xf32>
    %129 = tpu.matmul %98, %128, %cst_113 {dimension_numbers = #tpu.dot_dimension_numbers<[1], [0], [0], [1], [0, 0, 1, 1], [], []>} : vector<16x32xbf16>, vector<32x64xbf16>, vector<16x64xf32> -> vector<16x64xf32>
    %130 = arith.truncf %129 : vector<16x64xf32> to vector<16x64xbf16>
    %c8_114 = arith.constant 8 : index
    %c0_115 = arith.constant 0 : index
    %c0_116 = arith.constant 0 : index
    %131 = vector.load %arg10[%c8_114, %c0_115, %c0_116] : memref<9x32x64xbf16, #tpu.memory_space<vmem>>, vector<1x32x64xbf16>
    %132 = vector.shape_cast %131 : vector<1x32x64xbf16> to vector<32x64xbf16>
    %cst_117 = arith.constant dense<0.000000e+00> : vector<16x64xf32>
    %133 = tpu.matmul %98, %132, %cst_117 {dimension_numbers = #tpu.dot_dimension_numbers<[1], [0], [0], [1], [0, 0, 1, 1], [], []>} : vector<16x32xbf16>, vector<32x64xbf16>, vector<16x64xf32> -> vector<16x64xf32>
    %134 = arith.truncf %133 : vector<16x64xf32> to vector<16x64xbf16>
    %135 = tpu.concatenate %102, %106, %110, %114, %118, %122, %126, %130, %134 in 0 : vector<16x64xbf16>, vector<16x64xbf16>, vector<16x64xbf16>, vector<16x64xbf16>, vector<16x64xbf16>, vector<16x64xbf16>, vector<16x64xbf16>, vector<16x64xbf16>, vector<16x64xbf16> -> vector<144x64xbf16>
    %c0_118 = arith.constant 0 : index
    %c0_119 = arith.constant 0 : index
    %136 = vector.load %arg9[%c0_118, %c0_119] : memref<4x144xbf16, #tpu.memory_space<vmem>>, vector<4x144xbf16>
    %cst_120 = arith.constant dense<0.000000e+00> : vector<4x64xf32>
    %137 = tpu.matmul %136, %135, %cst_120 {dimension_numbers = #tpu.dot_dimension_numbers<[1], [0], [0], [1], [0, 0, 1, 1], [], []>} : vector<4x144xbf16>, vector<144x64xbf16>, vector<4x64xf32> -> vector<4x64xf32>
    %c0_121 = arith.constant 0 : index
    %c0_122 = arith.constant 0 : index
    %138 = vector.load %arg11[%c0_121, %c0_122] : memref<1x64xf32, #tpu.memory_space<vmem>>, vector<1x64xf32>
    %139 = vector.broadcast %138 : vector<1x64xf32> to vector<4x64xf32>
    %140 = arith.addf %137, %139 : vector<4x64xf32>
    %cst_123 = arith.constant 0.000000e+00 : f32
    %141 = vector.broadcast %cst_123 : f32 to vector<4x64xf32>
    %142 = arith.maximumf %140, %141 : vector<4x64xf32>
    %143 = arith.truncf %142 : vector<4x64xf32> to vector<4x64xbf16>
    %c0_124 = arith.constant 0 : index
    %c0_125 = arith.constant 0 : index
    %c0_126 = arith.constant 0 : index
    %144 = vector.load %arg13[%c0_124, %c0_125, %c0_126] : memref<4x64x128xbf16, #tpu.memory_space<vmem>>, vector<1x64x128xbf16>
    %145 = vector.shape_cast %144 : vector<1x64x128xbf16> to vector<64x128xbf16>
    %cst_127 = arith.constant dense<0.000000e+00> : vector<4x128xf32>
    %146 = tpu.matmul %143, %145, %cst_127 {dimension_numbers = #tpu.dot_dimension_numbers<[1], [0], [0], [1], [0, 0, 1, 1], [], []>} : vector<4x64xbf16>, vector<64x128xbf16>, vector<4x128xf32> -> vector<4x128xf32>
    %147 = arith.truncf %146 : vector<4x128xf32> to vector<4x128xbf16>
    %c1_128 = arith.constant 1 : index
    %c0_129 = arith.constant 0 : index
    %c0_130 = arith.constant 0 : index
    %148 = vector.load %arg13[%c1_128, %c0_129, %c0_130] : memref<4x64x128xbf16, #tpu.memory_space<vmem>>, vector<1x64x128xbf16>
    %149 = vector.shape_cast %148 : vector<1x64x128xbf16> to vector<64x128xbf16>
    %cst_131 = arith.constant dense<0.000000e+00> : vector<4x128xf32>
    %150 = tpu.matmul %143, %149, %cst_131 {dimension_numbers = #tpu.dot_dimension_numbers<[1], [0], [0], [1], [0, 0, 1, 1], [], []>} : vector<4x64xbf16>, vector<64x128xbf16>, vector<4x128xf32> -> vector<4x128xf32>
    %151 = arith.truncf %150 : vector<4x128xf32> to vector<4x128xbf16>
    %c2_132 = arith.constant 2 : index
    %c0_133 = arith.constant 0 : index
    %c0_134 = arith.constant 0 : index
    %152 = vector.load %arg13[%c2_132, %c0_133, %c0_134] : memref<4x64x128xbf16, #tpu.memory_space<vmem>>, vector<1x64x128xbf16>
    %153 = vector.shape_cast %152 : vector<1x64x128xbf16> to vector<64x128xbf16>
    %cst_135 = arith.constant dense<0.000000e+00> : vector<4x128xf32>
    %154 = tpu.matmul %143, %153, %cst_135 {dimension_numbers = #tpu.dot_dimension_numbers<[1], [0], [0], [1], [0, 0, 1, 1], [], []>} : vector<4x64xbf16>, vector<64x128xbf16>, vector<4x128xf32> -> vector<4x128xf32>
    %155 = arith.truncf %154 : vector<4x128xf32> to vector<4x128xbf16>
    %c3_136 = arith.constant 3 : index
    %c0_137 = arith.constant 0 : index
    %c0_138 = arith.constant 0 : index
    %156 = vector.load %arg13[%c3_136, %c0_137, %c0_138] : memref<4x64x128xbf16, #tpu.memory_space<vmem>>, vector<1x64x128xbf16>
    %157 = vector.shape_cast %156 : vector<1x64x128xbf16> to vector<64x128xbf16>
    %cst_139 = arith.constant dense<0.000000e+00> : vector<4x128xf32>
    %158 = tpu.matmul %143, %157, %cst_139 {dimension_numbers = #tpu.dot_dimension_numbers<[1], [0], [0], [1], [0, 0, 1, 1], [], []>} : vector<4x64xbf16>, vector<64x128xbf16>, vector<4x128xf32> -> vector<4x128xf32>
    %159 = arith.truncf %158 : vector<4x128xf32> to vector<4x128xbf16>
    %160 = tpu.concatenate %147, %151, %155, %159 in 0 : vector<4x128xbf16>, vector<4x128xbf16>, vector<4x128xbf16>, vector<4x128xbf16> -> vector<16x128xbf16>
    %c0_140 = arith.constant 0 : index
    %c0_141 = arith.constant 0 : index
    %161 = vector.load %arg12[%c0_140, %c0_141] : memref<1x16xbf16, #tpu.memory_space<vmem>>, vector<1x16xbf16>
    %cst_142 = arith.constant dense<0.000000e+00> : vector<1x128xf32>
    %162 = tpu.matmul %161, %160, %cst_142 {dimension_numbers = #tpu.dot_dimension_numbers<[1], [0], [0], [1], [0, 0, 1, 1], [], []>} : vector<1x16xbf16>, vector<16x128xbf16>, vector<1x128xf32> -> vector<1x128xf32>
    %c0_143 = arith.constant 0 : index
    %c0_144 = arith.constant 0 : index
    %163 = vector.load %arg14[%c0_143, %c0_144] : memref<1x128xf32, #tpu.memory_space<vmem>>, vector<1x128xf32>
    %164 = arith.addf %162, %163 : vector<1x128xf32>
    %cst_145 = arith.constant 0.000000e+00 : f32
    %165 = vector.broadcast %cst_145 : f32 to vector<1x128xf32>
    %166 = arith.maximumf %164, %165 : vector<1x128xf32>
    %cst_146 = arith.constant dense<0.000000e+00> : vector<128xf32>
    %167 = vector.multi_reduction <add>, %166, %cst_146 [0] : vector<1x128xf32> to vector<128xf32>
    %168 = vector.shape_cast %167 : vector<128xf32> to vector<1x128xf32>
    %cst_147 = arith.constant 1.000000e+00 : f32
    %169 = vector.broadcast %cst_147 : f32 to vector<1x128xf32>
    %170 = arith.divf %168, %169 : vector<1x128xf32>
    %c0_148 = arith.constant 0 : index
    %c0_149 = arith.constant 0 : index
    %171 = vector.load %arg15[%c0_148, %c0_149] : memref<128x32xbf16, #tpu.memory_space<vmem>>, vector<128x32xbf16>
    %172 = arith.truncf %170 : vector<1x128xf32> to vector<1x128xbf16>
    %cst_150 = arith.constant dense<0.000000e+00> : vector<1x32xf32>
    %173 = tpu.matmul %172, %171, %cst_150 {dimension_numbers = #tpu.dot_dimension_numbers<[1], [0], [0], [1], [0, 0, 1, 1], [], []>} : vector<1x128xbf16>, vector<128x32xbf16>, vector<1x32xf32> -> vector<1x32xf32>
    %c0_151 = arith.constant 0 : index
    %c0_152 = arith.constant 0 : index
    %174 = vector.load %arg16[%c0_151, %c0_152] : memref<1x32xf32, #tpu.memory_space<vmem>>, vector<1x32xf32>
    %175 = arith.addf %173, %174 : vector<1x32xf32>
    %c0_153 = arith.constant 0 : index
    %c0_154 = arith.constant 0 : index
    %176 = vector.load %arg34[%c0_153, %c0_154] : memref<1x32xf32, #tpu.memory_space<vmem>>, vector<1x32xf32>
    tpu.vector_store %arg34[%c0_153, %c0_154], %175 {strides = array<i32>} : memref<1x32xf32, #tpu.memory_space<vmem>>, vector<1x32xf32>,
    %177 = vector.shape_cast %166 : vector<1x128xf32> to vector<1x128xf32>
    %178 = vector.broadcast %177 : vector<1x128xf32> to vector<4x128xf32>
    %179 = arith.truncf %178 : vector<4x128xf32> to vector<4x128xbf16>
    %180 = arith.truncf %142 : vector<4x64xf32> to vector<4x64xbf16>
    %c0_155 = arith.constant 0 : index
    %c0_156 = arith.constant 0 : index
    %c0_157 = arith.constant 0 : index
    %181 = vector.load %arg19[%c0_155, %c0_156, %c0_157] : memref<9x128x64xbf16, #tpu.memory_space<vmem>>, vector<1x128x64xbf16>
    %182 = vector.shape_cast %181 : vector<1x128x64xbf16> to vector<128x64xbf16>
    %cst_158 = arith.constant dense<0.000000e+00> : vector<4x64xf32>
    %183 = tpu.matmul %179, %182, %cst_158 {dimension_numbers = #tpu.dot_dimension_numbers<[1], [0], [0], [1], [0, 0, 1, 1], [], []>} : vector<4x128xbf16>, vector<128x64xbf16>, vector<4x64xf32> -> vector<4x64xf32>
    %c0_159 = arith.constant 0 : index
    %c0_160 = arith.constant 0 : index
    %c0_161 = arith.constant 0 : index
    %184 = vector.load %arg20[%c0_159, %c0_160, %c0_161] : memref<9x64x64xbf16, #tpu.memory_space<vmem>>, vector<1x64x64xbf16>
    %185 = vector.shape_cast %184 : vector<1x64x64xbf16> to vector<64x64xbf16>
    %cst_162 = arith.constant dense<0.000000e+00> : vector<4x64xf32>
    %186 = tpu.matmul %180, %185, %cst_162 {dimension_numbers = #tpu.dot_dimension_numbers<[1], [0], [0], [1], [0, 0, 1, 1], [], []>} : vector<4x64xbf16>, vector<64x64xbf16>, vector<4x64xf32> -> vector<4x64xf32>
    %187 = arith.addf %183, %186 : vector<4x64xf32>
    %188 = arith.truncf %187 : vector<4x64xf32> to vector<4x64xbf16>
    %c1_163 = arith.constant 1 : index
    %c0_164 = arith.constant 0 : index
    %c0_165 = arith.constant 0 : index
    %189 = vector.load %arg19[%c1_163, %c0_164, %c0_165] : memref<9x128x64xbf16, #tpu.memory_space<vmem>>, vector<1x128x64xbf16>
    %190 = vector.shape_cast %189 : vector<1x128x64xbf16> to vector<128x64xbf16>
    %cst_166 = arith.constant dense<0.000000e+00> : vector<4x64xf32>
    %191 = tpu.matmul %179, %190, %cst_166 {dimension_numbers = #tpu.dot_dimension_numbers<[1], [0], [0], [1], [0, 0, 1, 1], [], []>} : vector<4x128xbf16>, vector<128x64xbf16>, vector<4x64xf32> -> vector<4x64xf32>
    %c1_167 = arith.constant 1 : index
    %c0_168 = arith.constant 0 : index
    %c0_169 = arith.constant 0 : index
    %192 = vector.load %arg20[%c1_167, %c0_168, %c0_169] : memref<9x64x64xbf16, #tpu.memory_space<vmem>>, vector<1x64x64xbf16>
    %193 = vector.shape_cast %192 : vector<1x64x64xbf16> to vector<64x64xbf16>
    %cst_170 = arith.constant dense<0.000000e+00> : vector<4x64xf32>
    %194 = tpu.matmul %180, %193, %cst_170 {dimension_numbers = #tpu.dot_dimension_numbers<[1], [0], [0], [1], [0, 0, 1, 1], [], []>} : vector<4x64xbf16>, vector<64x64xbf16>, vector<4x64xf32> -> vector<4x64xf32>
    %195 = arith.addf %191, %194 : vector<4x64xf32>
    %196 = arith.truncf %195 : vector<4x64xf32> to vector<4x64xbf16>
    %c2_171 = arith.constant 2 : index
    %c0_172 = arith.constant 0 : index
    %c0_173 = arith.constant 0 : index
    %197 = vector.load %arg19[%c2_171, %c0_172, %c0_173] : memref<9x128x64xbf16, #tpu.memory_space<vmem>>, vector<1x128x64xbf16>
    %198 = vector.shape_cast %197 : vector<1x128x64xbf16> to vector<128x64xbf16>
    %cst_174 = arith.constant dense<0.000000e+00> : vector<4x64xf32>
    %199 = tpu.matmul %179, %198, %cst_174 {dimension_numbers = #tpu.dot_dimension_numbers<[1], [0], [0], [1], [0, 0, 1, 1], [], []>} : vector<4x128xbf16>, vector<128x64xbf16>, vector<4x64xf32> -> vector<4x64xf32>
    %c2_175 = arith.constant 2 : index
    %c0_176 = arith.constant 0 : index
    %c0_177 = arith.constant 0 : index
    %200 = vector.load %arg20[%c2_175, %c0_176, %c0_177] : memref<9x64x64xbf16, #tpu.memory_space<vmem>>, vector<1x64x64xbf16>
    %201 = vector.shape_cast %200 : vector<1x64x64xbf16> to vector<64x64xbf16>
    %cst_178 = arith.constant dense<0.000000e+00> : vector<4x64xf32>
    %202 = tpu.matmul %180, %201, %cst_178 {dimension_numbers = #tpu.dot_dimension_numbers<[1], [0], [0], [1], [0, 0, 1, 1], [], []>} : vector<4x64xbf16>, vector<64x64xbf16>, vector<4x64xf32> -> vector<4x64xf32>
    %203 = arith.addf %199, %202 : vector<4x64xf32>
    %204 = arith.truncf %203 : vector<4x64xf32> to vector<4x64xbf16>
    %c3_179 = arith.constant 3 : index
    %c0_180 = arith.constant 0 : index
    %c0_181 = arith.constant 0 : index
    %205 = vector.load %arg19[%c3_179, %c0_180, %c0_181] : memref<9x128x64xbf16, #tpu.memory_space<vmem>>, vector<1x128x64xbf16>
    %206 = vector.shape_cast %205 : vector<1x128x64xbf16> to vector<128x64xbf16>
    %cst_182 = arith.constant dense<0.000000e+00> : vector<4x64xf32>
    %207 = tpu.matmul %179, %206, %cst_182 {dimension_numbers = #tpu.dot_dimension_numbers<[1], [0], [0], [1], [0, 0, 1, 1], [], []>} : vector<4x128xbf16>, vector<128x64xbf16>, vector<4x64xf32> -> vector<4x64xf32>
    %c3_183 = arith.constant 3 : index
    %c0_184 = arith.constant 0 : index
    %c0_185 = arith.constant 0 : index
    %208 = vector.load %arg20[%c3_183, %c0_184, %c0_185] : memref<9x64x64xbf16, #tpu.memory_space<vmem>>, vector<1x64x64xbf16>
    %209 = vector.shape_cast %208 : vector<1x64x64xbf16> to vector<64x64xbf16>
    %cst_186 = arith.constant dense<0.000000e+00> : vector<4x64xf32>
    %210 = tpu.matmul %180, %209, %cst_186 {dimension_numbers = #tpu.dot_dimension_numbers<[1], [0], [0], [1], [0, 0, 1, 1], [], []>} : vector<4x64xbf16>, vector<64x64xbf16>, vector<4x64xf32> -> vector<4x64xf32>
    %211 = arith.addf %207, %210 : vector<4x64xf32>
    %212 = arith.truncf %211 : vector<4x64xf32> to vector<4x64xbf16>
    %c4_187 = arith.constant 4 : index
    %c0_188 = arith.constant 0 : index
    %c0_189 = arith.constant 0 : index
    %213 = vector.load %arg19[%c4_187, %c0_188, %c0_189] : memref<9x128x64xbf16, #tpu.memory_space<vmem>>, vector<1x128x64xbf16>
    %214 = vector.shape_cast %213 : vector<1x128x64xbf16> to vector<128x64xbf16>
    %cst_190 = arith.constant dense<0.000000e+00> : vector<4x64xf32>
    %215 = tpu.matmul %179, %214, %cst_190 {dimension_numbers = #tpu.dot_dimension_numbers<[1], [0], [0], [1], [0, 0, 1, 1], [], []>} : vector<4x128xbf16>, vector<128x64xbf16>, vector<4x64xf32> -> vector<4x64xf32>
    %c4_191 = arith.constant 4 : index
    %c0_192 = arith.constant 0 : index
    %c0_193 = arith.constant 0 : index
    %216 = vector.load %arg20[%c4_191, %c0_192, %c0_193] : memref<9x64x64xbf16, #tpu.memory_space<vmem>>, vector<1x64x64xbf16>
    %217 = vector.shape_cast %216 : vector<1x64x64xbf16> to vector<64x64xbf16>
    %cst_194 = arith.constant dense<0.000000e+00> : vector<4x64xf32>
    %218 = tpu.matmul %180, %217, %cst_194 {dimension_numbers = #tpu.dot_dimension_numbers<[1], [0], [0], [1], [0, 0, 1, 1], [], []>} : vector<4x64xbf16>, vector<64x64xbf16>, vector<4x64xf32> -> vector<4x64xf32>
    %219 = arith.addf %215, %218 : vector<4x64xf32>
    %220 = arith.truncf %219 : vector<4x64xf32> to vector<4x64xbf16>
    %c5_195 = arith.constant 5 : index
    %c0_196 = arith.constant 0 : index
    %c0_197 = arith.constant 0 : index
    %221 = vector.load %arg19[%c5_195, %c0_196, %c0_197] : memref<9x128x64xbf16, #tpu.memory_space<vmem>>, vector<1x128x64xbf16>
    %222 = vector.shape_cast %221 : vector<1x128x64xbf16> to vector<128x64xbf16>
    %cst_198 = arith.constant dense<0.000000e+00> : vector<4x64xf32>
    %223 = tpu.matmul %179, %222, %cst_198 {dimension_numbers = #tpu.dot_dimension_numbers<[1], [0], [0], [1], [0, 0, 1, 1], [], []>} : vector<4x128xbf16>, vector<128x64xbf16>, vector<4x64xf32> -> vector<4x64xf32>
    %c5_199 = arith.constant 5 : index
    %c0_200 = arith.constant 0 : index
    %c0_201 = arith.constant 0 : index
    %224 = vector.load %arg20[%c5_199, %c0_200, %c0_201] : memref<9x64x64xbf16, #tpu.memory_space<vmem>>, vector<1x64x64xbf16>
    %225 = vector.shape_cast %224 : vector<1x64x64xbf16> to vector<64x64xbf16>
    %cst_202 = arith.constant dense<0.000000e+00> : vector<4x64xf32>
    %226 = tpu.matmul %180, %225, %cst_202 {dimension_numbers = #tpu.dot_dimension_numbers<[1], [0], [0], [1], [0, 0, 1, 1], [], []>} : vector<4x64xbf16>, vector<64x64xbf16>, vector<4x64xf32> -> vector<4x64xf32>
    %227 = arith.addf %223, %226 : vector<4x64xf32>
    %228 = arith.truncf %227 : vector<4x64xf32> to vector<4x64xbf16>
    %c6_203 = arith.constant 6 : index
    %c0_204 = arith.constant 0 : index
    %c0_205 = arith.constant 0 : index
    %229 = vector.load %arg19[%c6_203, %c0_204, %c0_205] : memref<9x128x64xbf16, #tpu.memory_space<vmem>>, vector<1x128x64xbf16>
    %230 = vector.shape_cast %229 : vector<1x128x64xbf16> to vector<128x64xbf16>
    %cst_206 = arith.constant dense<0.000000e+00> : vector<4x64xf32>
    %231 = tpu.matmul %179, %230, %cst_206 {dimension_numbers = #tpu.dot_dimension_numbers<[1], [0], [0], [1], [0, 0, 1, 1], [], []>} : vector<4x128xbf16>, vector<128x64xbf16>, vector<4x64xf32> -> vector<4x64xf32>
    %c6_207 = arith.constant 6 : index
    %c0_208 = arith.constant 0 : index
    %c0_209 = arith.constant 0 : index
    %232 = vector.load %arg20[%c6_207, %c0_208, %c0_209] : memref<9x64x64xbf16, #tpu.memory_space<vmem>>, vector<1x64x64xbf16>
    %233 = vector.shape_cast %232 : vector<1x64x64xbf16> to vector<64x64xbf16>
    %cst_210 = arith.constant dense<0.000000e+00> : vector<4x64xf32>
    %234 = tpu.matmul %180, %233, %cst_210 {dimension_numbers = #tpu.dot_dimension_numbers<[1], [0], [0], [1], [0, 0, 1, 1], [], []>} : vector<4x64xbf16>, vector<64x64xbf16>, vector<4x64xf32> -> vector<4x64xf32>
    %235 = arith.addf %231, %234 : vector<4x64xf32>
    %236 = arith.truncf %235 : vector<4x64xf32> to vector<4x64xbf16>
    %c7_211 = arith.constant 7 : index
    %c0_212 = arith.constant 0 : index
    %c0_213 = arith.constant 0 : index
    %237 = vector.load %arg19[%c7_211, %c0_212, %c0_213] : memref<9x128x64xbf16, #tpu.memory_space<vmem>>, vector<1x128x64xbf16>
    %238 = vector.shape_cast %237 : vector<1x128x64xbf16> to vector<128x64xbf16>
    %cst_214 = arith.constant dense<0.000000e+00> : vector<4x64xf32>
    %239 = tpu.matmul %179, %238, %cst_214 {dimension_numbers = #tpu.dot_dimension_numbers<[1], [0], [0], [1], [0, 0, 1, 1], [], []>} : vector<4x128xbf16>, vector<128x64xbf16>, vector<4x64xf32> -> vector<4x64xf32>
    %c7_215 = arith.constant 7 : index
    %c0_216 = arith.constant 0 : index
    %c0_217 = arith.constant 0 : index
    %240 = vector.load %arg20[%c7_215, %c0_216, %c0_217] : memref<9x64x64xbf16, #tpu.memory_space<vmem>>, vector<1x64x64xbf16>
    %241 = vector.shape_cast %240 : vector<1x64x64xbf16> to vector<64x64xbf16>
    %cst_218 = arith.constant dense<0.000000e+00> : vector<4x64xf32>
    %242 = tpu.matmul %180, %241, %cst_218 {dimension_numbers = #tpu.dot_dimension_numbers<[1], [0], [0], [1], [0, 0, 1, 1], [], []>} : vector<4x64xbf16>, vector<64x64xbf16>, vector<4x64xf32> -> vector<4x64xf32>
    %243 = arith.addf %239, %242 : vector<4x64xf32>
    %244 = arith.truncf %243 : vector<4x64xf32> to vector<4x64xbf16>
    %c8_219 = arith.constant 8 : index
    %c0_220 = arith.constant 0 : index
    %c0_221 = arith.constant 0 : index
    %245 = vector.load %arg19[%c8_219, %c0_220, %c0_221] : memref<9x128x64xbf16, #tpu.memory_space<vmem>>, vector<1x128x64xbf16>
    %246 = vector.shape_cast %245 : vector<1x128x64xbf16> to vector<128x64xbf16>
    %cst_222 = arith.constant dense<0.000000e+00> : vector<4x64xf32>
    %247 = tpu.matmul %179, %246, %cst_222 {dimension_numbers = #tpu.dot_dimension_numbers<[1], [0], [0], [1], [0, 0, 1, 1], [], []>} : vector<4x128xbf16>, vector<128x64xbf16>, vector<4x64xf32> -> vector<4x64xf32>
    %c8_223 = arith.constant 8 : index
    %c0_224 = arith.constant 0 : index
    %c0_225 = arith.constant 0 : index
    %248 = vector.load %arg20[%c8_223, %c0_224, %c0_225] : memref<9x64x64xbf16, #tpu.memory_space<vmem>>, vector<1x64x64xbf16>
    %249 = vector.shape_cast %248 : vector<1x64x64xbf16> to vector<64x64xbf16>
    %cst_226 = arith.constant dense<0.000000e+00> : vector<4x64xf32>
    %250 = tpu.matmul %180, %249, %cst_226 {dimension_numbers = #tpu.dot_dimension_numbers<[1], [0], [0], [1], [0, 0, 1, 1], [], []>} : vector<4x64xbf16>, vector<64x64xbf16>, vector<4x64xf32> -> vector<4x64xf32>
    %251 = arith.addf %247, %250 : vector<4x64xf32>
    %252 = arith.truncf %251 : vector<4x64xf32> to vector<4x64xbf16>
    %253 = tpu.concatenate %188, %196, %204, %212, %220, %228, %236, %244, %252 in 0 : vector<4x64xbf16>, vector<4x64xbf16>, vector<4x64xbf16>, vector<4x64xbf16>, vector<4x64xbf16>, vector<4x64xbf16>, vector<4x64xbf16>, vector<4x64xbf16>, vector<4x64xbf16> -> vector<36x64xbf16>
    %c0_227 = arith.constant 0 : index
    %c0_228 = arith.constant 0 : index
    %254 = vector.load %arg18[%c0_227, %c0_228] : memref<4x36xbf16, #tpu.memory_space<vmem>>, vector<4x36xbf16>
    %cst_229 = arith.constant dense<0.000000e+00> : vector<4x64xf32>
    %255 = tpu.matmul %254, %253, %cst_229 {dimension_numbers = #tpu.dot_dimension_numbers<[1], [0], [0], [1], [0, 0, 1, 1], [], []>} : vector<4x36xbf16>, vector<36x64xbf16>, vector<4x64xf32> -> vector<4x64xf32>
    %c0_230 = arith.constant 0 : index
    %c0_231 = arith.constant 0 : index
    %256 = vector.load %arg21[%c0_230, %c0_231] : memref<1x64xf32, #tpu.memory_space<vmem>>, vector<1x64xf32>
    %257 = vector.broadcast %256 : vector<1x64xf32> to vector<4x64xf32>
    %258 = arith.addf %255, %257 : vector<4x64xf32>
    %cst_232 = arith.constant 0.000000e+00 : f32
    %259 = vector.broadcast %cst_232 : f32 to vector<4x64xf32>
    %260 = arith.maximumf %258, %259 : vector<4x64xf32>
    %c0_233 = arith.constant 0 : index
    %c0_234 = arith.constant 0 : index
    %261 = vector.load %arg22[%c0_233, %c0_234] : memref<16x4xbf16, #tpu.memory_space<vmem>>, vector<16x4xbf16>
    %262 = arith.truncf %260 : vector<4x64xf32> to vector<4x64xbf16>
    %cst_235 = arith.constant dense<0.000000e+00> : vector<16x64xf32>
    %263 = tpu.matmul %261, %262, %cst_235 {dimension_numbers = #tpu.dot_dimension_numbers<[1], [0], [0], [1], [0, 0, 1, 1], [], []>} : vector<16x4xbf16>, vector<4x64xbf16>, vector<16x64xf32> -> vector<16x64xf32>
    %264 = arith.truncf %263 : vector<16x64xf32> to vector<16x64xbf16>
    %265 = arith.truncf %97 : vector<16x32xf32> to vector<16x32xbf16>
    %c0_236 = arith.constant 0 : index
    %c0_237 = arith.constant 0 : index
    %c0_238 = arith.constant 0 : index
    %266 = vector.load %arg24[%c0_236, %c0_237, %c0_238] : memref<9x64x32xbf16, #tpu.memory_space<vmem>>, vector<1x64x32xbf16>
    %267 = vector.shape_cast %266 : vector<1x64x32xbf16> to vector<64x32xbf16>
    %cst_239 = arith.constant dense<0.000000e+00> : vector<16x32xf32>
    %268 = tpu.matmul %264, %267, %cst_239 {dimension_numbers = #tpu.dot_dimension_numbers<[1], [0], [0], [1], [0, 0, 1, 1], [], []>} : vector<16x64xbf16>, vector<64x32xbf16>, vector<16x32xf32> -> vector<16x32xf32>
    %c0_240 = arith.constant 0 : index
    %c0_241 = arith.constant 0 : index
    %c0_242 = arith.constant 0 : index
    %269 = vector.load %arg25[%c0_240, %c0_241, %c0_242] : memref<9x32x32xbf16, #tpu.memory_space<vmem>>, vector<1x32x32xbf16>
    %270 = vector.shape_cast %269 : vector<1x32x32xbf16> to vector<32x32xbf16>
    %cst_243 = arith.constant dense<0.000000e+00> : vector<16x32xf32>
    %271 = tpu.matmul %265, %270, %cst_243 {dimension_numbers = #tpu.dot_dimension_numbers<[1], [0], [0], [1], [0, 0, 1, 1], [], []>} : vector<16x32xbf16>, vector<32x32xbf16>, vector<16x32xf32> -> vector<16x32xf32>
    %272 = arith.addf %268, %271 : vector<16x32xf32>
    %273 = arith.truncf %272 : vector<16x32xf32> to vector<16x32xbf16>
    %c1_244 = arith.constant 1 : index
    %c0_245 = arith.constant 0 : index
    %c0_246 = arith.constant 0 : index
    %274 = vector.load %arg24[%c1_244, %c0_245, %c0_246] : memref<9x64x32xbf16, #tpu.memory_space<vmem>>, vector<1x64x32xbf16>
    %275 = vector.shape_cast %274 : vector<1x64x32xbf16> to vector<64x32xbf16>
    %cst_247 = arith.constant dense<0.000000e+00> : vector<16x32xf32>
    %276 = tpu.matmul %264, %275, %cst_247 {dimension_numbers = #tpu.dot_dimension_numbers<[1], [0], [0], [1], [0, 0, 1, 1], [], []>} : vector<16x64xbf16>, vector<64x32xbf16>, vector<16x32xf32> -> vector<16x32xf32>
    %c1_248 = arith.constant 1 : index
    %c0_249 = arith.constant 0 : index
    %c0_250 = arith.constant 0 : index
    %277 = vector.load %arg25[%c1_248, %c0_249, %c0_250] : memref<9x32x32xbf16, #tpu.memory_space<vmem>>, vector<1x32x32xbf16>
    %278 = vector.shape_cast %277 : vector<1x32x32xbf16> to vector<32x32xbf16>
    %cst_251 = arith.constant dense<0.000000e+00> : vector<16x32xf32>
    %279 = tpu.matmul %265, %278, %cst_251 {dimension_numbers = #tpu.dot_dimension_numbers<[1], [0], [0], [1], [0, 0, 1, 1], [], []>} : vector<16x32xbf16>, vector<32x32xbf16>, vector<16x32xf32> -> vector<16x32xf32>
    %280 = arith.addf %276, %279 : vector<16x32xf32>
    %281 = arith.truncf %280 : vector<16x32xf32> to vector<16x32xbf16>
    %c2_252 = arith.constant 2 : index
    %c0_253 = arith.constant 0 : index
    %c0_254 = arith.constant 0 : index
    %282 = vector.load %arg24[%c2_252, %c0_253, %c0_254] : memref<9x64x32xbf16, #tpu.memory_space<vmem>>, vector<1x64x32xbf16>
    %283 = vector.shape_cast %282 : vector<1x64x32xbf16> to vector<64x32xbf16>
    %cst_255 = arith.constant dense<0.000000e+00> : vector<16x32xf32>
    %284 = tpu.matmul %264, %283, %cst_255 {dimension_numbers = #tpu.dot_dimension_numbers<[1], [0], [0], [1], [0, 0, 1, 1], [], []>} : vector<16x64xbf16>, vector<64x32xbf16>, vector<16x32xf32> -> vector<16x32xf32>
    %c2_256 = arith.constant 2 : index
    %c0_257 = arith.constant 0 : index
    %c0_258 = arith.constant 0 : index
    %285 = vector.load %arg25[%c2_256, %c0_257, %c0_258] : memref<9x32x32xbf16, #tpu.memory_space<vmem>>, vector<1x32x32xbf16>
    %286 = vector.shape_cast %285 : vector<1x32x32xbf16> to vector<32x32xbf16>
    %cst_259 = arith.constant dense<0.000000e+00> : vector<16x32xf32>
    %287 = tpu.matmul %265, %286, %cst_259 {dimension_numbers = #tpu.dot_dimension_numbers<[1], [0], [0], [1], [0, 0, 1, 1], [], []>} : vector<16x32xbf16>, vector<32x32xbf16>, vector<16x32xf32> -> vector<16x32xf32>
    %288 = arith.addf %284, %287 : vector<16x32xf32>
    %289 = arith.truncf %288 : vector<16x32xf32> to vector<16x32xbf16>
    %c3_260 = arith.constant 3 : index
    %c0_261 = arith.constant 0 : index
    %c0_262 = arith.constant 0 : index
    %290 = vector.load %arg24[%c3_260, %c0_261, %c0_262] : memref<9x64x32xbf16, #tpu.memory_space<vmem>>, vector<1x64x32xbf16>
    %291 = vector.shape_cast %290 : vector<1x64x32xbf16> to vector<64x32xbf16>
    %cst_263 = arith.constant dense<0.000000e+00> : vector<16x32xf32>
    %292 = tpu.matmul %264, %291, %cst_263 {dimension_numbers = #tpu.dot_dimension_numbers<[1], [0], [0], [1], [0, 0, 1, 1], [], []>} : vector<16x64xbf16>, vector<64x32xbf16>, vector<16x32xf32> -> vector<16x32xf32>
    %c3_264 = arith.constant 3 : index
    %c0_265 = arith.constant 0 : index
    %c0_266 = arith.constant 0 : index
    %293 = vector.load %arg25[%c3_264, %c0_265, %c0_266] : memref<9x32x32xbf16, #tpu.memory_space<vmem>>, vector<1x32x32xbf16>
    %294 = vector.shape_cast %293 : vector<1x32x32xbf16> to vector<32x32xbf16>
    %cst_267 = arith.constant dense<0.000000e+00> : vector<16x32xf32>
    %295 = tpu.matmul %265, %294, %cst_267 {dimension_numbers = #tpu.dot_dimension_numbers<[1], [0], [0], [1], [0, 0, 1, 1], [], []>} : vector<16x32xbf16>, vector<32x32xbf16>, vector<16x32xf32> -> vector<16x32xf32>
    %296 = arith.addf %292, %295 : vector<16x32xf32>
    %297 = arith.truncf %296 : vector<16x32xf32> to vector<16x32xbf16>
    %c4_268 = arith.constant 4 : index
    %c0_269 = arith.constant 0 : index
    %c0_270 = arith.constant 0 : index
    %298 = vector.load %arg24[%c4_268, %c0_269, %c0_270] : memref<9x64x32xbf16, #tpu.memory_space<vmem>>, vector<1x64x32xbf16>
    %299 = vector.shape_cast %298 : vector<1x64x32xbf16> to vector<64x32xbf16>
    %cst_271 = arith.constant dense<0.000000e+00> : vector<16x32xf32>
    %300 = tpu.matmul %264, %299, %cst_271 {dimension_numbers = #tpu.dot_dimension_numbers<[1], [0], [0], [1], [0, 0, 1, 1], [], []>} : vector<16x64xbf16>, vector<64x32xbf16>, vector<16x32xf32> -> vector<16x32xf32>
    %c4_272 = arith.constant 4 : index
    %c0_273 = arith.constant 0 : index
    %c0_274 = arith.constant 0 : index
    %301 = vector.load %arg25[%c4_272, %c0_273, %c0_274] : memref<9x32x32xbf16, #tpu.memory_space<vmem>>, vector<1x32x32xbf16>
    %302 = vector.shape_cast %301 : vector<1x32x32xbf16> to vector<32x32xbf16>
    %cst_275 = arith.constant dense<0.000000e+00> : vector<16x32xf32>
    %303 = tpu.matmul %265, %302, %cst_275 {dimension_numbers = #tpu.dot_dimension_numbers<[1], [0], [0], [1], [0, 0, 1, 1], [], []>} : vector<16x32xbf16>, vector<32x32xbf16>, vector<16x32xf32> -> vector<16x32xf32>
    %304 = arith.addf %300, %303 : vector<16x32xf32>
    %305 = arith.truncf %304 : vector<16x32xf32> to vector<16x32xbf16>
    %c5_276 = arith.constant 5 : index
    %c0_277 = arith.constant 0 : index
    %c0_278 = arith.constant 0 : index
    %306 = vector.load %arg24[%c5_276, %c0_277, %c0_278] : memref<9x64x32xbf16, #tpu.memory_space<vmem>>, vector<1x64x32xbf16>
    %307 = vector.shape_cast %306 : vector<1x64x32xbf16> to vector<64x32xbf16>
    %cst_279 = arith.constant dense<0.000000e+00> : vector<16x32xf32>
    %308 = tpu.matmul %264, %307, %cst_279 {dimension_numbers = #tpu.dot_dimension_numbers<[1], [0], [0], [1], [0, 0, 1, 1], [], []>} : vector<16x64xbf16>, vector<64x32xbf16>, vector<16x32xf32> -> vector<16x32xf32>
    %c5_280 = arith.constant 5 : index
    %c0_281 = arith.constant 0 : index
    %c0_282 = arith.constant 0 : index
    %309 = vector.load %arg25[%c5_280, %c0_281, %c0_282] : memref<9x32x32xbf16, #tpu.memory_space<vmem>>, vector<1x32x32xbf16>
    %310 = vector.shape_cast %309 : vector<1x32x32xbf16> to vector<32x32xbf16>
    %cst_283 = arith.constant dense<0.000000e+00> : vector<16x32xf32>
    %311 = tpu.matmul %265, %310, %cst_283 {dimension_numbers = #tpu.dot_dimension_numbers<[1], [0], [0], [1], [0, 0, 1, 1], [], []>} : vector<16x32xbf16>, vector<32x32xbf16>, vector<16x32xf32> -> vector<16x32xf32>
    %312 = arith.addf %308, %311 : vector<16x32xf32>
    %313 = arith.truncf %312 : vector<16x32xf32> to vector<16x32xbf16>
    %c6_284 = arith.constant 6 : index
    %c0_285 = arith.constant 0 : index
    %c0_286 = arith.constant 0 : index
    %314 = vector.load %arg24[%c6_284, %c0_285, %c0_286] : memref<9x64x32xbf16, #tpu.memory_space<vmem>>, vector<1x64x32xbf16>
    %315 = vector.shape_cast %314 : vector<1x64x32xbf16> to vector<64x32xbf16>
    %cst_287 = arith.constant dense<0.000000e+00> : vector<16x32xf32>
    %316 = tpu.matmul %264, %315, %cst_287 {dimension_numbers = #tpu.dot_dimension_numbers<[1], [0], [0], [1], [0, 0, 1, 1], [], []>} : vector<16x64xbf16>, vector<64x32xbf16>, vector<16x32xf32> -> vector<16x32xf32>
    %c6_288 = arith.constant 6 : index
    %c0_289 = arith.constant 0 : index
    %c0_290 = arith.constant 0 : index
    %317 = vector.load %arg25[%c6_288, %c0_289, %c0_290] : memref<9x32x32xbf16, #tpu.memory_space<vmem>>, vector<1x32x32xbf16>
    %318 = vector.shape_cast %317 : vector<1x32x32xbf16> to vector<32x32xbf16>
    %cst_291 = arith.constant dense<0.000000e+00> : vector<16x32xf32>
    %319 = tpu.matmul %265, %318, %cst_291 {dimension_numbers = #tpu.dot_dimension_numbers<[1], [0], [0], [1], [0, 0, 1, 1], [], []>} : vector<16x32xbf16>, vector<32x32xbf16>, vector<16x32xf32> -> vector<16x32xf32>
    %320 = arith.addf %316, %319 : vector<16x32xf32>
    %321 = arith.truncf %320 : vector<16x32xf32> to vector<16x32xbf16>
    %c7_292 = arith.constant 7 : index
    %c0_293 = arith.constant 0 : index
    %c0_294 = arith.constant 0 : index
    %322 = vector.load %arg24[%c7_292, %c0_293, %c0_294] : memref<9x64x32xbf16, #tpu.memory_space<vmem>>, vector<1x64x32xbf16>
    %323 = vector.shape_cast %322 : vector<1x64x32xbf16> to vector<64x32xbf16>
    %cst_295 = arith.constant dense<0.000000e+00> : vector<16x32xf32>
    %324 = tpu.matmul %264, %323, %cst_295 {dimension_numbers = #tpu.dot_dimension_numbers<[1], [0], [0], [1], [0, 0, 1, 1], [], []>} : vector<16x64xbf16>, vector<64x32xbf16>, vector<16x32xf32> -> vector<16x32xf32>
    %c7_296 = arith.constant 7 : index
    %c0_297 = arith.constant 0 : index
    %c0_298 = arith.constant 0 : index
    %325 = vector.load %arg25[%c7_296, %c0_297, %c0_298] : memref<9x32x32xbf16, #tpu.memory_space<vmem>>, vector<1x32x32xbf16>
    %326 = vector.shape_cast %325 : vector<1x32x32xbf16> to vector<32x32xbf16>
    %cst_299 = arith.constant dense<0.000000e+00> : vector<16x32xf32>
    %327 = tpu.matmul %265, %326, %cst_299 {dimension_numbers = #tpu.dot_dimension_numbers<[1], [0], [0], [1], [0, 0, 1, 1], [], []>} : vector<16x32xbf16>, vector<32x32xbf16>, vector<16x32xf32> -> vector<16x32xf32>
    %328 = arith.addf %324, %327 : vector<16x32xf32>
    %329 = arith.truncf %328 : vector<16x32xf32> to vector<16x32xbf16>
    %c8_300 = arith.constant 8 : index
    %c0_301 = arith.constant 0 : index
    %c0_302 = arith.constant 0 : index
    %330 = vector.load %arg24[%c8_300, %c0_301, %c0_302] : memref<9x64x32xbf16, #tpu.memory_space<vmem>>, vector<1x64x32xbf16>
    %331 = vector.shape_cast %330 : vector<1x64x32xbf16> to vector<64x32xbf16>
    %cst_303 = arith.constant dense<0.000000e+00> : vector<16x32xf32>
    %332 = tpu.matmul %264, %331, %cst_303 {dimension_numbers = #tpu.dot_dimension_numbers<[1], [0], [0], [1], [0, 0, 1, 1], [], []>} : vector<16x64xbf16>, vector<64x32xbf16>, vector<16x32xf32> -> vector<16x32xf32>
    %c8_304 = arith.constant 8 : index
    %c0_305 = arith.constant 0 : index
    %c0_306 = arith.constant 0 : index
    %333 = vector.load %arg25[%c8_304, %c0_305, %c0_306] : memref<9x32x32xbf16, #tpu.memory_space<vmem>>, vector<1x32x32xbf16>
    %334 = vector.shape_cast %333 : vector<1x32x32xbf16> to vector<32x32xbf16>
    %cst_307 = arith.constant dense<0.000000e+00> : vector<16x32xf32>
    %335 = tpu.matmul %265, %334, %cst_307 {dimension_numbers = #tpu.dot_dimension_numbers<[1], [0], [0], [1], [0, 0, 1, 1], [], []>} : vector<16x32xbf16>, vector<32x32xbf16>, vector<16x32xf32> -> vector<16x32xf32>
    %336 = arith.addf %332, %335 : vector<16x32xf32>
    %337 = arith.truncf %336 : vector<16x32xf32> to vector<16x32xbf16>
    %338 = tpu.concatenate %273, %281, %289, %297, %305, %313, %321, %329, %337 in 0 : vector<16x32xbf16>, vector<16x32xbf16>, vector<16x32xbf16>, vector<16x32xbf16>, vector<16x32xbf16>, vector<16x32xbf16>, vector<16x32xbf16>, vector<16x32xbf16>, vector<16x32xbf16> -> vector<144x32xbf16>
    %c0_308 = arith.constant 0 : index
    %c0_309 = arith.constant 0 : index
    %339 = vector.load %arg23[%c0_308, %c0_309] : memref<16x144xbf16, #tpu.memory_space<vmem>>, vector<16x144xbf16>
    %cst_310 = arith.constant dense<0.000000e+00> : vector<16x32xf32>
    %340 = tpu.matmul %339, %338, %cst_310 {dimension_numbers = #tpu.dot_dimension_numbers<[1], [0], [0], [1], [0, 0, 1, 1], [], []>} : vector<16x144xbf16>, vector<144x32xbf16>, vector<16x32xf32> -> vector<16x32xf32>
    %c0_311 = arith.constant 0 : index
    %c0_312 = arith.constant 0 : index
    %341 = vector.load %arg26[%c0_311, %c0_312] : memref<1x32xf32, #tpu.memory_space<vmem>>, vector<1x32xf32>
    %342 = vector.broadcast %341 : vector<1x32xf32> to vector<16x32xf32>
    %343 = arith.addf %340, %342 : vector<16x32xf32>
    %cst_313 = arith.constant 0.000000e+00 : f32
    %344 = vector.broadcast %cst_313 : f32 to vector<16x32xf32>
    %345 = arith.maximumf %343, %344 : vector<16x32xf32>
    %c0_314 = arith.constant 0 : index
    %c0_315 = arith.constant 0 : index
    %346 = vector.load %arg27[%c0_314, %c0_315] : memref<64x16xbf16, #tpu.memory_space<vmem>>, vector<64x16xbf16>
    %347 = arith.truncf %345 : vector<16x32xf32> to vector<16x32xbf16>
    %cst_316 = arith.constant dense<0.000000e+00> : vector<64x32xf32>
    %348 = tpu.matmul %346, %347, %cst_316 {dimension_numbers = #tpu.dot_dimension_numbers<[1], [0], [0], [1], [0, 0, 1, 1], [], []>} : vector<64x16xbf16>, vector<16x32xbf16>, vector<64x32xf32> -> vector<64x32xf32>
    %349 = arith.truncf %348 : vector<64x32xf32> to vector<64x32xbf16>
    %350 = arith.truncf %52 : vector<64x16xf32> to vector<64x16xbf16>
    %c0_317 = arith.constant 0 : index
    %c0_318 = arith.constant 0 : index
    %c0_319 = arith.constant 0 : index
    %351 = vector.load %arg29[%c0_317, %c0_318, %c0_319] : memref<9x32x32xbf16, #tpu.memory_space<vmem>>, vector<1x32x32xbf16>
    %352 = vector.shape_cast %351 : vector<1x32x32xbf16> to vector<32x32xbf16>
    %cst_320 = arith.constant dense<0.000000e+00> : vector<64x32xf32>
    %353 = tpu.matmul %349, %352, %cst_320 {dimension_numbers = #tpu.dot_dimension_numbers<[1], [0], [0], [1], [0, 0, 1, 1], [], []>} : vector<64x32xbf16>, vector<32x32xbf16>, vector<64x32xf32> -> vector<64x32xf32>
    %c0_321 = arith.constant 0 : index
    %c0_322 = arith.constant 0 : index
    %c0_323 = arith.constant 0 : index
    %354 = vector.load %arg30[%c0_321, %c0_322, %c0_323] : memref<9x16x32xbf16, #tpu.memory_space<vmem>>, vector<1x16x32xbf16>
    %355 = vector.shape_cast %354 : vector<1x16x32xbf16> to vector<16x32xbf16>
    %cst_324 = arith.constant dense<0.000000e+00> : vector<64x32xf32>
    %356 = tpu.matmul %350, %355, %cst_324 {dimension_numbers = #tpu.dot_dimension_numbers<[1], [0], [0], [1], [0, 0, 1, 1], [], []>} : vector<64x16xbf16>, vector<16x32xbf16>, vector<64x32xf32> -> vector<64x32xf32>
    %357 = arith.addf %353, %356 : vector<64x32xf32>
    %358 = arith.truncf %357 : vector<64x32xf32> to vector<64x32xbf16>
    %c1_325 = arith.constant 1 : index
    %c0_326 = arith.constant 0 : index
    %c0_327 = arith.constant 0 : index
    %359 = vector.load %arg29[%c1_325, %c0_326, %c0_327] : memref<9x32x32xbf16, #tpu.memory_space<vmem>>, vector<1x32x32xbf16>
    %360 = vector.shape_cast %359 : vector<1x32x32xbf16> to vector<32x32xbf16>
    %cst_328 = arith.constant dense<0.000000e+00> : vector<64x32xf32>
    %361 = tpu.matmul %349, %360, %cst_328 {dimension_numbers = #tpu.dot_dimension_numbers<[1], [0], [0], [1], [0, 0, 1, 1], [], []>} : vector<64x32xbf16>, vector<32x32xbf16>, vector<64x32xf32> -> vector<64x32xf32>
    %c1_329 = arith.constant 1 : index
    %c0_330 = arith.constant 0 : index
    %c0_331 = arith.constant 0 : index
    %362 = vector.load %arg30[%c1_329, %c0_330, %c0_331] : memref<9x16x32xbf16, #tpu.memory_space<vmem>>, vector<1x16x32xbf16>
    %363 = vector.shape_cast %362 : vector<1x16x32xbf16> to vector<16x32xbf16>
    %cst_332 = arith.constant dense<0.000000e+00> : vector<64x32xf32>
    %364 = tpu.matmul %350, %363, %cst_332 {dimension_numbers = #tpu.dot_dimension_numbers<[1], [0], [0], [1], [0, 0, 1, 1], [], []>} : vector<64x16xbf16>, vector<16x32xbf16>, vector<64x32xf32> -> vector<64x32xf32>
    %365 = arith.addf %361, %364 : vector<64x32xf32>
    %366 = arith.truncf %365 : vector<64x32xf32> to vector<64x32xbf16>
    %c2_333 = arith.constant 2 : index
    %c0_334 = arith.constant 0 : index
    %c0_335 = arith.constant 0 : index
    %367 = vector.load %arg29[%c2_333, %c0_334, %c0_335] : memref<9x32x32xbf16, #tpu.memory_space<vmem>>, vector<1x32x32xbf16>
    %368 = vector.shape_cast %367 : vector<1x32x32xbf16> to vector<32x32xbf16>
    %cst_336 = arith.constant dense<0.000000e+00> : vector<64x32xf32>
    %369 = tpu.matmul %349, %368, %cst_336 {dimension_numbers = #tpu.dot_dimension_numbers<[1], [0], [0], [1], [0, 0, 1, 1], [], []>} : vector<64x32xbf16>, vector<32x32xbf16>, vector<64x32xf32> -> vector<64x32xf32>
    %c2_337 = arith.constant 2 : index
    %c0_338 = arith.constant 0 : index
    %c0_339 = arith.constant 0 : index
    %370 = vector.load %arg30[%c2_337, %c0_338, %c0_339] : memref<9x16x32xbf16, #tpu.memory_space<vmem>>, vector<1x16x32xbf16>
    %371 = vector.shape_cast %370 : vector<1x16x32xbf16> to vector<16x32xbf16>
    %cst_340 = arith.constant dense<0.000000e+00> : vector<64x32xf32>
    %372 = tpu.matmul %350, %371, %cst_340 {dimension_numbers = #tpu.dot_dimension_numbers<[1], [0], [0], [1], [0, 0, 1, 1], [], []>} : vector<64x16xbf16>, vector<16x32xbf16>, vector<64x32xf32> -> vector<64x32xf32>
    %373 = arith.addf %369, %372 : vector<64x32xf32>
    %374 = arith.truncf %373 : vector<64x32xf32> to vector<64x32xbf16>
    %c3_341 = arith.constant 3 : index
    %c0_342 = arith.constant 0 : index
    %c0_343 = arith.constant 0 : index
    %375 = vector.load %arg29[%c3_341, %c0_342, %c0_343] : memref<9x32x32xbf16, #tpu.memory_space<vmem>>, vector<1x32x32xbf16>
    %376 = vector.shape_cast %375 : vector<1x32x32xbf16> to vector<32x32xbf16>
    %cst_344 = arith.constant dense<0.000000e+00> : vector<64x32xf32>
    %377 = tpu.matmul %349, %376, %cst_344 {dimension_numbers = #tpu.dot_dimension_numbers<[1], [0], [0], [1], [0, 0, 1, 1], [], []>} : vector<64x32xbf16>, vector<32x32xbf16>, vector<64x32xf32> -> vector<64x32xf32>
    %c3_345 = arith.constant 3 : index
    %c0_346 = arith.constant 0 : index
    %c0_347 = arith.constant 0 : index
    %378 = vector.load %arg30[%c3_345, %c0_346, %c0_347] : memref<9x16x32xbf16, #tpu.memory_space<vmem>>, vector<1x16x32xbf16>
    %379 = vector.shape_cast %378 : vector<1x16x32xbf16> to vector<16x32xbf16>
    %cst_348 = arith.constant dense<0.000000e+00> : vector<64x32xf32>
    %380 = tpu.matmul %350, %379, %cst_348 {dimension_numbers = #tpu.dot_dimension_numbers<[1], [0], [0], [1], [0, 0, 1, 1], [], []>} : vector<64x16xbf16>, vector<16x32xbf16>, vector<64x32xf32> -> vector<64x32xf32>
    %381 = arith.addf %377, %380 : vector<64x32xf32>
    %382 = arith.truncf %381 : vector<64x32xf32> to vector<64x32xbf16>
    %c4_349 = arith.constant 4 : index
    %c0_350 = arith.constant 0 : index
    %c0_351 = arith.constant 0 : index
    %383 = vector.load %arg29[%c4_349, %c0_350, %c0_351] : memref<9x32x32xbf16, #tpu.memory_space<vmem>>, vector<1x32x32xbf16>
    %384 = vector.shape_cast %383 : vector<1x32x32xbf16> to vector<32x32xbf16>
    %cst_352 = arith.constant dense<0.000000e+00> : vector<64x32xf32>
    %385 = tpu.matmul %349, %384, %cst_352 {dimension_numbers = #tpu.dot_dimension_numbers<[1], [0], [0], [1], [0, 0, 1, 1], [], []>} : vector<64x32xbf16>, vector<32x32xbf16>, vector<64x32xf32> -> vector<64x32xf32>
    %c4_353 = arith.constant 4 : index
    %c0_354 = arith.constant 0 : index
    %c0_355 = arith.constant 0 : index
    %386 = vector.load %arg30[%c4_353, %c0_354, %c0_355] : memref<9x16x32xbf16, #tpu.memory_space<vmem>>, vector<1x16x32xbf16>
    %387 = vector.shape_cast %386 : vector<1x16x32xbf16> to vector<16x32xbf16>
    %cst_356 = arith.constant dense<0.000000e+00> : vector<64x32xf32>
    %388 = tpu.matmul %350, %387, %cst_356 {dimension_numbers = #tpu.dot_dimension_numbers<[1], [0], [0], [1], [0, 0, 1, 1], [], []>} : vector<64x16xbf16>, vector<16x32xbf16>, vector<64x32xf32> -> vector<64x32xf32>
    %389 = arith.addf %385, %388 : vector<64x32xf32>
    %390 = arith.truncf %389 : vector<64x32xf32> to vector<64x32xbf16>
    %c5_357 = arith.constant 5 : index
    %c0_358 = arith.constant 0 : index
    %c0_359 = arith.constant 0 : index
    %391 = vector.load %arg29[%c5_357, %c0_358, %c0_359] : memref<9x32x32xbf16, #tpu.memory_space<vmem>>, vector<1x32x32xbf16>
    %392 = vector.shape_cast %391 : vector<1x32x32xbf16> to vector<32x32xbf16>
    %cst_360 = arith.constant dense<0.000000e+00> : vector<64x32xf32>
    %393 = tpu.matmul %349, %392, %cst_360 {dimension_numbers = #tpu.dot_dimension_numbers<[1], [0], [0], [1], [0, 0, 1, 1], [], []>} : vector<64x32xbf16>, vector<32x32xbf16>, vector<64x32xf32> -> vector<64x32xf32>
    %c5_361 = arith.constant 5 : index
    %c0_362 = arith.constant 0 : index
    %c0_363 = arith.constant 0 : index
    %394 = vector.load %arg30[%c5_361, %c0_362, %c0_363] : memref<9x16x32xbf16, #tpu.memory_space<vmem>>, vector<1x16x32xbf16>
    %395 = vector.shape_cast %394 : vector<1x16x32xbf16> to vector<16x32xbf16>
    %cst_364 = arith.constant dense<0.000000e+00> : vector<64x32xf32>
    %396 = tpu.matmul %350, %395, %cst_364 {dimension_numbers = #tpu.dot_dimension_numbers<[1], [0], [0], [1], [0, 0, 1, 1], [], []>} : vector<64x16xbf16>, vector<16x32xbf16>, vector<64x32xf32> -> vector<64x32xf32>
    %397 = arith.addf %393, %396 : vector<64x32xf32>
    %398 = arith.truncf %397 : vector<64x32xf32> to vector<64x32xbf16>
    %c6_365 = arith.constant 6 : index
    %c0_366 = arith.constant 0 : index
    %c0_367 = arith.constant 0 : index
    %399 = vector.load %arg29[%c6_365, %c0_366, %c0_367] : memref<9x32x32xbf16, #tpu.memory_space<vmem>>, vector<1x32x32xbf16>
    %400 = vector.shape_cast %399 : vector<1x32x32xbf16> to vector<32x32xbf16>
    %cst_368 = arith.constant dense<0.000000e+00> : vector<64x32xf32>
    %401 = tpu.matmul %349, %400, %cst_368 {dimension_numbers = #tpu.dot_dimension_numbers<[1], [0], [0], [1], [0, 0, 1, 1], [], []>} : vector<64x32xbf16>, vector<32x32xbf16>, vector<64x32xf32> -> vector<64x32xf32>
    %c6_369 = arith.constant 6 : index
    %c0_370 = arith.constant 0 : index
    %c0_371 = arith.constant 0 : index
    %402 = vector.load %arg30[%c6_369, %c0_370, %c0_371] : memref<9x16x32xbf16, #tpu.memory_space<vmem>>, vector<1x16x32xbf16>
    %403 = vector.shape_cast %402 : vector<1x16x32xbf16> to vector<16x32xbf16>
    %cst_372 = arith.constant dense<0.000000e+00> : vector<64x32xf32>
    %404 = tpu.matmul %350, %403, %cst_372 {dimension_numbers = #tpu.dot_dimension_numbers<[1], [0], [0], [1], [0, 0, 1, 1], [], []>} : vector<64x16xbf16>, vector<16x32xbf16>, vector<64x32xf32> -> vector<64x32xf32>
    %405 = arith.addf %401, %404 : vector<64x32xf32>
    %406 = arith.truncf %405 : vector<64x32xf32> to vector<64x32xbf16>
    %c7_373 = arith.constant 7 : index
    %c0_374 = arith.constant 0 : index
    %c0_375 = arith.constant 0 : index
    %407 = vector.load %arg29[%c7_373, %c0_374, %c0_375] : memref<9x32x32xbf16, #tpu.memory_space<vmem>>, vector<1x32x32xbf16>
    %408 = vector.shape_cast %407 : vector<1x32x32xbf16> to vector<32x32xbf16>
    %cst_376 = arith.constant dense<0.000000e+00> : vector<64x32xf32>
    %409 = tpu.matmul %349, %408, %cst_376 {dimension_numbers = #tpu.dot_dimension_numbers<[1], [0], [0], [1], [0, 0, 1, 1], [], []>} : vector<64x32xbf16>, vector<32x32xbf16>, vector<64x32xf32> -> vector<64x32xf32>
    %c7_377 = arith.constant 7 : index
    %c0_378 = arith.constant 0 : index
    %c0_379 = arith.constant 0 : index
    %410 = vector.load %arg30[%c7_377, %c0_378, %c0_379] : memref<9x16x32xbf16, #tpu.memory_space<vmem>>, vector<1x16x32xbf16>
    %411 = vector.shape_cast %410 : vector<1x16x32xbf16> to vector<16x32xbf16>
    %cst_380 = arith.constant dense<0.000000e+00> : vector<64x32xf32>
    %412 = tpu.matmul %350, %411, %cst_380 {dimension_numbers = #tpu.dot_dimension_numbers<[1], [0], [0], [1], [0, 0, 1, 1], [], []>} : vector<64x16xbf16>, vector<16x32xbf16>, vector<64x32xf32> -> vector<64x32xf32>
    %413 = arith.addf %409, %412 : vector<64x32xf32>
    %414 = arith.truncf %413 : vector<64x32xf32> to vector<64x32xbf16>
    %c8_381 = arith.constant 8 : index
    %c0_382 = arith.constant 0 : index
    %c0_383 = arith.constant 0 : index
    %415 = vector.load %arg29[%c8_381, %c0_382, %c0_383] : memref<9x32x32xbf16, #tpu.memory_space<vmem>>, vector<1x32x32xbf16>
    %416 = vector.shape_cast %415 : vector<1x32x32xbf16> to vector<32x32xbf16>
    %cst_384 = arith.constant dense<0.000000e+00> : vector<64x32xf32>
    %417 = tpu.matmul %349, %416, %cst_384 {dimension_numbers = #tpu.dot_dimension_numbers<[1], [0], [0], [1], [0, 0, 1, 1], [], []>} : vector<64x32xbf16>, vector<32x32xbf16>, vector<64x32xf32> -> vector<64x32xf32>
    %c8_385 = arith.constant 8 : index
    %c0_386 = arith.constant 0 : index
    %c0_387 = arith.constant 0 : index
    %418 = vector.load %arg30[%c8_385, %c0_386, %c0_387] : memref<9x16x32xbf16, #tpu.memory_space<vmem>>, vector<1x16x32xbf16>
    %419 = vector.shape_cast %418 : vector<1x16x32xbf16> to vector<16x32xbf16>
    %cst_388 = arith.constant dense<0.000000e+00> : vector<64x32xf32>
    %420 = tpu.matmul %350, %419, %cst_388 {dimension_numbers = #tpu.dot_dimension_numbers<[1], [0], [0], [1], [0, 0, 1, 1], [], []>} : vector<64x16xbf16>, vector<16x32xbf16>, vector<64x32xf32> -> vector<64x32xf32>
    %421 = arith.addf %417, %420 : vector<64x32xf32>
    %422 = arith.truncf %421 : vector<64x32xf32> to vector<64x32xbf16>
    %423 = tpu.concatenate %358, %366, %374, %382, %390, %398, %406, %414, %422 in 0 : vector<64x32xbf16>, vector<64x32xbf16>, vector<64x32xbf16>, vector<64x32xbf16>, vector<64x32xbf16>, vector<64x32xbf16>, vector<64x32xbf16>, vector<64x32xbf16>, vector<64x32xbf16> -> vector<576x32xbf16>
    %c0_389 = arith.constant 0 : index
    %c0_390 = arith.constant 0 : index
    %424 = vector.load %arg28[%c0_389, %c0_390] : memref<64x576xbf16, #tpu.memory_space<vmem>>, vector<64x576xbf16>
    %cst_391 = arith.constant dense<0.000000e+00> : vector<64x32xf32>
    %425 = tpu.matmul %424, %423, %cst_391 {dimension_numbers = #tpu.dot_dimension_numbers<[1], [0], [0], [1], [0, 0, 1, 1], [], []>} : vector<64x576xbf16>, vector<576x32xbf16>, vector<64x32xf32> -> vector<64x32xf32>
    %c0_392 = arith.constant 0 : index
    %c0_393 = arith.constant 0 : index
    %426 = vector.load %arg31[%c0_392, %c0_393] : memref<1x32xf32, #tpu.memory_space<vmem>>, vector<1x32xf32>
    %427 = vector.broadcast %426 : vector<1x32xf32> to vector<64x32xf32>
    %428 = arith.addf %425, %427 : vector<64x32xf32>
    %cst_394 = arith.constant 0.000000e+00 : f32
    %429 = vector.broadcast %cst_394 : f32 to vector<64x32xf32>
    %430 = arith.maximumf %428, %429 : vector<64x32xf32>
    %c0_395 = arith.constant 0 : index
    %c0_396 = arith.constant 0 : index
    %431 = vector.load %arg32[%c0_395, %c0_396] : memref<32x16xbf16, #tpu.memory_space<vmem>>, vector<32x16xbf16>
    %432 = arith.truncf %430 : vector<64x32xf32> to vector<64x32xbf16>
    %cst_397 = arith.constant dense<0.000000e+00> : vector<64x16xf32>
    %433 = tpu.matmul %432, %431, %cst_397 {dimension_numbers = #tpu.dot_dimension_numbers<[1], [0], [0], [1], [0, 0, 1, 1], [], []>} : vector<64x32xbf16>, vector<32x16xbf16>, vector<64x16xf32> -> vector<64x16xf32>
    %c0_398 = arith.constant 0 : index
    %c0_399 = arith.constant 0 : index
    %434 = vector.load %arg33[%c0_398, %c0_399] : memref<1x16xf32, #tpu.memory_space<vmem>>, vector<1x16xf32>
    %435 = vector.broadcast %434 : vector<1x16xf32> to vector<64x16xf32>
    %436 = arith.addf %433, %435 : vector<64x16xf32>
    %c0_400 = arith.constant 0 : index
    %c0_401 = arith.constant 0 : index
    %437 = vector.load %arg35[%c0_400, %c0_401] : memref<64x16xf32, #tpu.memory_space<vmem>>, vector<64x16xf32>
    tpu.vector_store %arg35[%c0_400, %c0_401], %436 {strides = array<i32>} : memref<64x16xf32, #tpu.memory_space<vmem>>, vector<64x16xf32>,
    return
  }
}

</mosaic_0001>

<bundles_post_ra>
// kernel: _forward_impl.1
= control target key start
LH: loop header
LB: loop body
LE: loop exit
PB: predicated region body
PF: predicated region fallthrough
CT: control target
= control target key end

     0   :  { %s14477_s3 = smov 1   ;;  %vm293_vm0 = vcmask 441344   ;;  %vm342_vm1 = vcmask 1042432   ;;  %s14478_s10 = smov 4   ;;  %vm563_vm2 = vcmask 130048   ;;  %vm14485_vm3 = vmmov 0   ;;  %s16976_s0 = inlined_call_operand.smem [shape: u32[36], index: -1, kind: input, shape index: {}] }
   0x1   :  { %s10304_s6 = sld [smem:[%s16976_s0 + %s14477_s3]]   ;;  %s14479_s14 = smov 2   ;;  %vm4064_vm4 = vcmask 523264   ;;  %vm4210_vm5 = vcmask 261120   ;;  %vm5095_vm6 = vcmask 1041408   ;;  %vm5099_vm7 = vcmask 1043456  }
   0x2   :  { %s14525_s9 = sld [smem:[%s16976_s0]]   ;;  %s14480_s18 = smov 3   ;;  %vm5102_vm8 = vcmask 1045504   ;;  %vm5259_vm9 = vcmask 253952   ;;  %vm6911_vm10 = vcmask 293888   ;;  %vm6967_vm11 = vcmask 31744  }
   0x3   :  { %s14562_s13 = sld [smem:[%s16976_s0 + %s14478_s10]]   ;;  %s14481_s22 = smov 5  }
   0x4   :  { %s10305_s17 = sld [smem:[%s16976_s0 + %s14479_s14]]   ;;  %s14482_s26 = smov 7  }
   0x5   :  { %s14845_s21 = sld [smem:[%s16976_s0 + %s14480_s18]]   ;;  %s14483_s30 = smov 6  }
   0x6   :  { %s10308_s25 = sld [smem:[%s16976_s0 + %s14481_s22]]   ;;  %s14486_s4 = smov 10  }
   0x7   :  { %v14055_v0 = vld [vmem:[%s10304_s6] sm:$0xff]   ;;  %v14056_v1 = vld [vmem:[%s10304_s6 + $0x8] sm:$0xff]   ;;  %v14057_v2 = vld [vmem:[%s10304_s6 + $0x10] sm:$0xff]   ;;  %s15791_s29 = sld [smem:[%s16976_s0 + %s14482_s26]]   ;;  %s14487_s8 = smov 8  }
   0x8   :  { %12559 = vmatprep.subr.bf16.mxu0 %v14055_v0  ;;  %v14059_v3 = vld [vmem:[%s14525_s9] sm:$0xff]   ;;  %v14058_v4 = vld [vmem:[%s10304_s6 + $0x18] ss:$0 sps:$4 sm:$0x77]   ;;  %v14060_v6 = vld [vmem:[%s14525_s9 + $0x8] sm:$0xff]   ;;  %s15955_s3 = sld [smem:[%s16976_s0 + %s14483_s30]]   ;;  %s14489_s12 = smov 9  }
   0x9   :  { %12560 = vmatpush3.bf16.msra.mxu0 %v14055_v0  ;;  %12567 = vmatprep.mubr.msk.bf16.mxu0 %vm293_vm0, %v14059_v3  ;;  %v344_v5 = vsel %vm342_vm1, %v14058_v4, 0  ;;  %v14061_v7 = vld [vmem:[%s14525_s9 + $0x10] sm:$0xff]   ;;  %v14062_v8 = vld [vmem:[%s14525_s9 + $0x18] sm:$0xff]   ;;  %v14063_v9 = vld [vmem:[%s14525_s9 + $0x20] sm:$0xff]   ;;  %s15978_s7 = sld [smem:[%s16976_s0 + %s14486_s4]]   ;;  %s14490_s16 = smov 13  }
   0xa   :  { %12561 = vmatprep.subr.bf16.mxu0 %v14056_v1  ;;  %v14064_v10 = vld [vmem:[%s14525_s9 + $0x28] sm:$0xff]   ;;  %v14065_v11 = vld [vmem:[%s14525_s9 + $0x30] sm:$0xff]   ;;  %v14066_v12 = vld [vmem:[%s14525_s9 + $0x38] sm:$0xff]   ;;  %s10311_s11 = sld [smem:[%s16976_s0 + %s14487_s8]]   ;;  %s14491_s20 = smov 11  }
   0xb   :  { %v14067_v13 = vld [vmem:[%s14525_s9 + $0x40] sm:$0xff]   ;;  %v14068_v14 = vld [vmem:[%s14525_s9 + $0x48] sm:$0xff]   ;;  %v14069_v15 = vld [vmem:[%s14525_s9 + $0x50] sm:$0xff]   ;;  %s10312_s15 = sld [smem:[%s16976_s0 + %s14489_s12]]   ;;  %s14492_s24 = smov 20  }
   0xc   :  { %v14070_v16 = vld [vmem:[%s14525_s9 + $0x58] sm:$0xff]   ;;  %v14071_v17 = vld [vmem:[%s14525_s9 + $0x60] sm:$0xff]   ;;  %v14072_v18 = vld [vmem:[%s14525_s9 + $0x68] sm:$0xff]   ;;  %s16066_s19 = sld [smem:[%s16976_s0 + %s14490_s16]]   ;;  %s14493_s28 = smov 15  }
   0xd   :  { %12562 = vmatpush3.bf16.msra.mxu0 %v14056_v1  ;;  %v14073_v19 = vld [vmem:[%s14525_s9 + $0x70] sm:$0xff]   ;;  %v14074_v20 = vld [vmem:[%s14525_s9 + $0x78] sm:$0xff]   ;;  %v14075_v21 = vld [vmem:[%s14562_s13] sm:$0xff]   ;;  %s10314_s23 = sld [smem:[%s16976_s0 + %s14491_s20]]   ;;  %s14494_s2 = smov 19  }
   0xe   :  { %12563 = vmatprep.subr.bf16.mxu0 %v14057_v2  ;;  %v14076_v22 = vld [vmem:[%s14562_s13 + $0x10] sm:$0xff]   ;;  %12599 = vmatprep.subr.bf16.mxu1 %v14075_v21  ;;  %v14077_v23 = vld [vmem:[%s14562_s13 + $0x8] sm:$0xff]   ;;  %v14078_v24 = vld [vmem:[%s14562_s13 + $0x20] sm:$0xff]   ;;  %s16136_s27 = sld [smem:[%s16976_s0 + %s14492_s24]]   ;;  %s14495_s6 = smov 12  }
   0xf   :  { %12600 = vmatpush3.bf16.msra.mxu1 %v14075_v21  ;;  %v14571_v25 = vld [vmem:[%s10305_s17] ss:$0 sm:$0xff]  ;;  %v14583_v43 = vld [vmem:[%s14562_s13 + $0x18] sm:$0xff]   ;;  %v14586_v44 = vld [vmem:[%s14562_s13 + $0x30] sm:$0xff]   ;;  %s16141_s1 = sld [smem:[%s16976_s0 + %s14493_s28]]   ;;  %s14496_s10 = smov 14  }
  0x10   :  { %12633 = vmatprep.subr.bf16.mxu1 %v14077_v23  ;;  %s16146_s5 = sld [smem:[%s16976_s0 + %s14494_s2]]   ;;  %s14497_s14 = smov 25  }
  0x11   :  { %12564 = vmatpush3.bf16.msra.mxu0 %v14057_v2  ;;  %s10315_s9 = sld [smem:[%s16976_s0 + %s14495_s6]]   ;;  %s14498_s18 = smov 16  }
  0x12   :  { %14017 = vmatprep.subr.msk.bf16.mxu0 %vm342_vm1, %v14058_v4  ;;  %s16290_s17 = sld [smem:[%s16976_s0 + %s14497_s14]]   ;;  %s14499_s22 = smov 34  }
  0x13   :  { %s14500_s26 = smov 18   ;;  %s14501_s30 = smov 22  }
  0x14   :  { %s14502_s4 = smov 24   ;;  %s14503_s8 = smov 21  }
  0x15   :  { %12566 = vmatpush3.bf16.msra.mxu0 %v344_v5  ;;  %s14504_s12 = smov 23   ;;  %s14505_s16 = smov 30  }
  0x16   :  { %12667 = vmatprep.subr.bf16.mxu0 %v14076_v22  ;;  %s14506_s20 = smov 27   ;;  %s14507_s24 = smov 29  }
  0x17   :  { %s14508_s28 = smov 26   ;;  %s14509_s2 = smov 28  }
  0x18   :  { %12568 = vmatmul.mubr.msk.bf16.vlgmr.msra.gmra.mrb[0].mxu0 %vm293_vm0, %v14060_v6  ;;  %s14510_s6 = smov 32   ;;  %s14512_s14 = smov 33  }
  0x19   :  { %12571 = vmatprep.mubr.msk.bf16.mxu0 %vm293_vm0, %v14061_v7  ;;  %12668 = vmatpush3.bf16.msra.mxu0 %v14076_v22 }
  0x1a   :  { %12735 = vmatprep.subr.bf16.mxu0 %v14078_v24 }
  0x20   :  { %12572 = vmatmul.mubr.msk.bf16.gmra.mrb[4].mxu0 %vm293_vm0, %v14062_v8 }
  0x21   :  { %12575 = vmatprep.mubr.msk.bf16.mxu0 %vm293_vm0, %v14063_v9 }
  0x28   :  { %12576 = vmatmul.mubr.msk.bf16.gmra.mrb[8].mxu0 %vm293_vm0, %v14064_v10 }
  0x29   :  { %12579 = vmatprep.mubr.msk.bf16.mxu0 %vm293_vm0, %v14065_v11 }
  0x30   :  { %12580 = vmatmul.mubr.msk.bf16.gmra.mrb[12].mxu0 %vm293_vm0, %v14066_v12 }
  0x31   :  { %12583 = vmatprep.mubr.msk.bf16.mxu0 %vm293_vm0, %v14067_v13 }
  0x38   :  { %12584 = vmatmul.mubr.msk.bf16.gmra.mrb[16].mxu0 %vm293_vm0, %v14068_v14 }
  0x39   :  { %12587 = vmatprep.mubr.msk.bf16.mxu0 %vm293_vm0, %v14069_v15 }
  0x40   :  { %12588 = vmatmul.mubr.msk.bf16.gmra.mrb[20].mxu0 %vm293_vm0, %v14070_v16 }
  0x41   :  { %12591 = vmatprep.mubr.msk.bf16.mxu0 %vm293_vm0, %v14071_v17 }
  0x48   :  { %12592 = vmatmul.mubr.msk.bf16.gmra.mrb[24].mxu0 %vm293_vm0, %v14072_v18 }
  0x49   :  { %12595 = vmatprep.mubr.msk.bf16.mxu0 %vm293_vm0, %v14073_v19 }
  0x50   :  { %12596 = vmatmul.mubr.msk.bf16.gmra.mrb[28].mxu0 %vm293_vm0, %v14074_v20 }
  0xeb   :  { %v12569_v26 = vpop.f32.mrb[0].mxu0 }
  0xec   :  { %v389_v27 = vadd.f32 %v12569_v26, %v14571_v25  ;;  %v380_v28 = vpop.f32.mrb[1].mxu0 }
  0xed   :  { %v381_v29 = vadd.f32 %v14571_v25, %v380_v28  ;;  %v12570_v30 = vpop.f32.mrb[2].mxu0 }
  0xee   :  { %v392_v31 = vadd.f32 %v12570_v30, %v14571_v25  ;;  %v383_v32 = vpop.f32.mrb[3].mxu0  ;;  %v509_v34 = vmax.f32 %v389_v27, 0.0 }
  0xef   :  { %v384_v33 = vadd.f32 %v14571_v25, %v383_v32  ;;  %v507_v36 = vmax.f32 %v381_v29, 0.0 }
  0xf0   :  { %v510_v35 = vmax.f32 %v392_v31, 0.0 }
  0xf1   :  { %v508_v37 = vmax.f32 %v384_v33, 0.0 }
  0xf2   :  { %v14577_v38 = vpack.c.bf16 %v510_v35, %v509_v34 }
  0xf3   :  { %v14579_v39 = vpack.c.bf16 %v508_v37, %v507_v36  ;;  %v12573_v40 = vpop.f32.mrb[4].mxu0 }
  0xf4   :  { %v405_v41 = vadd.f32 %v12573_v40, %v14571_v25  ;;  %v396_v42 = vpop.f32.mrb[5].mxu0 }
  0xf5   :  { %v397_v45 = vadd.f32 %v14571_v25, %v396_v42  ;;  %v12574_v46 = vpop.f32.mrb[6].mxu0  ;;  %12601 = vmatprep.mubr.msk.bf16.mxu1 %vm563_vm2, %v14579_v39  ;;  %12669 = vmatprep.mubr.msk.bf16.mxu0 %vm563_vm2, %v14579_v39 }
  0xf6   :  { %v408_v47 = vadd.f32 %v12574_v46, %v14571_v25  ;;  %v399_v48 = vpop.f32.mrb[7].mxu0  ;;  %12602 = vmatmul.mubr.msk.bf16.vlgmr.msra.gmra.mrb[0].mxu1 %vm563_vm2, %v14577_v38  ;;  %12670 = vmatmul.mubr.msk.bf16.vlgmr.msra.gmra.mrb[32].mxu0 %vm563_vm2, %v14577_v38  ;;  %v513_v50 = vmax.f32 %v405_v41, 0.0 }
  0xf7   :  { %v400_v49 = vadd.f32 %v14571_v25, %v399_v48  ;;  %12634 = vmatpush3.bf16.msra.mxu1 %v14077_v23  ;;  %12736 = vmatpush3.bf16.msra.mxu0 %v14078_v24  ;;  %v511_v52 = vmax.f32 %v397_v45, 0.0 }
  0xf8   :  { %v514_v51 = vmax.f32 %v408_v47, 0.0  ;;  %12701 = vmatprep.subr.bf16.mxu1 %v14583_v43  ;;  %12803 = vmatprep.subr.bf16.mxu0 %v14586_v44 }
  0xf9   :  { %v512_v53 = vmax.f32 %v400_v49, 0.0 }
  0xfa   :  { %v14601_v54 = vpack.c.bf16 %v514_v51, %v513_v50 }
  0xfb   :  { %v14603_v55 = vpack.c.bf16 %v512_v53, %v511_v52  ;;  %v12577_v56 = vpop.f32.mrb[8].mxu0 }
  0xfc   :  { %v421_v57 = vadd.f32 %v12577_v56, %v14571_v25  ;;  %v412_v58 = vpop.f32.mrb[9].mxu0 }
  0xfd   :  { %v413_v59 = vadd.f32 %v14571_v25, %v412_v58  ;;  %v12578_v60 = vpop.f32.mrb[10].mxu0  ;;  %12605 = vmatprep.mubr.msk.bf16.mxu1 %vm563_vm2, %v14603_v55  ;;  %12673 = vmatprep.mubr.msk.bf16.mxu0 %vm563_vm2, %v14603_v55 }
  0xfe   :  { %v424_v61 = vadd.f32 %v12578_v60, %v14571_v25  ;;  %v415_v62 = vpop.f32.mrb[11].mxu0  ;;  %12606 = vmatmul.mubr.msk.bf16.gmra.mrb[4].mxu1 %vm563_vm2, %v14601_v54  ;;  %12674 = vmatmul.mubr.msk.bf16.gmra.mrb[36].mxu0 %vm563_vm2, %v14601_v54  ;;  %v517_v0 = vmax.f32 %v421_v57, 0.0 }
  0xff   :  { %v416_v63 = vadd.f32 %v14571_v25, %v415_v62  ;;  %v515_v2 = vmax.f32 %v413_v59, 0.0 }
 0x100   :  { %v518_v1 = vmax.f32 %v424_v61, 0.0 }
 0x101   :  { %v516_v3 = vmax.f32 %v416_v63, 0.0 }
 0x102   :  { %v14617_v4 = vpack.c.bf16 %v518_v1, %v517_v0 }
 0x103   :  { %v14619_v5 = vpack.c.bf16 %v516_v3, %v515_v2  ;;  %v12581_v6 = vpop.f32.mrb[12].mxu0 }
 0x104   :  { %v437_v7 = vadd.f32 %v12581_v6, %v14571_v25  ;;  %v428_v8 = vpop.f32.mrb[13].mxu0 }
 0x105   :  { %v429_v9 = vadd.f32 %v14571_v25, %v428_v8  ;;  %v12582_v10 = vpop.f32.mrb[14].mxu0  ;;  %12609 = vmatprep.mubr.msk.bf16.mxu1 %vm563_vm2, %v14619_v5  ;;  %12677 = vmatprep.mubr.msk.bf16.mxu0 %vm563_vm2, %v14619_v5 }
 0x106   :  { %v440_v11 = vadd.f32 %v12582_v10, %v14571_v25  ;;  %v431_v12 = vpop.f32.mrb[15].mxu0  ;;  %12610 = vmatmul.mubr.msk.bf16.gmra.mrb[8].mxu1 %vm563_vm2, %v14617_v4  ;;  %12678 = vmatmul.mubr.msk.bf16.gmra.mrb[40].mxu0 %vm563_vm2, %v14617_v4  ;;  %v521_v14 = vmax.f32 %v437_v7, 0.0 }
 0x107   :  { %v432_v13 = vadd.f32 %v14571_v25, %v431_v12  ;;  %v519_v16 = vmax.f32 %v429_v9, 0.0 }
 0x108   :  { %v522_v15 = vmax.f32 %v440_v11, 0.0 }
 0x109   :  { %v520_v17 = vmax.f32 %v432_v13, 0.0 }
 0x10a   :  { %v14633_v18 = vpack.c.bf16 %v522_v15, %v521_v14 }
 0x10b   :  { %v14635_v19 = vpack.c.bf16 %v520_v17, %v519_v16  ;;  %v12585_v20 = vpop.f32.mrb[16].mxu0 }
 0x10c   :  { %v453_v21 = vadd.f32 %v12585_v20, %v14571_v25  ;;  %v444_v22 = vpop.f32.mrb[17].mxu0 }
 0x10d   :  { %v445_v23 = vadd.f32 %v14571_v25, %v444_v22  ;;  %v12586_v24 = vpop.f32.mrb[18].mxu0  ;;  %12613 = vmatprep.mubr.msk.bf16.mxu1 %vm563_vm2, %v14635_v19  ;;  %12681 = vmatprep.mubr.msk.bf16.mxu0 %vm563_vm2, %v14635_v19 }
 0x10e   :  { %v456_v26 = vadd.f32 %v12586_v24, %v14571_v25  ;;  %v447_v27 = vpop.f32.mrb[19].mxu0  ;;  %12614 = vmatmul.mubr.msk.bf16.gmra.mrb[12].mxu1 %vm563_vm2, %v14633_v18  ;;  %12682 = vmatmul.mubr.msk.bf16.gmra.mrb[44].mxu0 %vm563_vm2, %v14633_v18  ;;  %v525_v29 = vmax.f32 %v453_v21, 0.0 }
 0x10f   :  { %v448_v28 = vadd.f32 %v14571_v25, %v447_v27  ;;  %v523_v31 = vmax.f32 %v445_v23, 0.0  ;;  %v14082_v23 = vld [vmem:[%s14562_s13 + $0x40] sm:$0xff]  }
 0x110   :  { %v526_v30 = vmax.f32 %v456_v26, 0.0 }
 0x111   :  { %v524_v32 = vmax.f32 %v448_v28, 0.0 }
 0x112   :  { %v14649_v33 = vpack.c.bf16 %v526_v30, %v525_v29 }
 0x113   :  { %v14651_v34 = vpack.c.bf16 %v524_v32, %v523_v31  ;;  %v12589_v35 = vpop.f32.mrb[20].mxu0 }
 0x114   :  { %v469_v36 = vadd.f32 %v12589_v35, %v14571_v25  ;;  %v460_v37 = vpop.f32.mrb[21].mxu0 }
 0x115   :  { %v461_v40 = vadd.f32 %v14571_v25, %v460_v37  ;;  %v12590_v41 = vpop.f32.mrb[22].mxu0  ;;  %12617 = vmatprep.mubr.msk.bf16.mxu1 %vm563_vm2, %v14651_v34  ;;  %12685 = vmatprep.mubr.msk.bf16.mxu0 %vm563_vm2, %v14651_v34 }
 0x116   :  { %v472_v42 = vadd.f32 %v12590_v41, %v14571_v25  ;;  %v463_v45 = vpop.f32.mrb[23].mxu0  ;;  %12618 = vmatmul.mubr.msk.bf16.gmra.mrb[16].mxu1 %vm563_vm2, %v14649_v33  ;;  %12686 = vmatmul.mubr.msk.bf16.gmra.mrb[48].mxu0 %vm563_vm2, %v14649_v33  ;;  %v529_v47 = vmax.f32 %v469_v36, 0.0 }
 0x117   :  { %v464_v46 = vadd.f32 %v14571_v25, %v463_v45  ;;  %v527_v49 = vmax.f32 %v461_v40, 0.0 }
 0x118   :  { %v530_v48 = vmax.f32 %v472_v42, 0.0 }
 0x119   :  { %v528_v50 = vmax.f32 %v464_v46, 0.0 }
 0x11a   :  { %v14665_v51 = vpack.c.bf16 %v530_v48, %v529_v47  ;;  %v14110_v48 = vld [vmem:[%s14845_s21 + $0xc] ss:$72 sps:$4 sm:$0xff]  }
 0x11b   :  { %v14667_v52 = vpack.c.bf16 %v528_v50, %v527_v49  ;;  %v12593_v53 = vpop.f32.mrb[24].mxu0 }
 0x11c   :  { %v485_v56 = vadd.f32 %v12593_v53, %v14571_v25  ;;  %v476_v57 = vpop.f32.mrb[25].mxu0 }
 0x11d   :  { %v477_v58 = vadd.f32 %v14571_v25, %v476_v57  ;;  %v12594_v59 = vpop.f32.mrb[26].mxu0  ;;  %12621 = vmatprep.mubr.msk.bf16.mxu1 %vm563_vm2, %v14667_v52  ;;  %12689 = vmatprep.mubr.msk.bf16.mxu0 %vm563_vm2, %v14667_v52 }
 0x11e   :  { %v488_v60 = vadd.f32 %v12594_v59, %v14571_v25  ;;  %v479_v61 = vpop.f32.mrb[27].mxu0  ;;  %12622 = vmatmul.mubr.msk.bf16.gmra.mrb[20].mxu1 %vm563_vm2, %v14665_v51  ;;  %12690 = vmatmul.mubr.msk.bf16.gmra.mrb[52].mxu0 %vm563_vm2, %v14665_v51  ;;  %v533_v63 = vmax.f32 %v485_v56, 0.0 }
 0x11f   :  { %v480_v62 = vadd.f32 %v14571_v25, %v479_v61  ;;  %v531_v1 = vmax.f32 %v477_v58, 0.0 }
 0x120   :  { %v534_v0 = vmax.f32 %v488_v60, 0.0 }
 0x121   :  { %v532_v2 = vmax.f32 %v480_v62, 0.0 }
 0x122   :  { %v14681_v3 = vpack.c.bf16 %v534_v0, %v533_v63 }
 0x123   :  { %v14683_v6 = vpack.c.bf16 %v532_v2, %v531_v1  ;;  %v12597_v7 = vpop.f32.mrb[28].mxu0 }
 0x124   :  { %v501_v8 = vadd.f32 %v12597_v7, %v14571_v25  ;;  %v492_v9 = vpop.f32.mrb[29].mxu0 }
 0x125   :  { %v493_v10 = vadd.f32 %v14571_v25, %v492_v9  ;;  %v12598_v11 = vpop.f32.mrb[30].mxu0  ;;  %12625 = vmatprep.mubr.msk.bf16.mxu1 %vm563_vm2, %v14683_v6  ;;  %12693 = vmatprep.mubr.msk.bf16.mxu0 %vm563_vm2, %v14683_v6 }
 0x126   :  { %v504_v12 = vadd.f32 %v12598_v11, %v14571_v25  ;;  %v495_v13 = vpop.f32.mrb[31].mxu0  ;;  %12626 = vmatmul.mubr.msk.bf16.gmra.mrb[24].mxu1 %vm563_vm2, %v14681_v3  ;;  %12694 = vmatmul.mubr.msk.bf16.gmra.mrb[56].mxu0 %vm563_vm2, %v14681_v3  ;;  %v537_v15 = vmax.f32 %v501_v8, 0.0 }
 0x127   :  { %v496_v14 = vadd.f32 %v14571_v25, %v495_v13  ;;  %v535_v17 = vmax.f32 %v493_v10, 0.0  ;;  %v14081_v25 = vld [vmem:[%s14562_s13 + $0x28] sm:$0xff]  }
 0x128   :  { %v538_v16 = vmax.f32 %v504_v12, 0.0 }
 0x129   :  { %v536_v20 = vmax.f32 %v496_v14, 0.0 }
 0x12a   :  { %v14697_v21 = vpack.c.bf16 %v538_v16, %v537_v15 }
 0x12b   :  { %v14699_v22 = vpack.c.bf16 %v536_v20, %v535_v17 }
 0x12d   :  { %12629 = vmatprep.mubr.msk.bf16.mxu1 %vm563_vm2, %v14699_v22  ;;  %12697 = vmatprep.mubr.msk.bf16.mxu0 %vm563_vm2, %v14699_v22 }
 0x12e   :  { %12630 = vmatmul.mubr.msk.bf16.gmra.mrb[28].mxu1 %vm563_vm2, %v14697_v21  ;;  %12698 = vmatmul.mubr.msk.bf16.gmra.mrb[60].mxu0 %vm563_vm2, %v14697_v21 }
 0x12f   :  { %12635 = vmatprep.mubr.msk.bf16.mxu1 %vm563_vm2, %v14579_v39  ;;  %12737 = vmatprep.mubr.msk.bf16.mxu0 %vm563_vm2, %v14579_v39 }
 0x136   :  { %12636 = vmatmul.mubr.msk.bf16.vlgmr.msra.gmra.mrb[32].mxu1 %vm563_vm2, %v14577_v38  ;;  %12738 = vmatmul.mubr.msk.bf16.vlgmr.msra.gmra.mrb[64].mxu0 %vm563_vm2, %v14577_v38 }
 0x137   :  { %12639 = vmatprep.mubr.msk.bf16.mxu1 %vm563_vm2, %v14603_v55  ;;  %12741 = vmatprep.mubr.msk.bf16.mxu0 %vm563_vm2, %v14603_v55 }
 0x138   :  { %12702 = vmatpush3.bf16.msra.mxu1 %v14583_v43  ;;  %12804 = vmatpush3.bf16.msra.mxu0 %v14586_v44  ;;  %v14083_v43 = vld [vmem:[%s14562_s13 + $0x38] sm:$0xff]   ;;  %s10317_s13 = sld [smem:[%s16976_s0 + %s14496_s10]]   ;;  %s14511_s10 = smov 31  }
 0x139   :  { %12769 = vmatprep.subr.bf16.mxu1 %v14081_v25  ;;  %12871 = vmatprep.subr.bf16.mxu0 %v14082_v23 }
 0x13e   :  { %12640 = vmatmul.mubr.msk.bf16.gmra.mrb[36].mxu1 %vm563_vm2, %v14601_v54  ;;  %12742 = vmatmul.mubr.msk.bf16.gmra.mrb[68].mxu0 %vm563_vm2, %v14601_v54 }
 0x13f   :  { %12643 = vmatprep.mubr.msk.bf16.mxu1 %vm563_vm2, %v14619_v5  ;;  %12745 = vmatprep.mubr.msk.bf16.mxu0 %vm563_vm2, %v14619_v5 }
 0x146   :  { %12644 = vmatmul.mubr.msk.bf16.gmra.mrb[40].mxu1 %vm563_vm2, %v14617_v4  ;;  %12746 = vmatmul.mubr.msk.bf16.gmra.mrb[72].mxu0 %vm563_vm2, %v14617_v4 }
 0x147   :  { %12647 = vmatprep.mubr.msk.bf16.mxu1 %vm563_vm2, %v14635_v19  ;;  %12749 = vmatprep.mubr.msk.bf16.mxu0 %vm563_vm2, %v14635_v19 }
 0x14e   :  { %12648 = vmatmul.mubr.msk.bf16.gmra.mrb[44].mxu1 %vm563_vm2, %v14633_v18  ;;  %12750 = vmatmul.mubr.msk.bf16.gmra.mrb[76].mxu0 %vm563_vm2, %v14633_v18 }
 0x14f   :  { %12651 = vmatprep.mubr.msk.bf16.mxu1 %vm563_vm2, %v14651_v34  ;;  %12753 = vmatprep.mubr.msk.bf16.mxu0 %vm563_vm2, %v14651_v34 }
 0x156   :  { %12652 = vmatmul.mubr.msk.bf16.gmra.mrb[48].mxu1 %vm563_vm2, %v14649_v33  ;;  %12754 = vmatmul.mubr.msk.bf16.gmra.mrb[80].mxu0 %vm563_vm2, %v14649_v33 }
 0x157   :  { %12655 = vmatprep.mubr.msk.bf16.mxu1 %vm563_vm2, %v14667_v52  ;;  %12757 = vmatprep.mubr.msk.bf16.mxu0 %vm563_vm2, %v14667_v52 }
 0x15e   :  { %12656 = vmatmul.mubr.msk.bf16.gmra.mrb[52].mxu1 %vm563_vm2, %v14665_v51  ;;  %12758 = vmatmul.mubr.msk.bf16.gmra.mrb[84].mxu0 %vm563_vm2, %v14665_v51 }
 0x15f   :  { %12659 = vmatprep.mubr.msk.bf16.mxu1 %vm563_vm2, %v14683_v6  ;;  %12761 = vmatprep.mubr.msk.bf16.mxu0 %vm563_vm2, %v14683_v6 }
 0x166   :  { %12660 = vmatmul.mubr.msk.bf16.gmra.mrb[56].mxu1 %vm563_vm2, %v14681_v3  ;;  %12762 = vmatmul.mubr.msk.bf16.gmra.mrb[88].mxu0 %vm563_vm2, %v14681_v3 }
 0x167   :  { %12663 = vmatprep.mubr.msk.bf16.mxu1 %vm563_vm2, %v14699_v22  ;;  %12765 = vmatprep.mubr.msk.bf16.mxu0 %vm563_vm2, %v14699_v22 }
 0x16e   :  { %12664 = vmatmul.mubr.msk.bf16.gmra.mrb[60].mxu1 %vm563_vm2, %v14697_v21  ;;  %12766 = vmatmul.mubr.msk.bf16.gmra.mrb[92].mxu0 %vm563_vm2, %v14697_v21 }
 0x16f   :  { %12703 = vmatprep.mubr.msk.bf16.mxu1 %vm563_vm2, %v14579_v39  ;;  %12805 = vmatprep.mubr.msk.bf16.mxu0 %vm563_vm2, %v14579_v39 }
 0x176   :  { %12704 = vmatmul.mubr.msk.bf16.vlgmr.msra.gmra.mrb[64].mxu1 %vm563_vm2, %v14577_v38  ;;  %12806 = vmatmul.mubr.msk.bf16.vlgmr.msra.gmra.mrb[96].mxu0 %vm563_vm2, %v14577_v38 }
 0x177   :  { %12707 = vmatprep.mubr.msk.bf16.mxu1 %vm563_vm2, %v14603_v55  ;;  %12809 = vmatprep.mubr.msk.bf16.mxu0 %vm563_vm2, %v14603_v55 }
 0x178   :  { %12770 = vmatpush3.bf16.msra.mxu1 %v14081_v25  ;;  %12872 = vmatpush3.bf16.msra.mxu0 %v14082_v23 }
 0x179   :  { %12837 = vmatprep.subr.bf16.mxu1 %v14083_v43 }
 0x17e   :  { %12708 = vmatmul.mubr.msk.bf16.gmra.mrb[68].mxu1 %vm563_vm2, %v14601_v54  ;;  %12810 = vmatmul.mubr.msk.bf16.gmra.mrb[100].mxu0 %vm563_vm2, %v14601_v54 }
 0x17f   :  { %12711 = vmatprep.mubr.msk.bf16.mxu1 %vm563_vm2, %v14619_v5  ;;  %12813 = vmatprep.mubr.msk.bf16.mxu0 %vm563_vm2, %v14619_v5 }
 0x186   :  { %12712 = vmatmul.mubr.msk.bf16.gmra.mrb[72].mxu1 %vm563_vm2, %v14617_v4  ;;  %12814 = vmatmul.mubr.msk.bf16.gmra.mrb[104].mxu0 %vm563_vm2, %v14617_v4 }
 0x187   :  { %12715 = vmatprep.mubr.msk.bf16.mxu1 %vm563_vm2, %v14635_v19  ;;  %12817 = vmatprep.mubr.msk.bf16.mxu0 %vm563_vm2, %v14635_v19 }
 0x18e   :  { %12716 = vmatmul.mubr.msk.bf16.gmra.mrb[76].mxu1 %vm563_vm2, %v14633_v18  ;;  %12818 = vmatmul.mubr.msk.bf16.gmra.mrb[108].mxu0 %vm563_vm2, %v14633_v18 }
 0x18f   :  { %12719 = vmatprep.mubr.msk.bf16.mxu1 %vm563_vm2, %v14651_v34  ;;  %12821 = vmatprep.mubr.msk.bf16.mxu0 %vm563_vm2, %v14651_v34 }
 0x196   :  { %12720 = vmatmul.mubr.msk.bf16.gmra.mrb[80].mxu1 %vm563_vm2, %v14649_v33  ;;  %12822 = vmatmul.mubr.msk.bf16.gmra.mrb[112].mxu0 %vm563_vm2, %v14649_v33 }
 0x197   :  { %12723 = vmatprep.mubr.msk.bf16.mxu1 %vm563_vm2, %v14667_v52  ;;  %12825 = vmatprep.mubr.msk.bf16.mxu0 %vm563_vm2, %v14667_v52 }
 0x19e   :  { %12724 = vmatmul.mubr.msk.bf16.gmra.mrb[84].mxu1 %vm563_vm2, %v14665_v51  ;;  %12826 = vmatmul.mubr.msk.bf16.gmra.mrb[116].mxu0 %vm563_vm2, %v14665_v51 }
 0x19f   :  { %12727 = vmatprep.mubr.msk.bf16.mxu1 %vm563_vm2, %v14683_v6  ;;  %12829 = vmatprep.mubr.msk.bf16.mxu0 %vm563_vm2, %v14683_v6 }
 0x1a6   :  { %12728 = vmatmul.mubr.msk.bf16.gmra.mrb[88].mxu1 %vm563_vm2, %v14681_v3  ;;  %12830 = vmatmul.mubr.msk.bf16.gmra.mrb[120].mxu0 %vm563_vm2, %v14681_v3 }
 0x1a7   :  { %12731 = vmatprep.mubr.msk.bf16.mxu1 %vm563_vm2, %v14699_v22  ;;  %12833 = vmatprep.mubr.msk.bf16.mxu0 %vm563_vm2, %v14699_v22 }
 0x1ae   :  { %12732 = vmatmul.mubr.msk.bf16.gmra.mrb[92].mxu1 %vm563_vm2, %v14697_v21  ;;  %12834 = vmatmul.mubr.msk.bf16.gmra.mrb[124].mxu0 %vm563_vm2, %v14697_v21 }
 0x1af   :  { %12771 = vmatprep.mubr.msk.bf16.mxu1 %vm563_vm2, %v14579_v39  ;;  %12873 = vmatprep.mubr.msk.bf16.mxu0 %vm563_vm2, %v14579_v39 }
 0x1b6   :  { %12772 = vmatmul.mubr.msk.bf16.vlgmr.msra.gmra.mrb[96].mxu1 %vm563_vm2, %v14577_v38  ;;  %12874 = vmatmul.mubr.msk.bf16.vlgmr.msra.gmra.mrb[128].mxu0 %vm563_vm2, %v14577_v38 }
 0x1b7   :  { %12775 = vmatprep.mubr.msk.bf16.mxu1 %vm563_vm2, %v14603_v55  ;;  %12877 = vmatprep.mubr.msk.bf16.mxu0 %vm563_vm2, %v14603_v55 }
 0x1b8   :  { %12838 = vmatpush3.bf16.msra.mxu1 %v14083_v43 }
 0x1be   :  { %12776 = vmatmul.mubr.msk.bf16.gmra.mrb[100].mxu1 %vm563_vm2, %v14601_v54  ;;  %12878 = vmatmul.mubr.msk.bf16.gmra.mrb[132].mxu0 %vm563_vm2, %v14601_v54 }
 0x1bf   :  { %12779 = vmatprep.mubr.msk.bf16.mxu1 %vm563_vm2, %v14619_v5  ;;  %12881 = vmatprep.mubr.msk.bf16.mxu0 %vm563_vm2, %v14619_v5 }
 0x1c6   :  { %12780 = vmatmul.mubr.msk.bf16.gmra.mrb[104].mxu1 %vm563_vm2, %v14617_v4  ;;  %12882 = vmatmul.mubr.msk.bf16.gmra.mrb[136].mxu0 %vm563_vm2, %v14617_v4 }
 0x1c7   :  { %12783 = vmatprep.mubr.msk.bf16.mxu1 %vm563_vm2, %v14635_v19  ;;  %12885 = vmatprep.mubr.msk.bf16.mxu0 %vm563_vm2, %v14635_v19 }
 0x1c9   :  { %v14875_v44 = vpop.f32.mrb[0].mxu1  ;;  %v14877_v24 = vpop.f32.mrb[32].mxu0 }
 0x1ca   :  { %v14879_v26 = vpop.f32.mrb[1].mxu1  ;;  %v14881_v27 = vpop.f32.mrb[33].mxu0 }
 0x1cb   :  { %v14883_v28 = vpop.f32.mrb[2].mxu1  ;;  %v14885_v29 = vpop.f32.mrb[34].mxu0 }
 0x1cc   :  { %v14891_v32 = vpop.f32.mrb[3].mxu1  ;;  %v14893_v35 = vpop.f32.mrb[35].mxu0 }
 0x1ce   :  { %12784 = vmatmul.mubr.msk.bf16.gmra.mrb[108].mxu1 %vm563_vm2, %v14633_v18  ;;  %12886 = vmatmul.mubr.msk.bf16.gmra.mrb[140].mxu0 %vm563_vm2, %v14633_v18 }
 0x1cf   :  { %12787 = vmatprep.mubr.msk.bf16.mxu1 %vm563_vm2, %v14651_v34  ;;  %12889 = vmatprep.mubr.msk.bf16.mxu0 %vm563_vm2, %v14651_v34 }
 0x1d1   :  { %v14907_v40 = vpop.f32.mrb[4].mxu1  ;;  %v14909_v41 = vpop.f32.mrb[36].mxu0 }
 0x1d2   :  { %v14911_v42 = vpop.f32.mrb[5].mxu1  ;;  %v14913_v45 = vpop.f32.mrb[37].mxu0 }
 0x1d3   :  { %v14915_v46 = vpop.f32.mrb[6].mxu1  ;;  %v14917_v47 = vpop.f32.mrb[38].mxu0 }
 0x1d4   :  { %v14923_v50 = vpop.f32.mrb[7].mxu1  ;;  %v14925_v53 = vpop.f32.mrb[39].mxu0 }
 0x1d6   :  { %12788 = vmatmul.mubr.msk.bf16.gmra.mrb[112].mxu1 %vm563_vm2, %v14649_v33  ;;  %12890 = vmatmul.mubr.msk.bf16.gmra.mrb[144].mxu0 %vm563_vm2, %v14649_v33 }
 0x1d7   :  { %12791 = vmatprep.mubr.msk.bf16.mxu1 %vm563_vm2, %v14667_v52  ;;  %12893 = vmatprep.mubr.msk.bf16.mxu0 %vm563_vm2, %v14667_v52 }
 0x1d9   :  { %v14939_v58 = vpop.f32.mrb[8].mxu1  ;;  %v14941_v59 = vpop.f32.mrb[40].mxu0 }
 0x1da   :  { %v14943_v60 = vpop.f32.mrb[9].mxu1  ;;  %v14945_v61 = vpop.f32.mrb[41].mxu0 }
 0x1db   :  { %v14947_v62 = vpop.f32.mrb[10].mxu1  ;;  %v14949_v63 = vpop.f32.mrb[42].mxu0 }
 0x1dc   :  { %v14955_v2 = vpop.f32.mrb[11].mxu1  ;;  %v14957_v7 = vpop.f32.mrb[43].mxu0 }
 0x1de   :  { %12792 = vmatmul.mubr.msk.bf16.gmra.mrb[116].mxu1 %vm563_vm2, %v14665_v51  ;;  %12894 = vmatmul.mubr.msk.bf16.gmra.mrb[148].mxu0 %vm563_vm2, %v14665_v51 }
 0x1df   :  { %12795 = vmatprep.mubr.msk.bf16.mxu1 %vm563_vm2, %v14683_v6  ;;  %12897 = vmatprep.mubr.msk.bf16.mxu0 %vm563_vm2, %v14683_v6 }
 0x1e1   :  { %v14971_v10 = vpop.f32.mrb[12].mxu1  ;;  %v14973_v11 = vpop.f32.mrb[44].mxu0 }
 0x1e2   :  { %16993 = vst [vmem:[#allocation2_spill] sm:$0xff] %v14973_v11  ;;  %v14975_v12 = vpop.f32.mrb[13].mxu1  ;;  %v14977_v13 = vpop.f32.mrb[45].mxu0 }
 0x1e3   :  { %v14979_v14 = vpop.f32.mrb[14].mxu1  ;;  %v14981_v15 = vpop.f32.mrb[46].mxu0 }
 0x1e4   :  { %16994 = vst [vmem:[#allocation3_spill] sm:$0xff] %v14981_v15  ;;  %v14987_v20 = vpop.f32.mrb[15].mxu1  ;;  %v14989_v25 = vpop.f32.mrb[47].mxu0 }
 0x1e6   :  { %12796 = vmatmul.mubr.msk.bf16.gmra.mrb[120].mxu1 %vm563_vm2, %v14681_v3  ;;  %12898 = vmatmul.mubr.msk.bf16.gmra.mrb[152].mxu0 %vm563_vm2, %v14681_v3 }
 0x1e7   :  { %12799 = vmatprep.mubr.msk.bf16.mxu1 %vm563_vm2, %v14699_v22  ;;  %12901 = vmatprep.mubr.msk.bf16.mxu0 %vm563_vm2, %v14699_v22 }
 0x1e9   :  { %v12619_v17 = vpop.f32.mrb[16].mxu1  ;;  %v15003_v1 = vpop.f32.mrb[48].mxu0 }
 0x1ea   :  { %v710_v9 = vpop.f32.mrb[17].mxu1  ;;  %v15005_v49 = vpop.f32.mrb[49].mxu0 }
 0x1eb   :  { %v12620_v43 = vpop.f32.mrb[18].mxu1  ;;  %v15007_v57 = vpop.f32.mrb[50].mxu0 }
 0x1ec   :  { %v782_v31 = vpack.c.bf16 %v12620_v43, %v12619_v17  ;;  %v713_v37 = vpop.f32.mrb[19].mxu1  ;;  %v15009_v16 = vpop.f32.mrb[51].mxu0 }
 0x1ed   :  { %v781_v0 = vpack.c.bf16 %v713_v37, %v710_v9 }
 0x1ee   :  { %12800 = vmatmul.mubr.msk.bf16.gmra.mrb[124].mxu1 %vm563_vm2, %v14697_v21  ;;  %12902 = vmatmul.mubr.msk.bf16.gmra.mrb[156].mxu0 %vm563_vm2, %v14697_v21 }
 0x1ef   :  { %12839 = vmatprep.mubr.msk.bf16.mxu1 %vm563_vm2, %v14579_v39  ;;  %11645 = vmatprep.subr.bf16.mxu1 %v781_v0 }
 0x1f0   :  { %2813 = vmatprep.mubr.bf16.mxu0 %v14110_v48  ;;  %v16995_v48 = vpack.c.bf16 %v14891_v32, %v14879_v26 }
 0x1f1   :  { %v12623_v17 = vpop.f32.mrb[20].mxu1  ;;  %v15022_v43 = vpop.f32.mrb[52].mxu0 }
 0x1f2   :  { %v726_v23 = vpop.f32.mrb[21].mxu1  ;;  %v15024_v37 = vpop.f32.mrb[53].mxu0 }
 0x1f3   :  { %v12624_v9 = vpop.f32.mrb[22].mxu1  ;;  %v15026_v8 = vpop.f32.mrb[54].mxu0 }
 0x1f4   :  { %v784_v56 = vpack.c.bf16 %v12624_v9, %v12623_v17  ;;  %v729_v30 = vpop.f32.mrb[23].mxu1  ;;  %v15028_v36 = vpop.f32.mrb[55].mxu0 }
 0x1f5   :  { %v783_v15 = vpack.c.bf16 %v729_v30, %v726_v23  ;;  %v16996_v30 = vpack.c.bf16 %v14883_v28, %v14875_v44  ;;  %v16997_v44 = vpack.c.bf16 %v14923_v50, %v14911_v42 }
 0x1f6   :  { %12840 = vmatmul.mubr.msk.bf16.vlgmr.msra.gmra.mrb[128].mxu1 %vm563_vm2, %v14577_v38 }
 0x1f7   :  { %11646 = vmatpush3.bf16.msra.mxu1 %v16995_v48  ;;  %12843 = vmatprep.mubr.msk.bf16.mxu1 %vm563_vm2, %v14603_v55 }
 0x1f8   :  { %11647 = vmatprep.subr.bf16.mxu1 %v782_v31 }
 0x1f9   :  { %v12627_v0 = vpop.f32.mrb[24].mxu1  ;;  %v15041_v17 = vpop.f32.mrb[56].mxu0 }
 0x1fa   :  { %v742_v9 = vpop.f32.mrb[25].mxu1  ;;  %v15043_v11 = vpop.f32.mrb[57].mxu0 }
 0x1fb   :  { %11648 = vmatpush3.bf16.msra.mxu1 %v16996_v30  ;;  %v12628_v23 = vpop.f32.mrb[26].mxu1  ;;  %v15048_v38 = vpop.f32.mrb[58].mxu0 }
 0x1fc   :  { %v786_v39 = vpack.c.bf16 %v12628_v23, %v12627_v0  ;;  %11649 = vmatprep.subr.bf16.mxu1 %v783_v15  ;;  %v745_v26 = vpop.f32.mrb[27].mxu1  ;;  %v15050_v32 = vpop.f32.mrb[59].mxu0 }
 0x1fd   :  { %v785_v31 = vpack.c.bf16 %v745_v26, %v742_v9  ;;  %v16998_v9 = vpack.c.bf16 %v14915_v46, %v14907_v40  ;;  %v16999_v40 = vpack.c.bf16 %v14955_v2, %v14943_v60 }
 0x1fe   :  { %12844 = vmatmul.mubr.msk.bf16.gmra.mrb[132].mxu1 %vm563_vm2, %v14601_v54 }
 0x1ff   :  { %11650 = vmatpush3.bf16.msra.mxu1 %v16997_v44  ;;  %12847 = vmatprep.mubr.msk.bf16.mxu1 %vm563_vm2, %v14619_v5 }
 0x200   :  { %11651 = vmatprep.subr.bf16.mxu1 %v784_v56 }
 0x201   :  { %v12631_v28 = vpop.f32.mrb[28].mxu1  ;;  %v15063_v15 = vpop.f32.mrb[60].mxu0 }
 0x202   :  { %v758_v0 = vpop.f32.mrb[29].mxu1  ;;  %v15065_v30 = vpop.f32.mrb[61].mxu0 }
 0x203   :  { %11652 = vmatpush3.bf16.msra.mxu1 %v16998_v9  ;;  %v12632_v23 = vpop.f32.mrb[30].mxu1  ;;  %v15070_v54 = vpop.f32.mrb[62].mxu0  ;;  %v17001_v9 = vpack.c.bf16 %v14947_v62, %v14939_v58  ;;  %v17003_v62 = vpack.c.bf16 %v14987_v20, %v14975_v12  ;;  %v17006_v58 = vpack.c.bf16 %v14979_v14, %v14971_v10 }
 0x204   :  { %v788_v26 = vpack.c.bf16 %v12632_v23, %v12631_v28  ;;  %11653 = vmatprep.subr.bf16.mxu1 %v785_v31  ;;  %v761_v42 = vpop.f32.mrb[31].mxu1  ;;  %v15072_v50 = vpop.f32.mrb[63].mxu0 }
 0x205   :  { %v787_v56 = vpack.c.bf16 %v761_v42, %v758_v0 }
 0x206   :  { %12848 = vmatmul.mubr.msk.bf16.gmra.mrb[136].mxu1 %vm563_vm2, %v14617_v4 }
 0x207   :  { %11654 = vmatpush3.bf16.msra.mxu1 %v16999_v40  ;;  %12851 = vmatprep.mubr.msk.bf16.mxu1 %vm563_vm2, %v14635_v19 }
 0x208   :  { %11655 = vmatprep.subr.bf16.mxu1 %v786_v39 }
 0x209   :  { %v15085_v46 = vpop.f32.mrb[32].mxu1  ;;  %v15087_v31 = vpop.f32.mrb[64].mxu0 }
 0x20a   :  { %17000 = vst [vmem:[#allocation4_spill] sm:$0xff] %v15087_v31  ;;  %v15089_v28 = vpop.f32.mrb[33].mxu1  ;;  %v15091_v0 = vpop.f32.mrb[65].mxu0  ;;  %v14087_v31 = vld [vmem:[%s14845_s21 + $0x94] ss:$72 sps:$4 sm:$0xff]  }
 0x20b   :  { %11656 = vmatpush3.bf16.msra.mxu1 %v17001_v9  ;;  %v15096_v4 = vpop.f32.mrb[34].mxu1  ;;  %v15098_v60 = vpop.f32.mrb[66].mxu0 }
 0x20c   :  { %17002 = vst [vmem:[#allocation5_spill] sm:$0xff] %v15098_v60  ;;  %11657 = vmatprep.subr.bf16.mxu1 %v787_v56  ;;  %v15104_v39 = vpop.f32.mrb[35].mxu1  ;;  %v15106_v23 = vpop.f32.mrb[67].mxu0  ;;  %v17020_v60 = vpack.c.bf16 %v14893_v35, %v14881_v27  ;;  %v14089_v27 = vld [vmem:[%s14845_s21 + $0x90] ss:$72 sps:$4 sm:$0xff]   ;;  %v17023_v35 = vpack.c.bf16 %v14885_v29, %v14877_v24 }
 0x20e   :  { %12852 = vmatmul.mubr.msk.bf16.gmra.mrb[140].mxu1 %vm563_vm2, %v14633_v18 }
 0x20f   :  { %11658 = vmatpush3.bf16.msra.mxu1 %v17003_v62  ;;  %12855 = vmatprep.mubr.msk.bf16.mxu1 %vm563_vm2, %v14651_v34 }
 0x210   :  { %11659 = vmatprep.subr.bf16.mxu1 %v788_v26  ;;  %v17008_v26 = vpack.c.bf16 %v15009_v16, %v15005_v49 }
 0x211   :  { %v15119_v56 = vpop.f32.mrb[36].mxu1  ;;  %v15121_v40 = vpop.f32.mrb[68].mxu0 }
 0x212   :  { %17004 = vst [vmem:[#allocation6_spill] sm:$0xff] %v15121_v40  ;;  %v15123_v9 = vpop.f32.mrb[37].mxu1  ;;  %v15125_v2 = vpop.f32.mrb[69].mxu0 }
 0x213   :  { %17005 = vst [vmem:[#allocation7_spill] sm:$0xff] %v15125_v2  ;;  %11660 = vmatpush3.bf16.msra.mxu1 %v17006_v58  ;;  %v15130_v18 = vpop.f32.mrb[38].mxu1  ;;  %v15132_v12 = vpop.f32.mrb[70].mxu0 }
 0x214   :  { %17007 = vst [vmem:[#allocation8_spill] sm:$0xff] %v15132_v12  ;;  %11725 = vmatprep.subr.bf16.mxu1 %v17008_v26  ;;  %v15141_v62 = vpop.f32.mrb[39].mxu1  ;;  %v15143_v5 = vpop.f32.mrb[71].mxu0  ;;  %v14086_v12 = vld [vmem:[%s14845_s21 + $0x4] ss:$72 sps:$4 sm:$0xff]  }
 0x215   :  { %17009 = vst [vmem:[#allocation9_spill] sm:$0xff] %v15143_v5 }
 0x216   :  { %12856 = vmatmul.mubr.msk.bf16.gmra.mrb[144].mxu1 %vm563_vm2, %v14649_v33 }
 0x217   :  { %12859 = vmatprep.mubr.msk.bf16.mxu1 %vm563_vm2, %v14667_v52 }
 0x219   :  { %v15153_v58 = vpop.f32.mrb[40].mxu1  ;;  %v15155_v49 = vpop.f32.mrb[72].mxu0 }
 0x21a   :  { %17010 = vst [vmem:[#allocation10_spill] sm:$0xff] %v15155_v49  ;;  %v15157_v16 = vpop.f32.mrb[41].mxu1  ;;  %v15159_v26 = vpop.f32.mrb[73].mxu0 }
 0x21b   :  { %17011 = vst [vmem:[#allocation11_spill] sm:$0xff] %v15159_v26  ;;  %v15161_v20 = vpop.f32.mrb[42].mxu1  ;;  %v15163_v44 = vpop.f32.mrb[74].mxu0 }
 0x21c   :  { %17012 = vst [vmem:[#allocation12_spill] sm:$0xff] %v15163_v44  ;;  %v15169_v55 = vpop.f32.mrb[43].mxu1  ;;  %v15171_v52 = vpop.f32.mrb[75].mxu0 }
 0x21d   :  { %17013 = vst [vmem:[#allocation13_spill] sm:$0xff] %v15171_v52 }
 0x21e   :  { %12860 = vmatmul.mubr.msk.bf16.gmra.mrb[148].mxu1 %vm563_vm2, %v14665_v51 }
 0x21f   :  { %12863 = vmatprep.mubr.msk.bf16.mxu1 %vm563_vm2, %v14683_v6 }
 0x221   :  { %v15181_v14 = vpop.f32.mrb[44].mxu1  ;;  %v15183_v10 = vpop.f32.mrb[76].mxu0 }
 0x222   :  { %17014 = vst [vmem:[#allocation14_spill] sm:$0xff] %v15183_v10  ;;  %v15185_v33 = vpop.f32.mrb[45].mxu1  ;;  %v15187_v19 = vpop.f32.mrb[77].mxu0 }
 0x223   :  { %17015 = vst [vmem:[#allocation15_spill] sm:$0xff] %v15187_v19  ;;  %v15189_v42 = vpop.f32.mrb[46].mxu1  ;;  %v15191_v48 = vpop.f32.mrb[78].mxu0 }
 0x224   :  { %17016 = vst [vmem:[#allocation16_spill] sm:$0xff] %v15191_v48  ;;  %v15197_v6 = vpop.f32.mrb[47].mxu1  ;;  %v15199_v49 = vpop.f32.mrb[79].mxu0 }
 0x225   :  { %17017 = vst [vmem:[#allocation17_spill] sm:$0xff] %v15199_v49  ;;  %v17018_v49 = vpack.c.bf16 %v15104_v39, %v15089_v28  ;;  %v17019_v28 = vpack.c.bf16 %v15096_v4, %v15085_v46  ;;  %v17022_v46 = vpack.c.bf16 %v15141_v62, %v15123_v9 }
 0x226   :  { %12864 = vmatmul.mubr.msk.bf16.gmra.mrb[152].mxu1 %vm563_vm2, %v14681_v3 }
 0x227   :  { %12867 = vmatprep.mubr.msk.bf16.mxu1 %vm563_vm2, %v14699_v22 }
 0x229   :  { %v12653_v34 = vpop.f32.mrb[48].mxu1  ;;  %v15209_v52 = vpop.f32.mrb[80].mxu0 }
 0x22a   :  { %v896_v51 = vpop.f32.mrb[49].mxu1  ;;  %v15211_v10 = vpop.f32.mrb[81].mxu0 }
 0x22b   :  { %v12654_v48 = vpop.f32.mrb[50].mxu1  ;;  %v15213_v40 = vpop.f32.mrb[82].mxu0 }
 0x22c   :  { %v968_v44 = vpack.c.bf16 %v12654_v48, %v12653_v34  ;;  %v899_v2 = vpop.f32.mrb[51].mxu1  ;;  %v15216_v26 = vpop.f32.mrb[83].mxu0 }
 0x22d   :  { %v967_v19 = vpack.c.bf16 %v899_v2, %v896_v51  ;;  %v14084_v2 = vld [vmem:[%s14845_s21] ss:$72 sps:$4 sm:$0xff]  }
 0x22e   :  { %12868 = vmatmul.mubr.msk.bf16.gmra.mrb[156].mxu1 %vm563_vm2, %v14697_v21  ;;  %v17021_v21 = vpack.c.bf16 %v15007_v57, %v15003_v1 }
 0x22f   :  { %11685 = vmatprep.subr.bf16.mxu0 %v967_v19  ;;  %2748 = vmatprep.mubr.bf16.mxu1 %v14086_v12 }
 0x230   :  { %11686 = vmatpush3.bf16.msra.mxu0 %v17018_v49 }
 0x231   :  { %v12657_v48 = vpop.f32.mrb[52].mxu1  ;;  %v15227_v34 = vpop.f32.mrb[84].mxu0  ;;  %11687 = vmatprep.subr.bf16.mxu0 %v968_v44 }
 0x232   :  { %v912_v5 = vpop.f32.mrb[53].mxu1  ;;  %v15229_v3 = vpop.f32.mrb[85].mxu0 }
 0x233   :  { %v12658_v51 = vpop.f32.mrb[54].mxu1  ;;  %v15232_v22 = vpop.f32.mrb[86].mxu0 }
 0x234   :  { %v915_v19 = vpop.f32.mrb[55].mxu1  ;;  %v15236_v12 = vpop.f32.mrb[87].mxu0  ;;  %11688 = vmatpush3.bf16.msra.mxu0 %v17019_v28  ;;  %v970_v39 = vpack.c.bf16 %v12658_v51, %v12657_v48 }
 0x235   :  { %v1527_v44 = vpack.c.bf16 %v15236_v12, %v15229_v3  ;;  %v969_v49 = vpack.c.bf16 %v915_v19, %v912_v5  ;;  %v17052_v3 = vpack.c.bf16 %v15232_v22, %v15227_v34  ;;  %v14105_v34 = vld [vmem:[%s14845_s21 + $0x1c4] ss:$72 sps:$4 sm:$0xff]  }
 0x236   :  { %2749 = vmatmul.mubr.bf16.vlgmr.msra.gmra.mrb[160].mxu1 %v14084_v2 }
 0x237   :  { %11726 = vmatpush3.bf16.msra.mxu1 %v17020_v60  ;;  %11689 = vmatprep.subr.bf16.mxu0 %v969_v49  ;;  %v17024_v60 = vpack.c.bf16 %v15028_v36, %v15024_v37  ;;  %v17026_v36 = vpack.c.bf16 %v14925_v53, %v14913_v45  ;;  %v17027_v37 = vpack.c.bf16 %v15026_v8, %v15022_v43  ;;  %v14092_v45 = vld [vmem:[%s14845_s21 + $0x120] ss:$72 sps:$4 sm:$0xff]  }
 0x238   :  { %11727 = vmatprep.subr.bf16.mxu1 %v17021_v21  ;;  %11690 = vmatpush3.bf16.msra.mxu0 %v17022_v46  ;;  %v14090_v21 = vld [vmem:[%s14845_s21 + $0x124] ss:$72 sps:$4 sm:$0xff]   ;;  %v17029_v53 = vpack.c.bf16 %v14917_v47, %v14909_v41 }
 0x239   :  { %v12661_v4 = vpop.f32.mrb[56].mxu1  ;;  %v15253_v48 = vpop.f32.mrb[88].mxu0  ;;  %11691 = vmatprep.subr.bf16.mxu0 %v970_v39  ;;  %2756 = vmatprep.mubr.bf16.mxu1 %v14087_v31  ;;  %v17025_v31 = vpack.c.bf16 %v15130_v18, %v15119_v56  ;;  %v17028_v56 = vpack.c.bf16 %v15169_v55, %v15157_v16  ;;  %v17030_v55 = vpack.c.bf16 %v15050_v32, %v15043_v11 }
 0x23a   :  { %v928_v5 = vpop.f32.mrb[57].mxu1  ;;  %v15255_v2 = vpop.f32.mrb[89].mxu0  ;;  %v17032_v11 = vpack.c.bf16 %v14957_v7, %v14945_v61  ;;  %v17033_v32 = vpack.c.bf16 %v15048_v38, %v15041_v17  ;;  %v14095_v7 = vld [vmem:[%s14845_s21 + $0x1b0] ss:$72 sps:$4 sm:$0xff]   ;;  %v17035_v17 = vpack.c.bf16 %v14949_v63, %v14941_v59  ;;  %v17037_v59 = vpack.c.bf16 %v15189_v42, %v15181_v14 }
 0x23b   :  { %11728 = vmatpush3.bf16.msra.mxu1 %v17023_v35  ;;  %v12662_v57 = vpop.f32.mrb[58].mxu1  ;;  %v15261_v1 = vpop.f32.mrb[90].mxu0  ;;  %v14108_v63 = vld [vmem:[%s14845_s21 + $0x8] ss:$72 sps:$4 sm:$0xff]  }
 0x23c   :  { %11729 = vmatprep.subr.bf16.mxu1 %v17024_v60  ;;  %v931_v9 = vpop.f32.mrb[59].mxu1  ;;  %v15266_v62 = vpop.f32.mrb[91].mxu0  ;;  %11692 = vmatpush3.bf16.msra.mxu0 %v17025_v31  ;;  %v972_v51 = vpack.c.bf16 %v12662_v57, %v12661_v4  ;;  %v1530_v24 = vpack.c.bf16 %v15261_v1, %v15253_v48  ;;  %v17031_v4 = vpack.c.bf16 %v15161_v20, %v15153_v58 }
 0x23d   :  { %v971_v29 = vpack.c.bf16 %v931_v9, %v928_v5  ;;  %v1529_v19 = vpack.c.bf16 %v15266_v62, %v15255_v2  ;;  %v17034_v20 = vpack.c.bf16 %v15197_v6, %v15185_v33  ;;  %v14098_v6 = vld [vmem:[%s14845_s21 + $0x14] ss:$72 sps:$4 sm:$0xff]  }
 0x23e   :  { %2757 = vmatmul.mubr.bf16.gmra.mrb[164].mxu1 %v14089_v27  ;;  %v14093_v27 = vld [vmem:[%s14845_s21 + $0x1b4] ss:$72 sps:$4 sm:$0xff]  }
 0x23f   :  { %11730 = vmatpush3.bf16.msra.mxu1 %v17026_v36  ;;  %11693 = vmatprep.subr.bf16.mxu0 %v971_v29 }
 0x240   :  { %11731 = vmatprep.subr.bf16.mxu1 %v17027_v37  ;;  %11694 = vmatpush3.bf16.msra.mxu0 %v17028_v56  ;;  %v14114_v56 = vld [vmem:[%s14845_s21 + $0x9c] ss:$72 sps:$4 sm:$0xff]  }
 0x241   :  { %v12665_v18 = vpop.f32.mrb[60].mxu1  ;;  %v15285_v28 = vpop.f32.mrb[92].mxu0  ;;  %11695 = vmatprep.subr.bf16.mxu0 %v972_v51  ;;  %2764 = vmatprep.mubr.bf16.mxu1 %v14090_v21  ;;  %v17036_v51 = vpack.c.bf16 %v15072_v50, %v15065_v30  ;;  %v17038_v30 = vpack.c.bf16 %v14989_v25, %v14977_v13  ;;  %v17039_v50 = vpack.c.bf16 %v15070_v54, %v15063_v15  ;;  %v17040_v13 = vld [vmem:[#allocation3_spill] sm:$0xff]  ;;  %v17041_v25 = vld [vmem:[#allocation2_spill] sm:$0xff] }
 0x242   :  { %v944_v39 = vpop.f32.mrb[61].mxu1  ;;  %v15287_v49 = vpop.f32.mrb[93].mxu0  ;;  %v14099_v54 = vld [vmem:[%s14845_s21 + $0xa4] ss:$72 sps:$4 sm:$0xff]  }
 0x243   :  { %11732 = vmatpush3.bf16.msra.mxu1 %v17029_v53  ;;  %v12666_v8 = vpop.f32.mrb[62].mxu1  ;;  %v15293_v43 = vpop.f32.mrb[94].mxu0  ;;  %v17042_v53 = vpack.c.bf16 %v17040_v13, %v17041_v25  ;;  %v14119_v25 = vld [vmem:[%s14845_s21 + $0x128] ss:$72 sps:$4 sm:$0xff]  }
 0x244   :  { %11733 = vmatprep.subr.bf16.mxu1 %v17030_v55  ;;  %v947_v16 = vpop.f32.mrb[63].mxu1  ;;  %v15298_v46 = vpop.f32.mrb[95].mxu0  ;;  %11696 = vmatpush3.bf16.msra.mxu0 %v17031_v4  ;;  %v974_v5 = vpack.c.bf16 %v12666_v8, %v12665_v18  ;;  %v1532_v41 = vpack.c.bf16 %v15293_v43, %v15285_v28  ;;  %v17043_v4 = vpack.c.bf16 %v15216_v26, %v15211_v10 }
 0x245   :  { %v973_v47 = vpack.c.bf16 %v947_v16, %v944_v39  ;;  %v1531_v35 = vpack.c.bf16 %v15298_v46, %v15287_v49  ;;  %v17045_v10 = vpack.c.bf16 %v15213_v40, %v15209_v52  ;;  %v14102_v52 = vld [vmem:[%s14845_s21 + $0x134] ss:$72 sps:$4 sm:$0xff]  }
 0x246   :  { %2765 = vmatmul.mubr.bf16.gmra.mrb[168].mxu1 %v14092_v45  ;;  %v14096_v45 = vld [vmem:[%s14845_s21 + $0x10] ss:$72 sps:$4 sm:$0xff]  }
 0x247   :  { %11734 = vmatpush3.bf16.msra.mxu1 %v17032_v11  ;;  %11697 = vmatprep.subr.bf16.mxu0 %v973_v47 }
 0x248   :  { %11735 = vmatprep.subr.bf16.mxu1 %v17033_v32  ;;  %11698 = vmatpush3.bf16.msra.mxu0 %v17034_v20  ;;  %v14117_v20 = vld [vmem:[%s14845_s21 + $0x12c] ss:$72 sps:$4 sm:$0xff]  }
 0x249   :  { %v15317_v58 = vpop.f32.mrb[64].mxu1  ;;  %v15319_v57 = vpop.f32.mrb[96].mxu0  ;;  %11699 = vmatprep.subr.bf16.mxu0 %v974_v5  ;;  %2772 = vmatprep.mubr.bf16.mxu1 %v14093_v27  ;;  %v14116_v27 = vld [vmem:[%s14845_s21 + $0x98] ss:$72 sps:$4 sm:$0xff]  }
 0x24a   :  { %v15321_v60 = vpop.f32.mrb[65].mxu1  ;;  %v15323_v61 = vpop.f32.mrb[97].mxu0 }
 0x24b   :  { %11736 = vmatpush3.bf16.msra.mxu1 %v17035_v17  ;;  %v15329_v38 = vpop.f32.mrb[66].mxu1  ;;  %v15331_v33 = vpop.f32.mrb[98].mxu0 }
 0x24c   :  { %v1332_v9 = vpack.c.bf16 %v15329_v38, %v15317_v58  ;;  %v1890_v31 = vpack.c.bf16 %v15331_v33, %v15319_v57  ;;  %11737 = vmatprep.subr.bf16.mxu1 %v17036_v51  ;;  %v15341_v29 = vpop.f32.mrb[67].mxu1  ;;  %v15343_v21 = vpop.f32.mrb[99].mxu0  ;;  %11700 = vmatpush3.bf16.msra.mxu0 %v17037_v59  ;;  %v14101_v59 = vld [vmem:[%s14845_s21 + $0xa0] ss:$72 sps:$4 sm:$0xff]  }
 0x24d   :  { %v1331_v36 = vpack.c.bf16 %v15341_v29, %v15321_v60  ;;  %v1889_v37 = vpack.c.bf16 %v15343_v21, %v15323_v61 }
 0x24e   :  { %2773 = vmatmul.mubr.bf16.gmra.mrb[172].mxu1 %v14095_v7  ;;  %v17044_v7 = vpack.c.bf16 %v15106_v23, %v15091_v0  ;;  %v17046_v0 = vld [vmem:[#allocation5_spill] sm:$0xff]  ;;  %v17047_v23 = vld [vmem:[#allocation4_spill] sm:$0xff] }
 0x24f   :  { %11738 = vmatpush3.bf16.msra.mxu1 %v17038_v30  ;;  %2878 = vmatprep.mubr.bf16.mxu1 %v14098_v6  ;;  %v17060_v30 = vld [vmem:[#allocation10_spill] sm:$0xff] }
 0x250   :  { %11739 = vmatprep.subr.bf16.mxu1 %v17039_v50  ;;  %2814 = vmatmul.mubr.bf16.vlgmr.msra.gmra.mrb[160].mxu0 %v14108_v63  ;;  %v17048_v63 = vpack.c.bf16 %v17046_v0, %v17047_v23  ;;  %v14104_v0 = vld [vmem:[%s14845_s21 + $0x130] ss:$72 sps:$4 sm:$0xff]  }
 0x251   :  { %v15360_v42 = vpop.f32.mrb[68].mxu1  ;;  %v15362_v14 = vpop.f32.mrb[100].mxu0  ;;  %2821 = vmatprep.mubr.bf16.mxu0 %v14114_v56  ;;  %v17053_v23 = vld [vmem:[#allocation8_spill] sm:$0xff] }
 0x252   :  { %v15364_v18 = vpop.f32.mrb[69].mxu1  ;;  %v15366_v39 = vpop.f32.mrb[101].mxu0 }
 0x253   :  { %11740 = vmatpush3.bf16.msra.mxu1 %v17042_v53  ;;  %v15372_v8 = vpop.f32.mrb[70].mxu1  ;;  %v15374_v15 = vpop.f32.mrb[102].mxu0  ;;  %v17063_v53 = vld [vmem:[#allocation15_spill] sm:$0xff] }
 0x254   :  { %v1334_v55 = vpack.c.bf16 %v15372_v8, %v15360_v42  ;;  %11805 = vmatprep.subr.bf16.mxu1 %v17043_v4  ;;  %v15384_v5 = vpop.f32.mrb[71].mxu1  ;;  %v15386_v47 = vpop.f32.mrb[103].mxu0  ;;  %v14120_v4 = vld [vmem:[%s14845_s21 + $0x1bc] ss:$72 sps:$4 sm:$0xff]  }
 0x255   :  { %v1333_v11 = vpack.c.bf16 %v15384_v5, %v15364_v18  ;;  %v17068_v57 = vpack.c.bf16 %v15386_v47, %v15366_v39 }
 0x256   :  { %2879 = vmatmul.mubr.bf16.vlgmr.msra.gmra.mrb[176].mxu1 %v14096_v45 }
 0x257   :  { %11806 = vmatpush3.bf16.msra.mxu1 %v17044_v7  ;;  %2886 = vmatprep.mubr.bf16.mxu1 %v14099_v54  ;;  %v14107_v54 = vld [vmem:[%s14845_s21 + $0x1c0] ss:$72 sps:$4 sm:$0xff]  }
 0x258   :  { %11807 = vmatprep.subr.bf16.mxu1 %v17045_v10  ;;  %2822 = vmatmul.mubr.bf16.gmra.mrb[164].mxu0 %v14116_v27  ;;  %v17049_v27 = vld [vmem:[#allocation9_spill] sm:$0xff] }
 0x259   :  { %v15400_v26 = vpop.f32.mrb[72].mxu1  ;;  %v15402_v17 = vpop.f32.mrb[104].mxu0  ;;  %2829 = vmatprep.mubr.bf16.mxu0 %v14117_v20  ;;  %v17050_v20 = vld [vmem:[#allocation7_spill] sm:$0xff] }
 0x25a   :  { %v15404_v6 = vpop.f32.mrb[73].mxu1  ;;  %v15406_v51 = vpop.f32.mrb[105].mxu0  ;;  %v17051_v7 = vpack.c.bf16 %v17049_v27, %v17050_v20 }
 0x25b   :  { %11808 = vmatpush3.bf16.msra.mxu1 %v17048_v63  ;;  %v15412_v56 = vpop.f32.mrb[74].mxu1  ;;  %v15414_v40 = vpop.f32.mrb[106].mxu0  ;;  %v17054_v63 = vld [vmem:[#allocation6_spill] sm:$0xff] }
 0x25c   :  { %11809 = vmatprep.subr.bf16.mxu1 %v1527_v44  ;;  %v15424_v45 = vpop.f32.mrb[75].mxu1  ;;  %v15426_v13 = vpop.f32.mrb[107].mxu0 }
 0x25d   :  { %v17069_v33 = vpack.c.bf16 %v15424_v45, %v15404_v6  ;;  %v17071_v6 = vpack.c.bf16 %v15412_v56, %v15400_v26 }
 0x25e   :  { %2887 = vmatmul.mubr.bf16.gmra.mrb[180].mxu1 %v14101_v59 }
 0x25f   :  { %11810 = vmatpush3.bf16.msra.mxu1 %v17051_v7  ;;  %2894 = vmatprep.mubr.bf16.mxu1 %v14102_v52  ;;  %v17055_v52 = vpack.c.bf16 %v17053_v23, %v17054_v63  ;;  %v17059_v63 = vld [vmem:[#allocation12_spill] sm:$0xff] }
 0x260   :  { %11811 = vmatprep.subr.bf16.mxu1 %v17052_v3  ;;  %2830 = vmatmul.mubr.bf16.gmra.mrb[168].mxu0 %v14119_v25  ;;  %v14122_v3 = vld [vmem:[%s14845_s21 + $0x1b8] ss:$72 sps:$4 sm:$0xff]  }
 0x261   :  { %v15440_v12 = vpop.f32.mrb[76].mxu1  ;;  %v15442_v44 = vpop.f32.mrb[108].mxu0  ;;  %2837 = vmatprep.mubr.bf16.mxu0 %v14120_v4  ;;  %v17056_v25 = vld [vmem:[#allocation13_spill] sm:$0xff]  ;;  %v17057_v4 = vld [vmem:[#allocation11_spill] sm:$0xff] }
 0x262   :  { %v15444_v10 = vpop.f32.mrb[77].mxu1  ;;  %v15446_v59 = vpop.f32.mrb[109].mxu0  ;;  %v17058_v50 = vpack.c.bf16 %v17056_v25, %v17057_v4 }
 0x263   :  { %11812 = vmatpush3.bf16.msra.mxu1 %v17055_v52  ;;  %v15452_v27 = vpop.f32.mrb[78].mxu1  ;;  %v15454_v22 = vpop.f32.mrb[110].mxu0  ;;  %v14125_v52 = vld [vmem:[%s14845_s21 + $0x1c] ss:$72 sps:$4 sm:$0xff]  }
 0x264   :  { %11813 = vmatprep.subr.bf16.mxu1 %v1529_v19  ;;  %v15464_v20 = vpop.f32.mrb[79].mxu1  ;;  %v15466_v7 = vpop.f32.mrb[111].mxu0 }
 0x266   :  { %2895 = vmatmul.mubr.bf16.gmra.mrb[184].mxu1 %v14104_v0  ;;  %v17061_v0 = vpack.c.bf16 %v17059_v63, %v17060_v30  ;;  %v14111_v30 = vld [vmem:[%s14845_s21 + $0x20] ss:$72 sps:$4 sm:$0xff]  }
 0x267   :  { %11814 = vmatpush3.bf16.msra.mxu1 %v17058_v50  ;;  %2902 = vmatprep.mubr.bf16.mxu1 %v14105_v34 }
 0x268   :  { %11815 = vmatprep.subr.bf16.mxu1 %v1530_v24  ;;  %2838 = vmatmul.mubr.bf16.gmra.mrb[172].mxu0 %v14122_v3  ;;  %v14113_v3 = vld [vmem:[%s14845_s21 + $0x24] ss:$72 sps:$4 sm:$0xff]  }
 0x269   :  { %v12721_v2 = vpop.f32.mrb[80].mxu1  ;;  %v12823_v62 = vpop.f32.mrb[112].mxu0  ;;  %2943 = vmatprep.mubr.bf16.mxu0 %v14125_v52  ;;  %v17062_v52 = vld [vmem:[#allocation17_spill] sm:$0xff] }
 0x26a   :  { %v1268_v19 = vpop.f32.mrb[81].mxu1  ;;  %v1826_v23 = vpop.f32.mrb[113].mxu0  ;;  %v17064_v32 = vpack.c.bf16 %v17062_v52, %v17063_v53  ;;  %v17066_v53 = vld [vmem:[#allocation14_spill] sm:$0xff] }
 0x26b   :  { %11816 = vmatpush3.bf16.msra.mxu1 %v17061_v0  ;;  %v12722_v16 = vpop.f32.mrb[82].mxu1  ;;  %v12824_v25 = vpop.f32.mrb[114].mxu0 }
 0x26c   :  { %11817 = vmatprep.subr.bf16.mxu1 %v1531_v35  ;;  %v1271_v48 = vpop.f32.mrb[83].mxu1  ;;  %v1829_v1 = vpop.f32.mrb[115].mxu0  ;;  %v1340_v24 = vpack.c.bf16 %v12722_v16, %v12721_v2  ;;  %v1898_v50 = vpack.c.bf16 %v12824_v25, %v12823_v62  ;;  %v14126_v2 = vld [vmem:[%s14845_s21 + $0xb4] ss:$72 sps:$4 sm:$0xff]  }
 0x26d   :  { %v1339_v34 = vpack.c.bf16 %v1271_v48, %v1268_v19  ;;  %v1897_v4 = vpack.c.bf16 %v1829_v1, %v1826_v23  ;;  %v14128_v19 = vld [vmem:[%s14845_s21 + $0xb0] ss:$72 sps:$4 sm:$0xff]   ;;  %v14132_v48 = vld [vmem:[%s14845_s21 + $0x144] ss:$72 sps:$4 sm:$0xff]   ;;  %v14134_v1 = vld [vmem:[%s14845_s21 + $0x140] ss:$72 sps:$4 sm:$0xff]  }
 0x26e   :  { %2903 = vmatmul.mubr.bf16.gmra.mrb[188].mxu1 %v14107_v54  ;;  %v17065_v54 = vld [vmem:[#allocation16_spill] sm:$0xff] }
 0x26f   :  { %11818 = vmatpush3.bf16.msra.mxu1 %v17064_v32  ;;  %11765 = vmatprep.subr.bf16.mxu0 %v1339_v34  ;;  %v17067_v32 = vpack.c.bf16 %v17065_v54, %v17066_v53 }
 0x270   :  { %11819 = vmatprep.subr.bf16.mxu1 %v1532_v41  ;;  %11766 = vmatpush3.bf16.msra.mxu0 %v1331_v36 }
 0x271   :  { %v12725_v49 = vpop.f32.mrb[84].mxu1  ;;  %v12827_v46 = vpop.f32.mrb[116].mxu0  ;;  %11767 = vmatprep.subr.bf16.mxu0 %v1340_v24  ;;  %3008 = vmatprep.mubr.bf16.mxu1 %v14113_v3  ;;  %v17070_v24 = vpack.c.bf16 %v15374_v15, %v15362_v14  ;;  %v17072_v14 = vpack.c.bf16 %v15426_v13, %v15406_v51  ;;  %v17073_v15 = vpack.c.bf16 %v15464_v20, %v15444_v10  ;;  %v14140_v51 = vld [vmem:[%s14845_s21 + $0x1d0] ss:$72 sps:$4 sm:$0xff]  }
 0x272   :  { %v1284_v35 = vpop.f32.mrb[85].mxu1  ;;  %v1842_v16 = vpop.f32.mrb[117].mxu0  ;;  %v17074_v13 = vpack.c.bf16 %v15414_v40, %v15402_v17  ;;  %v14123_v20 = vld [vmem:[%s14845_s21 + $0x18] ss:$72 sps:$4 sm:$0xff]   ;;  %v17075_v17 = vpack.c.bf16 %v15452_v27, %v15440_v12  ;;  %v14129_v40 = vld [vmem:[%s14845_s21 + $0xac] ss:$72 sps:$4 sm:$0xff]  }
 0x273   :  { %11820 = vmatpush3.bf16.msra.mxu1 %v17067_v32  ;;  %v12726_v23 = vpop.f32.mrb[86].mxu1  ;;  %v12828_v63 = vpop.f32.mrb[118].mxu0 }
 0x274   :  { %11885 = vmatprep.subr.bf16.mxu1 %v1897_v4  ;;  %v1287_v28 = vpop.f32.mrb[87].mxu1  ;;  %v1845_v43 = vpop.f32.mrb[119].mxu0  ;;  %11768 = vmatpush3.bf16.msra.mxu0 %v1332_v9  ;;  %v1342_v41 = vpack.c.bf16 %v12726_v23, %v12725_v49  ;;  %v1900_v60 = vpack.c.bf16 %v12828_v63, %v12827_v46  ;;  %v14138_v49 = vld [vmem:[%s14845_s21 + $0x1d4] ss:$72 sps:$4 sm:$0xff]  }
 0x275   :  { %v1341_v29 = vpack.c.bf16 %v1287_v28, %v1284_v35  ;;  %v1899_v36 = vpack.c.bf16 %v1845_v43, %v1842_v16  ;;  %v14146_v28 = vld [vmem:[%s14845_s21 + $0x34] ss:$72 sps:$4 sm:$0xff]   ;;  %v17076_v43 = vpack.c.bf16 %v15466_v7, %v15446_v59 }
 0x276   :  { %3009 = vmatmul.mubr.bf16.vlgmr.msra.gmra.mrb[192].mxu1 %v14111_v30 }
 0x277   :  { %11886 = vmatpush3.bf16.msra.mxu1 %v1889_v37  ;;  %11769 = vmatprep.subr.bf16.mxu0 %v1341_v29  ;;  %v14144_v29 = vld [vmem:[%s14845_s21 + $0x30] ss:$72 sps:$4 sm:$0xff]  }
 0x278   :  { %11887 = vmatprep.subr.bf16.mxu1 %v1898_v50  ;;  %11770 = vmatpush3.bf16.msra.mxu0 %v1333_v11 }
 0x279   :  { %v12729_v62 = vpop.f32.mrb[88].mxu1  ;;  %v12831_v58 = vpop.f32.mrb[120].mxu0  ;;  %11771 = vmatprep.subr.bf16.mxu0 %v1342_v41  ;;  %3016 = vmatprep.mubr.bf16.mxu1 %v14126_v2  ;;  %v14131_v2 = vld [vmem:[%s14845_s21 + $0xa8] ss:$72 sps:$4 sm:$0xff]  }
 0x27a   :  { %v1300_v38 = vpop.f32.mrb[89].mxu1  ;;  %v1858_v9 = vpop.f32.mrb[121].mxu0 }
 0x27b   :  { %11888 = vmatpush3.bf16.msra.mxu1 %v1890_v31  ;;  %v12730_v61 = vpop.f32.mrb[90].mxu1  ;;  %v12832_v21 = vpop.f32.mrb[122].mxu0 }
 0x27c   :  { %11889 = vmatprep.subr.bf16.mxu1 %v1899_v36  ;;  %v1303_v37 = vpop.f32.mrb[91].mxu1  ;;  %v1861_v0 = vpop.f32.mrb[123].mxu0  ;;  %11772 = vmatpush3.bf16.msra.mxu0 %v1334_v55  ;;  %v1344_v18 = vpack.c.bf16 %v12730_v61, %v12729_v62  ;;  %v1902_v5 = vpack.c.bf16 %v12832_v21, %v12831_v58  ;;  %v17077_v36 = vpack.c.bf16 %v15454_v22, %v15442_v44  ;;  %v14153_v62 = vld [vmem:[%s14845_s21 + $0xc4] ss:$72 sps:$4 sm:$0xff]  }
 0x27d   :  { %v1343_v11 = vpack.c.bf16 %v1303_v37, %v1300_v38  ;;  %v1901_v25 = vpack.c.bf16 %v1861_v0, %v1858_v9  ;;  %v14135_v44 = vld [vmem:[%s14845_s21 + $0x13c] ss:$72 sps:$4 sm:$0xff]  }
 0x27e   :  { %3017 = vmatmul.mubr.bf16.gmra.mrb[196].mxu1 %v14128_v19 }
 0x27f   :  { %11890 = vmatpush3.bf16.msra.mxu1 %v17068_v57  ;;  %11773 = vmatprep.subr.bf16.mxu0 %v1343_v11  ;;  %v14159_v57 = vld [vmem:[%s14845_s21 + $0x154] ss:$72 sps:$4 sm:$0xff]  }
 0x280   :  { %11891 = vmatprep.subr.bf16.mxu1 %v1900_v60  ;;  %11774 = vmatpush3.bf16.msra.mxu0 %v17069_v33 }
 0x281   :  { %v12733_v31 = vpop.f32.mrb[92].mxu1  ;;  %v12835_v42 = vpop.f32.mrb[124].mxu0  ;;  %11775 = vmatprep.subr.bf16.mxu0 %v1344_v18  ;;  %3024 = vmatprep.mubr.bf16.mxu1 %v14132_v48  ;;  %v14137_v48 = vld [vmem:[%s14845_s21 + $0x138] ss:$72 sps:$4 sm:$0xff]  }
 0x282   :  { %v1316_v8 = vpop.f32.mrb[93].mxu1  ;;  %v1874_v55 = vpop.f32.mrb[125].mxu0 }
 0x283   :  { %11892 = vmatpush3.bf16.msra.mxu1 %v17070_v24  ;;  %v12734_v39 = vpop.f32.mrb[94].mxu1  ;;  %v12836_v47 = vpop.f32.mrb[126].mxu0 }
 0x284   :  { %11893 = vmatprep.subr.bf16.mxu1 %v1901_v25  ;;  %v1319_v50 = vpop.f32.mrb[95].mxu1  ;;  %v1877_v34 = vpop.f32.mrb[127].mxu0  ;;  %11776 = vmatpush3.bf16.msra.mxu0 %v17071_v6  ;;  %v1346_v45 = vpack.c.bf16 %v12734_v39, %v12733_v31  ;;  %v1904_v4 = vpack.c.bf16 %v12836_v47, %v12835_v42  ;;  %v14161_v6 = vld [vmem:[%s14845_s21 + $0x150] ss:$72 sps:$4 sm:$0xff]  }
 0x285   :  { %v1345_v3 = vpack.c.bf16 %v1319_v50, %v1316_v8  ;;  %v1903_v52 = vpack.c.bf16 %v1877_v34, %v1874_v55  ;;  %v14141_v55 = vld [vmem:[%s14845_s21 + $0x1cc] ss:$72 sps:$4 sm:$0xff]  }
 0x286   :  { %3025 = vmatmul.mubr.bf16.gmra.mrb[200].mxu1 %v14134_v1 }
 0x287   :  { %11894 = vmatpush3.bf16.msra.mxu1 %v17072_v14  ;;  %11777 = vmatprep.subr.bf16.mxu0 %v1345_v3  ;;  %v14143_v3 = vld [vmem:[%s14845_s21 + $0x1c8] ss:$72 sps:$4 sm:$0xff]  }
 0x288   :  { %11895 = vmatprep.subr.bf16.mxu1 %v1902_v5  ;;  %11778 = vmatpush3.bf16.msra.mxu0 %v17073_v15  ;;  %v14155_v5 = vld [vmem:[%s14845_s21 + $0xc0] ss:$72 sps:$4 sm:$0xff]  }
 0x289   :  { %v15539_v26 = vpop.f32.mrb[96].mxu1  ;;  %v15541_v56 = vpop.f32.mrb[128].mxu0  ;;  %11779 = vmatprep.subr.bf16.mxu0 %v1346_v45  ;;  %3032 = vmatprep.mubr.bf16.mxu1 %v14138_v49  ;;  %v14170_v49 = vld [vmem:[%s14845_s21 + $0x44] ss:$72 sps:$4 sm:$0xff]  }
 0x28a   :  { %v15543_v46 = vpop.f32.mrb[97].mxu1  ;;  %v15545_v35 = vpop.f32.mrb[129].mxu0 }
 0x28b   :  { %11896 = vmatpush3.bf16.msra.mxu1 %v17074_v13  ;;  %v15551_v16 = vpop.f32.mrb[98].mxu1  ;;  %v15553_v10 = vpop.f32.mrb[130].mxu0  ;;  %v14149_v13 = vld [vmem:[%s14845_s21 + $0x2c] ss:$72 sps:$4 sm:$0xff]  }
 0x28c   :  { %v1704_v30 = vpack.c.bf16 %v15551_v16, %v15539_v26  ;;  %v2262_v54 = vpack.c.bf16 %v15553_v10, %v15541_v56  ;;  %11897 = vmatprep.subr.bf16.mxu1 %v1903_v52  ;;  %v15560_v53 = vpop.f32.mrb[99].mxu1  ;;  %v15562_v32 = vpop.f32.mrb[131].mxu0  ;;  %11780 = vmatpush3.bf16.msra.mxu0 %v17075_v17  ;;  %v14165_v52 = vld [vmem:[%s14845_s21 + $0x1e4] ss:$72 sps:$4 sm:$0xff]  }
 0x28d   :  { %v1703_v23 = vpack.c.bf16 %v15560_v53, %v15543_v46  ;;  %v2261_v63 = vpack.c.bf16 %v15562_v32, %v15545_v35 }
 0x28e   :  { %3033 = vmatmul.mubr.bf16.gmra.mrb[204].mxu1 %v14140_v51 }
 0x28f   :  { %11898 = vmatpush3.bf16.msra.mxu1 %v17076_v43  ;;  %2944 = vmatmul.mubr.bf16.vlgmr.msra.gmra.mrb[176].mxu0 %v14123_v20 }
 0x290   :  { %11899 = vmatprep.subr.bf16.mxu1 %v1904_v4  ;;  %2951 = vmatprep.mubr.bf16.mxu0 %v14129_v40 }
 0x291   :  { %v15576_v12 = vpop.f32.mrb[100].mxu1  ;;  %v15578_v27 = vpop.f32.mrb[132].mxu0  ;;  %3138 = vmatprep.mubr.bf16.mxu1 %v14146_v28 }
 0x292   :  { %v15580_v41 = vpop.f32.mrb[101].mxu1  ;;  %v15582_v60 = vpop.f32.mrb[133].mxu0 }
 0x293   :  { %11900 = vmatpush3.bf16.msra.mxu1 %v17077_v36  ;;  %v15588_v59 = vpop.f32.mrb[102].mxu1  ;;  %v15590_v7 = vpop.f32.mrb[134].mxu0  ;;  %v14167_v36 = vld [vmem:[%s14845_s21 + $0x1e0] ss:$72 sps:$4 sm:$0xff]  }
 0x294   :  { %v1706_v58 = vpack.c.bf16 %v15588_v59, %v15576_v12  ;;  %v2264_v38 = vpack.c.bf16 %v15590_v7, %v15578_v27  ;;  %v15598_v9 = vpop.f32.mrb[103].mxu1  ;;  %v15600_v19 = vpop.f32.mrb[135].mxu0 }
 0x295   :  { %v1705_v22 = vpack.c.bf16 %v15598_v9, %v15580_v41  ;;  %v2263_v61 = vpack.c.bf16 %v15600_v19, %v15582_v60 }
 0x296   :  { %3139 = vmatmul.mubr.bf16.vlgmr.msra.gmra.mrb[208].mxu1 %v14144_v29 }
 0x297   :  { %2952 = vmatmul.mubr.bf16.gmra.mrb[180].mxu0 %v14131_v2  ;;  %3146 = vmatprep.mubr.bf16.mxu1 %v14153_v62 }
 0x298   :  { %2959 = vmatprep.mubr.bf16.mxu0 %v14135_v44 }
 0x299   :  { %v15607_v21 = vpop.f32.mrb[104].mxu1  ;;  %v15609_v37 = vpop.f32.mrb[136].mxu0 }
 0x29a   :  { %v15611_v0 = vpop.f32.mrb[105].mxu1  ;;  %v15613_v18 = vpop.f32.mrb[137].mxu0 }
 0x29b   :  { %v15616_v11 = vpop.f32.mrb[106].mxu1  ;;  %v15618_v25 = vpop.f32.mrb[138].mxu0 }
 0x29c   :  { %v1708_v33 = vpack.c.bf16 %v15616_v11, %v15607_v21  ;;  %v2266_v31 = vpack.c.bf16 %v15618_v25, %v15609_v37  ;;  %v15626_v42 = vpop.f32.mrb[107].mxu1  ;;  %v15628_v8 = vpop.f32.mrb[139].mxu0  ;;  %v14147_v25 = vld [vmem:[%s14845_s21 + $0x28] ss:$72 sps:$4 sm:$0xff]  }
 0x29d   :  { %v1707_v1 = vpack.c.bf16 %v15626_v42, %v15611_v0  ;;  %v2265_v24 = vpack.c.bf16 %v15628_v8, %v15613_v18 }
 0x29e   :  { %3147 = vmatmul.mubr.bf16.gmra.mrb[212].mxu1 %v14155_v5 }
 0x29f   :  { %2960 = vmatmul.mubr.bf16.gmra.mrb[184].mxu0 %v14137_v48  ;;  %3154 = vmatprep.mubr.bf16.mxu1 %v14159_v57 }
 0x2a0   :  { %2967 = vmatprep.mubr.bf16.mxu0 %v14141_v55 }
 0x2a1   :  { %v15635_v39 = vpop.f32.mrb[108].mxu1  ;;  %v15637_v47 = vpop.f32.mrb[140].mxu0 }
 0x2a2   :  { %v15639_v50 = vpop.f32.mrb[109].mxu1  ;;  %v15641_v34 = vpop.f32.mrb[141].mxu0 }
 0x2a3   :  { %v15644_v45 = vpop.f32.mrb[110].mxu1  ;;  %v15646_v4 = vpop.f32.mrb[142].mxu0 }
 0x2a4   :  { %v15654_v15 = vpop.f32.mrb[111].mxu1  ;;  %v15656_v51 = vpop.f32.mrb[143].mxu0 }
 0x2a5   :  { %v1709_v20 = vpack.c.bf16 %v15654_v15, %v15639_v50  ;;  %v2267_v17 = vpack.c.bf16 %v15656_v51, %v15641_v34  ;;  %v14150_v50 = vld [vmem:[%s14845_s21 + $0xbc] ss:$72 sps:$4 sm:$0xff]  }
 0x2a6   :  { %3155 = vmatmul.mubr.bf16.gmra.mrb[216].mxu1 %v14161_v6  ;;  %v14174_v34 = vld [vmem:[%s14845_s21 + $0xd4] ss:$72 sps:$4 sm:$0xff]  }
 0x2a7   :  { %2968 = vmatmul.mubr.bf16.gmra.mrb[188].mxu0 %v14143_v3  ;;  %3162 = vmatprep.mubr.bf16.mxu1 %v14165_v52 }
 0x2a8   :  { %3073 = vmatprep.mubr.bf16.mxu0 %v14149_v13 }
 0x2a9   :  { %v12789_v40 = vpop.f32.mrb[112].mxu1  ;;  %v12891_v28 = vpop.f32.mrb[144].mxu0 }
 0x2aa   :  { %v1640_v43 = vpop.f32.mrb[113].mxu1  ;;  %v2198_v29 = vpop.f32.mrb[145].mxu0 }
 0x2ab   :  { %v12790_v2 = vpop.f32.mrb[114].mxu1  ;;  %v12892_v62 = vpop.f32.mrb[146].mxu0 }
 0x2ac   :  { %v2270_v44 = vpack.c.bf16 %v12892_v62, %v12891_v28  ;;  %v1643_v5 = vpop.f32.mrb[115].mxu1  ;;  %v2201_v48 = vpop.f32.mrb[147].mxu0  ;;  %v1712_v57 = vpack.c.bf16 %v12790_v2, %v12789_v40 }
 0x2ad   :  { %v2269_v55 = vpack.c.bf16 %v2201_v48, %v2198_v29  ;;  %v1711_v14 = vpack.c.bf16 %v1643_v5, %v1640_v43  ;;  %v14158_v48 = vld [vmem:[%s14845_s21 + $0x148] ss:$72 sps:$4 sm:$0xff]  }
 0x2ae   :  { %3163 = vmatmul.mubr.bf16.gmra.mrb[220].mxu1 %v14167_v36  ;;  %v14180_v36 = vld [vmem:[%s14845_s21 + $0x164] ss:$72 sps:$4 sm:$0xff]  }
 0x2af   :  { %11845 = vmatprep.subr.bf16.mxu0 %v1711_v14  ;;  %11965 = vmatprep.subr.bf16.mxu1 %v2269_v55 }
 0x2b0   :  { %11846 = vmatpush3.bf16.msra.mxu0 %v1703_v23  ;;  %11966 = vmatpush3.bf16.msra.mxu1 %v2261_v63 }
 0x2b1   :  { %v12793_v6 = vpop.f32.mrb[116].mxu1  ;;  %v12895_v3 = vpop.f32.mrb[148].mxu0  ;;  %11847 = vmatprep.subr.bf16.mxu0 %v1712_v57  ;;  %11967 = vmatprep.subr.bf16.mxu1 %v2270_v44  ;;  %v14184_v57 = vld [vmem:[%s14845_s21 + $0x160] ss:$72 sps:$4 sm:$0xff]  }
 0x2b2   :  { %v1656_v52 = vpop.f32.mrb[117].mxu1  ;;  %v2214_v13 = vpop.f32.mrb[149].mxu0  ;;  %3268 = vmatprep.mubr.bf16.mxu1 %v14170_v49 }
 0x2b3   :  { %v12794_v40 = vpop.f32.mrb[118].mxu1  ;;  %v12896_v28 = vpop.f32.mrb[150].mxu0 }
 0x2b4   :  { %v2272_v43 = vpack.c.bf16 %v12896_v28, %v12895_v3  ;;  %v1659_v14 = vpop.f32.mrb[119].mxu1  ;;  %v2217_v29 = vpop.f32.mrb[151].mxu0  ;;  %11848 = vmatpush3.bf16.msra.mxu0 %v1704_v30  ;;  %11968 = vmatpush3.bf16.msra.mxu1 %v2262_v54  ;;  %v1714_v46 = vpack.c.bf16 %v12794_v40, %v12793_v6  ;;  %v14162_v3 = vld [vmem:[%s14845_s21 + $0x1dc] ss:$72 sps:$4 sm:$0xff]  }
 0x2b5   :  { %v2271_v35 = vpack.c.bf16 %v2217_v29, %v2214_v13  ;;  %v1713_v53 = vpack.c.bf16 %v1659_v14, %v1656_v52  ;;  %v14186_v52 = vld [vmem:[%s14845_s21 + $0x1f4] ss:$72 sps:$4 sm:$0xff]   ;;  %v14164_v14 = vld [vmem:[%s14845_s21 + $0x1d8] ss:$72 sps:$4 sm:$0xff]  }
 0x2b6   :  { %v14190_v29 = vld [vmem:[%s14845_s21 + $0x1f0] ss:$72 sps:$4 sm:$0xff]  }
 0x2b7   :  { %11849 = vmatprep.subr.bf16.mxu0 %v1713_v53  ;;  %11969 = vmatprep.subr.bf16.mxu1 %v2271_v35  ;;  %v14173_v53 = vld [vmem:[%s14845_s21 + $0x3c] ss:$72 sps:$4 sm:$0xff]  }
 0x2b8   :  { %11850 = vmatpush3.bf16.msra.mxu0 %v1705_v22  ;;  %11970 = vmatpush3.bf16.msra.mxu1 %v2263_v61 }
 0x2b9   :  { %v12797_v32 = vpop.f32.mrb[120].mxu1  ;;  %v12899_v26 = vpop.f32.mrb[152].mxu0  ;;  %11851 = vmatprep.subr.bf16.mxu0 %v1714_v46  ;;  %11971 = vmatprep.subr.bf16.mxu1 %v2272_v43 }
 0x2ba   :  { %v1672_v16 = vpop.f32.mrb[121].mxu1  ;;  %v2230_v56 = vpop.f32.mrb[153].mxu0 }
 0x2bb   :  { %v12798_v10 = vpop.f32.mrb[122].mxu1  ;;  %v12900_v30 = vpop.f32.mrb[154].mxu0 }
 0x2bc   :  { %v2274_v54 = vpack.c.bf16 %v12900_v30, %v12899_v26  ;;  %v1675_v23 = vpop.f32.mrb[123].mxu1  ;;  %v2233_v63 = vpop.f32.mrb[155].mxu0  ;;  %11852 = vmatpush3.bf16.msra.mxu0 %v1706_v58  ;;  %11972 = vmatpush3.bf16.msra.mxu1 %v2264_v38  ;;  %v1716_v41 = vpack.c.bf16 %v12798_v10, %v12797_v32 }
 0x2bd   :  { %v2273_v60 = vpack.c.bf16 %v2233_v63, %v2230_v56  ;;  %v1715_v9 = vpack.c.bf16 %v1675_v23, %v1672_v16 }
 0x2bf   :  { %11853 = vmatprep.subr.bf16.mxu0 %v1715_v9  ;;  %11973 = vmatprep.subr.bf16.mxu1 %v2273_v60 }
 0x2c0   :  { %11854 = vmatpush3.bf16.msra.mxu0 %v1707_v1  ;;  %11974 = vmatpush3.bf16.msra.mxu1 %v2265_v24  ;;  %v17078_v1 = vpack.c.bf16 %v15644_v45, %v15635_v39  ;;  %v17079_v24 = vpack.c.bf16 %v15646_v4, %v15637_v47  ;;  %v14152_v39 = vld [vmem:[%s14845_s21 + $0xb8] ss:$72 sps:$4 sm:$0xff]  }
 0x2c1   :  { %v12801_v19 = vpop.f32.mrb[124].mxu1  ;;  %v12903_v12 = vpop.f32.mrb[156].mxu0  ;;  %11855 = vmatprep.subr.bf16.mxu0 %v1716_v41  ;;  %11975 = vmatprep.subr.bf16.mxu1 %v2274_v54  ;;  %v14178_v45 = vld [vmem:[%s14845_s21 + $0xd0] ss:$72 sps:$4 sm:$0xff]  }
 0x2c2   :  { %v1688_v59 = vpop.f32.mrb[125].mxu1  ;;  %v2246_v27 = vpop.f32.mrb[157].mxu0 }
 0x2c3   :  { %v12802_v7 = vpop.f32.mrb[126].mxu1  ;;  %v12904_v58 = vpop.f32.mrb[158].mxu0 }
 0x2c4   :  { %v2276_v38 = vpack.c.bf16 %v12904_v58, %v12903_v12  ;;  %v1691_v22 = vpop.f32.mrb[127].mxu1  ;;  %v2249_v61 = vpop.f32.mrb[159].mxu0  ;;  %11856 = vmatpush3.bf16.msra.mxu0 %v1708_v33  ;;  %11976 = vmatpush3.bf16.msra.mxu1 %v2266_v31  ;;  %v1718_v0 = vpack.c.bf16 %v12802_v7, %v12801_v19  ;;  %v14168_v33 = vld [vmem:[%s14845_s21 + $0x40] ss:$72 sps:$4 sm:$0xff]  }
 0x2c5   :  { %v2275_v18 = vpack.c.bf16 %v2249_v61, %v2246_v27  ;;  %v1717_v42 = vpack.c.bf16 %v1691_v22, %v1688_v59 }
 0x2c7   :  { %11857 = vmatprep.subr.bf16.mxu0 %v1717_v42  ;;  %11977 = vmatprep.subr.bf16.mxu1 %v2275_v18 }
 0x2c8   :  { %11858 = vmatpush3.bf16.msra.mxu0 %v1709_v20  ;;  %11978 = vmatpush3.bf16.msra.mxu1 %v2267_v17  ;;  %v14156_v17 = vld [vmem:[%s14845_s21 + $0x14c] ss:$72 sps:$4 sm:$0xff]  }
 0x2c9   :  { %v15707_v21 = vpop.f32.mrb[128].mxu1  ;;  %11859 = vmatprep.subr.bf16.mxu0 %v1718_v0  ;;  %11979 = vmatprep.subr.bf16.mxu1 %v2276_v38 }
 0x2ca   :  { %v1948_v37 = vpop.f32.mrb[129].mxu1 }
 0x2cb   :  { %v15709_v11 = vpop.f32.mrb[130].mxu1 }
 0x2cc   :  { %v2076_v31 = vpack.c.bf16 %v15709_v11, %v15707_v21  ;;  %v1951_v8 = vpop.f32.mrb[131].mxu1  ;;  %11860 = vmatpush3.bf16.msra.mxu0 %v17078_v1  ;;  %11980 = vmatpush3.bf16.msra.mxu1 %v17079_v24 }
 0x2cd   :  { %v2075_v49 = vpack.c.bf16 %v1951_v8, %v1948_v37  ;;  %v14176_v8 = vld [vmem:[%s14845_s21 + $0xcc] ss:$72 sps:$4 sm:$0xff]  }
 0x2cf   :  { %3074 = vmatmul.mubr.bf16.vlgmr.msra.gmra.mrb[192].mxu0 %v14147_v25  ;;  %3269 = vmatmul.mubr.bf16.vlgmr.msra.gmra.mrb[224].mxu1 %v14168_v33  ;;  %v14171_v25 = vld [vmem:[%s14845_s21 + $0x38] ss:$72 sps:$4 sm:$0xff]  }
 0x2d0   :  { %3081 = vmatprep.mubr.bf16.mxu0 %v14150_v50  ;;  %3276 = vmatprep.mubr.bf16.mxu1 %v14174_v34 }
 0x2d1   :  { %v15723_v15 = vpop.f32.mrb[132].mxu1 }
 0x2d2   :  { %v1964_v51 = vpop.f32.mrb[133].mxu1 }
 0x2d3   :  { %v12846_v20 = vpop.f32.mrb[134].mxu1 }
 0x2d4   :  { %v2078_v47 = vpack.c.bf16 %v12846_v20, %v15723_v15  ;;  %v1967_v4 = vpop.f32.mrb[135].mxu1  ;;  %v14182_v20 = vld [vmem:[%s14845_s21 + $0x15c] ss:$72 sps:$4 sm:$0xff]  }
 0x2d5   :  { %v2077_v2 = vpack.c.bf16 %v1967_v4, %v1964_v51 }
 0x2d7   :  { %3082 = vmatmul.mubr.bf16.gmra.mrb[196].mxu0 %v14152_v39  ;;  %3277 = vmatmul.mubr.bf16.gmra.mrb[228].mxu1 %v14178_v45 }
 0x2d8   :  { %3089 = vmatprep.mubr.bf16.mxu0 %v14156_v17  ;;  %3284 = vmatprep.mubr.bf16.mxu1 %v14180_v36  ;;  %v14185_v17 = vld [vmem:[%s14845_s21 + $0x158] ss:$72 sps:$4 sm:$0xff]  }
 0x2d9   :  { %v12849_v62 = vpop.f32.mrb[136].mxu1 }
 0x2da   :  { %v1980_v44 = vpop.f32.mrb[137].mxu1 }
 0x2db   :  { %v12850_v5 = vpop.f32.mrb[138].mxu1 }
 0x2dc   :  { %v2080_v55 = vpack.c.bf16 %v12850_v5, %v12849_v62  ;;  %v1983_v6 = vpop.f32.mrb[139].mxu1  ;;  %v14188_v62 = vld [vmem:[%s14845_s21 + $0x1ec] ss:$72 sps:$4 sm:$0xff]  }
 0x2dd   :  { %v2079_v13 = vpack.c.bf16 %v1983_v6, %v1980_v44  ;;  %v14191_v6 = vld [vmem:[%s14845_s21 + $0x1e8] ss:$72 sps:$4 sm:$0xff]  }
 0x2df   :  { %3090 = vmatmul.mubr.bf16.gmra.mrb[200].mxu0 %v14158_v48  ;;  %3285 = vmatmul.mubr.bf16.gmra.mrb[232].mxu1 %v14184_v57  ;;  %v15749_v48 = vld [vmem:[%s10308_s25] ss:$0 sm:$0xff]  ;;  %s10336_s25 = sld [smem:[%s16976_s0 + %s14499_s22]]  }
 0x2e0   :  { %3097 = vmatprep.mubr.bf16.mxu0 %v14162_v3  ;;  %3292 = vmatprep.mubr.bf16.mxu1 %v14186_v52 }
 0x2e1   :  { %v12853_v40 = vpop.f32.mrb[140].mxu1 }
 0x2e2   :  { %v1996_v28 = vpop.f32.mrb[141].mxu1 }
 0x2e3   :  { %v12854_v43 = vpop.f32.mrb[142].mxu1 }
 0x2e4   :  { %v2082_v46 = vpack.c.bf16 %v12854_v43, %v12853_v40  ;;  %v1999_v35 = vpop.f32.mrb[143].mxu1 }
 0x2e5   :  { %v2081_v32 = vpack.c.bf16 %v1999_v35, %v1996_v28 }
 0x2e7   :  { %3098 = vmatmul.mubr.bf16.gmra.mrb[204].mxu0 %v14164_v14  ;;  %3293 = vmatmul.mubr.bf16.gmra.mrb[236].mxu1 %v14190_v29 }
 0x2e8   :  { %3203 = vmatprep.mubr.bf16.mxu0 %v14173_v53 }
 0x2e9   :  { %v12857_v26 = vpop.f32.mrb[144].mxu1 }
 0x2ea   :  { %v2012_v16 = vpop.f32.mrb[145].mxu1 }
 0x2eb   :  { %v12858_v56 = vpop.f32.mrb[146].mxu1 }
 0x2ec   :  { %v2084_v10 = vpack.c.bf16 %v12858_v56, %v12857_v26  ;;  %v2015_v30 = vpop.f32.mrb[147].mxu1 }
 0x2ed   :  { %v2083_v54 = vpack.c.bf16 %v2015_v30, %v2012_v16 }
 0x2ef   :  { %11925 = vmatprep.subr.bf16.mxu0 %v2083_v54 }
 0x2f0   :  { %11926 = vmatpush3.bf16.msra.mxu0 %v2075_v49  ;;  %v14179_v49 = vld [vmem:[%s14845_s21 + $0xc8] ss:$72 sps:$4 sm:$0xff]   ;;  %s10319_s21 = sld [smem:[%s16976_s0 + %s14498_s18]]   ;;  %s14513_s18 = smov 35  }
 0x2f1   :  { %v12861_v23 = vpop.f32.mrb[148].mxu1  ;;  %11927 = vmatprep.subr.bf16.mxu0 %v2084_v10 }
 0x2f2   :  { %v2028_v63 = vpop.f32.mrb[149].mxu1 }
 0x2f3   :  { %v12862_v41 = vpop.f32.mrb[150].mxu1 }
 0x2f4   :  { %v2086_v60 = vpack.c.bf16 %v12862_v41, %v12861_v23  ;;  %v2031_v9 = vpop.f32.mrb[151].mxu1  ;;  %11928 = vmatpush3.bf16.msra.mxu0 %v2076_v31 }
 0x2f5   :  { %v2085_v19 = vpack.c.bf16 %v2031_v9, %v2028_v63 }
 0x2f7   :  { %11929 = vmatprep.subr.bf16.mxu0 %v2085_v19 }
 0x2f8   :  { %11930 = vmatpush3.bf16.msra.mxu0 %v2077_v2 }
 0x2f9   :  { %v12865_v12 = vpop.f32.mrb[152].mxu1  ;;  %11931 = vmatprep.subr.bf16.mxu0 %v2086_v60 }
 0x2fa   :  { %v2044_v59 = vpop.f32.mrb[153].mxu1 }
 0x2fb   :  { %v12866_v27 = vpop.f32.mrb[154].mxu1 }
 0x2fc   :  { %v2088_v7 = vpack.c.bf16 %v12866_v27, %v12865_v12  ;;  %v2047_v58 = vpop.f32.mrb[155].mxu1  ;;  %11932 = vmatpush3.bf16.msra.mxu0 %v2078_v47 }
 0x2fd   :  { %v2087_v38 = vpack.c.bf16 %v2047_v58, %v2044_v59 }
 0x2ff   :  { %11933 = vmatprep.subr.bf16.mxu0 %v2087_v38 }
 0x300   :  { %11934 = vmatpush3.bf16.msra.mxu0 %v2079_v13 }
 0x301   :  { %v12869_v22 = vpop.f32.mrb[156].mxu1  ;;  %11935 = vmatprep.subr.bf16.mxu0 %v2088_v7 }
 0x302   :  { %v2060_v61 = vpop.f32.mrb[157].mxu1 }
 0x303   :  { %v12870_v0 = vpop.f32.mrb[158].mxu1 }
 0x304   :  { %v2090_v18 = vpack.c.bf16 %v12870_v0, %v12869_v22  ;;  %v2063_v42 = vpop.f32.mrb[159].mxu1  ;;  %11936 = vmatpush3.bf16.msra.mxu0 %v2080_v55 }
 0x305   :  { %v2089_v21 = vpack.c.bf16 %v2063_v42, %v2060_v61 }
 0x307   :  { %11937 = vmatprep.subr.bf16.mxu0 %v2089_v21 }
 0x308   :  { %11938 = vmatpush3.bf16.msra.mxu0 %v2081_v32 }
 0x309   :  { %11939 = vmatprep.subr.bf16.mxu0 %v2090_v18  ;;  %v11661_v37 = vpop.f32.mrb[160].mxu1 }
 0x30a   :  { %v11662_v11 = vpop.f32.mrb[161].mxu1 }
 0x30b   :  { %v11663_v33 = vadd.f32 %v11662_v11, %v11661_v37  ;;  %v11664_v31 = vpop.f32.mrb[162].mxu1 }
 0x30c   :  { %11940 = vmatpush3.bf16.msra.mxu0 %v2082_v46  ;;  %v11665_v1 = vpop.f32.mrb[163].mxu1 }
 0x30d   :  { %v11666_v24 = vadd.f32 %v11665_v1, %v11664_v31  ;;  %v2751_v40 = vadd.f32 %v11663_v33, %v15749_v48 }
 0x30f   :  { %3204 = vmatmul.mubr.bf16.vlgmr.msra.gmra.mrb[208].mxu0 %v14171_v25  ;;  %v2754_v35 = vadd.f32 %v11666_v24, %v15749_v48 }
 0x310   :  { %3211 = vmatprep.mubr.bf16.mxu0 %v14176_v8 }
 0x311   :  { %v11667_v50 = vpop.f32.mrb[164].mxu1 }
 0x312   :  { %v11668_v34 = vpop.f32.mrb[165].mxu1 }
 0x313   :  { %v11669_v15 = vadd.f32 %v11668_v34, %v11667_v50  ;;  %v11670_v51 = vpop.f32.mrb[166].mxu1 }
 0x314   :  { %v11671_v39 = vpop.f32.mrb[167].mxu1 }
 0x315   :  { %v11672_v45 = vadd.f32 %v11671_v39, %v11670_v51  ;;  %v2759_v63 = vadd.f32 %v11669_v15, %v15749_v48 }
 0x317   :  { %3212 = vmatmul.mubr.bf16.gmra.mrb[212].mxu0 %v14179_v49  ;;  %v2762_v27 = vadd.f32 %v11672_v45, %v15749_v48 }
 0x318   :  { %3219 = vmatprep.mubr.bf16.mxu0 %v14182_v20 }
 0x319   :  { %v11673_v47 = vpop.f32.mrb[168].mxu1 }
 0x31a   :  { %v11674_v4 = vpop.f32.mrb[169].mxu1 }
 0x31b   :  { %v11675_v36 = vadd.f32 %v11674_v4, %v11673_v47  ;;  %v11676_v2 = vpop.f32.mrb[170].mxu1 }
 0x31c   :  { %v11677_v44 = vpop.f32.mrb[171].mxu1 }
 0x31d   :  { %v11678_v5 = vadd.f32 %v11677_v44, %v11676_v2  ;;  %v2767_v42 = vadd.f32 %v11675_v36, %v15749_v48 }
 0x31f   :  { %3220 = vmatmul.mubr.bf16.gmra.mrb[216].mxu0 %v14185_v17  ;;  %v2770_v31 = vadd.f32 %v11678_v5, %v15749_v48 }
 0x320   :  { %3227 = vmatprep.mubr.bf16.mxu0 %v14188_v62 }
 0x321   :  { %v11679_v57 = vpop.f32.mrb[172].mxu1 }
 0x322   :  { %v11680_v55 = vpop.f32.mrb[173].mxu1 }
 0x323   :  { %v11681_v3 = vadd.f32 %v11680_v55, %v11679_v57  ;;  %v11682_v52 = vpop.f32.mrb[174].mxu1  ;;  %v11701_v13 = vpop.f32.mrb[160].mxu0 }
 0x324   :  { %v11683_v28 = vpop.f32.mrb[175].mxu1  ;;  %v11702_v43 = vpop.f32.mrb[161].mxu0 }
 0x325   :  { %v11684_v14 = vadd.f32 %v11683_v28, %v11682_v52  ;;  %v11703_v29 = vadd.f32 %v11702_v43, %v11701_v13  ;;  %v11704_v46 = vpop.f32.mrb[162].mxu0  ;;  %v2775_v47 = vadd.f32 %v11681_v3, %v15749_v48 }
 0x326   :  { %v11705_v53 = vpop.f32.mrb[163].mxu0 }
 0x327   :  { %3228 = vmatmul.mubr.bf16.gmra.mrb[220].mxu0 %v14191_v6  ;;  %v2816_v32 = vadd.f32 %v11703_v29, %v2751_v40  ;;  %v11706_v26 = vadd.f32 %v11705_v53, %v11704_v46  ;;  %v2778_v44 = vadd.f32 %v11684_v14, %v15749_v48 }
 0x329   :  { %v11741_v16 = vpop.f32.mrb[176].mxu1  ;;  %v2819_v56 = vadd.f32 %v11706_v26, %v2754_v35 }
 0x32a   :  { %v11742_v10 = vpop.f32.mrb[177].mxu1 }
 0x32b   :  { %v11743_v30 = vadd.f32 %v11742_v10, %v11741_v16  ;;  %v11707_v54 = vpop.f32.mrb[164].mxu0  ;;  %v11744_v23 = vpop.f32.mrb[178].mxu1 }
 0x32c   :  { %v11708_v41 = vpop.f32.mrb[165].mxu0  ;;  %v11745_v60 = vpop.f32.mrb[179].mxu1 }
 0x32d   :  { %v15755_v9 = vadd.f32 %v11743_v30, %v2816_v32  ;;  %v11709_v19 = vadd.f32 %v11708_v41, %v11707_v54  ;;  %v11746_v12 = vadd.f32 %v11745_v60, %v11744_v23  ;;  %v11710_v59 = vpop.f32.mrb[166].mxu0 }
 0x32e   :  { %v11711_v7 = vpop.f32.mrb[167].mxu0 }
 0x32f   :  { %v2824_v58 = vadd.f32 %v11709_v19, %v2759_v63  ;;  %v15758_v38 = vadd.f32 %v11746_v12, %v2819_v56  ;;  %v11712_v22 = vadd.f32 %v11711_v7, %v11710_v59 }
 0x331   :  { %v11747_v61 = vpop.f32.mrb[180].mxu1  ;;  %v2827_v0 = vadd.f32 %v11712_v22, %v2762_v27 }
 0x332   :  { %v11748_v18 = vpop.f32.mrb[181].mxu1 }
 0x333   :  { %v11749_v21 = vadd.f32 %v11748_v18, %v11747_v61  ;;  %v11713_v37 = vpop.f32.mrb[168].mxu0  ;;  %v11750_v11 = vpop.f32.mrb[182].mxu1 }
 0x334   :  { %v11714_v25 = vpop.f32.mrb[169].mxu0  ;;  %v11751_v33 = vpop.f32.mrb[183].mxu1 }
 0x335   :  { %v15762_v8 = vadd.f32 %v11749_v21, %v2824_v58  ;;  %v11715_v1 = vadd.f32 %v11714_v25, %v11713_v37  ;;  %v11752_v24 = vadd.f32 %v11751_v33, %v11750_v11  ;;  %v11716_v50 = vpop.f32.mrb[170].mxu0 }
 0x336   :  { %v11717_v34 = vpop.f32.mrb[171].mxu0 }
 0x337   :  { %v2832_v49 = vadd.f32 %v11715_v1, %v2767_v42  ;;  %v15764_v15 = vadd.f32 %v11752_v24, %v2827_v0  ;;  %v11718_v51 = vadd.f32 %v11717_v34, %v11716_v50 }
 0x339   :  { %v11753_v20 = vpop.f32.mrb[184].mxu1  ;;  %v2835_v39 = vadd.f32 %v11718_v51, %v2770_v31 }
 0x33a   :  { %v11754_v45 = vpop.f32.mrb[185].mxu1 }
 0x33b   :  { %v11755_v4 = vadd.f32 %v11754_v45, %v11753_v20  ;;  %v11719_v17 = vpop.f32.mrb[172].mxu0  ;;  %v11756_v36 = vpop.f32.mrb[186].mxu1 }
 0x33c   :  { %v11720_v2 = vpop.f32.mrb[173].mxu0  ;;  %v11757_v62 = vpop.f32.mrb[187].mxu1 }
 0x33d   :  { %v15768_v5 = vadd.f32 %v11755_v4, %v2832_v49  ;;  %v11721_v57 = vadd.f32 %v11720_v2, %v11719_v17  ;;  %v11758_v55 = vadd.f32 %v11757_v62, %v11756_v36  ;;  %v11722_v6 = vpop.f32.mrb[174].mxu0 }
 0x33e   :  { %v11723_v52 = vpop.f32.mrb[175].mxu0 }
 0x33f   :  { %v2840_v13 = vadd.f32 %v11721_v57, %v2775_v47  ;;  %v15770_v40 = vadd.f32 %v11758_v55, %v2835_v39  ;;  %v11724_v28 = vadd.f32 %v11723_v52, %v11722_v6 }
 0x341   :  { %v11759_v43 = vpop.f32.mrb[188].mxu1  ;;  %v2843_v29 = vadd.f32 %v11724_v28, %v2778_v44 }
 0x342   :  { %v11760_v3 = vpop.f32.mrb[189].mxu1 }
 0x343   :  { %v11761_v46 = vadd.f32 %v11760_v3, %v11759_v43  ;;  %v11762_v35 = vpop.f32.mrb[190].mxu1 }
 0x344   :  { %v11763_v53 = vpop.f32.mrb[191].mxu1 }
 0x345   :  { %v15772_v32 = vadd.f32 %v11761_v46, %v2840_v13  ;;  %v11764_v26 = vadd.f32 %v11763_v53, %v11762_v35 }
 0x347   :  { %v15774_v48 = vadd.f32 %v11764_v26, %v2843_v29 }
 0x349   :  { %v11821_v14 = vpop.f32.mrb[192].mxu1 }
 0x34a   :  { %v11822_v16 = vpop.f32.mrb[193].mxu1 }
 0x34b   :  { %v11823_v56 = vadd.f32 %v11822_v16, %v11821_v14  ;;  %v11824_v10 = vpop.f32.mrb[194].mxu1  ;;  %v14192_v16 = vld [vmem:[%s15791_s29] sm:$0xff]  }
 0x34c   :  { %v11825_v30 = vpop.f32.mrb[195].mxu1  ;;  %12905 = vmatprep.subr.bf16.mxu0 %v14192_v16 }
 0x34d   :  { %v11826_v54 = vadd.f32 %v11825_v30, %v11824_v10  ;;  %12906 = vmatpush3.bf16.msra.mxu0 %v14192_v16 }
 0x351   :  { %v11827_v23 = vpop.f32.mrb[196].mxu1 }
 0x352   :  { %v11828_v63 = vpop.f32.mrb[197].mxu1 }
 0x353   :  { %v11829_v41 = vadd.f32 %v11828_v63, %v11827_v23  ;;  %v11830_v60 = vpop.f32.mrb[198].mxu1 }
 0x354   :  { %v11831_v19 = vpop.f32.mrb[199].mxu1 }
 0x355   :  { %v11832_v12 = vadd.f32 %v11831_v19, %v11830_v60 }
 0x359   :  { %v11833_v59 = vpop.f32.mrb[200].mxu1 }
 0x35a   :  { %v11834_v27 = vpop.f32.mrb[201].mxu1 }
 0x35b   :  { %v11835_v7 = vadd.f32 %v11834_v27, %v11833_v59  ;;  %v11836_v58 = vpop.f32.mrb[202].mxu1 }
 0x35c   :  { %v11837_v22 = vpop.f32.mrb[203].mxu1 }
 0x35d   :  { %v11838_v61 = vadd.f32 %v11837_v22, %v11836_v58 }
 0x361   :  { %v11839_v0 = vpop.f32.mrb[204].mxu1 }
 0x362   :  { %v11781_v18 = vpop.f32.mrb[176].mxu0  ;;  %v11840_v42 = vpop.f32.mrb[205].mxu1 }
 0x363   :  { %v11782_v21 = vpop.f32.mrb[177].mxu0  ;;  %v15776_v37 = vadd.f32 %v11840_v42, %v11839_v0  ;;  %v11842_v11 = vpop.f32.mrb[206].mxu1 }
 0x364   :  { %v11783_v25 = vadd.f32 %v11782_v21, %v11781_v18  ;;  %v11784_v33 = vpop.f32.mrb[178].mxu0  ;;  %v11843_v31 = vpop.f32.mrb[207].mxu1 }
 0x365   :  { %v11785_v1 = vpop.f32.mrb[179].mxu0  ;;  %v11844_v24 = vadd.f32 %v11843_v31, %v11842_v11 }
 0x366   :  { %v2946_v50 = vadd.f32 %v11783_v25, %v15755_v9  ;;  %v11786_v34 = vadd.f32 %v11785_v1, %v11784_v33 }
 0x368   :  { %v2949_v49 = vadd.f32 %v11786_v34, %v15758_v38  ;;  %v15780_v51 = vadd.f32 %v11823_v56, %v2946_v50  ;;  %v14193_v56 = vld [vmem:[%s15791_s29 + $0x10] sm:$0xff]   ;;  %v15827_v34 = vld [vmem:[%s15791_s29 + $0x8] sm:$0xff]  }
 0x369   :  { %v11901_v20 = vpop.f32.mrb[208].mxu1  ;;  %12925 = vmatprep.subr.bf16.mxu1 %v14193_v56  ;;  %12915 = vmatprep.subr.bf16.mxu0 %v15827_v34 }
 0x36a   :  { %v15782_v39 = vadd.f32 %v11826_v54, %v2949_v49  ;;  %v11787_v45 = vpop.f32.mrb[180].mxu0  ;;  %v11902_v47 = vpop.f32.mrb[209].mxu1  ;;  %12926 = vmatpush3.bf16.msra.mxu1 %v14193_v56  ;;  %v15830_v49 = vld [vmem:[%s15791_s29 + $0x20] sm:$0xff]  }
 0x36b   :  { %v11788_v4 = vpop.f32.mrb[181].mxu0  ;;  %v15784_v17 = vadd.f32 %v11902_v47, %v11901_v20  ;;  %v11904_v36 = vpop.f32.mrb[210].mxu1  ;;  %12945 = vmatprep.subr.bf16.mxu1 %v15830_v49 }
 0x36c   :  { %v11789_v2 = vadd.f32 %v11788_v4, %v11787_v45  ;;  %v11790_v62 = vpop.f32.mrb[182].mxu0  ;;  %v11905_v44 = vpop.f32.mrb[211].mxu1 }
 0x36d   :  { %v11791_v57 = vpop.f32.mrb[183].mxu0  ;;  %v15786_v55 = vadd.f32 %v11905_v44, %v11904_v36 }
 0x36e   :  { %v2954_v9 = vadd.f32 %v11789_v2, %v15762_v8  ;;  %v11792_v38 = vadd.f32 %v11791_v57, %v11790_v62 }
 0x370   :  { %v2957_v6 = vadd.f32 %v11792_v38, %v15764_v15  ;;  %v15795_v52 = vadd.f32 %v11829_v41, %v2954_v9 }
 0x371   :  { %v11907_v13 = vpop.f32.mrb[212].mxu1 }
 0x372   :  { %v15797_v28 = vadd.f32 %v11832_v12, %v2957_v6  ;;  %v11793_v43 = vpop.f32.mrb[184].mxu0  ;;  %v11908_v29 = vpop.f32.mrb[213].mxu1 }
 0x373   :  { %v11794_v3 = vpop.f32.mrb[185].mxu0  ;;  %v15799_v46 = vadd.f32 %v11908_v29, %v11907_v13  ;;  %v11910_v35 = vpop.f32.mrb[214].mxu1 }
 0x374   :  { %v11795_v53 = vadd.f32 %v11794_v3, %v11793_v43  ;;  %v11796_v26 = vpop.f32.mrb[186].mxu0  ;;  %v11911_v14 = vpop.f32.mrb[215].mxu1 }
 0x375   :  { %v11797_v8 = vpop.f32.mrb[187].mxu0  ;;  %v15803_v10 = vadd.f32 %v11911_v14, %v11910_v35 }
 0x376   :  { %v2962_v15 = vadd.f32 %v11795_v53, %v15768_v5  ;;  %v11798_v30 = vadd.f32 %v11797_v8, %v11796_v26 }
 0x378   :  { %v2965_v54 = vadd.f32 %v11798_v30, %v15770_v40  ;;  %v15807_v23 = vadd.f32 %v11835_v7, %v2962_v15 }
 0x379   :  { %v11913_v63 = vpop.f32.mrb[216].mxu1 }
 0x37a   :  { %v15809_v41 = vadd.f32 %v11838_v61, %v2965_v54  ;;  %v11799_v60 = vpop.f32.mrb[188].mxu0  ;;  %v11914_v19 = vpop.f32.mrb[217].mxu1 }
 0x37b   :  { %v11800_v12 = vpop.f32.mrb[189].mxu0  ;;  %v15811_v59 = vadd.f32 %v11914_v19, %v11913_v63  ;;  %v11916_v27 = vpop.f32.mrb[218].mxu1 }
 0x37c   :  { %v11801_v58 = vadd.f32 %v11800_v12, %v11799_v60  ;;  %v11802_v5 = vpop.f32.mrb[190].mxu0  ;;  %v11917_v22 = vpop.f32.mrb[219].mxu1 }
 0x37d   :  { %v11803_v0 = vpop.f32.mrb[191].mxu0  ;;  %v15813_v18 = vadd.f32 %v11917_v22, %v11916_v27 }
 0x37e   :  { %v2970_v40 = vadd.f32 %v11801_v58, %v15772_v32  ;;  %v11804_v7 = vadd.f32 %v11803_v0, %v11802_v5 }
 0x380   :  { %v2973_v61 = vadd.f32 %v11804_v7, %v15774_v48  ;;  %v15818_v42 = vadd.f32 %v15776_v37, %v2970_v40 }
 0x381   :  { %v11919_v21 = vpop.f32.mrb[220].mxu1 }
 0x382   :  { %v15820_v11 = vadd.f32 %v11844_v24, %v2973_v61  ;;  %v11920_v25 = vpop.f32.mrb[221].mxu1 }
 0x383   :  { %v15822_v33 = vadd.f32 %v11920_v25, %v11919_v21  ;;  %v11922_v31 = vpop.f32.mrb[222].mxu1 }
 0x384   :  { %v11923_v1 = vpop.f32.mrb[223].mxu1 }
 0x385   :  { %v15824_v50 = vadd.f32 %v11923_v1, %v11922_v31 }
 0x3a2   :  { %v11861_v32 = vpop.f32.mrb[192].mxu0  ;;  %v11981_v48 = vpop.f32.mrb[224].mxu1 }
 0x3a3   :  { %v11862_v37 = vpop.f32.mrb[193].mxu0  ;;  %v11982_v24 = vpop.f32.mrb[225].mxu1 }
 0x3a4   :  { %v11863_v20 = vadd.f32 %v11862_v37, %v11861_v32  ;;  %v11864_v45 = vpop.f32.mrb[194].mxu0  ;;  %v15834_v47 = vadd.f32 %v11982_v24, %v11981_v48  ;;  %v11984_v4 = vpop.f32.mrb[226].mxu1 }
 0x3a5   :  { %v11865_v36 = vpop.f32.mrb[195].mxu0  ;;  %v11985_v2 = vpop.f32.mrb[227].mxu1 }
 0x3a6   :  { %v3076_v62 = vadd.f32 %v11863_v20, %v15780_v51  ;;  %v11866_v44 = vadd.f32 %v11865_v36, %v11864_v45  ;;  %v11986_v57 = vadd.f32 %v11985_v2, %v11984_v4 }
 0x3a8   :  { %v3079_v9 = vadd.f32 %v11866_v44, %v15782_v39  ;;  %v3141_v38 = vadd.f32 %v15784_v17, %v3076_v62 }
 0x3aa   :  { %v3144_v6 = vadd.f32 %v15786_v55, %v3079_v9  ;;  %v11867_v13 = vpop.f32.mrb[196].mxu0  ;;  %v11987_v43 = vpop.f32.mrb[228].mxu1 }
 0x3ab   :  { %v11868_v29 = vpop.f32.mrb[197].mxu0  ;;  %v11988_v3 = vpop.f32.mrb[229].mxu1 }
 0x3ac   :  { %v11869_v35 = vadd.f32 %v11868_v29, %v11867_v13  ;;  %v11870_v53 = vpop.f32.mrb[198].mxu0  ;;  %v11989_v26 = vadd.f32 %v11988_v3, %v11987_v43  ;;  %v11990_v14 = vpop.f32.mrb[230].mxu1 }
 0x3ad   :  { %v11871_v16 = vpop.f32.mrb[199].mxu0  ;;  %v11991_v56 = vpop.f32.mrb[231].mxu1 }
 0x3ae   :  { %v3084_v51 = vadd.f32 %v11869_v35, %v15795_v52  ;;  %v11872_v8 = vadd.f32 %v11871_v16, %v11870_v53  ;;  %v11992_v15 = vadd.f32 %v11991_v56, %v11990_v14 }
 0x3b0   :  { %v3087_v39 = vadd.f32 %v11872_v8, %v15797_v28  ;;  %v3149_v17 = vadd.f32 %v15799_v46, %v3084_v51 }
 0x3b2   :  { %v3152_v55 = vadd.f32 %v15803_v10, %v3087_v39  ;;  %v11873_v30 = vpop.f32.mrb[200].mxu0  ;;  %v11993_v54 = vpop.f32.mrb[232].mxu1 }
 0x3b3   :  { %v11874_v63 = vpop.f32.mrb[201].mxu0  ;;  %v11994_v60 = vpop.f32.mrb[233].mxu1 }
 0x3b4   :  { %v11875_v19 = vadd.f32 %v11874_v63, %v11873_v30  ;;  %v11876_v12 = vpop.f32.mrb[202].mxu0  ;;  %v15844_v27 = vadd.f32 %v11994_v60, %v11993_v54  ;;  %v11996_v58 = vpop.f32.mrb[234].mxu1 }
 0x3b5   :  { %v11877_v5 = vpop.f32.mrb[203].mxu0  ;;  %v11997_v22 = vpop.f32.mrb[235].mxu1 }
 0x3b6   :  { %v3092_v52 = vadd.f32 %v11875_v19, %v15807_v23  ;;  %v11878_v0 = vadd.f32 %v11877_v5, %v11876_v12  ;;  %v15847_v40 = vadd.f32 %v11997_v22, %v11996_v58  ;;  %v14196_v12 = vld [vmem:[%s15791_s29 + $0x18] sm:$0xff]  }
 0x3b8   :  { %v3095_v28 = vadd.f32 %v11878_v0, %v15809_v41  ;;  %v3157_v46 = vadd.f32 %v15811_v59, %v3092_v52 }
 0x3ba   :  { %v3160_v10 = vadd.f32 %v15813_v18, %v3095_v28  ;;  %v11879_v7 = vpop.f32.mrb[204].mxu0  ;;  %v11999_v61 = vpop.f32.mrb[236].mxu1 }
 0x3bb   :  { %v11880_v21 = vpop.f32.mrb[205].mxu0  ;;  %v12000_v25 = vpop.f32.mrb[237].mxu1 }
 0x3bc   :  { %v11881_v31 = vadd.f32 %v11880_v21, %v11879_v7  ;;  %v11882_v1 = vpop.f32.mrb[206].mxu0  ;;  %v15852_v32 = vadd.f32 %v12000_v25, %v11999_v61  ;;  %v12002_v48 = vpop.f32.mrb[238].mxu1 }
 0x3bd   :  { %v11883_v37 = vpop.f32.mrb[207].mxu0  ;;  %v12003_v23 = vpop.f32.mrb[239].mxu1 }
 0x3be   :  { %v3100_v24 = vadd.f32 %v11881_v31, %v15818_v42  ;;  %v11884_v20 = vadd.f32 %v11883_v37, %v11882_v1  ;;  %v15855_v45 = vadd.f32 %v12003_v23, %v12002_v48  ;;  %v14199_v48 = vld [vmem:[%s15791_s29 + $0x40] sm:$0xff]   ;;  %v14200_v37 = vld [vmem:[%s15791_s29 + $0x38] sm:$0xff]  }
 0x3bf   :  { %v14203_v23 = vld [vmem:[%s15955_s3 + $0x4] ss:$20 sps:$4 sm:$0xff]  }
 0x3c0   :  { %v3103_v41 = vadd.f32 %v11884_v20, %v15820_v11  ;;  %v3165_v59 = vadd.f32 %v15822_v33, %v3100_v24  ;;  %v14206_v24 = vld [vmem:[%s15955_s3 + $0xc] ss:$20 sps:$4 sm:$0xff]  }
 0x3c2   :  { %v3168_v18 = vadd.f32 %v15824_v50, %v3103_v41 }
 0x3e2   :  { %v11941_v4 = vpop.f32.mrb[208].mxu0 }
 0x3e3   :  { %v11942_v36 = vpop.f32.mrb[209].mxu0 }
 0x3e4   :  { %v11943_v2 = vadd.f32 %v11942_v36, %v11941_v4  ;;  %v11944_v62 = vpop.f32.mrb[210].mxu0 }
 0x3e5   :  { %v11945_v44 = vpop.f32.mrb[211].mxu0 }
 0x3e6   :  { %v3206_v9 = vadd.f32 %v11943_v2, %v3141_v38  ;;  %v11946_v13 = vadd.f32 %v11945_v44, %v11944_v62 }
 0x3e8   :  { %v3271_v43 = vadd.f32 %v15834_v47, %v3206_v9  ;;  %v3209_v29 = vadd.f32 %v11946_v13, %v3144_v6 }
 0x3ea   :  { %v3274_v42 = vadd.f32 %v11986_v57, %v3209_v29  ;;  %v11947_v3 = vpop.f32.mrb[212].mxu0  ;;  %v3301_v53 = vmax.f32 %v3271_v43, 0.0 }
 0x3eb   :  { %v11948_v35 = vpop.f32.mrb[213].mxu0 }
 0x3ec   :  { %v3302_v14 = vmax.f32 %v3274_v42, 0.0  ;;  %v11949_v11 = vadd.f32 %v11948_v35, %v11947_v3  ;;  %v11950_v16 = vpop.f32.mrb[214].mxu0 }
 0x3ed   :  { %v11951_v33 = vpop.f32.mrb[215].mxu0 }
 0x3ee   :  { %v15861_v56 = vpack.c.bf16 %v3302_v14, %v3301_v53  ;;  %v3214_v50 = vadd.f32 %v11949_v11, %v3149_v17  ;;  %v11952_v51 = vadd.f32 %v11951_v33, %v11950_v16 }
 0x3f0   :  { %v3279_v8 = vadd.f32 %v11989_v26, %v3214_v50  ;;  %v3217_v38 = vadd.f32 %v11952_v51, %v3152_v55  ;;  %12907 = vmatprep.mubr.msk.bf16.mxu0 %vm563_vm2, %v15861_v56  ;;  %12927 = vmatprep.mubr.msk.bf16.mxu1 %vm563_vm2, %v15861_v56  ;;  %v14197_v55 = vld [vmem:[%s15791_s29 + $0x30] sm:$0xff]  }
 0x3f2   :  { %v3282_v47 = vadd.f32 %v11992_v15, %v3217_v38  ;;  %v11953_v57 = vpop.f32.mrb[216].mxu0  ;;  %v3303_v39 = vmax.f32 %v3279_v8, 0.0 }
 0x3f3   :  { %v11954_v6 = vpop.f32.mrb[217].mxu0 }
 0x3f4   :  { %v3304_v30 = vmax.f32 %v3282_v47, 0.0  ;;  %v11955_v54 = vadd.f32 %v11954_v6, %v11953_v57  ;;  %v11956_v63 = vpop.f32.mrb[218].mxu0 }
 0x3f5   :  { %v11957_v60 = vpop.f32.mrb[219].mxu0 }
 0x3f6   :  { %v15867_v17 = vpack.c.bf16 %v3304_v30, %v3303_v39  ;;  %v3222_v19 = vadd.f32 %v11955_v54, %v3157_v46  ;;  %v11958_v26 = vadd.f32 %v11957_v60, %v11956_v63 }
 0x3f8   :  { %v3287_v58 = vadd.f32 %v15844_v27, %v3222_v19  ;;  %v3225_v5 = vadd.f32 %v11958_v26, %v3160_v10  ;;  %12908 = vmatmul.mubr.msk.bf16.vlgmr.msra.gmra.mrb[224].mxu0 %vm563_vm2, %v15867_v17  ;;  %12928 = vmatmul.mubr.msk.bf16.vlgmr.msra.gmra.mrb[240].mxu1 %vm563_vm2, %v15867_v17 }
 0x3f9   :  { %12916 = vmatpush3.bf16.msra.mxu0 %v15827_v34  ;;  %12946 = vmatpush3.bf16.msra.mxu1 %v15830_v49 }
 0x3fa   :  { %v3290_v15 = vadd.f32 %v15847_v40, %v3225_v5  ;;  %v11959_v22 = vpop.f32.mrb[220].mxu0  ;;  %12935 = vmatprep.subr.bf16.mxu0 %v14196_v12  ;;  %12965 = vmatprep.subr.bf16.mxu1 %v14197_v55  ;;  %v3305_v0 = vmax.f32 %v3287_v58, 0.0 }
 0x3fb   :  { %v11960_v52 = vpop.f32.mrb[221].mxu0 }
 0x3fc   :  { %v3306_v28 = vmax.f32 %v3290_v15, 0.0  ;;  %v11961_v27 = vadd.f32 %v11960_v52, %v11959_v22  ;;  %v11962_v46 = vpop.f32.mrb[222].mxu0 }
 0x3fd   :  { %v11963_v10 = vpop.f32.mrb[223].mxu0 }
 0x3fe   :  { %v15879_v7 = vpack.c.bf16 %v3306_v28, %v3305_v0  ;;  %v3230_v61 = vadd.f32 %v11961_v27, %v3165_v59  ;;  %v11964_v21 = vadd.f32 %v11963_v10, %v11962_v46 }
 0x400   :  { %v3295_v34 = vadd.f32 %v15852_v32, %v3230_v61  ;;  %v3233_v49 = vadd.f32 %v11964_v21, %v3168_v18  ;;  %12911 = vmatprep.mubr.msk.bf16.mxu0 %vm563_vm2, %v15879_v7  ;;  %12931 = vmatprep.mubr.msk.bf16.mxu1 %vm563_vm2, %v15879_v7  ;;  %v14198_v32 = vld [vmem:[%s15791_s29 + $0x28] sm:$0xff]   ;;  %s10320_s29 = sld [smem:[%s16976_s0 + %s14500_s26]]  }
 0x402   :  { %v3298_v40 = vadd.f32 %v15855_v45, %v3233_v49  ;;  %v3307_v25 = vmax.f32 %v3295_v34, 0.0 }
 0x404   :  { %v3308_v31 = vmax.f32 %v3298_v40, 0.0 }
 0x406   :  { %v15887_v1 = vpack.c.bf16 %v3308_v31, %v3307_v25 }
 0x408   :  { %12912 = vmatmul.mubr.msk.bf16.gmra.mrb[228].mxu0 %vm563_vm2, %v15887_v1  ;;  %12932 = vmatmul.mubr.msk.bf16.gmra.mrb[244].mxu1 %vm563_vm2, %v15887_v1 }
 0x409   :  { %12917 = vmatprep.mubr.msk.bf16.mxu0 %vm563_vm2, %v15861_v56  ;;  %12947 = vmatprep.mubr.msk.bf16.mxu1 %vm563_vm2, %v15861_v56 }
 0x410   :  { %12918 = vmatmul.mubr.msk.bf16.vlgmr.msra.gmra.mrb[232].mxu0 %vm563_vm2, %v15867_v17  ;;  %12948 = vmatmul.mubr.msk.bf16.vlgmr.msra.gmra.mrb[248].mxu1 %vm563_vm2, %v15867_v17 }
 0x411   :  { %12921 = vmatprep.mubr.msk.bf16.mxu0 %vm563_vm2, %v15879_v7  ;;  %12951 = vmatprep.mubr.msk.bf16.mxu1 %vm563_vm2, %v15879_v7 }
 0x412   :  { %12936 = vmatpush3.bf16.msra.mxu0 %v14196_v12  ;;  %12966 = vmatpush3.bf16.msra.mxu1 %v14197_v55 }
 0x413   :  { %12955 = vmatprep.subr.bf16.mxu0 %v14198_v32  ;;  %12985 = vmatprep.subr.bf16.mxu1 %v14199_v48 }
 0x418   :  { %12922 = vmatmul.mubr.msk.bf16.gmra.mrb[236].mxu0 %vm563_vm2, %v15887_v1  ;;  %12952 = vmatmul.mubr.msk.bf16.gmra.mrb[252].mxu1 %vm563_vm2, %v15887_v1 }
 0x419   :  { %12937 = vmatprep.mubr.msk.bf16.mxu0 %vm563_vm2, %v15861_v56  ;;  %12967 = vmatprep.mubr.msk.bf16.mxu1 %vm563_vm2, %v15861_v56 }
 0x420   :  { %12938 = vmatmul.mubr.msk.bf16.vlgmr.msra.gmra.mrb[240].mxu0 %vm563_vm2, %v15867_v17  ;;  %12968 = vmatmul.mubr.msk.bf16.vlgmr.msra.gmra.mrb[0].mxu1 %vm563_vm2, %v15867_v17 }
 0x421   :  { %12941 = vmatprep.mubr.msk.bf16.mxu0 %vm563_vm2, %v15879_v7  ;;  %12971 = vmatprep.mubr.msk.bf16.mxu1 %vm563_vm2, %v15879_v7 }
 0x422   :  { %12956 = vmatpush3.bf16.msra.mxu0 %v14198_v32  ;;  %12986 = vmatpush3.bf16.msra.mxu1 %v14199_v48 }
 0x423   :  { %12975 = vmatprep.subr.bf16.mxu0 %v14200_v37 }
 0x428   :  { %12942 = vmatmul.mubr.msk.bf16.gmra.mrb[244].mxu0 %vm563_vm2, %v15887_v1  ;;  %12972 = vmatmul.mubr.msk.bf16.gmra.mrb[4].mxu1 %vm563_vm2, %v15887_v1 }
 0x429   :  { %12957 = vmatprep.mubr.msk.bf16.mxu0 %vm563_vm2, %v15861_v56  ;;  %12987 = vmatprep.mubr.msk.bf16.mxu1 %vm563_vm2, %v15861_v56 }
 0x430   :  { %12958 = vmatmul.mubr.msk.bf16.vlgmr.msra.gmra.mrb[248].mxu0 %vm563_vm2, %v15867_v17  ;;  %12988 = vmatmul.mubr.msk.bf16.vlgmr.msra.gmra.mrb[8].mxu1 %vm563_vm2, %v15867_v17 }
 0x431   :  { %12961 = vmatprep.mubr.msk.bf16.mxu0 %vm563_vm2, %v15879_v7  ;;  %12991 = vmatprep.mubr.msk.bf16.mxu1 %vm563_vm2, %v15879_v7 }
 0x432   :  { %12976 = vmatpush3.bf16.msra.mxu0 %v14200_v37 }
 0x438   :  { %12962 = vmatmul.mubr.msk.bf16.gmra.mrb[252].mxu0 %vm563_vm2, %v15887_v1  ;;  %12992 = vmatmul.mubr.msk.bf16.gmra.mrb[12].mxu1 %vm563_vm2, %v15887_v1 }
 0x439   :  { %12977 = vmatprep.mubr.msk.bf16.mxu0 %vm563_vm2, %v15861_v56  ;;  %4141 = vmatprep.mubr.bf16.mxu1 %v14206_v24 }
 0x440   :  { %12978 = vmatmul.mubr.msk.bf16.vlgmr.msra.gmra.mrb[0].mxu0 %vm563_vm2, %v15867_v17 }
 0x441   :  { %12981 = vmatprep.mubr.msk.bf16.mxu0 %vm563_vm2, %v15879_v7 }
 0x448   :  { %12982 = vmatmul.mubr.msk.bf16.gmra.mrb[4].mxu0 %vm563_vm2, %v15887_v1 }
 0x449   :  { %4100 = vmatprep.mubr.bf16.mxu0 %v14203_v23 }
 0x4cb   :  { %v12909_v20 = vpop.f32.mrb[224].mxu0  ;;  %v12929_v45 = vpop.f32.mrb[240].mxu1 }
 0x4cc   :  { %v3367_v41 = vpop.f32.mrb[225].mxu0  ;;  %v3523_v59 = vpop.f32.mrb[241].mxu1 }
 0x4cd   :  { %v12910_v18 = vpop.f32.mrb[226].mxu0  ;;  %v12930_v4 = vpop.f32.mrb[242].mxu1 }
 0x4ce   :  { %v3399_v36 = vpack.c.bf16 %v12910_v18, %v12909_v20  ;;  %v3555_v2 = vpack.c.bf16 %v12930_v4, %v12929_v45  ;;  %v3370_v62 = vpop.f32.mrb[227].mxu0  ;;  %v3526_v44 = vpop.f32.mrb[243].mxu1 }
 0x4cf   :  { %v3398_v9 = vpack.c.bf16 %v3370_v62, %v3367_v41  ;;  %v3554_v13 = vpack.c.bf16 %v3526_v44, %v3523_v59 }
 0x4d1   :  { %12050 = vmatprep.subr.bf16.mxu0 %v3554_v13 }
 0x4d2   :  { %12051 = vmatpush3.bf16.msra.mxu0 %v3398_v9 }
 0x4d3   :  { %12052 = vmatprep.subr.bf16.mxu0 %v3555_v2 }
 0x4d6   :  { %12053 = vmatpush3.bf16.msra.mxu0 %v3399_v36 }
 0x4db   :  { %v12913_v43 = vpop.f32.mrb[228].mxu0  ;;  %v12933_v29 = vpop.f32.mrb[244].mxu1 }
 0x4dc   :  { %v3383_v42 = vpop.f32.mrb[229].mxu0  ;;  %v3539_v3 = vpop.f32.mrb[245].mxu1 }
 0x4dd   :  { %v12914_v35 = vpop.f32.mrb[230].mxu0  ;;  %v12934_v53 = vpop.f32.mrb[246].mxu1 }
 0x4de   :  { %v3401_v14 = vpack.c.bf16 %v12914_v35, %v12913_v43  ;;  %v3557_v11 = vpack.c.bf16 %v12934_v53, %v12933_v29  ;;  %v3386_v16 = vpop.f32.mrb[231].mxu0  ;;  %v3542_v33 = vpop.f32.mrb[247].mxu1 }
 0x4df   :  { %v3400_v50 = vpack.c.bf16 %v3386_v16, %v3383_v42  ;;  %v3556_v51 = vpack.c.bf16 %v3542_v33, %v3539_v3 }
 0x4e1   :  { %12054 = vmatprep.subr.bf16.mxu0 %v3556_v51 }
 0x4e2   :  { %12055 = vmatpush3.bf16.msra.mxu0 %v3400_v50 }
 0x4e3   :  { %v12919_v8 = vpop.f32.mrb[232].mxu0  ;;  %v12949_v38 = vpop.f32.mrb[248].mxu1  ;;  %12056 = vmatprep.subr.bf16.mxu0 %v3557_v11 }
 0x4e4   :  { %v3445_v47 = vpop.f32.mrb[233].mxu0  ;;  %v3679_v57 = vpop.f32.mrb[249].mxu1 }
 0x4e5   :  { %v12920_v6 = vpop.f32.mrb[234].mxu0  ;;  %v12950_v39 = vpop.f32.mrb[250].mxu1 }
 0x4e6   :  { %v3477_v30 = vpack.c.bf16 %v12920_v6, %v12919_v8  ;;  %v3711_v54 = vpack.c.bf16 %v12950_v39, %v12949_v38  ;;  %v3448_v63 = vpop.f32.mrb[235].mxu0  ;;  %v3682_v60 = vpop.f32.mrb[251].mxu1  ;;  %12057 = vmatpush3.bf16.msra.mxu0 %v3401_v14  ;;  %v14201_v14 = vld [vmem:[%s15955_s3] ss:$20 sps:$4 sm:$0xff]   ;;  %v14484_v38 = vmov 0.0  }
 0x4e7   :  { %v3476_v19 = vpack.c.bf16 %v3448_v63, %v3445_v47  ;;  %v3710_v26 = vpack.c.bf16 %v3682_v60, %v3679_v57 }
 0x4eb   :  { %v12923_v12 = vpop.f32.mrb[236].mxu0  ;;  %v12953_v55 = vpop.f32.mrb[252].mxu1 }
 0x4ec   :  { %v3461_v58 = vpop.f32.mrb[237].mxu0  ;;  %v3695_v5 = vpop.f32.mrb[253].mxu1 }
 0x4ed   :  { %v12924_v15 = vpop.f32.mrb[238].mxu0  ;;  %v12954_v22 = vpop.f32.mrb[254].mxu1 }
 0x4ee   :  { %v3479_v52 = vpack.c.bf16 %v12924_v15, %v12923_v12  ;;  %v3713_v0 = vpack.c.bf16 %v12954_v22, %v12953_v55  ;;  %v3464_v28 = vpop.f32.mrb[239].mxu0  ;;  %v3698_v27 = vpop.f32.mrb[255].mxu1  ;;  %v14207_v22 = vld [vmem:[%s15955_s3 + $0x10] ss:$20 sps:$4 sm:$0xff]  }
 0x4ef   :  { %v3478_v46 = vpack.c.bf16 %v3464_v28, %v3461_v58  ;;  %v3712_v10 = vpack.c.bf16 %v3698_v27, %v3695_v5 }
 0x4f3   :  { %v12939_v61 = vpop.f32.mrb[240].mxu0  ;;  %v12969_v21 = vpop.f32.mrb[0].mxu1 }
 0x4f4   :  { %v3601_v34 = vpop.f32.mrb[241].mxu0  ;;  %v3835_v49 = vpop.f32.mrb[1].mxu1 }
 0x4f5   :  { %v12940_v40 = vpop.f32.mrb[242].mxu0  ;;  %v12970_v25 = vpop.f32.mrb[2].mxu1 }
 0x4f6   :  { %v3633_v31 = vpack.c.bf16 %v12940_v40, %v12939_v61  ;;  %v3867_v32 = vpack.c.bf16 %v12970_v25, %v12969_v21  ;;  %v3604_v48 = vpop.f32.mrb[243].mxu0  ;;  %v3838_v37 = vpop.f32.mrb[3].mxu1  ;;  %v14208_v40 = vld [vmem:[%s15978_s7] sm:$0xff]  }
 0x4f7   :  { %v3632_v23 = vpack.c.bf16 %v3604_v48, %v3601_v34  ;;  %v3866_v24 = vpack.c.bf16 %v3838_v37, %v3835_v49  ;;  %v14204_v49 = vld [vmem:[%s15955_s3 + $0x8] ss:$20 sps:$4 sm:$0xff]   ;;  %v14209_v25 = vld [vmem:[%s15978_s7 + $0x20] sm:$0xff]   ;;  %s10324_s3 = sld [smem:[%s16976_s0 + %s14501_s30]]  }
 0x4f9   :  { %12058 = vmatprep.subr.bf16.mxu0 %v3632_v23  ;;  %12072 = vmatprep.subr.bf16.mxu1 %v3866_v24 }
 0x4fa   :  { %12059 = vmatpush3.bf16.msra.mxu0 %v3476_v19  ;;  %12073 = vmatpush3.bf16.msra.mxu1 %v3710_v26 }
 0x4fb   :  { %v12943_v20 = vpop.f32.mrb[244].mxu0  ;;  %v12973_v45 = vpop.f32.mrb[4].mxu1  ;;  %12060 = vmatprep.subr.bf16.mxu0 %v3633_v31  ;;  %12074 = vmatprep.subr.bf16.mxu1 %v3867_v32  ;;  %v14210_v31 = vld [vmem:[%s15978_s7 + $0x8] sm:$0xff]  }
 0x4fc   :  { %v3617_v41 = vpop.f32.mrb[245].mxu0  ;;  %v3851_v59 = vpop.f32.mrb[5].mxu1  ;;  %v14211_v32 = vld [vmem:[%s15978_s7 + $0x28] sm:$0xff]  }
 0x4fd   :  { %v12944_v18 = vpop.f32.mrb[246].mxu0  ;;  %v12974_v4 = vpop.f32.mrb[6].mxu1 }
 0x4fe   :  { %v3635_v36 = vpack.c.bf16 %v12944_v18, %v12943_v20  ;;  %v3869_v2 = vpack.c.bf16 %v12974_v4, %v12973_v45  ;;  %v3620_v62 = vpop.f32.mrb[247].mxu0  ;;  %v3854_v44 = vpop.f32.mrb[7].mxu1  ;;  %12061 = vmatpush3.bf16.msra.mxu0 %v3477_v30  ;;  %12075 = vmatpush3.bf16.msra.mxu1 %v3711_v54 }
 0x4ff   :  { %v3634_v9 = vpack.c.bf16 %v3620_v62, %v3617_v41  ;;  %v3868_v13 = vpack.c.bf16 %v3854_v44, %v3851_v59 }
 0x501   :  { %12062 = vmatprep.subr.bf16.mxu0 %v3634_v9  ;;  %12076 = vmatprep.subr.bf16.mxu1 %v3868_v13 }
 0x502   :  { %12063 = vmatpush3.bf16.msra.mxu0 %v3478_v46  ;;  %12077 = vmatpush3.bf16.msra.mxu1 %v3712_v10 }
 0x503   :  { %v12959_v43 = vpop.f32.mrb[248].mxu0  ;;  %v12989_v29 = vpop.f32.mrb[8].mxu1  ;;  %12064 = vmatprep.subr.bf16.mxu0 %v3635_v36  ;;  %12078 = vmatprep.subr.bf16.mxu1 %v3869_v2  ;;  %v10678_v36 = vld [vmem:[%s10311_s11] ss:$0 sm:$0xff]  ;;  %s10323_s11 = sld [smem:[%s16976_s0 + %s14503_s8]]  }
 0x504   :  { %v3757_v42 = vpop.f32.mrb[249].mxu0  ;;  %v3991_v3 = vpop.f32.mrb[9].mxu1 }
 0x505   :  { %v12960_v35 = vpop.f32.mrb[250].mxu0  ;;  %v12990_v53 = vpop.f32.mrb[10].mxu1 }
 0x506   :  { %v3789_v11 = vpack.c.bf16 %v12960_v35, %v12959_v43  ;;  %v4023_v16 = vpack.c.bf16 %v12990_v53, %v12989_v29  ;;  %v3760_v33 = vpop.f32.mrb[251].mxu0  ;;  %v3994_v50 = vpop.f32.mrb[11].mxu1  ;;  %12065 = vmatpush3.bf16.msra.mxu0 %v3479_v52  ;;  %12079 = vmatpush3.bf16.msra.mxu1 %v3713_v0 }
 0x507   :  { %v3788_v51 = vpack.c.bf16 %v3760_v33, %v3757_v42  ;;  %v4022_v8 = vpack.c.bf16 %v3994_v50, %v3991_v3  ;;  %12995 = vmatprep.subr.bf16.mxu0 %v14484_v38  ;;  %v14212_v33 = vld [vmem:[%s15978_s7 + $0x10] sm:$0xff]   ;;  %v14213_v50 = vld [vmem:[%s15978_s7 + $0x40] sm:$0xff]  }
 0x509   :  { %4101 = vmatmul.mubr.bf16.vlgmr.msra.gmra.mrb[8].mxu0 %v14201_v14 }
 0x50a   :  { %12996 = vmatpush3.bf16.msra.mxu0 %v4022_v8  ;;  %13003 = vmatprep.mubr.msk.bf16.mxu0 %vm14485_vm3, %v14484_v38  ;;  %v14214_v8 = vld [vmem:[%s15978_s7 + $0x18] sm:$0xff]  }
 0x50b   :  { %v12963_v47 = vpop.f32.mrb[252].mxu0  ;;  %v12993_v57 = vpop.f32.mrb[12].mxu1  ;;  %12997 = vmatprep.subr.bf16.mxu0 %v14484_v38 }
 0x50c   :  { %v3773_v6 = vpop.f32.mrb[253].mxu0  ;;  %v4007_v39 = vpop.f32.mrb[13].mxu1 }
 0x50d   :  { %v12964_v30 = vpop.f32.mrb[254].mxu0  ;;  %v12994_v54 = vpop.f32.mrb[14].mxu1 }
 0x50e   :  { %v3791_v63 = vpack.c.bf16 %v12964_v30, %v12963_v47  ;;  %v4025_v60 = vpack.c.bf16 %v12994_v54, %v12993_v57  ;;  %v3776_v19 = vpop.f32.mrb[255].mxu0  ;;  %v4010_v26 = vpop.f32.mrb[15].mxu1  ;;  %12998 = vmatpush3.bf16.msra.mxu0 %v4023_v16  ;;  %v14215_v47 = vld [vmem:[%s15978_s7 + $0x48] sm:$0xff]   ;;  %v14216_v57 = vld [vmem:[%s15978_s7 + $0x30] sm:$0xff]  }
 0x50f   :  { %v3790_v12 = vpack.c.bf16 %v3776_v19, %v3773_v6  ;;  %v4024_v55 = vpack.c.bf16 %v4010_v26, %v4007_v39  ;;  %12999 = vmatprep.subr.bf16.mxu0 %v14484_v38  ;;  %v14217_v6 = vld [vmem:[%s15978_s7 + $0x60] sm:$0xff]   ;;  %v14218_v39 = vld [vmem:[%s15978_s7 + $0x38] sm:$0xff]   ;;  %v14219_v30 = vld [vmem:[%s15978_s7 + $0x68] sm:$0xff]  }
 0x510   :  { %v14220_v54 = vld [vmem:[%s15978_s7 + $0x50] sm:$0xff]   ;;  %v14223_v19 = vld [vmem:[%s15978_s7 + $0x88] sm:$0xff]  }
 0x511   :  { %v14224_v26 = vld [vmem:[%s15978_s7 + $0x70] sm:$0xff]  }
 0x512   :  { %13000 = vmatpush3.bf16.msra.mxu0 %v4024_v55  ;;  %v14488_v55 = vmov 0  }
 0x513   :  { %v12979_v58 = vpop.f32.mrb[0].mxu0  ;;  %13001 = vmatprep.subr.bf16.mxu0 %v14484_v38 }
 0x514   :  { %v3913_v5 = vpop.f32.mrb[1].mxu0 }
 0x515   :  { %v12980_v15 = vpop.f32.mrb[2].mxu0 }
 0x516   :  { %v3945_v52 = vpack.c.bf16 %v12980_v15, %v12979_v58  ;;  %v3916_v0 = vpop.f32.mrb[3].mxu0  ;;  %13002 = vmatpush3.bf16.msra.mxu0 %v4025_v60  ;;  %v14222_v60 = vld [vmem:[%s15978_s7 + $0x58] sm:$0xff]   ;;  %v16058_v58 = vld.sshfl [vmem:[%s10312_s15] sm:$0x33 pattern:$0x76325410]  ;;  %s16681_s15 = sld [smem:[%s16976_s0 + %s14504_s12]]  }
 0x517   :  { %v3944_v28 = vpack.c.bf16 %v3916_v0, %v3913_v5  ;;  %13023 = vmatprep.subr.bf16.mxu0 %v14484_v38  ;;  %v4744_v5 = vcombine.high %v16058_v58, %v16058_v58  ;;  %v14226_v15 = vld [vmem:[%s16066_s19] sm:$0xff]  }
 0x519   :  { %12080 = vmatprep.subr.bf16.mxu1 %v3944_v28  ;;  %13004 = vmatmul.mubr.msk.bf16.vlgmr.msra.gmra.mrb[12].mxu0 %vm4064_vm4, %v14207_v22  ;;  %v14228_v22 = vld [vmem:[%s16066_s19 + $0x8] sm:$0xff]  }
 0x51a   :  { %12081 = vmatpush3.bf16.msra.mxu1 %v3788_v51  ;;  %13027 = vmatprep.mubr.msk.bf16.mxu0 %vm14485_vm3, %v14484_v38 }
 0x51b   :  { %v12983_v27 = vpop.f32.mrb[4].mxu0  ;;  %12082 = vmatprep.subr.bf16.mxu1 %v3945_v52  ;;  %13024 = vmatpush3.bf16.msra.mxu0 %v14209_v25  ;;  %v14230_v52 = vld [vmem:[%s16066_s19 + $0x10] sm:$0xff]  }
 0x51c   :  { %v3929_v46 = vpop.f32.mrb[5].mxu0  ;;  %13025 = vmatprep.subr.bf16.mxu0 %v14484_v38 }
 0x51d   :  { %v12984_v10 = vpop.f32.mrb[6].mxu0 }
 0x51e   :  { %v3947_v61 = vpack.c.bf16 %v12984_v10, %v12983_v27  ;;  %v3932_v21 = vpop.f32.mrb[7].mxu0  ;;  %12083 = vmatpush3.bf16.msra.mxu1 %v3789_v11 }
 0x51f   :  { %v3946_v34 = vpack.c.bf16 %v3932_v21, %v3929_v46  ;;  %13026 = vmatpush3.bf16.msra.mxu0 %v14211_v32 }
 0x520   :  { %13039 = vmatprep.subr.bf16.mxu0 %v14484_v38 }
 0x521   :  { %12084 = vmatprep.subr.bf16.mxu1 %v3946_v34 }
 0x522   :  { %12085 = vmatpush3.bf16.msra.mxu1 %v3790_v12  ;;  %v14225_v12 = vld [vmem:[%s15978_s7 + $0x78] sm:$0xff]  }
 0x523   :  { %12086 = vmatprep.subr.bf16.mxu1 %v3947_v61 }
 0x526   :  { %12087 = vmatpush3.bf16.msra.mxu1 %v3791_v63  ;;  %v14221_v63 = vld [vmem:[%s15978_s7 + $0x80] sm:$0xff]   ;;  %s16500_s7 = sld [smem:[%s16976_s0 + %s14502_s4]]  }
 0x527   :  { %13007 = vmatprep.subr.bf16.mxu1 %v14484_v38 }
 0x529   :  { %4142 = vmatmul.mubr.bf16.vlgmr.msra.gmra.mrb[16].mxu1 %v14204_v49 }
 0x52a   :  { %13011 = vmatprep.mubr.msk.bf16.mxu1 %vm14485_vm3, %v14484_v38  ;;  %13008 = vmatpush3.bf16.msra.mxu1 %v14208_v40 }
 0x52b   :  { %13009 = vmatprep.subr.bf16.mxu1 %v14484_v38 }
 0x52e   :  { %13010 = vmatpush3.bf16.msra.mxu1 %v14210_v31 }
 0x52f   :  { %13015 = vmatprep.subr.bf16.mxu1 %v14484_v38 }
 0x5dc   :  { %v12066_v48 = vpop.f32.mrb[8].mxu0 }
 0x5dd   :  { %v12067_v37 = vpop.f32.mrb[9].mxu0 }
 0x5de   :  { %v12068_v23 = vadd.f32 %v12067_v37, %v12066_v48  ;;  %v12069_v24 = vpop.f32.mrb[10].mxu0 }
 0x5df   :  { %v12070_v20 = vpop.f32.mrb[11].mxu0 }
 0x5e0   :  { %v12071_v45 = vadd.f32 %v12070_v20, %v12069_v24  ;;  %v4103_v44 = vadd.f32 %v12068_v23, %v10678_v36 }
 0x5e2   :  { %v4106_v29 = vadd.f32 %v12071_v45, %v10678_v36 }
 0x5ec   :  { %v4184_v41 = vpop.f32.mrb[12].mxu0 }
 0x5ed   :  { %v13005_v59 = vpop.f32.mrb[13].mxu0 }
 0x5ee   :  { %v4187_v18 = vpop.f32.mrb[14].mxu0 }
 0x5ef   :  { %v13006_v4 = vpop.f32.mrb[15].mxu0 }
 0x5fc   :  { %v12088_v2 = vpop.f32.mrb[16].mxu1 }
 0x5fd   :  { %v12089_v62 = vpop.f32.mrb[17].mxu1 }
 0x5fe   :  { %v12090_v9 = vadd.f32 %v12089_v62, %v12088_v2  ;;  %v12091_v13 = vpop.f32.mrb[18].mxu1 }
 0x5ff   :  { %v12092_v43 = vpop.f32.mrb[19].mxu1 }
 0x600   :  { %v4144_v42 = vadd.f32 %v12090_v9, %v4103_v44  ;;  %v12093_v3 = vadd.f32 %v12092_v43, %v12091_v13 }
 0x602   :  { %v4185_v35 = vadd.f32 %v4184_v41, %v4144_v42  ;;  %v4147_v53 = vadd.f32 %v12093_v3, %v4106_v29 }
 0x604   :  { %v4188_v14 = vadd.f32 %v4187_v18, %v4147_v53  ;;  %v4191_v11 = vmax.f32 %v4185_v35, 0.0 }
 0x606   :  { %v4192_v16 = vmax.f32 %v4188_v14, 0.0 }
 0x608   :  { %v15993_v51 = vpack.c.bf16 %v4192_v16, %v4191_v11 }
 0x60a   :  { %13012 = vmatmul.mubr.msk.bf16.vlgmr.msra.gmra.mrb[20].mxu1 %vm4210_vm5, %v15993_v51  ;;  %13028 = vmatmul.mubr.msk.bf16.vlgmr.msra.gmra.mrb[16].mxu0 %vm4210_vm5, %v15993_v51 }
 0x60b   :  { %13016 = vmatpush3.bf16.msra.mxu1 %v14212_v33  ;;  %13040 = vmatpush3.bf16.msra.mxu0 %v14213_v50 }
 0x60c   :  { %13017 = vmatprep.subr.bf16.mxu1 %v14484_v38  ;;  %13041 = vmatprep.subr.bf16.mxu0 %v14484_v38 }
 0x60d   :  { %13019 = vmatprep.mubr.msk.bf16.mxu1 %vm14485_vm3, %v14484_v38  ;;  %13043 = vmatprep.mubr.msk.bf16.mxu0 %vm14485_vm3, %v14484_v38 }
 0x60f   :  { %13018 = vmatpush3.bf16.msra.mxu1 %v14214_v8  ;;  %13042 = vmatpush3.bf16.msra.mxu0 %v14215_v47 }
 0x610   :  { %13031 = vmatprep.subr.bf16.mxu1 %v14484_v38  ;;  %13055 = vmatprep.subr.bf16.mxu0 %v14484_v38 }
 0x612   :  { %13020 = vmatmul.mubr.msk.bf16.vlgmr.msra.gmra.mrb[24].mxu1 %vm4210_vm5, %v15993_v51  ;;  %13044 = vmatmul.mubr.msk.bf16.vlgmr.msra.gmra.mrb[20].mxu0 %vm4210_vm5, %v15993_v51 }
 0x613   :  { %13032 = vmatpush3.bf16.msra.mxu1 %v14216_v57  ;;  %13056 = vmatpush3.bf16.msra.mxu0 %v14217_v6 }
 0x614   :  { %13033 = vmatprep.subr.bf16.mxu1 %v14484_v38  ;;  %13057 = vmatprep.subr.bf16.mxu0 %v14484_v38 }
 0x615   :  { %13035 = vmatprep.mubr.msk.bf16.mxu1 %vm14485_vm3, %v14484_v38  ;;  %13059 = vmatprep.mubr.msk.bf16.mxu0 %vm14485_vm3, %v14484_v38 }
 0x617   :  { %13034 = vmatpush3.bf16.msra.mxu1 %v14218_v39  ;;  %13058 = vmatpush3.bf16.msra.mxu0 %v14219_v30  ;;  %v14227_v30 = vld [vmem:[%s16066_s19 + $0x60] sm:$0xff]  }
 0x618   :  { %13047 = vmatprep.subr.bf16.mxu1 %v14484_v38  ;;  %13071 = vmatprep.subr.bf16.mxu0 %v14484_v38 }
 0x61a   :  { %13036 = vmatmul.mubr.msk.bf16.vlgmr.msra.gmra.mrb[28].mxu1 %vm4210_vm5, %v15993_v51  ;;  %13060 = vmatmul.mubr.msk.bf16.vlgmr.msra.gmra.mrb[24].mxu0 %vm4210_vm5, %v15993_v51 }
 0x61b   :  { %13048 = vmatpush3.bf16.msra.mxu1 %v14220_v54  ;;  %13072 = vmatpush3.bf16.msra.mxu0 %v14221_v63  ;;  %v14229_v54 = vld [vmem:[%s16066_s19 + $0x68] sm:$0xff]   ;;  %v14231_v63 = vld [vmem:[%s16066_s19 + $0x70] sm:$0xff]  }
 0x61c   :  { %13049 = vmatprep.subr.bf16.mxu1 %v14484_v38  ;;  %13073 = vmatprep.subr.bf16.mxu0 %v14484_v38 }
 0x61d   :  { %13051 = vmatprep.mubr.msk.bf16.mxu1 %vm14485_vm3, %v14484_v38  ;;  %13075 = vmatprep.mubr.msk.bf16.mxu0 %vm14485_vm3, %v14484_v38 }
 0x61f   :  { %13050 = vmatpush3.bf16.msra.mxu1 %v14222_v60  ;;  %13074 = vmatpush3.bf16.msra.mxu0 %v14223_v19  ;;  %v14232_v60 = vld [vmem:[%s16066_s19 + $0x18] sm:$0xff]  }
 0x620   :  { %13063 = vmatprep.subr.bf16.mxu1 %v14484_v38  ;;  %13079 = vmatprep.subr.bf16.mxu0 %v14484_v38  ;;  %v14233_v19 = vld [vmem:[%s16066_s19 + $0x78] sm:$0xff]  }
 0x622   :  { %13052 = vmatmul.mubr.msk.bf16.vlgmr.msra.gmra.mrb[32].mxu1 %vm4210_vm5, %v15993_v51  ;;  %13076 = vmatmul.mubr.msk.bf16.vlgmr.msra.gmra.mrb[28].mxu0 %vm4210_vm5, %v15993_v51 }
 0x623   :  { %13064 = vmatpush3.bf16.msra.mxu1 %v14224_v26  ;;  %13067 = vmatprep.mubr.msk.bf16.mxu1 %vm14485_vm3, %v14484_v38  ;;  %v10744_v26 = vld [vmem:[%s10314_s23] ss:$0 sm:$0xff]  ;;  %s16711_s23 = sld [smem:[%s16976_s0 + %s14506_s20]]  }
 0x624   :  { %13065 = vmatprep.subr.bf16.mxu1 %v14484_v38  ;;  %13087 = vmatprep.mubr.msk.bf16.mxu0 %vm14485_vm3, %v14484_v38 }
 0x625   :  { %13080 = vmatpush3.bf16.msra.mxu0 %v14226_v15 }
 0x626   :  { %13081 = vmatprep.subr.bf16.mxu0 %v14484_v38 }
 0x627   :  { %13066 = vmatpush3.bf16.msra.mxu1 %v14225_v12 }
 0x628   :  { %4749 = vmatprep.subr.bf16.mxu1 %v14488_v55 }
 0x629   :  { %13082 = vmatpush3.bf16.msra.mxu0 %v14228_v22 }
 0x62a   :  { %13068 = vmatmul.mubr.msk.bf16.vlgmr.msra.gmra.mrb[36].mxu1 %vm4210_vm5, %v15993_v51  ;;  %13083 = vmatprep.subr.bf16.mxu0 %v14484_v38 }
 0x62b   :  { %10746 = vmatprep.mubr.msk.bf16.mxu1 %vm563_vm2, %v4744_v5 }
 0x62d   :  { %13084 = vmatpush3.bf16.msra.mxu0 %v14230_v52 }
 0x62e   :  { %13085 = vmatprep.subr.bf16.mxu0 %v14484_v38 }
 0x631   :  { %13086 = vmatpush3.bf16.msra.mxu0 %v14232_v60  ;;  %v14249_v60 = vld [vmem:[%s16146_s5 + $0x8] sm:$0xff]  }
 0x632   :  { %13091 = vmatprep.subr.bf16.mxu0 %v14484_v38 }
 0x6dd   :  { %v4248_v0 = vpop.f32.mrb[20].mxu1  ;;  %v4366_v28 = vpop.f32.mrb[16].mxu0 }
 0x6de   :  { %v13013_v27 = vpop.f32.mrb[21].mxu1  ;;  %v13029_v46 = vpop.f32.mrb[17].mxu0 }
 0x6df   :  { %v4251_v10 = vpop.f32.mrb[22].mxu1  ;;  %v4369_v61 = vpop.f32.mrb[18].mxu0  ;;  %v14235_v27 = vld [vmem:[%s16066_s19 + $0x28] sm:$0xff]   ;;  %v14236_v46 = vld [vmem:[%s16066_s19 + $0x30] sm:$0xff]  }
 0x6e0   :  { %v4255_v21 = vpack.c.bf16 %v4251_v10, %v4248_v0  ;;  %v4373_v34 = vpack.c.bf16 %v4369_v61, %v4366_v28  ;;  %v13014_v49 = vpop.f32.mrb[23].mxu1  ;;  %v13030_v40 = vpop.f32.mrb[19].mxu0  ;;  %v14234_v0 = vld [vmem:[%s16066_s19 + $0x20] sm:$0xff]   ;;  %v14237_v10 = vld [vmem:[%s16066_s19 + $0x38] sm:$0xff]  }
 0x6e1   :  { %v14238_v61 = vld [vmem:[%s16066_s19 + $0x40] sm:$0xff]   ;;  %v14241_v49 = vld [vmem:[%s16066_s19 + $0x58] sm:$0xff]  }
 0x6e2   :  { %4750 = vmatpush1.bf16.msra.mxu1 %v4255_v21  ;;  %v14239_v21 = vld [vmem:[%s16066_s19 + $0x48] sm:$0xff]   ;;  %v14246_v40 = vld [vmem:[%s16141_s1] sm:$0xff]  }
 0x6e3   :  { %4751 = vmatprep.subr.bf16.mxu1 %v14488_v55 }
 0x6e5   :  { %v4307_v25 = vpop.f32.mrb[24].mxu1  ;;  %v4484_v31 = vpop.f32.mrb[20].mxu0 }
 0x6e6   :  { %v13021_v32 = vpop.f32.mrb[25].mxu1  ;;  %v13045_v48 = vpop.f32.mrb[21].mxu0 }
 0x6e7   :  { %v4310_v37 = vpop.f32.mrb[26].mxu1  ;;  %v4487_v23 = vpop.f32.mrb[22].mxu0  ;;  %v14252_v32 = vld [vmem:[%s16141_s1 + $0x18] sm:$0xff]   ;;  %v14254_v48 = vld [vmem:[%s16141_s1 + $0x20] sm:$0xff]  }
 0x6e8   :  { %v4314_v24 = vpack.c.bf16 %v4310_v37, %v4307_v25  ;;  %v4491_v20 = vpack.c.bf16 %v4487_v23, %v4484_v31  ;;  %v13022_v45 = vpop.f32.mrb[27].mxu1  ;;  %v13046_v41 = vpop.f32.mrb[23].mxu0  ;;  %v14248_v25 = vld [vmem:[%s16141_s1 + $0x8] sm:$0xff]   ;;  %v14250_v31 = vld [vmem:[%s16141_s1 + $0x10] sm:$0xff]  }
 0x6e9   :  { %v14256_v37 = vld [vmem:[%s16141_s1 + $0x28] sm:$0xff]   ;;  %v14258_v23 = vld [vmem:[%s16141_s1 + $0x30] sm:$0xff]  }
 0x6ea   :  { %4752 = vmatpush1.bf16.msra.mxu1 %v4314_v24 }
 0x6eb   :  { %4753 = vmatprep.subr.bf16.mxu1 %v14488_v55 }
 0x6ed   :  { %v4425_v59 = vpop.f32.mrb[28].mxu1  ;;  %v4602_v18 = vpop.f32.mrb[24].mxu0 }
 0x6ee   :  { %v13037_v4 = vpop.f32.mrb[29].mxu1  ;;  %v13061_v36 = vpop.f32.mrb[25].mxu0  ;;  %4754 = vmatpush1.bf16.msra.mxu1 %v4373_v34  ;;  %v14240_v34 = vld [vmem:[%s16066_s19 + $0x50] sm:$0xff]   ;;  %s16686_s19 = sld [smem:[%s16976_s0 + %s14505_s16]]  }
 0x6ef   :  { %v4428_v2 = vpop.f32.mrb[30].mxu1  ;;  %v4605_v62 = vpop.f32.mrb[26].mxu0  ;;  %4755 = vmatprep.subr.bf16.mxu1 %v14488_v55 }
 0x6f0   :  { %v4432_v44 = vpack.c.bf16 %v4428_v2, %v4425_v59  ;;  %v4609_v9 = vpack.c.bf16 %v4605_v62, %v4602_v18  ;;  %v13038_v13 = vpop.f32.mrb[31].mxu1  ;;  %v13062_v43 = vpop.f32.mrb[27].mxu0 }
 0x6f2   :  { %4756 = vmatpush1.bf16.msra.mxu1 %v4432_v44 }
 0x6f3   :  { %4757 = vmatprep.subr.bf16.mxu1 %v14488_v55 }
 0x6f5   :  { %v4543_v29 = vpop.f32.mrb[32].mxu1  ;;  %v4720_v42 = vpop.f32.mrb[28].mxu0 }
 0x6f6   :  { %v13053_v3 = vpop.f32.mrb[33].mxu1  ;;  %v13077_v35 = vpop.f32.mrb[29].mxu0  ;;  %4758 = vmatpush1.bf16.msra.mxu1 %v4491_v20 }
 0x6f7   :  { %v4546_v53 = vpop.f32.mrb[34].mxu1  ;;  %v4723_v14 = vpop.f32.mrb[30].mxu0  ;;  %4759 = vmatprep.subr.bf16.mxu1 %v14488_v55 }
 0x6f8   :  { %v4550_v11 = vpack.c.bf16 %v4546_v53, %v4543_v29  ;;  %v4727_v16 = vpack.c.bf16 %v4723_v14, %v4720_v42  ;;  %v13054_v33 = vpop.f32.mrb[35].mxu1  ;;  %v13078_v50 = vpop.f32.mrb[31].mxu0 }
 0x6fa   :  { %4760 = vmatpush1.bf16.msra.mxu1 %v4550_v11 }
 0x6fb   :  { %4761 = vmatprep.subr.bf16.mxu1 %v14488_v55 }
 0x6fd   :  { %v4661_v8 = vpop.f32.mrb[36].mxu1 }
 0x6fe   :  { %v13069_v47 = vpop.f32.mrb[37].mxu1  ;;  %4762 = vmatpush1.bf16.msra.mxu1 %v4609_v9 }
 0x6ff   :  { %v4664_v57 = vpop.f32.mrb[38].mxu1  ;;  %4763 = vmatprep.subr.bf16.mxu1 %v14488_v55 }
 0x700   :  { %v4668_v6 = vpack.c.bf16 %v4664_v57, %v4661_v8  ;;  %v13070_v39 = vpop.f32.mrb[39].mxu1  ;;  %v5106_v57 = vld [vmem:[%s10315_s9] sm:$0x1]  ;;  %s10334_s9 = sld [smem:[%s16976_s0 + %s14510_s6]]  }
 0x701   :  { %v14243_v39 = vld [vmem:[%s16136_s27 + $0x8] sm:$0xff]  }
 0x702   :  { %4764 = vmatpush1.bf16.msra.mxu1 %v4668_v6  ;;  %v14242_v6 = vld [vmem:[%s16136_s27] sm:$0xff]  }
 0x703   :  { %4765 = vmatprep.subr.bf16.mxu1 %v14488_v55 }
 0x706   :  { %4766 = vmatpush1.bf16.msra.mxu1 %v4727_v16 }
 0x707   :  { %13115 = vmatprep.subr.bf16.mxu1 %v14484_v38 }
 0x709   :  { %4782 = vmatmul.mubr.bf16.vlgmr.msra.gmra.mrb[40].mxu1 %v16058_v58 }
 0x70a   :  { %13116 = vmatpush3.bf16.msra.mxu1 %v14227_v30  ;;  %13123 = vmatprep.mubr.msk.bf16.mxu1 %vm14485_vm3, %v14484_v38  ;;  %v14244_v30 = vld [vmem:[%s16136_s27 + $0x10] sm:$0xff]  }
 0x70b   :  { %13117 = vmatprep.subr.bf16.mxu1 %v14484_v38 }
 0x70e   :  { %13118 = vmatpush3.bf16.msra.mxu1 %v14229_v54  ;;  %v14245_v54 = vld [vmem:[%s16136_s27 + $0x18] sm:$0xff]  }
 0x70f   :  { %13119 = vmatprep.subr.bf16.mxu1 %v14484_v38 }
 0x712   :  { %13120 = vmatpush3.bf16.msra.mxu1 %v14231_v63  ;;  %v14247_v63 = vld [vmem:[%s16146_s5] sm:$0xff]  }
 0x713   :  { %13121 = vmatprep.subr.bf16.mxu1 %v14484_v38 }
 0x716   :  { %13122 = vmatpush3.bf16.msra.mxu1 %v14233_v19  ;;  %v14251_v19 = vld [vmem:[%s16146_s5 + $0x10] sm:$0xff]  }
 0x717   :  { %13133 = vmatprep.subr.bf16.mxu1 %v14484_v38 }
 0x7dc   :  { %v4783_v12 = vpop.f32.mrb[40].mxu1 }
 0x7dd   :  { %v4784_v58 = vadd.f32 %v10744_v26, %v4783_v12  ;;  %v4785_v5 = vpop.f32.mrb[41].mxu1  ;;  %v14253_v26 = vld [vmem:[%s16146_s5 + $0x18] sm:$0xff]   ;;  %v14255_v12 = vld [vmem:[%s16146_s5 + $0x20] sm:$0xff]  }
 0x7de   :  { %v4786_v15 = vpop.f32.mrb[42].mxu1  ;;  %v14259_v5 = vld [vmem:[%s16146_s5 + $0x30] sm:$0xff]  }
 0x7df   :  { %v4789_v22 = vmax.f32 %v4784_v58, 0.0  ;;  %v4787_v52 = vpop.f32.mrb[43].mxu1  ;;  %v14257_v58 = vld [vmem:[%s16146_s5 + $0x28] sm:$0xff]   ;;  %v14260_v15 = vld [vmem:[%s16141_s1 + $0x38] sm:$0xff]   ;;  %s10328_s1 = sld [smem:[%s16976_s0 + %s14508_s28]]  }
 0x7e0   :  { %v5261_v52 = vlaneseq }
 0x7e1   :  { %v16100_v28 = vpack.c.bf16 %v4789_v22, %v4789_v22  ;;  %v14261_v22 = vld [vmem:[%s16146_s5 + $0x38] sm:$0xff]  }
 0x7e3   :  { %13088 = vmatmul.mubr.msk.bf16.vlgmr.msra.gmra.mrb[32].mxu0 %vm4064_vm4, %v16100_v28  ;;  %13124 = vmatmul.mubr.msk.bf16.vlgmr.msra.gmra.mrb[44].mxu1 %vm4064_vm4, %v16100_v28 }
 0x7e4   :  { %13092 = vmatpush3.bf16.msra.mxu0 %v14234_v0  ;;  %13099 = vmatprep.mubr.msk.bf16.mxu0 %vm14485_vm3, %v14484_v38  ;;  %v5262_v0 = vshrl.u32 %v5261_v52, 7  ;;  %v14305_v52 = vld [vmem:[%s16146_s5 + $0x128] sm:$0xff]  }
 0x7e5   :  { %13093 = vmatprep.subr.bf16.mxu0 %v14484_v38  ;;  %13149 = vmatprep.mubr.msk.bf16.mxu1 %vm14485_vm3, %v14484_v38 }
 0x7e6   :  { %13134 = vmatpush3.bf16.msra.mxu1 %v14246_v40 }
 0x7e7   :  { %13135 = vmatprep.subr.bf16.mxu1 %v14484_v38 }
 0x7e8   :  { %13094 = vmatpush3.bf16.msra.mxu0 %v14235_v27  ;;  %v5107_v27 = vld [vmem:[%s10317_s13] sm:$0x1]  ;;  %s10333_s13 = sld [smem:[%s16976_s0 + %s14511_s10]]  }
 0x7e9   :  { %13095 = vmatprep.subr.bf16.mxu0 %v14484_v38 }
 0x7ea   :  { %13136 = vmatpush3.bf16.msra.mxu1 %v14248_v25  ;;  %v14262_v25 = vld [vmem:[%s16136_s27 + $0x20] sm:$0xff]  }
 0x7eb   :  { %13137 = vmatprep.subr.bf16.mxu1 %v14484_v38 }
 0x7ec   :  { %13096 = vmatpush3.bf16.msra.mxu0 %v14236_v46 }
 0x7ed   :  { %13097 = vmatprep.subr.bf16.mxu0 %v14484_v38 }
 0x7ee   :  { %13138 = vmatpush3.bf16.msra.mxu1 %v14250_v31 }
 0x7ef   :  { %13139 = vmatprep.subr.bf16.mxu1 %v14484_v38 }
 0x7f0   :  { %13098 = vmatpush3.bf16.msra.mxu0 %v14237_v10 }
 0x7f1   :  { %13103 = vmatprep.subr.bf16.mxu0 %v14484_v38 }
 0x7f2   :  { %13140 = vmatpush3.bf16.msra.mxu1 %v14252_v32 }
 0x7f3   :  { %13100 = vmatmul.mubr.msk.bf16.vlgmr.msra.gmra.mrb[36].mxu0 %vm4064_vm4, %v16100_v28  ;;  %13141 = vmatprep.subr.bf16.mxu1 %v14484_v38 }
 0x7f4   :  { %13104 = vmatpush3.bf16.msra.mxu0 %v14238_v61  ;;  %13111 = vmatprep.mubr.msk.bf16.mxu0 %vm14485_vm3, %v14484_v38  ;;  %v5263_v61 = vsub.s32 0, %v5262_v0  ;;  %v14306_v0 = vld [vmem:[%s16146_s5 + $0xf0] sm:$0xff]  }
 0x7f5   :  { %13105 = vmatprep.subr.bf16.mxu0 %v14484_v38 }
 0x7f6   :  { %13142 = vmatpush3.bf16.msra.mxu1 %v14254_v48  ;;  %v14263_v48 = vld [vmem:[%s16136_s27 + $0x40] sm:$0xff]  }
 0x7f7   :  { %13143 = vmatprep.subr.bf16.mxu1 %v14484_v38 }
 0x7f8   :  { %13106 = vmatpush3.bf16.msra.mxu0 %v14239_v21 }
 0x7f9   :  { %13107 = vmatprep.subr.bf16.mxu0 %v14484_v38 }
 0x7fa   :  { %13144 = vmatpush3.bf16.msra.mxu1 %v14256_v37 }
 0x7fb   :  { %13145 = vmatprep.subr.bf16.mxu1 %v14484_v38 }
 0x7fc   :  { %13108 = vmatpush3.bf16.msra.mxu0 %v14240_v34 }
 0x7fd   :  { %13109 = vmatprep.subr.bf16.mxu0 %v14484_v38 }
 0x7fe   :  { %13146 = vmatpush3.bf16.msra.mxu1 %v14258_v23  ;;  %v14264_v23 = vld [vmem:[%s16136_s27 + $0x28] sm:$0xff]  }
 0x7ff   :  { %13147 = vmatprep.subr.bf16.mxu1 %v14484_v38 }
 0x800   :  { %13110 = vmatpush3.bf16.msra.mxu0 %v14241_v49 }
 0x801   :  { %13127 = vmatprep.subr.bf16.mxu0 %v14484_v38 }
 0x802   :  { %13148 = vmatpush3.bf16.msra.mxu1 %v14260_v15  ;;  %v14303_v15 = vld [vmem:[%s16146_s5 + $0x120] sm:$0xff]  }
 0x803   :  { %13112 = vmatmul.mubr.msk.bf16.vlgmr.msra.gmra.mrb[40].mxu0 %vm4064_vm4, %v16100_v28  ;;  %13185 = vmatprep.subr.bf16.mxu1 %v14484_v38 }
 0x804   :  { %13129 = vmatprep.mubr.msk.bf16.mxu0 %vm14485_vm3, %v14484_v38 }
 0x8b6   :  { %v4860_v24 = vpop.f32.mrb[32].mxu0  ;;  %v5082_v20 = vpop.f32.mrb[44].mxu1 }
 0x8b7   :  { %v13089_v45 = vpop.f32.mrb[33].mxu0  ;;  %v13125_v41 = vpop.f32.mrb[45].mxu1  ;;  %v4866_v13 = vpack.c.bf16 %v4860_v24, %v4860_v24  ;;  %v5088_v3 = vpack.c.bf16 %v5082_v20, %v5082_v20  ;;  %v14265_v24 = vld [vmem:[%s16136_s27 + $0x48] sm:$0xff]   ;;  %v14266_v20 = vld [vmem:[%s16136_s27 + $0x30] sm:$0xff]  }
 0x8b8   :  { %v4863_v59 = vpop.f32.mrb[34].mxu0  ;;  %v5085_v18 = vpop.f32.mrb[46].mxu1  ;;  %v14267_v45 = vld [vmem:[%s16136_s27 + $0x50] sm:$0xff]   ;;  %v14268_v41 = vld [vmem:[%s16136_s27 + $0x38] sm:$0xff]  }
 0x8b9   :  { %v13090_v4 = vpop.f32.mrb[35].mxu0  ;;  %v13126_v36 = vpop.f32.mrb[47].mxu1  ;;  %v5094_v50 = vrot.slane %v5088_v3, 2  ;;  %v14269_v59 = vld [vmem:[%s16136_s27 + $0x58] sm:$0xff]   ;;  %v14270_v18 = vld [vmem:[%s16146_s5 + $0x40] sm:$0xff]   ;;  %v14281_v3 = vld [vmem:[%s16146_s5 + $0xa8] sm:$0xff]  }
 0x8ba   :  { %v14271_v4 = vld [vmem:[%s16146_s5 + $0x80] sm:$0xff]   ;;  %v14272_v36 = vld [vmem:[%s16146_s5 + $0x48] sm:$0xff]  }
 0x8c6   :  { %v4934_v2 = vpop.f32.mrb[36].mxu0 }
 0x8c7   :  { %v4940_v62 = vpack.c.bf16 %v4934_v2, %v4934_v2  ;;  %v13101_v44 = vpop.f32.mrb[37].mxu0  ;;  %v14273_v2 = vld [vmem:[%s16146_s5 + $0x88] sm:$0xff]  }
 0x8c8   :  { %v4937_v9 = vpop.f32.mrb[38].mxu0  ;;  %v14275_v44 = vld [vmem:[%s16146_s5 + $0x90] sm:$0xff]  }
 0x8c9   :  { %v5090_v43 = vrot.slane %v4940_v62, 6  ;;  %v13102_v29 = vpop.f32.mrb[39].mxu0  ;;  %v14274_v62 = vld [vmem:[%s16146_s5 + $0x50] sm:$0xff]   ;;  %v14276_v9 = vld [vmem:[%s16146_s5 + $0x58] sm:$0xff]  }
 0x8ca   :  { %v14279_v29 = vld [vmem:[%s16146_s5 + $0xa0] sm:$0xff]  }
 0x8cb   :  { %v5098_v42 = vsel %vm5095_vm6, %v4866_v13, %v5090_v43  ;;  %v14277_v13 = vld [vmem:[%s16146_s5 + $0x98] sm:$0xff]   ;;  %v14278_v43 = vld [vmem:[%s16146_s5 + $0x60] sm:$0xff]  }
 0x8d6   :  { %v5008_v35 = vpop.f32.mrb[40].mxu0 }
 0x8d7   :  { %v5014_v53 = vpack.c.bf16 %v5008_v35, %v5008_v35  ;;  %v13113_v14 = vpop.f32.mrb[41].mxu0  ;;  %v14282_v35 = vld [vmem:[%s16146_s5 + $0x70] sm:$0xff]  }
 0x8d8   :  { %v5011_v11 = vpop.f32.mrb[42].mxu0  ;;  %v14284_v14 = vld [vmem:[%s16146_s5 + $0x78] sm:$0xff]  }
 0x8d9   :  { %v5092_v16 = vrot.slane %v5014_v53, 4  ;;  %v13114_v33 = vpop.f32.mrb[43].mxu0  ;;  %v14283_v53 = vld [vmem:[%s16146_s5 + $0xb0] sm:$0xff]   ;;  %v14285_v11 = vld [vmem:[%s16146_s5 + $0xb8] sm:$0xff]  }
 0x8da   :  { %v14287_v33 = vld [vmem:[%s16136_s27 + $0x80] sm:$0xff]  }
 0x8db   :  { %v5101_v8 = vsel %vm5099_vm7, %v5098_v42, %v5092_v16  ;;  %v14280_v42 = vld [vmem:[%s16146_s5 + $0x68] sm:$0xff]   ;;  %v14286_v16 = vld [vmem:[%s16136_s27 + $0x60] sm:$0xff]  }
 0x8dc   :  { %v5104_v47 = vsel %vm5102_vm8, %v5101_v8, %v5094_v50  ;;  %v14288_v50 = vld [vmem:[%s16136_s27 + $0x68] sm:$0xff]  }
 0x8dd   :  { %13128 = vmatpush3.bf16.msra.mxu0 %v5104_v47  ;;  %v14289_v8 = vld [vmem:[%s16136_s27 + $0x88] sm:$0xff]   ;;  %v14290_v47 = vld [vmem:[%s16136_s27 + $0x70] sm:$0xff]  }
 0x8de   :  { %13153 = vmatprep.subr.bf16.mxu0 %v14484_v38 }
 0x8e0   :  { %13130 = vmatmul.mubr.msk.bf16.vlgmr.msra.gmra.mrb[44].mxu0 %vm563_vm2, %v5106_v57  ;;  %v14291_v57 = vld [vmem:[%s16136_s27 + $0x90] sm:$0xff]  }
 0x8e1   :  { %13154 = vmatpush3.bf16.msra.mxu0 %v14242_v6  ;;  %13161 = vmatprep.mubr.msk.bf16.mxu0 %vm14485_vm3, %v14484_v38  ;;  %v14292_v6 = vld [vmem:[%s16136_s27 + $0x78] sm:$0xff]  }
 0x8e2   :  { %13155 = vmatprep.subr.bf16.mxu0 %v14484_v38 }
 0x8e5   :  { %13156 = vmatpush3.bf16.msra.mxu0 %v14243_v39  ;;  %v14293_v39 = vld [vmem:[%s16136_s27 + $0x98] sm:$0xff]  }
 0x8e6   :  { %13157 = vmatprep.subr.bf16.mxu0 %v14484_v38 }
 0x8e9   :  { %13158 = vmatpush3.bf16.msra.mxu0 %v14244_v30  ;;  %v14294_v30 = vld [vmem:[%s16146_s5 + $0xc0] sm:$0xff]  }
 0x8ea   :  { %13159 = vmatprep.subr.bf16.mxu0 %v14484_v38 }
 0x8ed   :  { %13160 = vmatpush3.bf16.msra.mxu0 %v14245_v54  ;;  %v14295_v54 = vld [vmem:[%s16146_s5 + $0x100] sm:$0xff]  }
 0x8ee   :  { %13165 = vmatprep.subr.bf16.mxu0 %v14484_v38 }
 0x8f0   :  { %13162 = vmatmul.mubr.msk.bf16.vlgmr.msra.gmra.mrb[48].mxu0 %vm4064_vm4, %v16100_v28 }
 0x8f1   :  { %13166 = vmatpush3.bf16.msra.mxu0 %v14247_v63  ;;  %13181 = vmatprep.mubr.msk.bf16.mxu0 %vm14485_vm3, %v14484_v38  ;;  %v14296_v63 = vld [vmem:[%s16146_s5 + $0xc8] sm:$0xff]  }
 0x8f2   :  { %13167 = vmatprep.subr.bf16.mxu0 %v14484_v38 }
 0x8f5   :  { %13168 = vmatpush3.bf16.msra.mxu0 %v14249_v60  ;;  %v14297_v60 = vld [vmem:[%s16146_s5 + $0x108] sm:$0xff]  }
 0x8f6   :  { %13169 = vmatprep.subr.bf16.mxu0 %v14484_v38 }
 0x8f9   :  { %13170 = vmatpush3.bf16.msra.mxu0 %v14251_v19  ;;  %v14298_v19 = vld [vmem:[%s16146_s5 + $0xd0] sm:$0xff]  }
 0x8fa   :  { %13171 = vmatprep.subr.bf16.mxu0 %v14484_v38 }
 0x8fd   :  { %13172 = vmatpush3.bf16.msra.mxu0 %v14253_v26  ;;  %v14299_v26 = vld [vmem:[%s16146_s5 + $0x110] sm:$0xff]  }
 0x8fe   :  { %13173 = vmatprep.subr.bf16.mxu0 %v14484_v38 }
 0x901   :  { %13174 = vmatpush3.bf16.msra.mxu0 %v14255_v12  ;;  %v14300_v12 = vld [vmem:[%s16146_s5 + $0xd8] sm:$0xff]  }
 0x902   :  { %13175 = vmatprep.subr.bf16.mxu0 %v14484_v38 }
 0x905   :  { %13176 = vmatpush3.bf16.msra.mxu0 %v14257_v58  ;;  %v14301_v58 = vld [vmem:[%s16146_s5 + $0x118] sm:$0xff]  }
 0x906   :  { %13177 = vmatprep.subr.bf16.mxu0 %v14484_v38 }
 0x909   :  { %13178 = vmatpush3.bf16.msra.mxu0 %v14259_v5  ;;  %v14302_v5 = vld [vmem:[%s16146_s5 + $0xe0] sm:$0xff]  }
 0x90a   :  { %13179 = vmatprep.subr.bf16.mxu0 %v14484_v38 }
 0x90d   :  { %13180 = vmatpush3.bf16.msra.mxu0 %v14261_v22  ;;  %v14304_v22 = vld [vmem:[%s16146_s5 + $0xe8] sm:$0xff]  }
 0x90e   :  { %13217 = vmatprep.subr.bf16.mxu0 %v14484_v38 }
 0x9b3   :  { %v5145_v46 = vpop.f32.mrb[44].mxu0 }
 0x9b4   :  { %v5146_v10 = vadd.f32 %v5145_v46, %v5107_v27  ;;  %v13131_v21 = vpop.f32.mrb[45].mxu0  ;;  %v14307_v27 = vld [vmem:[%s16146_s5 + $0x130] sm:$0xff]   ;;  %v14308_v46 = vld [vmem:[%s16146_s5 + $0xf8] sm:$0xff]  }
 0x9b5   :  { %v5148_v34 = vpop.f32.mrb[46].mxu0  ;;  %v14311_v21 = vld [vmem:[%s16136_s27 + $0xc0] sm:$0xff]  }
 0x9b6   :  { %v5151_v49 = vmax.f32 %v5146_v10, 0.0  ;;  %v13132_v40 = vpop.f32.mrb[47].mxu0  ;;  %v14309_v10 = vld [vmem:[%s16146_s5 + $0x138] sm:$0xff]   ;;  %v14312_v34 = vld [vmem:[%s16136_s27 + $0xa8] sm:$0xff]  }
 0x9b7   :  { %v14314_v40 = vld [vmem:[%s16136_s27 + $0xb0] sm:$0xff]  }
 0x9b8   :  { %v5169_v31 = vpack.c.bf16 %v5151_v49, %v5151_v49  ;;  %v5264_v32 = vrot.slane %v5151_v49, %v5263_v61  ;;  %v14310_v61 = vld [vmem:[%s16136_s27 + $0xa0] sm:$0xff]   ;;  %v14313_v49 = vld [vmem:[%s16136_s27 + $0xc8] sm:$0xff]  }
 0x9ba   :  { %v16207_v37 = vpack.c.bf16 %v5264_v32, %v5264_v32  ;;  %13150 = vmatmul.mubr.bf16.vlgmr.msra.gmra.mrb[48].mxu1 %v5169_v31  ;;  %v14316_v31 = vld [vmem:[%s16136_s27 + $0xb8] sm:$0xff]  }
 0x9bb   :  { %13186 = vmatpush3.bf16.msra.mxu1 %v14262_v25  ;;  %13193 = vmatprep.mubr.msk.bf16.mxu1 %vm14485_vm3, %v14484_v38  ;;  %v14315_v25 = vld [vmem:[%s16136_s27 + $0xd0] sm:$0xff]   ;;  %v14317_v32 = vld [vmem:[%s16136_s27 + $0xd8] sm:$0xff]  }
 0x9bc   :  { %13182 = vmatmul.mubr.bf16.vlgmr.msra.gmra.mrb[48].mxu0 %v16207_v37  ;;  %13187 = vmatprep.subr.bf16.mxu1 %v14484_v38 }
 0x9bd   :  { %13218 = vmatpush3.bf16.msra.mxu0 %v14263_v48  ;;  %13225 = vmatprep.mubr.msk.bf16.mxu0 %vm14485_vm3, %v14484_v38  ;;  %v14318_v48 = vld [vmem:[%s16146_s5 + $0x140] sm:$0xff]  }
 0x9be   :  { %13219 = vmatprep.subr.bf16.mxu0 %v14484_v38 }
 0x9bf   :  { %13188 = vmatpush3.bf16.msra.mxu1 %v14264_v23  ;;  %v14319_v23 = vld [vmem:[%s16146_s5 + $0x180] sm:$0xff]  }
 0x9c0   :  { %13189 = vmatprep.subr.bf16.mxu1 %v14484_v38 }
 0x9c1   :  { %13220 = vmatpush3.bf16.msra.mxu0 %v14265_v24  ;;  %v14320_v24 = vld [vmem:[%s16146_s5 + $0x148] sm:$0xff]  }
 0x9c2   :  { %13221 = vmatprep.subr.bf16.mxu0 %v14484_v38 }
 0x9c3   :  { %13190 = vmatpush3.bf16.msra.mxu1 %v14266_v20  ;;  %v14321_v20 = vld [vmem:[%s16146_s5 + $0x188] sm:$0xff]  }
 0x9c4   :  { %13191 = vmatprep.subr.bf16.mxu1 %v14484_v38 }
 0x9c5   :  { %13222 = vmatpush3.bf16.msra.mxu0 %v14267_v45  ;;  %v14322_v45 = vld [vmem:[%s16146_s5 + $0x150] sm:$0xff]  }
 0x9c6   :  { %13223 = vmatprep.subr.bf16.mxu0 %v14484_v38 }
 0x9c7   :  { %13192 = vmatpush3.bf16.msra.mxu1 %v14268_v41  ;;  %v14323_v41 = vld [vmem:[%s16146_s5 + $0x190] sm:$0xff]  }
 0x9c8   :  { %13197 = vmatprep.subr.bf16.mxu1 %v14484_v38 }
 0x9c9   :  { %13224 = vmatpush3.bf16.msra.mxu0 %v14269_v59  ;;  %v14324_v59 = vld [vmem:[%s16146_s5 + $0x158] sm:$0xff]  }
 0x9ca   :  { %13194 = vmatmul.mubr.msk.bf16.vlgmr.msra.gmra.mrb[52].mxu1 %vm4064_vm4, %v16100_v28  ;;  %13229 = vmatprep.subr.bf16.mxu0 %v14484_v38 }
 0x9cb   :  { %13198 = vmatpush3.bf16.msra.mxu1 %v14270_v18  ;;  %13213 = vmatprep.mubr.msk.bf16.mxu1 %vm14485_vm3, %v14484_v38  ;;  %v14325_v18 = vld [vmem:[%s16146_s5 + $0x198] sm:$0xff]  }
 0x9cc   :  { %13226 = vmatmul.mubr.msk.bf16.vlgmr.msra.gmra.mrb[52].mxu0 %vm4064_vm4, %v16100_v28  ;;  %13199 = vmatprep.subr.bf16.mxu1 %v14484_v38 }
 0x9cd   :  { %13230 = vmatpush3.bf16.msra.mxu0 %v14271_v4  ;;  %13245 = vmatprep.mubr.msk.bf16.mxu0 %vm14485_vm3, %v14484_v38  ;;  %v14326_v4 = vld [vmem:[%s16146_s5 + $0x160] sm:$0xff]  }
 0x9ce   :  { %13231 = vmatprep.subr.bf16.mxu0 %v14484_v38 }
 0x9cf   :  { %13200 = vmatpush3.bf16.msra.mxu1 %v14272_v36  ;;  %v14327_v36 = vld [vmem:[%s16146_s5 + $0x1a0] sm:$0xff]  }
 0x9d0   :  { %13201 = vmatprep.subr.bf16.mxu1 %v14484_v38 }
 0x9d1   :  { %13232 = vmatpush3.bf16.msra.mxu0 %v14273_v2  ;;  %v14328_v2 = vld [vmem:[%s16146_s5 + $0x168] sm:$0xff]  }
 0x9d2   :  { %13233 = vmatprep.subr.bf16.mxu0 %v14484_v38 }
 0x9d3   :  { %13202 = vmatpush3.bf16.msra.mxu1 %v14274_v62  ;;  %v14329_v62 = vld [vmem:[%s16146_s5 + $0x1a8] sm:$0xff]  }
 0x9d4   :  { %13203 = vmatprep.subr.bf16.mxu1 %v14484_v38 }
 0x9d5   :  { %13234 = vmatpush3.bf16.msra.mxu0 %v14275_v44  ;;  %v14330_v44 = vld [vmem:[%s16146_s5 + $0x170] sm:$0xff]  }
 0x9d6   :  { %13235 = vmatprep.subr.bf16.mxu0 %v14484_v38 }
 0x9d7   :  { %13204 = vmatpush3.bf16.msra.mxu1 %v14276_v9  ;;  %v14331_v9 = vld [vmem:[%s16146_s5 + $0x1b0] sm:$0xff]  }
 0x9d8   :  { %13205 = vmatprep.subr.bf16.mxu1 %v14484_v38 }
 0x9d9   :  { %13236 = vmatpush3.bf16.msra.mxu0 %v14277_v13  ;;  %v14332_v13 = vld [vmem:[%s16146_s5 + $0x178] sm:$0xff]  }
 0x9da   :  { %13237 = vmatprep.subr.bf16.mxu0 %v14484_v38 }
 0x9db   :  { %13206 = vmatpush3.bf16.msra.mxu1 %v14278_v43  ;;  %v14333_v43 = vld [vmem:[%s16146_s5 + $0x1b8] sm:$0xff]  }
 0x9dc   :  { %13207 = vmatprep.subr.bf16.mxu1 %v14484_v38 }
 0x9dd   :  { %13238 = vmatpush3.bf16.msra.mxu0 %v14279_v29  ;;  %v14334_v29 = vld [vmem:[%s16136_s27 + $0xe0] sm:$0xff]  }
 0x9de   :  { %13239 = vmatprep.subr.bf16.mxu0 %v14484_v38 }
 0x9df   :  { %13208 = vmatpush3.bf16.msra.mxu1 %v14280_v42  ;;  %v14335_v42 = vld [vmem:[%s16136_s27 + $0x100] sm:$0xff]  }
 0x9e0   :  { %13209 = vmatprep.subr.bf16.mxu1 %v14484_v38 }
 0x9e1   :  { %13240 = vmatpush3.bf16.msra.mxu0 %v14281_v3  ;;  %v14336_v3 = vld [vmem:[%s16136_s27 + $0xe8] sm:$0xff]  }
 0x9e2   :  { %13241 = vmatprep.subr.bf16.mxu0 %v14484_v38 }
 0x9e3   :  { %13210 = vmatpush3.bf16.msra.mxu1 %v14282_v35  ;;  %v14337_v35 = vld [vmem:[%s16136_s27 + $0x108] sm:$0xff]  }
 0x9e4   :  { %13211 = vmatprep.subr.bf16.mxu1 %v14484_v38 }
 0x9e5   :  { %13242 = vmatpush3.bf16.msra.mxu0 %v14283_v53  ;;  %v14338_v53 = vld [vmem:[%s16136_s27 + $0xf0] sm:$0xff]  }
 0x9e6   :  { %13243 = vmatprep.subr.bf16.mxu0 %v14484_v38 }
 0x9e7   :  { %13212 = vmatpush3.bf16.msra.mxu1 %v14284_v14  ;;  %v14339_v14 = vld [vmem:[%s16136_s27 + $0x110] sm:$0xff]  }
 0x9e8   :  { %13249 = vmatprep.subr.bf16.mxu1 %v14484_v38 }
 0x9e9   :  { %13244 = vmatpush3.bf16.msra.mxu0 %v14285_v11  ;;  %v14340_v11 = vld [vmem:[%s16136_s27 + $0xf8] sm:$0xff]  }
 0x9ea   :  { %13214 = vmatmul.mubr.bf16.vlgmr.msra.gmra.mrb[52].mxu1 %v16207_v37  ;;  %13281 = vmatprep.subr.bf16.mxu0 %v14484_v38 }
 0x9eb   :  { %13250 = vmatpush3.bf16.msra.mxu1 %v14286_v16  ;;  %13257 = vmatprep.mubr.msk.bf16.mxu1 %vm14485_vm3, %v14484_v38  ;;  %v14341_v16 = vld [vmem:[%s16136_s27 + $0x118] sm:$0xff]   ;;  %s16718_s27 = sld [smem:[%s16976_s0 + %s14507_s24]]  }
 0x9ec   :  { %13246 = vmatmul.mubr.bf16.vlgmr.msra.gmra.mrb[52].mxu0 %v16207_v37  ;;  %13251 = vmatprep.subr.bf16.mxu1 %v14484_v38 }
 0x9ed   :  { %13282 = vmatpush3.bf16.msra.mxu0 %v14287_v33  ;;  %13289 = vmatprep.mubr.msk.bf16.mxu0 %vm14485_vm3, %v14484_v38  ;;  %v14342_v33 = vld [vmem:[%s16146_s5 + $0x1c0] sm:$0xff]  }
 0x9ee   :  { %13283 = vmatprep.subr.bf16.mxu0 %v14484_v38 }
 0x9ef   :  { %13252 = vmatpush3.bf16.msra.mxu1 %v14288_v50  ;;  %v14343_v50 = vld [vmem:[%s16146_s5 + $0x200] sm:$0xff]  }
 0x9f0   :  { %13253 = vmatprep.subr.bf16.mxu1 %v14484_v38 }
 0x9f1   :  { %13284 = vmatpush3.bf16.msra.mxu0 %v14289_v8  ;;  %v14344_v8 = vld [vmem:[%s16146_s5 + $0x1c8] sm:$0xff]  }
 0x9f2   :  { %13285 = vmatprep.subr.bf16.mxu0 %v14484_v38 }
 0x9f3   :  { %13254 = vmatpush3.bf16.msra.mxu1 %v14290_v47  ;;  %v14345_v47 = vld [vmem:[%s16146_s5 + $0x208] sm:$0xff]  }
 0x9f4   :  { %13255 = vmatprep.subr.bf16.mxu1 %v14484_v38 }
 0x9f5   :  { %13286 = vmatpush3.bf16.msra.mxu0 %v14291_v57  ;;  %v14346_v57 = vld [vmem:[%s16146_s5 + $0x1d0] sm:$0xff]  }
 0x9f6   :  { %13287 = vmatprep.subr.bf16.mxu0 %v14484_v38 }
 0x9f7   :  { %13256 = vmatpush3.bf16.msra.mxu1 %v14292_v6  ;;  %v14347_v6 = vld [vmem:[%s16146_s5 + $0x210] sm:$0xff]  }
 0x9f8   :  { %13261 = vmatprep.subr.bf16.mxu1 %v14484_v38 }
 0x9f9   :  { %13288 = vmatpush3.bf16.msra.mxu0 %v14293_v39  ;;  %v14349_v39 = vld [vmem:[%s16146_s5 + $0x218] sm:$0xff]  }
 0x9fa   :  { %13258 = vmatmul.mubr.msk.bf16.vlgmr.msra.gmra.mrb[56].mxu1 %vm4064_vm4, %v16100_v28  ;;  %13293 = vmatprep.subr.bf16.mxu0 %v14484_v38 }
 0x9fb   :  { %13262 = vmatpush3.bf16.msra.mxu1 %v14294_v30  ;;  %13277 = vmatprep.mubr.msk.bf16.mxu1 %vm14485_vm3, %v14484_v38  ;;  %v14350_v30 = vld [vmem:[%s16146_s5 + $0x1e0] sm:$0xff]  }
 0x9fc   :  { %13290 = vmatmul.mubr.msk.bf16.vlgmr.msra.gmra.mrb[56].mxu0 %vm4064_vm4, %v16100_v28  ;;  %13263 = vmatprep.subr.bf16.mxu1 %v14484_v38 }
 0x9fd   :  { %13294 = vmatpush3.bf16.msra.mxu0 %v14295_v54  ;;  %13309 = vmatprep.mubr.msk.bf16.mxu0 %vm14485_vm3, %v14484_v38  ;;  %v14351_v54 = vld [vmem:[%s16146_s5 + $0x220] sm:$0xff]  }
 0x9fe   :  { %13295 = vmatprep.subr.bf16.mxu0 %v14484_v38 }
 0x9ff   :  { %13264 = vmatpush3.bf16.msra.mxu1 %v14296_v63  ;;  %v14352_v63 = vld [vmem:[%s16146_s5 + $0x1e8] sm:$0xff]  }
 0xa00   :  { %13265 = vmatprep.subr.bf16.mxu1 %v14484_v38 }
 0xa01   :  { %13296 = vmatpush3.bf16.msra.mxu0 %v14297_v60  ;;  %v14353_v60 = vld [vmem:[%s16146_s5 + $0x228] sm:$0xff]  }
 0xa02   :  { %13297 = vmatprep.subr.bf16.mxu0 %v14484_v38 }
 0xa03   :  { %13266 = vmatpush3.bf16.msra.mxu1 %v14298_v19  ;;  %v14354_v19 = vld [vmem:[%s16146_s5 + $0x1f0] sm:$0xff]  }
 0xa04   :  { %13267 = vmatprep.subr.bf16.mxu1 %v14484_v38 }
 0xa05   :  { %13298 = vmatpush3.bf16.msra.mxu0 %v14299_v26  ;;  %v14355_v26 = vld [vmem:[%s16146_s5 + $0x230] sm:$0xff]  }
 0xa06   :  { %13299 = vmatprep.subr.bf16.mxu0 %v14484_v38 }
 0xa07   :  { %13268 = vmatpush3.bf16.msra.mxu1 %v14300_v12  ;;  %v14356_v12 = vld [vmem:[%s16146_s5 + $0x1f8] sm:$0xff]  }
 0xa08   :  { %13269 = vmatprep.subr.bf16.mxu1 %v14484_v38 }
 0xa09   :  { %13300 = vmatpush3.bf16.msra.mxu0 %v14301_v58  ;;  %v14357_v58 = vld [vmem:[%s16146_s5 + $0x238] sm:$0xff]  }
 0xa0a   :  { %13301 = vmatprep.subr.bf16.mxu0 %v14484_v38 }
 0xa0b   :  { %13270 = vmatpush3.bf16.msra.mxu1 %v14302_v5  ;;  %v14358_v5 = vld [vmem:[%s16290_s17 + $0x10] sm:$0xff]  }
 0xa0c   :  { %13271 = vmatprep.subr.bf16.mxu1 %v14484_v38 }
 0xa0d   :  { %13302 = vmatpush3.bf16.msra.mxu0 %v14303_v15  ;;  %v14359_v15 = vld [vmem:[%s16290_s17 + $0x18] sm:$0xff]  }
 0xa0e   :  { %13303 = vmatprep.subr.bf16.mxu0 %v14484_v38 }
 0xa0f   :  { %13272 = vmatpush3.bf16.msra.mxu1 %v14304_v22 }
 0xa10   :  { %13273 = vmatprep.subr.bf16.mxu1 %v14484_v38 }
 0xa11   :  { %13304 = vmatpush3.bf16.msra.mxu0 %v14305_v52 }
 0xa12   :  { %13305 = vmatprep.subr.bf16.mxu0 %v14484_v38 }
 0xa13   :  { %13274 = vmatpush3.bf16.msra.mxu1 %v14306_v0 }
 0xa14   :  { %13275 = vmatprep.subr.bf16.mxu1 %v14484_v38 }
 0xa15   :  { %13306 = vmatpush3.bf16.msra.mxu0 %v14307_v27 }
 0xa16   :  { %13307 = vmatprep.subr.bf16.mxu0 %v14484_v38 }
 0xa17   :  { %13276 = vmatpush3.bf16.msra.mxu1 %v14308_v46 }
 0xa18   :  { %13313 = vmatprep.subr.bf16.mxu1 %v14484_v38 }
 0xa19   :  { %13308 = vmatpush3.bf16.msra.mxu0 %v14309_v10 }
 0xa1a   :  { %13278 = vmatmul.mubr.bf16.vlgmr.msra.gmra.mrb[56].mxu1 %v16207_v37  ;;  %13345 = vmatprep.subr.bf16.mxu0 %v14484_v38 }
 0xa1b   :  { %13314 = vmatpush3.bf16.msra.mxu1 %v14310_v61  ;;  %13321 = vmatprep.mubr.msk.bf16.mxu1 %vm14485_vm3, %v14484_v38 }
 0xa1c   :  { %13310 = vmatmul.mubr.bf16.vlgmr.msra.gmra.mrb[56].mxu0 %v16207_v37  ;;  %13315 = vmatprep.subr.bf16.mxu1 %v14484_v38 }
 0xa1d   :  { %13346 = vmatpush3.bf16.msra.mxu0 %v14311_v21  ;;  %13353 = vmatprep.mubr.msk.bf16.mxu0 %vm14485_vm3, %v14484_v38 }
 0xa1e   :  { %13347 = vmatprep.subr.bf16.mxu0 %v14484_v38 }
 0xa1f   :  { %13316 = vmatpush3.bf16.msra.mxu1 %v14312_v34 }
 0xa20   :  { %13317 = vmatprep.subr.bf16.mxu1 %v14484_v38 }
 0xa21   :  { %13348 = vmatpush3.bf16.msra.mxu0 %v14313_v49 }
 0xa22   :  { %13349 = vmatprep.subr.bf16.mxu0 %v14484_v38 }
 0xa23   :  { %13318 = vmatpush3.bf16.msra.mxu1 %v14314_v40 }
 0xa24   :  { %13319 = vmatprep.subr.bf16.mxu1 %v14484_v38 }
 0xa25   :  { %13350 = vmatpush3.bf16.msra.mxu0 %v14315_v25 }
 0xa26   :  { %13351 = vmatprep.subr.bf16.mxu0 %v14484_v38 }
 0xa27   :  { %13320 = vmatpush3.bf16.msra.mxu1 %v14316_v31 }
 0xa28   :  { %13325 = vmatprep.subr.bf16.mxu1 %v14484_v38 }
 0xa29   :  { %13352 = vmatpush3.bf16.msra.mxu0 %v14317_v32 }
 0xa2a   :  { %13322 = vmatmul.mubr.msk.bf16.vlgmr.msra.gmra.mrb[60].mxu1 %vm4064_vm4, %v16100_v28  ;;  %13357 = vmatprep.subr.bf16.mxu0 %v14484_v38 }
 0xa2b   :  { %13326 = vmatpush3.bf16.msra.mxu1 %v14318_v48  ;;  %13341 = vmatprep.mubr.msk.bf16.mxu1 %vm14485_vm3, %v14484_v38 }
 0xa2c   :  { %13354 = vmatmul.mubr.msk.bf16.vlgmr.msra.gmra.mrb[60].mxu0 %vm4064_vm4, %v16100_v28  ;;  %13327 = vmatprep.subr.bf16.mxu1 %v14484_v38 }
 0xa2d   :  { %13358 = vmatpush3.bf16.msra.mxu0 %v14319_v23  ;;  %13373 = vmatprep.mubr.msk.bf16.mxu0 %vm14485_vm3, %v14484_v38 }
 0xa2e   :  { %13359 = vmatprep.subr.bf16.mxu0 %v14484_v38 }
 0xa2f   :  { %13328 = vmatpush3.bf16.msra.mxu1 %v14320_v24 }
 0xa30   :  { %13329 = vmatprep.subr.bf16.mxu1 %v14484_v38 }
 0xa31   :  { %13360 = vmatpush3.bf16.msra.mxu0 %v14321_v20 }
 0xa32   :  { %13361 = vmatprep.subr.bf16.mxu0 %v14484_v38 }
 0xa33   :  { %13330 = vmatpush3.bf16.msra.mxu1 %v14322_v45 }
 0xa34   :  { %13331 = vmatprep.subr.bf16.mxu1 %v14484_v38 }
 0xa35   :  { %13362 = vmatpush3.bf16.msra.mxu0 %v14323_v41 }
 0xa36   :  { %13363 = vmatprep.subr.bf16.mxu0 %v14484_v38 }
 0xa37   :  { %13332 = vmatpush3.bf16.msra.mxu1 %v14324_v59 }
 0xa38   :  { %13333 = vmatprep.subr.bf16.mxu1 %v14484_v38 }
 0xa39   :  { %13364 = vmatpush3.bf16.msra.mxu0 %v14325_v18 }
 0xa3a   :  { %13365 = vmatprep.subr.bf16.mxu0 %v14484_v38 }
 0xa3b   :  { %13334 = vmatpush3.bf16.msra.mxu1 %v14326_v4 }
 0xa3c   :  { %13335 = vmatprep.subr.bf16.mxu1 %v14484_v38 }
 0xa3d   :  { %13366 = vmatpush3.bf16.msra.mxu0 %v14327_v36 }
 0xa3e   :  { %13367 = vmatprep.subr.bf16.mxu0 %v14484_v38 }
 0xa3f   :  { %13336 = vmatpush3.bf16.msra.mxu1 %v14328_v2 }
 0xa40   :  { %13337 = vmatprep.subr.bf16.mxu1 %v14484_v38 }
 0xa41   :  { %13368 = vmatpush3.bf16.msra.mxu0 %v14329_v62 }
 0xa42   :  { %13369 = vmatprep.subr.bf16.mxu0 %v14484_v38 }
 0xa43   :  { %13338 = vmatpush3.bf16.msra.mxu1 %v14330_v44 }
 0xa44   :  { %13339 = vmatprep.subr.bf16.mxu1 %v14484_v38 }
 0xa45   :  { %13370 = vmatpush3.bf16.msra.mxu0 %v14331_v9 }
 0xa46   :  { %13371 = vmatprep.subr.bf16.mxu0 %v14484_v38 }
 0xa47   :  { %13340 = vmatpush3.bf16.msra.mxu1 %v14332_v13 }
 0xa48   :  { %13377 = vmatprep.subr.bf16.mxu1 %v14484_v38 }
 0xa49   :  { %13372 = vmatpush3.bf16.msra.mxu0 %v14333_v43 }
 0xa4a   :  { %13342 = vmatmul.mubr.bf16.vlgmr.msra.gmra.mrb[60].mxu1 %v16207_v37  ;;  %13409 = vmatprep.subr.bf16.mxu0 %v14484_v38 }
 0xa4b   :  { %13378 = vmatpush3.bf16.msra.mxu1 %v14334_v29  ;;  %13385 = vmatprep.mubr.msk.bf16.mxu1 %vm14485_vm3, %v14484_v38 }
 0xa4c   :  { %13374 = vmatmul.mubr.bf16.vlgmr.msra.gmra.mrb[60].mxu0 %v16207_v37  ;;  %13379 = vmatprep.subr.bf16.mxu1 %v14484_v38 }
 0xa4d   :  { %13410 = vmatpush3.bf16.msra.mxu0 %v14335_v42  ;;  %13417 = vmatprep.mubr.msk.bf16.mxu0 %vm14485_vm3, %v14484_v38 }
 0xa4e   :  { %13411 = vmatprep.subr.bf16.mxu0 %v14484_v38 }
 0xa4f   :  { %13380 = vmatpush3.bf16.msra.mxu1 %v14336_v3 }
 0xa50   :  { %13381 = vmatprep.subr.bf16.mxu1 %v14484_v38 }
 0xa51   :  { %13412 = vmatpush3.bf16.msra.mxu0 %v14337_v35 }
 0xa52   :  { %13413 = vmatprep.subr.bf16.mxu0 %v14484_v38 }
 0xa53   :  { %13382 = vmatpush3.bf16.msra.mxu1 %v14338_v53 }
 0xa54   :  { %13383 = vmatprep.subr.bf16.mxu1 %v14484_v38 }
 0xa55   :  { %13414 = vmatpush3.bf16.msra.mxu0 %v14339_v14 }
 0xa56   :  { %13415 = vmatprep.subr.bf16.mxu0 %v14484_v38 }
 0xa57   :  { %13384 = vmatpush3.bf16.msra.mxu1 %v14340_v11 }
 0xa58   :  { %13389 = vmatprep.subr.bf16.mxu1 %v14484_v38 }
 0xa59   :  { %13416 = vmatpush3.bf16.msra.mxu0 %v14341_v16 }
 0xa5a   :  { %13386 = vmatmul.mubr.msk.bf16.vlgmr.msra.gmra.mrb[64].mxu1 %vm4064_vm4, %v16100_v28  ;;  %13421 = vmatprep.subr.bf16.mxu0 %v14484_v38 }
 0xa5b   :  { %13390 = vmatpush3.bf16.msra.mxu1 %v14342_v33  ;;  %13405 = vmatprep.mubr.msk.bf16.mxu1 %vm14485_vm3, %v14484_v38 }
 0xa5c   :  { %13418 = vmatmul.mubr.msk.bf16.vlgmr.msra.gmra.mrb[64].mxu0 %vm4064_vm4, %v16100_v28  ;;  %13391 = vmatprep.subr.bf16.mxu1 %v14484_v38  ;;  %v14348_v28 = vld [vmem:[%s16146_s5 + $0x1d8] sm:$0xff]   ;;  %s16902_s5 = sld [smem:[%s16976_s0 + %s14509_s2]]  }
 0xa5d   :  { %13422 = vmatpush3.bf16.msra.mxu0 %v14343_v50  ;;  %13437 = vmatprep.mubr.msk.bf16.mxu0 %vm14485_vm3, %v14484_v38 }
 0xa5e   :  { %13423 = vmatprep.subr.bf16.mxu0 %v14484_v38 }
 0xa5f   :  { %13392 = vmatpush3.bf16.msra.mxu1 %v14344_v8 }
 0xa60   :  { %13393 = vmatprep.subr.bf16.mxu1 %v14484_v38 }
 0xa61   :  { %13424 = vmatpush3.bf16.msra.mxu0 %v14345_v47 }
 0xa62   :  { %13425 = vmatprep.subr.bf16.mxu0 %v14484_v38 }
 0xa63   :  { %13394 = vmatpush3.bf16.msra.mxu1 %v14346_v57 }
 0xa64   :  { %13395 = vmatprep.subr.bf16.mxu1 %v14484_v38 }
 0xa65   :  { %13426 = vmatpush3.bf16.msra.mxu0 %v14347_v6 }
 0xa66   :  { %13427 = vmatprep.subr.bf16.mxu0 %v14484_v38 }
 0xa67   :  { %13396 = vmatpush3.bf16.msra.mxu1 %v14348_v28 }
 0xa68   :  { %13397 = vmatprep.subr.bf16.mxu1 %v14484_v38 }
 0xa69   :  { %13428 = vmatpush3.bf16.msra.mxu0 %v14349_v39 }
 0xa6a   :  { %13429 = vmatprep.subr.bf16.mxu0 %v14484_v38 }
 0xa6b   :  { %13398 = vmatpush3.bf16.msra.mxu1 %v14350_v30 }
 0xa6c   :  { %13399 = vmatprep.subr.bf16.mxu1 %v14484_v38 }
 0xa6d   :  { %13430 = vmatpush3.bf16.msra.mxu0 %v14351_v54 }
 0xa6e   :  { %13431 = vmatprep.subr.bf16.mxu0 %v14484_v38 }
 0xa6f   :  { %13400 = vmatpush3.bf16.msra.mxu1 %v14352_v63 }
 0xa70   :  { %13401 = vmatprep.subr.bf16.mxu1 %v14484_v38 }
 0xa71   :  { %13432 = vmatpush3.bf16.msra.mxu0 %v14353_v60 }
 0xa72   :  { %13433 = vmatprep.subr.bf16.mxu0 %v14484_v38 }
 0xa73   :  { %13402 = vmatpush3.bf16.msra.mxu1 %v14354_v19 }
 0xa74   :  { %13403 = vmatprep.subr.bf16.mxu1 %v14484_v38 }
 0xa75   :  { %13434 = vmatpush3.bf16.msra.mxu0 %v14355_v26 }
 0xa76   :  { %13435 = vmatprep.subr.bf16.mxu0 %v14484_v38 }
 0xa77   :  { %13404 = vmatpush3.bf16.msra.mxu1 %v14356_v12 }
 0xa78   :  { %13441 = vmatprep.subr.bf16.mxu1 %v14484_v38 }
 0xa79   :  { %13436 = vmatpush3.bf16.msra.mxu0 %v14357_v58 }
 0xa7a   :  { %13406 = vmatmul.mubr.bf16.vlgmr.msra.gmra.mrb[64].mxu1 %v16207_v37  ;;  %13477 = vmatprep.subr.bf16.mxu0 %v14484_v38 }
 0xa7b   :  { %13447 = vmatprep.mubr.msk.bf16.mxu1 %vm14485_vm3, %v14484_v38 }
 0xa7c   :  { %13438 = vmatmul.mubr.bf16.vlgmr.msra.gmra.mrb[64].mxu0 %v16207_v37  ;;  %v5170_v37 = vld [vmem:[%s10319_s21] sm:$0x1]  ;;  %s10337_s21 = sld [smem:[%s16976_s0 + %s14513_s18]]  }
 0xa7d   :  { %13478 = vmatpush3.bf16.msra.mxu0 %v14358_v5  ;;  %13481 = vmatprep.mubr.msk.bf16.mxu0 %vm14485_vm3, %v14484_v38 }
 0xa7e   :  { %13479 = vmatprep.subr.bf16.mxu0 %v14484_v38 }
 0xa81   :  { %13480 = vmatpush3.bf16.msra.mxu0 %v14359_v15 }
 0xa82   :  { %13485 = vmatprep.subr.bf16.mxu0 %v14484_v38 }
 0xa84   :  { %13482 = vmatmul.mubr.msk.bf16.vlgmr.msra.gmra.mrb[68].mxu0 %vm4210_vm5, %v15993_v51 }
 0xa85   :  { %13493 = vmatprep.mubr.msk.bf16.mxu0 %vm14485_vm3, %v14484_v38 }
 0xa8d   :  { %v5253_v22 = vpop.f32.mrb[48].mxu1 }
 0xa8e   :  { %v5254_v52 = vadd.f32 %v5253_v22, %v5170_v37  ;;  %v13151_v0 = vpop.f32.mrb[49].mxu1 }
 0xa8f   :  { %v5256_v27 = vpop.f32.mrb[50].mxu1  ;;  %v5436_v46 = vpop.f32.mrb[48].mxu0 }
 0xa90   :  { %5260 = vst.msk [vmem:[%s10336_s25] sm:$0x1] %vm5259_vm9, %v5254_v52  ;;  %v13152_v10 = vpop.f32.mrb[51].mxu1  ;;  %v13183_v61 = vpop.f32.mrb[49].mxu0  ;;  %v5442_v48 = vpack.c.bf16 %v5436_v46, %v5436_v46 }
 0xa91   :  { %v5439_v21 = vpop.f32.mrb[50].mxu0  ;;  %v6903_v61 = vld [vmem:[%s10320_s29] sm:$0x3] }
 0xa92   :  { %v13184_v34 = vpop.f32.mrb[51].mxu0  ;;  %v14364_v21 = vld [vmem:[%s16500_s7 + $0x20] sm:$0xff]  }
 0xa93   :  { %13486 = vmatpush3.bf16.msra.mxu0 %v14364_v21  ;;  %v14366_v34 = vld [vmem:[%s16500_s7 + $0x28] sm:$0xff]   ;;  %v14403_v21 = vld [vmem:[%s16500_s7 + $0xd0] sm:$0xff]  }
 0xa94   :  { %13487 = vmatprep.subr.bf16.mxu0 %v14484_v38 }
 0xa97   :  { %13488 = vmatpush3.bf16.msra.mxu0 %v14366_v34  ;;  %v14404_v34 = vld [vmem:[%s16500_s7 + $0xf0] sm:$0xff]  }
 0xa98   :  { %13489 = vmatprep.subr.bf16.mxu0 %v14484_v38 }
 0xabd   :  { %v5615_v49 = vpop.f32.mrb[52].mxu1 }
 0xabe   :  { %v5621_v40 = vpack.c.bf16 %v5615_v49, %v5615_v49  ;;  %v13215_v25 = vpop.f32.mrb[53].mxu1  ;;  %v14368_v49 = vld [vmem:[%s16500_s7 + $0x30] sm:$0xff]  }
 0xabf   :  { %v5618_v31 = vpop.f32.mrb[54].mxu1  ;;  %v5794_v32 = vpop.f32.mrb[52].mxu0  ;;  %13490 = vmatpush3.bf16.msra.mxu0 %v14368_v49  ;;  %v14405_v49 = vld [vmem:[%s16500_s7 + $0xd8] sm:$0xff]  }
 0xac0   :  { %v6876_v23 = vrot.slane %v5621_v40, 6  ;;  %v5800_v24 = vpack.c.bf16 %v5794_v32, %v5794_v32  ;;  %v13216_v20 = vpop.f32.mrb[55].mxu1  ;;  %v13247_v45 = vpop.f32.mrb[53].mxu0  ;;  %13491 = vmatprep.subr.bf16.mxu0 %v14484_v38  ;;  %v11109_v40 = vld [vmem:[%s10323_s11] ss:$0 sm:$0xff] }
 0xac1   :  { %v5797_v41 = vpop.f32.mrb[54].mxu0 }
 0xac2   :  { %v6889_v59 = vsel %vm5095_vm6, %v5442_v48, %v6876_v23  ;;  %v6878_v18 = vrot.slane %v5800_v24, 4  ;;  %v13248_v4 = vpop.f32.mrb[55].mxu0  ;;  %v14360_v41 = vld [vmem:[%s10324_s3] sm:$0xff]  }
 0xac3   :  { %v14363_v4 = vld [vmem:[%s16500_s7] sm:$0xff]  }
 0xac4   :  { %v6891_v36 = vsel %vm5099_vm7, %v6889_v59, %v6878_v18  ;;  %v14361_v59 = vld [vmem:[%s16290_s17] sm:$0xff]   ;;  %v14362_v18 = vld [vmem:[%s16290_s17 + $0x8] sm:$0xff]  }
 0xaed   :  { %v5973_v2 = vpop.f32.mrb[56].mxu1 }
 0xaee   :  { %v5979_v62 = vpack.c.bf16 %v5973_v2, %v5973_v2  ;;  %v13279_v44 = vpop.f32.mrb[57].mxu1  ;;  %v14367_v2 = vld [vmem:[%s16500_s7 + $0x10] sm:$0xff]  }
 0xaef   :  { %v5976_v9 = vpop.f32.mrb[58].mxu1  ;;  %v6152_v13 = vpop.f32.mrb[56].mxu0  ;;  %v14370_v44 = vld [vmem:[%s16500_s7 + $0x38] sm:$0xff]  }
 0xaf0   :  { %v6880_v43 = vrot.slane %v5979_v62, 2  ;;  %v13280_v29 = vpop.f32.mrb[59].mxu1  ;;  %v13311_v42 = vpop.f32.mrb[57].mxu0  ;;  %v6158_v8 = vpack.c.bf16 %v6152_v13, %v6152_v13  ;;  %v14369_v62 = vld [vmem:[%s16500_s7 + $0x18] sm:$0xff]   ;;  %13492 = vmatpush3.bf16.msra.mxu0 %v14370_v44 }
 0xaf1   :  { %v6155_v3 = vpop.f32.mrb[58].mxu0  ;;  %13517 = vmatprep.subr.bf16.mxu0 %v14484_v38  ;;  %v14371_v29 = vld [vmem:[%s16290_s17 + $0x20] sm:$0xff]   ;;  %v14372_v42 = vld [vmem:[%s16290_s17 + $0x30] sm:$0xff]  }
 0xaf2   :  { %v13312_v35 = vpop.f32.mrb[59].mxu0  ;;  %v6893_v53 = vsel %vm5102_vm8, %v6891_v36, %v6880_v43  ;;  %v14365_v36 = vld [vmem:[%s16500_s7 + $0x8] sm:$0xff]  }
 0xaf3   :  { %13442 = vmatpush3.bf16.msra.mxu1 %v6893_v53  ;;  %v14373_v53 = vld [vmem:[%s16290_s17 + $0x28] sm:$0xff]  }
 0xaf4   :  { %13443 = vmatprep.subr.bf16.mxu1 %v14484_v38 }
 0xb1d   :  { %v6331_v14 = vpop.f32.mrb[60].mxu1 }
 0xb1e   :  { %v6337_v11 = vpack.c.bf16 %v6331_v14, %v6331_v14  ;;  %v13343_v16 = vpop.f32.mrb[61].mxu1  ;;  %v14374_v14 = vld [vmem:[%s16290_s17 + $0x38] sm:$0xff]  }
 0xb1f   :  { %v6334_v33 = vpop.f32.mrb[62].mxu1  ;;  %v6510_v50 = vpop.f32.mrb[60].mxu0  ;;  %v14376_v16 = vld [vmem:[%s16500_s7 + $0x60] sm:$0xff]  }
 0xb20   :  { %v6882_v47 = vrot.slane %v6337_v11, 6  ;;  %v6516_v57 = vpack.c.bf16 %v6510_v50, %v6510_v50  ;;  %v13344_v6 = vpop.f32.mrb[63].mxu1  ;;  %v13375_v28 = vpop.f32.mrb[61].mxu0  ;;  %v14375_v11 = vld [vmem:[%s16500_s7 + $0x40] sm:$0xff]   ;;  %v14377_v33 = vld [vmem:[%s16500_s7 + $0x48] sm:$0xff]  }
 0xb21   :  { %v6513_v39 = vpop.f32.mrb[62].mxu0  ;;  %v14378_v50 = vld [vmem:[%s16500_s7 + $0x68] sm:$0xff]   ;;  %v14382_v6 = vld [vmem:[%s16500_s7 + $0x78] sm:$0xff]   ;;  %v14383_v28 = vld [vmem:[%s16290_s17 + $0x40] sm:$0xff]  }
 0xb22   :  { %v6897_v30 = vsel %vm5095_vm6, %v6158_v8, %v6882_v47  ;;  %v6884_v54 = vrot.slane %v6516_v57, 4  ;;  %v13376_v63 = vpop.f32.mrb[63].mxu0  ;;  %v14379_v8 = vld [vmem:[%s16500_s7 + $0x50] sm:$0xff]   ;;  %v14381_v57 = vld [vmem:[%s16500_s7 + $0x58] sm:$0xff]  }
 0xb23   :  { %v14380_v47 = vld [vmem:[%s16500_s7 + $0x70] sm:$0xff]   ;;  %v14387_v63 = vld [vmem:[%s16500_s7 + $0x80] sm:$0xff]  }
 0xb24   :  { %v6899_v60 = vsel %vm5099_vm7, %v6897_v30, %v6884_v54  ;;  %v14384_v39 = vld [vmem:[%s16290_s17 + $0x50] sm:$0xff]   ;;  %v14385_v30 = vld [vmem:[%s16290_s17 + $0x48] sm:$0xff]   ;;  %v14386_v54 = vld [vmem:[%s16290_s17 + $0x58] sm:$0xff]  }
 0xb4d   :  { %v6689_v19 = vpop.f32.mrb[64].mxu1 }
 0xb4e   :  { %v6695_v26 = vpack.c.bf16 %v6689_v19, %v6689_v19  ;;  %v13407_v12 = vpop.f32.mrb[65].mxu1  ;;  %v14389_v19 = vld [vmem:[%s16500_s7 + $0x88] sm:$0xff]  }
 0xb4f   :  { %v6692_v58 = vpop.f32.mrb[66].mxu1  ;;  %v6868_v5 = vpop.f32.mrb[64].mxu0  ;;  %v14391_v12 = vld [vmem:[%s16500_s7 + $0x90] sm:$0xff]  }
 0xb50   :  { %v6886_v15 = vrot.slane %v6695_v26, 2  ;;  %v13408_v37 = vpop.f32.mrb[67].mxu1  ;;  %v13439_v22 = vpop.f32.mrb[65].mxu0  ;;  %v6874_v0 = vpack.c.bf16 %v6868_v5, %v6868_v5  ;;  %v14390_v26 = vld [vmem:[%s16500_s7 + $0xa8] sm:$0xff]   ;;  %v14392_v58 = vld [vmem:[%s16500_s7 + $0xb0] sm:$0xff]   ;;  %v14393_v5 = vld [vmem:[%s16500_s7 + $0x98] sm:$0xff]  }
 0xb51   :  { %v6871_v52 = vpop.f32.mrb[66].mxu0  ;;  %v14395_v37 = vld [vmem:[%s16290_s17 + $0x60] sm:$0xff]   ;;  %v14396_v22 = vld [vmem:[%s16290_s17 + $0x70] sm:$0xff]  }
 0xb52   :  { %v13440_v27 = vpop.f32.mrb[67].mxu0  ;;  %v6901_v46 = vsel %vm5102_vm8, %v6899_v60, %v6886_v15  ;;  %v6916_v10 = vsel %vm5095_vm6, %v6874_v0, 0  ;;  %v14388_v60 = vld [vmem:[%s16500_s7 + $0xa0] sm:$0xff]   ;;  %v14394_v15 = vld [vmem:[%s16500_s7 + $0xb8] sm:$0xff]   ;;  %v14397_v52 = vld [vmem:[%s16290_s17 + $0x68] sm:$0xff]  }
 0xb53   :  { %13444 = vmatpush3.bf16.msra.mxu1 %v6901_v46  ;;  %v14398_v0 = vld [vmem:[%s16290_s17 + $0x78] sm:$0xff]   ;;  %v14399_v27 = vld [vmem:[%s16500_s7 + $0xc0] sm:$0xff]  }
 0xb54   :  { %13445 = vmatprep.subr.bf16.mxu1 %v14484_v38  ;;  %v14400_v46 = vld [vmem:[%s16500_s7 + $0xe0] sm:$0xff]  }
 0xb57   :  { %13446 = vmatpush3.bf16.msra.mxu1 %v6916_v10  ;;  %v14401_v10 = vld [vmem:[%s16500_s7 + $0xc8] sm:$0xff]  }
 0xb58   :  { %13451 = vmatprep.subr.bf16.mxu1 %v14484_v38 }
 0xb5a   :  { %13448 = vmatmul.mubr.msk.bf16.vlgmr.msra.gmra.mrb[68].mxu1 %vm6911_vm10, %v6903_v61  ;;  %v14402_v61 = vld [vmem:[%s16500_s7 + $0xe8] sm:$0xff]  }
 0xb5b   :  { %13453 = vmatprep.mubr.msk.bf16.mxu1 %vm14485_vm3, %v14484_v38 }
 0xc2d   :  { %v6952_v25 = vpop.f32.mrb[68].mxu1 }
 0xc2e   :  { %v6953_v31 = vadd.f32 %v11109_v40, %v6952_v25  ;;  %v13449_v32 = vpop.f32.mrb[69].mxu1  ;;  %v14406_v40 = vld [vmem:[%s16500_s7 + $0xf8] sm:$0xff]   ;;  %v14407_v25 = vld [vmem:[%s16290_s17 + $0x80] sm:$0xff]  }
 0xc2f   :  { %v6955_v48 = vpop.f32.mrb[70].mxu1  ;;  %v14409_v32 = vld [vmem:[%s16500_s7 + $0x100] sm:$0xff]  }
 0xc30   :  { %v6958_v23 = vmax.f32 %v6953_v31, 0.0  ;;  %v13450_v24 = vpop.f32.mrb[71].mxu1  ;;  %v14408_v31 = vld [vmem:[%s16290_s17 + $0x88] sm:$0xff]   ;;  %s10335_s17 = sld [smem:[%s16976_s0 + %s14512_s14]]  }
 0xc31   :  { %v14410_v48 = vld [vmem:[%s16500_s7 + $0x108] sm:$0xff]   ;;  %v14412_v24 = vld [vmem:[%s16500_s7 + $0x118] sm:$0xff]  }
 0xc32   :  { %v6961_v20 = vpack.c.bf16 %v6958_v23, %v6958_v23  ;;  %v14411_v23 = vld [vmem:[%s16500_s7 + $0x110] sm:$0xff]  }
 0xc34   :  { %v6972_v45 = vsel %vm5095_vm6, %v6961_v20, 0 }
 0xc35   :  { %13452 = vmatpush3.bf16.msra.mxu1 %v6972_v45 }
 0xc36   :  { %13457 = vmatprep.subr.bf16.mxu1 %v14484_v38 }
 0xc38   :  { %13454 = vmatmul.mubr.msk.bf16.vlgmr.msra.gmra.mrb[72].mxu1 %vm6967_vm11, %v14360_v41 }
 0xc39   :  { %13458 = vmatpush3.bf16.msra.mxu1 %v14361_v59  ;;  %13461 = vmatprep.mubr.msk.bf16.mxu1 %vm14485_vm3, %v14484_v38 }
 0xc3a   :  { %13459 = vmatprep.subr.bf16.mxu1 %v14484_v38 }
 0xc3d   :  { %13460 = vmatpush3.bf16.msra.mxu1 %v14362_v18 }
 0xc3e   :  { %13465 = vmatprep.subr.bf16.mxu1 %v14484_v38 }
 0xc40   :  { %13462 = vmatmul.mubr.msk.bf16.vlgmr.msra.gmra.mrb[76].mxu1 %vm4210_vm5, %v15993_v51 }
 0xc41   :  { %13466 = vmatpush3.bf16.msra.mxu1 %v14363_v4  ;;  %13473 = vmatprep.mubr.msk.bf16.mxu1 %vm14485_vm3, %v14484_v38 }
 0xc42   :  { %13467 = vmatprep.subr.bf16.mxu1 %v14484_v38 }
 0xc45   :  { %13468 = vmatpush3.bf16.msra.mxu1 %v14365_v36 }
 0xc46   :  { %13469 = vmatprep.subr.bf16.mxu1 %v14484_v38 }
 0xc49   :  { %13470 = vmatpush3.bf16.msra.mxu1 %v14367_v2 }
 0xc4a   :  { %13471 = vmatprep.subr.bf16.mxu1 %v14484_v38 }
 0xc4d   :  { %13472 = vmatpush3.bf16.msra.mxu1 %v14369_v62 }
 0xc4e   :  { %13497 = vmatprep.subr.bf16.mxu1 %v14484_v38 }
 0xd0b   :  { %v7008_v9 = vpop.f32.mrb[72].mxu1 }
 0xd0c   :  { %v13455_v13 = vpop.f32.mrb[73].mxu1 }
 0xd0d   :  { %v7011_v43 = vpop.f32.mrb[74].mxu1 }
 0xd0e   :  { %v16535_v3 = vpack.c.bf16 %v7011_v43, %v7008_v9  ;;  %v13456_v35 = vpop.f32.mrb[75].mxu1 }
 0xd10   :  { %13474 = vmatmul.mubr.msk.bf16.vlgmr.msra.gmra.mrb[76].mxu1 %vm4064_vm4, %v16535_v3  ;;  %13494 = vmatmul.mubr.msk.bf16.vlgmr.msra.gmra.mrb[68].mxu0 %vm4064_vm4, %v16535_v3 }
 0xd11   :  { %13498 = vmatpush3.bf16.msra.mxu1 %v14371_v29  ;;  %13518 = vmatpush3.bf16.msra.mxu0 %v14372_v42 }
 0xd12   :  { %13499 = vmatprep.subr.bf16.mxu1 %v14484_v38  ;;  %13519 = vmatprep.subr.bf16.mxu0 %v14484_v38 }
 0xd13   :  { %13501 = vmatprep.mubr.msk.bf16.mxu1 %vm14485_vm3, %v14484_v38  ;;  %13521 = vmatprep.mubr.msk.bf16.mxu0 %vm14485_vm3, %v14484_v38 }
 0xd15   :  { %13500 = vmatpush3.bf16.msra.mxu1 %v14373_v53  ;;  %13520 = vmatpush3.bf16.msra.mxu0 %v14374_v14 }
 0xd16   :  { %13505 = vmatprep.subr.bf16.mxu1 %v14484_v38  ;;  %13525 = vmatprep.subr.bf16.mxu0 %v14484_v38 }
 0xd18   :  { %13502 = vmatmul.mubr.msk.bf16.vlgmr.msra.gmra.mrb[80].mxu1 %vm4210_vm5, %v15993_v51  ;;  %13522 = vmatmul.mubr.msk.bf16.vlgmr.msra.gmra.mrb[72].mxu0 %vm4210_vm5, %v15993_v51 }
 0xd19   :  { %13506 = vmatpush3.bf16.msra.mxu1 %v14375_v11  ;;  %13526 = vmatpush3.bf16.msra.mxu0 %v14376_v16 }
 0xd1a   :  { %13507 = vmatprep.subr.bf16.mxu1 %v14484_v38  ;;  %13527 = vmatprep.subr.bf16.mxu0 %v14484_v38 }
 0xd1b   :  { %13513 = vmatprep.mubr.msk.bf16.mxu1 %vm14485_vm3, %v14484_v38  ;;  %13533 = vmatprep.mubr.msk.bf16.mxu0 %vm14485_vm3, %v14484_v38 }
 0xd1d   :  { %13508 = vmatpush3.bf16.msra.mxu1 %v14377_v33  ;;  %13528 = vmatpush3.bf16.msra.mxu0 %v14378_v50 }
 0xd1e   :  { %13509 = vmatprep.subr.bf16.mxu1 %v14484_v38  ;;  %13529 = vmatprep.subr.bf16.mxu0 %v14484_v38 }
 0xd21   :  { %13510 = vmatpush3.bf16.msra.mxu1 %v14379_v8  ;;  %13530 = vmatpush3.bf16.msra.mxu0 %v14380_v47 }
 0xd22   :  { %13511 = vmatprep.subr.bf16.mxu1 %v14484_v38  ;;  %13531 = vmatprep.subr.bf16.mxu0 %v14484_v38 }
 0xd25   :  { %13512 = vmatpush3.bf16.msra.mxu1 %v14381_v57  ;;  %13532 = vmatpush3.bf16.msra.mxu0 %v14382_v6 }
 0xd26   :  { %13537 = vmatprep.subr.bf16.mxu1 %v14484_v38  ;;  %13557 = vmatprep.subr.bf16.mxu0 %v14484_v38 }
 0xd28   :  { %13514 = vmatmul.mubr.msk.bf16.vlgmr.msra.gmra.mrb[80].mxu1 %vm4064_vm4, %v16535_v3  ;;  %13534 = vmatmul.mubr.msk.bf16.vlgmr.msra.gmra.mrb[72].mxu0 %vm4064_vm4, %v16535_v3 }
 0xd29   :  { %13538 = vmatpush3.bf16.msra.mxu1 %v14383_v28  ;;  %13558 = vmatpush3.bf16.msra.mxu0 %v14384_v39 }
 0xd2a   :  { %13539 = vmatprep.subr.bf16.mxu1 %v14484_v38  ;;  %13559 = vmatprep.subr.bf16.mxu0 %v14484_v38 }
 0xd2b   :  { %13541 = vmatprep.mubr.msk.bf16.mxu1 %vm14485_vm3, %v14484_v38  ;;  %13561 = vmatprep.mubr.msk.bf16.mxu0 %vm14485_vm3, %v14484_v38 }
 0xd2d   :  { %13540 = vmatpush3.bf16.msra.mxu1 %v14385_v30  ;;  %13560 = vmatpush3.bf16.msra.mxu0 %v14386_v54 }
 0xd2e   :  { %13545 = vmatprep.subr.bf16.mxu1 %v14484_v38  ;;  %13565 = vmatprep.subr.bf16.mxu0 %v14484_v38 }
 0xd30   :  { %13542 = vmatmul.mubr.msk.bf16.vlgmr.msra.gmra.mrb[84].mxu1 %vm4210_vm5, %v15993_v51  ;;  %13562 = vmatmul.mubr.msk.bf16.vlgmr.msra.gmra.mrb[76].mxu0 %vm4210_vm5, %v15993_v51 }
 0xd31   :  { %13546 = vmatpush3.bf16.msra.mxu1 %v14387_v63  ;;  %13566 = vmatpush3.bf16.msra.mxu0 %v14388_v60 }
 0xd32   :  { %13547 = vmatprep.subr.bf16.mxu1 %v14484_v38  ;;  %13567 = vmatprep.subr.bf16.mxu0 %v14484_v38 }
 0xd33   :  { %13553 = vmatprep.mubr.msk.bf16.mxu1 %vm14485_vm3, %v14484_v38  ;;  %13573 = vmatprep.mubr.msk.bf16.mxu0 %vm14485_vm3, %v14484_v38 }
 0xd35   :  { %13548 = vmatpush3.bf16.msra.mxu1 %v14389_v19  ;;  %13568 = vmatpush3.bf16.msra.mxu0 %v14390_v26 }
 0xd36   :  { %13549 = vmatprep.subr.bf16.mxu1 %v14484_v38  ;;  %13569 = vmatprep.subr.bf16.mxu0 %v14484_v38 }
 0xd39   :  { %13550 = vmatpush3.bf16.msra.mxu1 %v14391_v12  ;;  %13570 = vmatpush3.bf16.msra.mxu0 %v14392_v58 }
 0xd3a   :  { %13551 = vmatprep.subr.bf16.mxu1 %v14484_v38  ;;  %13571 = vmatprep.subr.bf16.mxu0 %v14484_v38 }
 0xd3d   :  { %13552 = vmatpush3.bf16.msra.mxu1 %v14393_v5  ;;  %13572 = vmatpush3.bf16.msra.mxu0 %v14394_v15 }
 0xd3e   :  { %13577 = vmatprep.subr.bf16.mxu1 %v14484_v38  ;;  %13597 = vmatprep.subr.bf16.mxu0 %v14484_v38 }
 0xd40   :  { %13554 = vmatmul.mubr.msk.bf16.vlgmr.msra.gmra.mrb[84].mxu1 %vm4064_vm4, %v16535_v3  ;;  %13574 = vmatmul.mubr.msk.bf16.vlgmr.msra.gmra.mrb[76].mxu0 %vm4064_vm4, %v16535_v3 }
 0xd41   :  { %13578 = vmatpush3.bf16.msra.mxu1 %v14395_v37  ;;  %13598 = vmatpush3.bf16.msra.mxu0 %v14396_v22 }
 0xd42   :  { %13579 = vmatprep.subr.bf16.mxu1 %v14484_v38  ;;  %13599 = vmatprep.subr.bf16.mxu0 %v14484_v38 }
 0xd43   :  { %13581 = vmatprep.mubr.msk.bf16.mxu1 %vm14485_vm3, %v14484_v38  ;;  %13601 = vmatprep.mubr.msk.bf16.mxu0 %vm14485_vm3, %v14484_v38 }
 0xd45   :  { %13580 = vmatpush3.bf16.msra.mxu1 %v14397_v52  ;;  %13600 = vmatpush3.bf16.msra.mxu0 %v14398_v0  ;;  %v14416_v0 = vld [vmem:[%s16686_s19] sm:$0xff]  }
 0xd46   :  { %13585 = vmatprep.subr.bf16.mxu1 %v14484_v38  ;;  %13605 = vmatprep.subr.bf16.mxu0 %v14484_v38 }
 0xd48   :  { %13582 = vmatmul.mubr.msk.bf16.vlgmr.msra.gmra.mrb[88].mxu1 %vm4210_vm5, %v15993_v51  ;;  %13602 = vmatmul.mubr.msk.bf16.vlgmr.msra.gmra.mrb[80].mxu0 %vm4210_vm5, %v15993_v51 }
 0xd49   :  { %13586 = vmatpush3.bf16.msra.mxu1 %v14399_v27  ;;  %13606 = vmatpush3.bf16.msra.mxu0 %v14400_v46 }
 0xd4a   :  { %13587 = vmatprep.subr.bf16.mxu1 %v14484_v38  ;;  %13607 = vmatprep.subr.bf16.mxu0 %v14484_v38 }
 0xd4b   :  { %13593 = vmatprep.mubr.msk.bf16.mxu1 %vm14485_vm3, %v14484_v38  ;;  %13613 = vmatprep.mubr.msk.bf16.mxu0 %vm14485_vm3, %v14484_v38 }
 0xd4d   :  { %13588 = vmatpush3.bf16.msra.mxu1 %v14401_v10  ;;  %13608 = vmatpush3.bf16.msra.mxu0 %v14402_v61  ;;  %v14413_v10 = vld [vmem:[%s16681_s15] ss:$8 sps:$4 sm:$0xff]  }
 0xd4e   :  { %13589 = vmatprep.subr.bf16.mxu1 %v14484_v38  ;;  %13609 = vmatprep.subr.bf16.mxu0 %v14484_v38  ;;  %v14422_v61 = vld [vmem:[%s16718_s27] sm:$0xff]  }
 0xd51   :  { %13590 = vmatpush3.bf16.msra.mxu1 %v14403_v21  ;;  %13610 = vmatpush3.bf16.msra.mxu0 %v14404_v34  ;;  %v11281_v21 = vld [vmem:[%s10328_s1] ss:$0 sm:$0xff] }
 0xd52   :  { %13591 = vmatprep.subr.bf16.mxu1 %v14484_v38  ;;  %13611 = vmatprep.subr.bf16.mxu0 %v14484_v38 }
 0xd55   :  { %13592 = vmatpush3.bf16.msra.mxu1 %v14405_v49  ;;  %13612 = vmatpush3.bf16.msra.mxu0 %v14406_v40 }
 0xd56   :  { %13617 = vmatprep.subr.bf16.mxu1 %v14484_v38  ;;  %8235 = vmatprep.subr.bf16.mxu0 %v14488_v55 }
 0xd58   :  { %13594 = vmatmul.mubr.msk.bf16.vlgmr.msra.gmra.mrb[88].mxu1 %vm4064_vm4, %v16535_v3  ;;  %13614 = vmatmul.mubr.msk.bf16.vlgmr.msra.gmra.mrb[80].mxu0 %vm4064_vm4, %v16535_v3 }
 0xd59   :  { %13618 = vmatpush3.bf16.msra.mxu1 %v14407_v25  ;;  %13621 = vmatprep.mubr.msk.bf16.mxu1 %vm14485_vm3, %v14484_v38 }
 0xd5a   :  { %13619 = vmatprep.subr.bf16.mxu1 %v14484_v38 }
 0xd5d   :  { %13620 = vmatpush3.bf16.msra.mxu1 %v14408_v31 }
 0xd5e   :  { %13625 = vmatprep.subr.bf16.mxu1 %v14484_v38 }
 0xd60   :  { %13622 = vmatmul.mubr.msk.bf16.vlgmr.msra.gmra.mrb[92].mxu1 %vm4210_vm5, %v15993_v51  ;;  %v14415_v51 = vld [vmem:[%s16681_s15 + $0x4] ss:$8 sps:$4 sm:$0xff]  }
 0xd61   :  { %13626 = vmatpush3.bf16.msra.mxu1 %v14409_v32  ;;  %13633 = vmatprep.mubr.msk.bf16.mxu1 %vm14485_vm3, %v14484_v38 }
 0xd62   :  { %13627 = vmatprep.subr.bf16.mxu1 %v14484_v38  ;;  %11284 = vmatprep.mubr.msk.bf16.mxu0 %vm563_vm2, %v14415_v51  ;;  %v14421_v51 = vld [vmem:[%s16686_s19 + $0x8] sm:$0xff]  }
 0xd65   :  { %13628 = vmatpush3.bf16.msra.mxu1 %v14410_v48 }
 0xd66   :  { %13629 = vmatprep.subr.bf16.mxu1 %v14484_v38 }
 0xd69   :  { %13630 = vmatpush3.bf16.msra.mxu1 %v14411_v23 }
 0xd6a   :  { %13631 = vmatprep.subr.bf16.mxu1 %v14484_v38 }
 0xd6d   :  { %13632 = vmatpush3.bf16.msra.mxu1 %v14412_v24 }
 0xd70   :  { %13634 = vmatmul.mubr.msk.bf16.vlgmr.msra.gmra.mrb[92].mxu1 %vm4064_vm4, %v16535_v3 }
 0xde3   :  { %v7142_v38 = vpop.f32.mrb[76].mxu1  ;;  %v7275_v20 = vpop.f32.mrb[68].mxu0 }
 0xde4   :  { %v13475_v45 = vpop.f32.mrb[77].mxu1  ;;  %v13495_v41 = vpop.f32.mrb[69].mxu0 }
 0xde5   :  { %v7145_v59 = vpop.f32.mrb[78].mxu1  ;;  %v7278_v18 = vpop.f32.mrb[70].mxu0  ;;  %v14423_v45 = vld [vmem:[%s16718_s27 + $0x10] sm:$0xff]   ;;  %v14420_v41 = vld [vmem:[%s16711_s23 + $0x18] sm:$0xff]  }
 0xde6   :  { %v7149_v4 = vpack.c.bf16 %v7145_v59, %v7142_v38  ;;  %v7282_v36 = vpack.c.bf16 %v7278_v18, %v7275_v20  ;;  %v13476_v2 = vpop.f32.mrb[79].mxu1  ;;  %v13496_v62 = vpop.f32.mrb[71].mxu0  ;;  %v14418_v38 = vld [vmem:[%s16711_s23 + $0x8] sm:$0xff]   ;;  %v14419_v20 = vld [vmem:[%s16711_s23 + $0x10] sm:$0xff]   ;;  %v14425_v18 = vld [vmem:[%s16718_s27 + $0x18] sm:$0xff]  }
 0xde7   :  { %v14424_v59 = vld [vmem:[%s16718_s27 + $0x8] sm:$0xff]  }
 0xde8   :  { %8236 = vmatpush1.bf16.msra.mxu0 %v7149_v4  ;;  %v14426_v4 = vld [vmem:[%s16686_s19 + $0x10] sm:$0xff]  }
 0xde9   :  { %8237 = vmatprep.subr.bf16.mxu0 %v14488_v55 }
 0xdec   :  { %8238 = vmatpush1.bf16.msra.mxu0 %v7282_v36  ;;  %v14427_v36 = vld [vmem:[%s16686_s19 + $0x18] sm:$0xff]  }
 0xded   :  { %8239 = vmatprep.subr.bf16.mxu0 %v14488_v55 }
 0xdfb   :  { %v7408_v44 = vpop.f32.mrb[80].mxu1  ;;  %v7541_v9 = vpop.f32.mrb[72].mxu0 }
 0xdfc   :  { %v13515_v13 = vpop.f32.mrb[81].mxu1  ;;  %v13535_v43 = vpop.f32.mrb[73].mxu0 }
 0xdfd   :  { %v7411_v29 = vpop.f32.mrb[82].mxu1  ;;  %v7544_v42 = vpop.f32.mrb[74].mxu0 }
 0xdfe   :  { %v7415_v3 = vpack.c.bf16 %v7411_v29, %v7408_v44  ;;  %v7548_v35 = vpack.c.bf16 %v7544_v42, %v7541_v9  ;;  %v13516_v53 = vpop.f32.mrb[83].mxu1  ;;  %v13536_v14 = vpop.f32.mrb[75].mxu0  ;;  %v14428_v29 = vld [vmem:[%s16718_s27 + $0x20] sm:$0xff]   ;;  %v14429_v42 = vld [vmem:[%s16718_s27 + $0x30] sm:$0xff]  }
 0xe00   :  { %8240 = vmatpush1.bf16.msra.mxu0 %v7415_v3 }
 0xe01   :  { %8241 = vmatprep.subr.bf16.mxu0 %v14488_v55 }
 0xe04   :  { %8242 = vmatpush1.bf16.msra.mxu0 %v7548_v35 }
 0xe05   :  { %8243 = vmatprep.subr.bf16.mxu0 %v14488_v55 }
 0xe13   :  { %v7674_v11 = vpop.f32.mrb[84].mxu1  ;;  %v7807_v16 = vpop.f32.mrb[76].mxu0 }
 0xe14   :  { %v13555_v33 = vpop.f32.mrb[85].mxu1  ;;  %v13575_v50 = vpop.f32.mrb[77].mxu0 }
 0xe15   :  { %v7677_v8 = vpop.f32.mrb[86].mxu1  ;;  %v7810_v47 = vpop.f32.mrb[78].mxu0  ;;  %v14430_v33 = vld [vmem:[%s16718_s27 + $0x28] sm:$0xff]   ;;  %v14431_v50 = vld [vmem:[%s16718_s27 + $0x38] sm:$0xff]  }
 0xe16   :  { %v7681_v57 = vpack.c.bf16 %v7677_v8, %v7674_v11  ;;  %v7814_v6 = vpack.c.bf16 %v7810_v47, %v7807_v16  ;;  %v13556_v28 = vpop.f32.mrb[87].mxu1  ;;  %v13576_v39 = vpop.f32.mrb[79].mxu0  ;;  %v14432_v8 = vld [vmem:[%s16686_s19 + $0x20] sm:$0xff]   ;;  %v14433_v47 = vld [vmem:[%s16686_s19 + $0x28] sm:$0xff]  }
 0xe17   :  { %v14436_v28 = vld [vmem:[%s16718_s27 + $0x48] sm:$0xff]   ;;  %v14437_v39 = vld [vmem:[%s16718_s27 + $0x58] sm:$0xff]  }
 0xe18   :  { %8244 = vmatpush1.bf16.msra.mxu0 %v7681_v57  ;;  %v14434_v57 = vld [vmem:[%s16718_s27 + $0x40] sm:$0xff]  }
 0xe19   :  { %8245 = vmatprep.subr.bf16.mxu0 %v14488_v55 }
 0xe1c   :  { %8246 = vmatpush1.bf16.msra.mxu0 %v7814_v6  ;;  %v14435_v6 = vld [vmem:[%s16718_s27 + $0x50] sm:$0xff]  }
 0xe1d   :  { %8247 = vmatprep.subr.bf16.mxu0 %v14488_v55 }
 0xe2b   :  { %v7940_v30 = vpop.f32.mrb[88].mxu1  ;;  %v8073_v54 = vpop.f32.mrb[80].mxu0 }
 0xe2c   :  { %v13595_v63 = vpop.f32.mrb[89].mxu1  ;;  %v13615_v60 = vpop.f32.mrb[81].mxu0 }
 0xe2d   :  { %v7943_v19 = vpop.f32.mrb[90].mxu1  ;;  %v8076_v26 = vpop.f32.mrb[82].mxu0  ;;  %v14440_v63 = vld [vmem:[%s16718_s27 + $0x60] sm:$0xff]   ;;  %v14441_v60 = vld [vmem:[%s16718_s27 + $0x70] sm:$0xff]  }
 0xe2e   :  { %v7947_v12 = vpack.c.bf16 %v7943_v19, %v7940_v30  ;;  %v8080_v58 = vpack.c.bf16 %v8076_v26, %v8073_v54  ;;  %v13596_v5 = vpop.f32.mrb[91].mxu1  ;;  %v13616_v15 = vpop.f32.mrb[83].mxu0  ;;  %v14438_v30 = vld [vmem:[%s16686_s19 + $0x30] sm:$0xff]   ;;  %v14439_v54 = vld [vmem:[%s16686_s19 + $0x38] sm:$0xff]   ;;  %v14442_v19 = vld [vmem:[%s16718_s27 + $0x68] sm:$0xff]  }
 0xe2f   :  { %v14443_v26 = vld [vmem:[%s16718_s27 + $0x78] sm:$0xff]   ;;  %v14446_v5 = vld [vmem:[%s16718_s27 + $0x88] sm:$0xff]  }
 0xe30   :  { %8248 = vmatpush1.bf16.msra.mxu0 %v7947_v12  ;;  %v14444_v12 = vld [vmem:[%s16686_s19 + $0x40] sm:$0xff]  }
 0xe31   :  { %8249 = vmatprep.subr.bf16.mxu0 %v14488_v55 }
 0xe34   :  { %8250 = vmatpush1.bf16.msra.mxu0 %v8080_v58  ;;  %v14445_v58 = vld [vmem:[%s16718_s27 + $0x80] sm:$0xff]  }
 0xe35   :  { %8251 = vmatprep.subr.bf16.mxu0 %v14488_v55  ;;  %v14417_v55 = vld [vmem:[%s16711_s23] sm:$0xff]  }
 0xe36   :  { %13639 = vmatprep.mubr.msk.bf16.mxu1 %vm563_vm2, %v14417_v55 }
 0xe43   :  { %v8206_v37 = vpop.f32.mrb[92].mxu1 }
 0xe44   :  { %v13635_v22 = vpop.f32.mrb[93].mxu1 }
 0xe45   :  { %v8209_v52 = vpop.f32.mrb[94].mxu1 }
 0xe46   :  { %v8213_v27 = vpack.c.bf16 %v8209_v52, %v8206_v37  ;;  %v13636_v46 = vpop.f32.mrb[95].mxu1 }
 0xe48   :  { %8252 = vmatpush1.bf16.msra.mxu0 %v8213_v27 }
 0xe49   :  { %13647 = vmatprep.subr.bf16.mxu0 %v14416_v0 }
 0xe4b   :  { %8268 = vmatmul.mubr.bf16.vlgmr.msra.gmra.mrb[84].mxu0 %v14413_v10  ;;  %v14458_v10 = vld [vmem:[%s16902_s5 + $0xc] ss:$20 sps:$4 sm:$0xff]  }
 0xe4c   :  { %13649 = vmatprep.mubr.msk.bf16.mxu0 %vm563_vm2, %v15861_v56  ;;  %13648 = vmatpush3.bf16.msra.mxu0 %v14416_v0 }
 0xe4d   :  { %13657 = vmatprep.subr.bf16.mxu0 %v14422_v61 }
 0xe53   :  { %13650 = vmatmul.mubr.msk.bf16.vlgmr.msra.gmra.mrb[88].mxu0 %vm563_vm2, %v15867_v17 }
 0xe54   :  { %13653 = vmatprep.mubr.msk.bf16.mxu0 %vm563_vm2, %v15879_v7  ;;  %13658 = vmatpush3.bf16.msra.mxu0 %v14422_v61 }
 0xe55   :  { %13659 = vmatprep.subr.bf16.mxu0 %v14424_v59 }
 0xe58   :  { %13660 = vmatpush3.bf16.msra.mxu0 %v14424_v59 }
 0xe59   :  { %13691 = vmatprep.subr.bf16.mxu0 %v14426_v4 }
 0xe5b   :  { %13654 = vmatmul.mubr.msk.bf16.gmra.mrb[92].mxu0 %vm563_vm2, %v15887_v1 }
 0xf1e   :  { %v8269_v34 = vpop.f32.mrb[84].mxu0 }
 0xf1f   :  { %v8270_v49 = vadd.f32 %v11281_v21, %v8269_v34  ;;  %v8271_v40 = vpop.f32.mrb[85].mxu0 }
 0xf20   :  { %v8272_v25 = vpop.f32.mrb[86].mxu0 }
 0xf21   :  { %v8273_v31 = vadd.f32 %v11281_v21, %v8272_v25  ;;  %v8274_v32 = vpop.f32.mrb[87].mxu0  ;;  %v8276_v48 = vmax.f32 %v8270_v49, 0.0 }
 0xf23   :  { %v8277_v23 = vmax.f32 %v8273_v31, 0.0 }
 0xf25   :  { %v8286_v24 = vpack.c.bf16 %v8277_v23, %v8276_v48 }
 0xf27   :  { %13637 = vmatprep.subr.bf16.mxu1 %v8286_v24 }
 0xf28   :  { %13638 = vmatpush3.bf16.msra.mxu1 %v8286_v24 }
 0xf29   :  { %13669 = vmatprep.subr.bf16.mxu1 %v14421_v51 }
 0xf2b   :  { %13640 = vmatmul.mubr.msk.bf16.vlgmr.msra.gmra.mrb[96].mxu1 %vm563_vm2, %v14418_v38 }
 0xf2c   :  { %13643 = vmatprep.mubr.msk.bf16.mxu1 %vm563_vm2, %v14419_v20  ;;  %13670 = vmatpush3.bf16.msra.mxu1 %v14421_v51 }
 0xf2d   :  { %13679 = vmatprep.subr.bf16.mxu1 %v14423_v45 }
 0xf33   :  { %13644 = vmatmul.mubr.msk.bf16.gmra.mrb[100].mxu1 %vm563_vm2, %v14420_v41 }
 0xf34   :  { %13671 = vmatprep.mubr.msk.bf16.mxu1 %vm563_vm2, %v15861_v56 }
 0xf3b   :  { %13672 = vmatmul.mubr.msk.bf16.vlgmr.msra.gmra.mrb[104].mxu1 %vm563_vm2, %v15867_v17 }
 0xf3c   :  { %13675 = vmatprep.mubr.msk.bf16.mxu1 %vm563_vm2, %v15879_v7  ;;  %13680 = vmatpush3.bf16.msra.mxu1 %v14423_v45 }
 0xf3d   :  { %13681 = vmatprep.subr.bf16.mxu1 %v14425_v18 }
 0xf40   :  { %13682 = vmatpush3.bf16.msra.mxu1 %v14425_v18 }
 0xf41   :  { %13713 = vmatprep.subr.bf16.mxu1 %v14427_v36 }
 0xf43   :  { %13676 = vmatmul.mubr.msk.bf16.gmra.mrb[108].mxu1 %vm563_vm2, %v15887_v1 }
 0xffe   :  { %v13641_v2 = vpop.f32.mrb[96].mxu1 }
 0xfff   :  { %v8353_v62 = vpop.f32.mrb[97].mxu1 }
0x1000   :  { %v13642_v44 = vpop.f32.mrb[98].mxu1 }
0x1001   :  { %v16744_v9 = vpack.c.bf16 %v13642_v44, %v13641_v2  ;;  %v8356_v13 = vpop.f32.mrb[99].mxu1 }
0x1002   :  { %v16746_v43 = vpack.c.bf16 %v8356_v13, %v8353_v62 }
0x1004   :  { %13661 = vmatprep.mubr.msk.bf16.mxu0 %vm4210_vm5, %v16746_v43  ;;  %13683 = vmatprep.mubr.msk.bf16.mxu1 %vm4210_vm5, %v16746_v43 }
0x1005   :  { %13662 = vmatmul.mubr.msk.bf16.vlgmr.msra.gmra.mrb[88].mxu0 %vm4210_vm5, %v16744_v9  ;;  %13684 = vmatmul.mubr.msk.bf16.vlgmr.msra.gmra.mrb[104].mxu1 %vm4210_vm5, %v16744_v9 }
0x1006   :  { %v13645_v3 = vpop.f32.mrb[100].mxu1  ;;  %13692 = vmatpush3.bf16.msra.mxu0 %v14426_v4  ;;  %13714 = vmatpush3.bf16.msra.mxu1 %v14427_v36 }
0x1007   :  { %v8369_v35 = vpop.f32.mrb[101].mxu1  ;;  %13701 = vmatprep.subr.bf16.mxu0 %v14428_v29  ;;  %13723 = vmatprep.subr.bf16.mxu1 %v14429_v42 }
0x1008   :  { %v13646_v53 = vpop.f32.mrb[102].mxu1 }
0x1009   :  { %v16758_v14 = vpack.c.bf16 %v13646_v53, %v13645_v3  ;;  %v8372_v11 = vpop.f32.mrb[103].mxu1 }
0x100a   :  { %v16760_v16 = vpack.c.bf16 %v8372_v11, %v8369_v35 }
0x100c   :  { %13665 = vmatprep.mubr.msk.bf16.mxu0 %vm4210_vm5, %v16760_v16  ;;  %13687 = vmatprep.mubr.msk.bf16.mxu1 %vm4210_vm5, %v16760_v16 }
0x100d   :  { %13666 = vmatmul.mubr.msk.bf16.gmra.mrb[92].mxu0 %vm4210_vm5, %v16758_v14  ;;  %13688 = vmatmul.mubr.msk.bf16.gmra.mrb[108].mxu1 %vm4210_vm5, %v16758_v14 }
0x100e   :  { %13693 = vmatprep.mubr.msk.bf16.mxu0 %vm563_vm2, %v15861_v56  ;;  %13715 = vmatprep.mubr.msk.bf16.mxu1 %vm563_vm2, %v15861_v56 }
0x1015   :  { %13694 = vmatmul.mubr.msk.bf16.vlgmr.msra.gmra.mrb[96].mxu0 %vm563_vm2, %v15867_v17  ;;  %13716 = vmatmul.mubr.msk.bf16.vlgmr.msra.gmra.mrb[112].mxu1 %vm563_vm2, %v15867_v17 }
0x1016   :  { %13697 = vmatprep.mubr.msk.bf16.mxu0 %vm563_vm2, %v15879_v7  ;;  %13719 = vmatprep.mubr.msk.bf16.mxu1 %vm563_vm2, %v15879_v7 }
0x1017   :  { %13702 = vmatpush3.bf16.msra.mxu0 %v14428_v29  ;;  %13724 = vmatpush3.bf16.msra.mxu1 %v14429_v42 }
0x1018   :  { %13703 = vmatprep.subr.bf16.mxu0 %v14430_v33  ;;  %13725 = vmatprep.subr.bf16.mxu1 %v14431_v50 }
0x101b   :  { %13704 = vmatpush3.bf16.msra.mxu0 %v14430_v33  ;;  %13726 = vmatpush3.bf16.msra.mxu1 %v14431_v50 }
0x101c   :  { %13735 = vmatprep.subr.bf16.mxu0 %v14432_v8  ;;  %13757 = vmatprep.subr.bf16.mxu1 %v14433_v47 }
0x101d   :  { %13698 = vmatmul.mubr.msk.bf16.gmra.mrb[100].mxu0 %vm563_vm2, %v15887_v1  ;;  %13720 = vmatmul.mubr.msk.bf16.gmra.mrb[116].mxu1 %vm563_vm2, %v15887_v1 }
0x101e   :  { %13705 = vmatprep.mubr.msk.bf16.mxu0 %vm4210_vm5, %v16746_v43  ;;  %13727 = vmatprep.mubr.msk.bf16.mxu1 %vm4210_vm5, %v16746_v43 }
0x1025   :  { %13706 = vmatmul.mubr.msk.bf16.vlgmr.msra.gmra.mrb[96].mxu0 %vm4210_vm5, %v16744_v9  ;;  %13728 = vmatmul.mubr.msk.bf16.vlgmr.msra.gmra.mrb[112].mxu1 %vm4210_vm5, %v16744_v9 }
0x1026   :  { %13709 = vmatprep.mubr.msk.bf16.mxu0 %vm4210_vm5, %v16760_v16  ;;  %13731 = vmatprep.mubr.msk.bf16.mxu1 %vm4210_vm5, %v16760_v16 }
0x1027   :  { %13736 = vmatpush3.bf16.msra.mxu0 %v14432_v8  ;;  %13758 = vmatpush3.bf16.msra.mxu1 %v14433_v47 }
0x1028   :  { %13745 = vmatprep.subr.bf16.mxu0 %v14434_v57  ;;  %13767 = vmatprep.subr.bf16.mxu1 %v14435_v6 }
0x102d   :  { %13710 = vmatmul.mubr.msk.bf16.gmra.mrb[100].mxu0 %vm4210_vm5, %v16758_v14  ;;  %13732 = vmatmul.mubr.msk.bf16.gmra.mrb[116].mxu1 %vm4210_vm5, %v16758_v14 }
0x102e   :  { %13737 = vmatprep.mubr.msk.bf16.mxu0 %vm563_vm2, %v15861_v56  ;;  %13759 = vmatprep.mubr.msk.bf16.mxu1 %vm563_vm2, %v15861_v56 }
0x1035   :  { %13738 = vmatmul.mubr.msk.bf16.vlgmr.msra.gmra.mrb[104].mxu0 %vm563_vm2, %v15867_v17  ;;  %13760 = vmatmul.mubr.msk.bf16.vlgmr.msra.gmra.mrb[120].mxu1 %vm563_vm2, %v15867_v17 }
0x1036   :  { %13741 = vmatprep.mubr.msk.bf16.mxu0 %vm563_vm2, %v15879_v7  ;;  %13763 = vmatprep.mubr.msk.bf16.mxu1 %vm563_vm2, %v15879_v7 }
0x1037   :  { %13746 = vmatpush3.bf16.msra.mxu0 %v14434_v57  ;;  %13768 = vmatpush3.bf16.msra.mxu1 %v14435_v6 }
0x1038   :  { %13747 = vmatprep.subr.bf16.mxu0 %v14436_v28  ;;  %13769 = vmatprep.subr.bf16.mxu1 %v14437_v39 }
0x103b   :  { %13748 = vmatpush3.bf16.msra.mxu0 %v14436_v28  ;;  %13770 = vmatpush3.bf16.msra.mxu1 %v14437_v39 }
0x103c   :  { %13779 = vmatprep.subr.bf16.mxu0 %v14438_v30  ;;  %13801 = vmatprep.subr.bf16.mxu1 %v14439_v54 }
0x103d   :  { %13742 = vmatmul.mubr.msk.bf16.gmra.mrb[108].mxu0 %vm563_vm2, %v15887_v1  ;;  %13764 = vmatmul.mubr.msk.bf16.gmra.mrb[124].mxu1 %vm563_vm2, %v15887_v1 }
0x103e   :  { %13749 = vmatprep.mubr.msk.bf16.mxu0 %vm4210_vm5, %v16746_v43  ;;  %13771 = vmatprep.mubr.msk.bf16.mxu1 %vm4210_vm5, %v16746_v43 }
0x1045   :  { %13750 = vmatmul.mubr.msk.bf16.vlgmr.msra.gmra.mrb[104].mxu0 %vm4210_vm5, %v16744_v9  ;;  %13772 = vmatmul.mubr.msk.bf16.vlgmr.msra.gmra.mrb[120].mxu1 %vm4210_vm5, %v16744_v9 }
0x1046   :  { %13753 = vmatprep.mubr.msk.bf16.mxu0 %vm4210_vm5, %v16760_v16  ;;  %13775 = vmatprep.mubr.msk.bf16.mxu1 %vm4210_vm5, %v16760_v16 }
0x1047   :  { %13780 = vmatpush3.bf16.msra.mxu0 %v14438_v30  ;;  %13802 = vmatpush3.bf16.msra.mxu1 %v14439_v54  ;;  %v14447_v54 = vld [vmem:[%s16902_s5] ss:$20 sps:$4 sm:$0xff]  }
0x1048   :  { %13789 = vmatprep.subr.bf16.mxu0 %v14440_v63  ;;  %13811 = vmatprep.subr.bf16.mxu1 %v14441_v60 }
0x104d   :  { %13754 = vmatmul.mubr.msk.bf16.gmra.mrb[108].mxu0 %vm4210_vm5, %v16758_v14  ;;  %13776 = vmatmul.mubr.msk.bf16.gmra.mrb[124].mxu1 %vm4210_vm5, %v16758_v14 }
0x104e   :  { %13781 = vmatprep.mubr.msk.bf16.mxu0 %vm563_vm2, %v15861_v56  ;;  %13803 = vmatprep.mubr.msk.bf16.mxu1 %vm563_vm2, %v15861_v56 }
0x1055   :  { %13782 = vmatmul.mubr.msk.bf16.vlgmr.msra.gmra.mrb[112].mxu0 %vm563_vm2, %v15867_v17  ;;  %13804 = vmatmul.mubr.msk.bf16.vlgmr.msra.gmra.mrb[128].mxu1 %vm563_vm2, %v15867_v17 }
0x1056   :  { %13785 = vmatprep.mubr.msk.bf16.mxu0 %vm563_vm2, %v15879_v7  ;;  %13807 = vmatprep.mubr.msk.bf16.mxu1 %vm563_vm2, %v15879_v7 }
0x1057   :  { %13790 = vmatpush3.bf16.msra.mxu0 %v14440_v63  ;;  %13812 = vmatpush3.bf16.msra.mxu1 %v14441_v60 }
0x1058   :  { %13791 = vmatprep.subr.bf16.mxu0 %v14442_v19  ;;  %13813 = vmatprep.subr.bf16.mxu1 %v14443_v26 }
0x105b   :  { %13792 = vmatpush3.bf16.msra.mxu0 %v14442_v19  ;;  %13814 = vmatpush3.bf16.msra.mxu1 %v14443_v26 }
0x105c   :  { %13823 = vmatprep.subr.bf16.mxu0 %v14444_v12 }
0x105d   :  { %13786 = vmatmul.mubr.msk.bf16.gmra.mrb[116].mxu0 %vm563_vm2, %v15887_v1  ;;  %13808 = vmatmul.mubr.msk.bf16.gmra.mrb[132].mxu1 %vm563_vm2, %v15887_v1 }
0x105e   :  { %13793 = vmatprep.mubr.msk.bf16.mxu0 %vm4210_vm5, %v16746_v43  ;;  %13815 = vmatprep.mubr.msk.bf16.mxu1 %vm4210_vm5, %v16746_v43 }
0x1065   :  { %13794 = vmatmul.mubr.msk.bf16.vlgmr.msra.gmra.mrb[112].mxu0 %vm4210_vm5, %v16744_v9  ;;  %13816 = vmatmul.mubr.msk.bf16.vlgmr.msra.gmra.mrb[128].mxu1 %vm4210_vm5, %v16744_v9 }
0x1066   :  { %13797 = vmatprep.mubr.msk.bf16.mxu0 %vm4210_vm5, %v16760_v16  ;;  %13819 = vmatprep.mubr.msk.bf16.mxu1 %vm4210_vm5, %v16760_v16 }
0x1067   :  { %13824 = vmatpush3.bf16.msra.mxu0 %v14444_v12  ;;  %v14452_v12 = vld [vmem:[%s16902_s5 + $0x2c] ss:$20 sps:$4 sm:$0xff]  }
0x1068   :  { %13833 = vmatprep.subr.bf16.mxu0 %v14445_v58 }
0x106d   :  { %13798 = vmatmul.mubr.msk.bf16.gmra.mrb[116].mxu0 %vm4210_vm5, %v16758_v14  ;;  %13820 = vmatmul.mubr.msk.bf16.gmra.mrb[132].mxu1 %vm4210_vm5, %v16758_v14 }
0x106e   :  { %13825 = vmatprep.mubr.msk.bf16.mxu0 %vm563_vm2, %v15861_v56  ;;  %v14449_v56 = vld [vmem:[%s16902_s5 + $0x4] ss:$20 sps:$4 sm:$0xff]  }
0x106f   :  { %10013 = vmatprep.mubr.bf16.mxu1 %v14449_v56 }
0x1075   :  { %13826 = vmatmul.mubr.msk.bf16.vlgmr.msra.gmra.mrb[120].mxu0 %vm563_vm2, %v15867_v17 }
0x1076   :  { %13829 = vmatprep.mubr.msk.bf16.mxu0 %vm563_vm2, %v15879_v7  ;;  %13834 = vmatpush3.bf16.msra.mxu0 %v14445_v58 }
0x1077   :  { %13835 = vmatprep.subr.bf16.mxu0 %v14446_v5 }
0x107a   :  { %13836 = vmatpush3.bf16.msra.mxu0 %v14446_v5 }
0x107d   :  { %13830 = vmatmul.mubr.msk.bf16.gmra.mrb[124].mxu0 %vm563_vm2, %v15887_v1 }
0x107e   :  { %13837 = vmatprep.mubr.msk.bf16.mxu0 %vm4210_vm5, %v16746_v43 }
0x1085   :  { %13838 = vmatmul.mubr.msk.bf16.vlgmr.msra.gmra.mrb[120].mxu0 %vm4210_vm5, %v16744_v9 }
0x1086   :  { %13841 = vmatprep.mubr.msk.bf16.mxu0 %vm4210_vm5, %v16760_v16 }
0x108d   :  { %13842 = vmatmul.mubr.msk.bf16.gmra.mrb[124].mxu0 %vm4210_vm5, %v16758_v14 }
0x108e   :  { %10078 = vmatprep.mubr.bf16.mxu0 %v14458_v10  ;;  %v14455_v10 = vld [vmem:[%s16902_s5 + $0x54] ss:$20 sps:$4 sm:$0xff]  }
0x10d8   :  { %v13663_v17 = vpop.f32.mrb[88].mxu0  ;;  %v13685_v7 = vpop.f32.mrb[104].mxu1 }
0x10d9   :  { %v8523_v1 = vpop.f32.mrb[89].mxu0  ;;  %v8683_v15 = vpop.f32.mrb[105].mxu1 }
0x10da   :  { %v13664_v37 = vpop.f32.mrb[90].mxu0  ;;  %v13686_v22 = vpop.f32.mrb[106].mxu1 }
0x10db   :  { %v8555_v52 = vpack.c.bf16 %v13664_v37, %v13663_v17  ;;  %v8715_v0 = vpack.c.bf16 %v13686_v22, %v13685_v7  ;;  %v8526_v27 = vpop.f32.mrb[91].mxu0  ;;  %v8686_v46 = vpop.f32.mrb[107].mxu1  ;;  %v14450_v22 = vld [vmem:[%s16902_s5 + $0x28] ss:$20 sps:$4 sm:$0xff]  }
0x10dc   :  { %v8554_v55 = vpack.c.bf16 %v8526_v27, %v8523_v1  ;;  %v8714_v61 = vpack.c.bf16 %v8686_v46, %v8683_v15 }
0x10e0   :  { %v13667_v21 = vpop.f32.mrb[92].mxu0  ;;  %v13689_v34 = vpop.f32.mrb[108].mxu1 }
0x10e1   :  { %v8539_v49 = vpop.f32.mrb[93].mxu0  ;;  %v8699_v40 = vpop.f32.mrb[109].mxu1 }
0x10e2   :  { %v13668_v25 = vpop.f32.mrb[94].mxu0  ;;  %v13690_v31 = vpop.f32.mrb[110].mxu1 }
0x10e3   :  { %v8557_v32 = vpack.c.bf16 %v13668_v25, %v13667_v21  ;;  %v8717_v48 = vpack.c.bf16 %v13690_v31, %v13689_v34  ;;  %v8542_v23 = vpop.f32.mrb[95].mxu0  ;;  %v8702_v24 = vpop.f32.mrb[111].mxu1  ;;  %v14453_v21 = vld [vmem:[%s16902_s5 + $0x50] ss:$20 sps:$4 sm:$0xff]  }
0x10e4   :  { %v8556_v51 = vpack.c.bf16 %v8542_v23, %v8539_v49  ;;  %v8716_v38 = vpack.c.bf16 %v8702_v24, %v8699_v40  ;;  %v14461_v34 = vld [vmem:[%s16902_s5 + $0x7c] ss:$20 sps:$4 sm:$0xff]   ;;  %v14459_v49 = vld [vmem:[%s16902_s5 + $0x78] ss:$20 sps:$4 sm:$0xff]  }
0x10e5   :  { %v14468_v40 = vld [vmem:[%s16902_s5 + $0x10] ss:$20 sps:$4 sm:$0xff]  }
0x10f8   :  { %v13707_v20 = vpop.f32.mrb[96].mxu0  ;;  %v13729_v45 = vpop.f32.mrb[112].mxu1 }
0x10f9   :  { %v8843_v41 = vpop.f32.mrb[97].mxu0  ;;  %v9003_v59 = vpop.f32.mrb[113].mxu1 }
0x10fa   :  { %v13708_v18 = vpop.f32.mrb[98].mxu0  ;;  %v13730_v4 = vpop.f32.mrb[114].mxu1 }
0x10fb   :  { %v8875_v36 = vpack.c.bf16 %v13708_v18, %v13707_v20  ;;  %v9035_v2 = vpack.c.bf16 %v13730_v4, %v13729_v45  ;;  %v8846_v62 = vpop.f32.mrb[99].mxu0  ;;  %v9006_v44 = vpop.f32.mrb[115].mxu1 }
0x10fc   :  { %v8874_v9 = vpack.c.bf16 %v8846_v62, %v8843_v41  ;;  %v9034_v13 = vpack.c.bf16 %v9006_v44, %v9003_v59 }
0x10fe   :  { %12465 = vmatprep.subr.bf16.mxu1 %v8874_v9 }
0x10ff   :  { %12466 = vmatpush3.bf16.msra.mxu1 %v8554_v55 }
0x1100   :  { %v13711_v43 = vpop.f32.mrb[100].mxu0  ;;  %v13733_v29 = vpop.f32.mrb[116].mxu1  ;;  %12467 = vmatprep.subr.bf16.mxu1 %v8875_v36 }
0x1101   :  { %v8859_v42 = vpop.f32.mrb[101].mxu0  ;;  %v9019_v3 = vpop.f32.mrb[117].mxu1 }
0x1102   :  { %v13712_v35 = vpop.f32.mrb[102].mxu0  ;;  %v13734_v53 = vpop.f32.mrb[118].mxu1 }
0x1103   :  { %v8877_v14 = vpack.c.bf16 %v13712_v35, %v13711_v43  ;;  %v9037_v11 = vpack.c.bf16 %v13734_v53, %v13733_v29  ;;  %v8862_v16 = vpop.f32.mrb[103].mxu0  ;;  %v9022_v33 = vpop.f32.mrb[119].mxu1  ;;  %12468 = vmatpush3.bf16.msra.mxu1 %v8555_v52 }
0x1104   :  { %v8876_v50 = vpack.c.bf16 %v8862_v16, %v8859_v42  ;;  %v9036_v8 = vpack.c.bf16 %v9022_v33, %v9019_v3 }
0x1106   :  { %12469 = vmatprep.subr.bf16.mxu1 %v8876_v50  ;;  %v14464_v50 = vld [vmem:[%s16902_s5 + $0x34] ss:$20 sps:$4 sm:$0xff]  }
0x1107   :  { %12470 = vmatpush3.bf16.msra.mxu1 %v8556_v51 }
0x1108   :  { %12471 = vmatprep.subr.bf16.mxu1 %v8877_v14 }
0x110b   :  { %12472 = vmatpush3.bf16.msra.mxu1 %v8557_v32 }
0x110c   :  { %12473 = vmatprep.subr.bf16.mxu1 %v9034_v13 }
0x110f   :  { %12474 = vmatpush3.bf16.msra.mxu1 %v8714_v61 }
0x1110   :  { %12475 = vmatprep.subr.bf16.mxu1 %v9035_v2 }
0x1113   :  { %12476 = vmatpush3.bf16.msra.mxu1 %v8715_v0 }
0x1114   :  { %12477 = vmatprep.subr.bf16.mxu1 %v9036_v8 }
0x1117   :  { %12478 = vmatpush3.bf16.msra.mxu1 %v8716_v38 }
0x1118   :  { %v16906_v47 = vpop.f32.mrb[104].mxu0  ;;  %v16908_v57 = vpop.f32.mrb[120].mxu1  ;;  %12479 = vmatprep.subr.bf16.mxu1 %v9037_v11  ;;  %v14456_v11 = vld [vmem:[%s16902_s5 + $0x8] ss:$20 sps:$4 sm:$0xff]  }
0x1119   :  { %v9163_v6 = vpop.f32.mrb[105].mxu0  ;;  %v16910_v28 = vpop.f32.mrb[121].mxu1 }
0x111a   :  { %v13752_v39 = vpop.f32.mrb[106].mxu0  ;;  %v16912_v30 = vpop.f32.mrb[122].mxu1 }
0x111b   :  { %v9195_v63 = vpack.c.bf16 %v13752_v39, %v16906_v47  ;;  %v9355_v60 = vpack.c.bf16 %v16912_v30, %v16908_v57  ;;  %v9166_v19 = vpop.f32.mrb[107].mxu0  ;;  %v16918_v26 = vpop.f32.mrb[123].mxu1  ;;  %12480 = vmatpush3.bf16.msra.mxu1 %v8717_v48 }
0x111c   :  { %v9194_v58 = vpack.c.bf16 %v9166_v19, %v9163_v6  ;;  %v9354_v5 = vpack.c.bf16 %v16918_v26, %v16910_v28  ;;  %v14462_v28 = vld [vmem:[%s16902_s5 + $0x30] ss:$20 sps:$4 sm:$0xff]   ;;  %v14469_v19 = vld [vmem:[%s16902_s5 + $0x38] ss:$20 sps:$4 sm:$0xff]  }
0x111d   :  { %v14472_v26 = vld [vmem:[%s16902_s5 + $0x84] ss:$20 sps:$4 sm:$0xff]  }
0x111e   :  { %10014 = vmatmul.mubr.bf16.vlgmr.msra.gmra.mrb[136].mxu1 %v14447_v54  ;;  %v14467_v54 = vld [vmem:[%s16902_s5 + $0x5c] ss:$20 sps:$4 sm:$0xff]  }
0x111f   :  { %10021 = vmatprep.mubr.bf16.mxu1 %v14452_v12  ;;  %v14473_v12 = vld [vmem:[%s16902_s5 + $0x60] ss:$20 sps:$4 sm:$0xff]  }
0x1120   :  { %v13755_v56 = vpop.f32.mrb[108].mxu0  ;;  %v16923_v17 = vpop.f32.mrb[124].mxu1 }
0x1121   :  { %v9179_v7 = vpop.f32.mrb[109].mxu0  ;;  %v9339_v1 = vpop.f32.mrb[125].mxu1 }
0x1122   :  { %v13756_v15 = vpop.f32.mrb[110].mxu0  ;;  %v16925_v37 = vpop.f32.mrb[126].mxu1 }
0x1123   :  { %v9197_v52 = vpack.c.bf16 %v13756_v15, %v13755_v56  ;;  %v9357_v0 = vpack.c.bf16 %v16925_v37, %v16923_v17  ;;  %v9182_v27 = vpop.f32.mrb[111].mxu0  ;;  %v9342_v46 = vpop.f32.mrb[127].mxu1  ;;  %v14475_v56 = vld [vmem:[%s10334_s9] sm:$0xff]   ;;  %v14476_v17 = vld [vmem:[%s10334_s9 + $0x8] sm:$0xff]  }
0x1124   :  { %v9196_v55 = vpack.c.bf16 %v9182_v27, %v9179_v7  ;;  %v9356_v61 = vpack.c.bf16 %v9342_v46, %v9339_v1 }
0x1126   :  { %10022 = vmatmul.mubr.bf16.gmra.mrb[140].mxu1 %v14450_v22 }
0x1127   :  { %10029 = vmatprep.mubr.bf16.mxu1 %v14455_v10 }
0x112e   :  { %10030 = vmatmul.mubr.bf16.gmra.mrb[144].mxu1 %v14453_v21 }
0x112f   :  { %10037 = vmatprep.mubr.bf16.mxu1 %v14461_v34 }
0x1136   :  { %10038 = vmatmul.mubr.bf16.gmra.mrb[148].mxu1 %v14459_v49 }
0x1137   :  { %13853 = vmatprep.mubr.msk.bf16.mxu1 %vm4064_vm4, %v14468_v40 }
0x1138   :  { %v13795_v25 = vpop.f32.mrb[112].mxu0  ;;  %v13817_v31 = vpop.f32.mrb[128].mxu1 }
0x1139   :  { %v9483_v32 = vpop.f32.mrb[113].mxu0  ;;  %v9643_v48 = vpop.f32.mrb[129].mxu1 }
0x113a   :  { %v13796_v23 = vpop.f32.mrb[114].mxu0  ;;  %v13818_v24 = vpop.f32.mrb[130].mxu1 }
0x113b   :  { %v9515_v51 = vpack.c.bf16 %v13796_v23, %v13795_v25  ;;  %v9675_v38 = vpack.c.bf16 %v13818_v24, %v13817_v31  ;;  %v9486_v20 = vpop.f32.mrb[115].mxu0  ;;  %v9646_v45 = vpop.f32.mrb[131].mxu1 }
0x113c   :  { %v9514_v41 = vpack.c.bf16 %v9486_v20, %v9483_v32  ;;  %v9674_v59 = vpack.c.bf16 %v9646_v45, %v9643_v48  ;;  %v11440_v20 = vld [vmem:[%s10333_s13] ss:$0 sm:$0xff] }
0x113e   :  { %12505 = vmatprep.subr.bf16.mxu0 %v9514_v41 }
0x113f   :  { %12506 = vmatpush3.bf16.msra.mxu0 %v9194_v58  ;;  %v14470_v58 = vld [vmem:[%s16902_s5 + $0x80] ss:$20 sps:$4 sm:$0xff]  }
0x1140   :  { %v13799_v18 = vpop.f32.mrb[116].mxu0  ;;  %v13821_v4 = vpop.f32.mrb[132].mxu1  ;;  %12507 = vmatprep.subr.bf16.mxu0 %v9515_v51 }
0x1141   :  { %v9499_v36 = vpop.f32.mrb[117].mxu0  ;;  %v9659_v2 = vpop.f32.mrb[133].mxu1 }
0x1142   :  { %v13800_v62 = vpop.f32.mrb[118].mxu0  ;;  %v13822_v44 = vpop.f32.mrb[134].mxu1 }
0x1143   :  { %v9517_v9 = vpack.c.bf16 %v13800_v62, %v13799_v18  ;;  %v9677_v13 = vpack.c.bf16 %v13822_v44, %v13821_v4  ;;  %v9502_v43 = vpop.f32.mrb[119].mxu0  ;;  %v9662_v29 = vpop.f32.mrb[135].mxu1  ;;  %12508 = vmatpush3.bf16.msra.mxu0 %v9195_v63 }
0x1144   :  { %v9516_v42 = vpack.c.bf16 %v9502_v43, %v9499_v36  ;;  %v9676_v3 = vpack.c.bf16 %v9662_v29, %v9659_v2 }
0x1146   :  { %12509 = vmatprep.subr.bf16.mxu0 %v9516_v42 }
0x1147   :  { %12510 = vmatpush3.bf16.msra.mxu0 %v9196_v55 }
0x1148   :  { %12511 = vmatprep.subr.bf16.mxu0 %v9517_v9 }
0x114b   :  { %12512 = vmatpush3.bf16.msra.mxu0 %v9197_v52 }
0x114c   :  { %12513 = vmatprep.subr.bf16.mxu0 %v9674_v59 }
0x114f   :  { %12514 = vmatpush3.bf16.msra.mxu0 %v9354_v5  ;;  %v14474_v5 = vld [vmem:[%s16902_s5 + $0x88] ss:$20 sps:$4 sm:$0xff]  }
0x1150   :  { %12515 = vmatprep.subr.bf16.mxu0 %v9675_v38 }
0x1153   :  { %12516 = vmatpush3.bf16.msra.mxu0 %v9355_v60  ;;  %v14465_v60 = vld [vmem:[%s16902_s5 + $0x58] ss:$20 sps:$4 sm:$0xff]  }
0x1154   :  { %12517 = vmatprep.subr.bf16.mxu0 %v9676_v3 }
0x1157   :  { %12518 = vmatpush3.bf16.msra.mxu0 %v9356_v61 }
0x1158   :  { %v13839_v35 = vpop.f32.mrb[120].mxu0  ;;  %12519 = vmatprep.subr.bf16.mxu0 %v9677_v13 }
0x1159   :  { %v9803_v53 = vpop.f32.mrb[121].mxu0 }
0x115a   :  { %v13840_v14 = vpop.f32.mrb[122].mxu0 }
0x115b   :  { %v9835_v16 = vpack.c.bf16 %v13840_v14, %v13839_v35  ;;  %v9806_v33 = vpop.f32.mrb[123].mxu0  ;;  %12520 = vmatpush3.bf16.msra.mxu0 %v9357_v0 }
0x115c   :  { %v9834_v8 = vpack.c.bf16 %v9806_v33, %v9803_v53 }
0x115e   :  { %10079 = vmatmul.mubr.bf16.vlgmr.msra.gmra.mrb[128].mxu0 %v14456_v11  ;;  %13845 = vmatprep.subr.bf16.mxu1 %v9834_v8 }
0x115f   :  { %13846 = vmatpush3.bf16.msra.mxu1 %v9834_v8  ;;  %10086 = vmatprep.mubr.bf16.mxu0 %v14464_v50 }
0x1160   :  { %v13843_v47 = vpop.f32.mrb[124].mxu0  ;;  %13847 = vmatprep.subr.bf16.mxu1 %v9835_v16 }
0x1161   :  { %v9819_v57 = vpop.f32.mrb[125].mxu0 }
0x1162   :  { %v13844_v6 = vpop.f32.mrb[126].mxu0 }
0x1163   :  { %v9837_v39 = vpack.c.bf16 %v13844_v6, %v13843_v47  ;;  %v9822_v30 = vpop.f32.mrb[127].mxu0  ;;  %13848 = vmatpush3.bf16.msra.mxu1 %v9835_v16 }
0x1164   :  { %v9836_v63 = vpack.c.bf16 %v9822_v30, %v9819_v57 }
0x1166   :  { %10087 = vmatmul.mubr.bf16.gmra.mrb[132].mxu0 %v14462_v28  ;;  %13849 = vmatprep.subr.bf16.mxu1 %v9836_v63 }
0x1167   :  { %13850 = vmatpush3.bf16.msra.mxu1 %v9836_v63  ;;  %10094 = vmatprep.mubr.bf16.mxu0 %v14467_v54 }
0x1168   :  { %13851 = vmatprep.subr.bf16.mxu1 %v9837_v39 }
0x116b   :  { %13852 = vmatpush3.bf16.msra.mxu1 %v9837_v39 }
0x116c   :  { %13861 = vmatprep.subr.bf16.mxu1 %v14475_v56 }
0x116e   :  { %10095 = vmatmul.mubr.bf16.gmra.mrb[136].mxu0 %v14465_v60  ;;  %13854 = vmatmul.mubr.msk.bf16.vlgmr.msra.gmra.mrb[152].mxu1 %vm4064_vm4, %v14469_v19 }
0x116f   :  { %10102 = vmatprep.mubr.bf16.mxu0 %v14472_v26  ;;  %13857 = vmatprep.mubr.msk.bf16.mxu1 %vm4064_vm4, %v14473_v12 }
0x1170   :  { %13862 = vmatpush3.bf16.msra.mxu1 %v14475_v56 }
0x1171   :  { %13863 = vmatprep.subr.bf16.mxu1 %v14476_v17 }
0x1174   :  { %13864 = vmatpush3.bf16.msra.mxu1 %v14476_v17 }
0x1176   :  { %10103 = vmatmul.mubr.bf16.gmra.mrb[140].mxu0 %v14470_v58  ;;  %13858 = vmatmul.mubr.msk.bf16.gmra.mrb[156].mxu1 %vm4064_vm4, %v14474_v5 }
0x11f1   :  { %v12481_v7 = vpop.f32.mrb[136].mxu1 }
0x11f2   :  { %v12482_v1 = vpop.f32.mrb[137].mxu1 }
0x11f3   :  { %v12483_v15 = vadd.f32 %v12482_v1, %v12481_v7  ;;  %v12484_v37 = vpop.f32.mrb[138].mxu1 }
0x11f4   :  { %v12485_v22 = vpop.f32.mrb[139].mxu1 }
0x11f5   :  { %v12486_v52 = vadd.f32 %v12485_v22, %v12484_v37  ;;  %v10016_v59 = vadd.f32 %v12483_v15, %v11440_v20 }
0x11f7   :  { %v10019_v2 = vadd.f32 %v12486_v52, %v11440_v20 }
0x11f9   :  { %v12487_v0 = vpop.f32.mrb[140].mxu1 }
0x11fa   :  { %v12488_v27 = vpop.f32.mrb[141].mxu1 }
0x11fb   :  { %v12489_v46 = vadd.f32 %v12488_v27, %v12487_v0  ;;  %v12490_v10 = vpop.f32.mrb[142].mxu1 }
0x11fc   :  { %v12491_v55 = vpop.f32.mrb[143].mxu1 }
0x11fd   :  { %v12492_v61 = vadd.f32 %v12491_v55, %v12490_v10  ;;  %v10024_v29 = vadd.f32 %v12489_v46, %v11440_v20 }
0x11ff   :  { %v10027_v53 = vadd.f32 %v12492_v61, %v11440_v20 }
0x1201   :  { %v12493_v21 = vpop.f32.mrb[144].mxu1 }
0x1202   :  { %v12494_v34 = vpop.f32.mrb[145].mxu1 }
0x1203   :  { %v12495_v49 = vadd.f32 %v12494_v34, %v12493_v21  ;;  %v12496_v40 = vpop.f32.mrb[146].mxu1 }
0x1204   :  { %v12497_v25 = vpop.f32.mrb[147].mxu1 }
0x1205   :  { %v12498_v31 = vadd.f32 %v12497_v25, %v12496_v40  ;;  %v10032_v6 = vadd.f32 %v12495_v49, %v11440_v20 }
0x1207   :  { %v10035_v26 = vadd.f32 %v12498_v31, %v11440_v20 }
0x1209   :  { %v12499_v32 = vpop.f32.mrb[148].mxu1 }
0x120a   :  { %v12500_v48 = vpop.f32.mrb[149].mxu1 }
0x120b   :  { %v12501_v23 = vadd.f32 %v12500_v48, %v12499_v32  ;;  %v12502_v24 = vpop.f32.mrb[150].mxu1 }
0x120c   :  { %v12503_v51 = vpop.f32.mrb[151].mxu1 }
0x120d   :  { %v12504_v38 = vadd.f32 %v12503_v51, %v12502_v24  ;;  %v10040_v10 = vadd.f32 %v12501_v23, %v11440_v20 }
0x120f   :  { %v10043_v25 = vadd.f32 %v12504_v38, %v11440_v20  ;;  %v11465_v38 = vld [vmem:[%s10335_s17] ss:$0 sm:$0xff] }
0x1231   :  { %v12521_v45 = vpop.f32.mrb[128].mxu0 }
0x1232   :  { %v12522_v41 = vpop.f32.mrb[129].mxu0 }
0x1233   :  { %v12523_v18 = vadd.f32 %v12522_v41, %v12521_v45  ;;  %v12524_v4 = vpop.f32.mrb[130].mxu0 }
0x1234   :  { %v12525_v36 = vpop.f32.mrb[131].mxu0 }
0x1235   :  { %v12526_v62 = vadd.f32 %v12525_v36, %v12524_v4  ;;  %v10081_v44 = vadd.f32 %v12523_v18, %v10016_v59 }
0x1237   :  { %v10084_v9 = vadd.f32 %v12526_v62, %v10019_v2 }
0x1239   :  { %v12527_v13 = vpop.f32.mrb[132].mxu0 }
0x123a   :  { %v12528_v43 = vpop.f32.mrb[133].mxu0 }
0x123b   :  { %v12529_v42 = vadd.f32 %v12528_v43, %v12527_v13  ;;  %v12530_v3 = vpop.f32.mrb[134].mxu0 }
0x123c   :  { %v12531_v35 = vpop.f32.mrb[135].mxu0 }
0x123d   :  { %v12532_v14 = vadd.f32 %v12531_v35, %v12530_v3  ;;  %v10089_v11 = vadd.f32 %v12529_v42, %v10024_v29 }
0x123f   :  { %v10092_v16 = vadd.f32 %v12532_v14, %v10027_v53 }
0x1241   :  { %v12533_v33 = vpop.f32.mrb[136].mxu0  ;;  %v13855_v50 = vpop.f32.mrb[152].mxu1 }
0x1242   :  { %v10154_v8 = vadd.f32 %v13855_v50, %v10089_v11  ;;  %v12534_v47 = vpop.f32.mrb[137].mxu0  ;;  %v10145_v57 = vpop.f32.mrb[153].mxu1 }
0x1243   :  { %v12535_v28 = vadd.f32 %v12534_v47, %v12533_v33  ;;  %v10146_v39 = vadd.f32 %v10145_v57, %v10081_v44  ;;  %v12536_v30 = vpop.f32.mrb[138].mxu0  ;;  %v13856_v54 = vpop.f32.mrb[154].mxu1 }
0x1244   :  { %v10157_v63 = vadd.f32 %v13856_v54, %v10092_v16  ;;  %v12537_v60 = vpop.f32.mrb[139].mxu0  ;;  %v10148_v19 = vpop.f32.mrb[155].mxu1  ;;  %v10178_v56 = vmax.f32 %v10154_v8, 0.0 }
0x1245   :  { %v12538_v12 = vadd.f32 %v12537_v60, %v12536_v30  ;;  %v10149_v58 = vadd.f32 %v10148_v19, %v10084_v9  ;;  %v10097_v5 = vadd.f32 %v12535_v28, %v10032_v6  ;;  %v10176_v7 = vmax.f32 %v10146_v39, 0.0 }
0x1246   :  { %v10179_v17 = vmax.f32 %v10157_v63, 0.0 }
0x1247   :  { %v10177_v1 = vmax.f32 %v10149_v58, 0.0  ;;  %v10100_v15 = vadd.f32 %v12538_v12, %v10035_v26 }
0x1248   :  { %v10189_v37 = vpack.c.bf16 %v10179_v17, %v10178_v56 }
0x1249   :  { %v10188_v22 = vpack.c.bf16 %v10177_v1, %v10176_v7  ;;  %v12539_v52 = vpop.f32.mrb[140].mxu0  ;;  %v13859_v0 = vpop.f32.mrb[156].mxu1 }
0x124a   :  { %v12540_v27 = vpop.f32.mrb[141].mxu0  ;;  %v10161_v46 = vpop.f32.mrb[157].mxu1 }
0x124b   :  { %v12541_v55 = vadd.f32 %v12540_v27, %v12539_v52  ;;  %v10162_v61 = vadd.f32 %v10161_v46, %v10097_v5  ;;  %v12542_v21 = vpop.f32.mrb[142].mxu0  ;;  %v13860_v34 = vpop.f32.mrb[158].mxu1  ;;  %13865 = vmatprep.mubr.msk.bf16.mxu1 %vm4210_vm5, %v10188_v22 }
0x124c   :  { %v12543_v49 = vpop.f32.mrb[143].mxu0  ;;  %v10164_v40 = vpop.f32.mrb[159].mxu1  ;;  %13866 = vmatmul.mubr.msk.bf16.vlgmr.msra.gmra.mrb[160].mxu1 %vm4210_vm5, %v10189_v37 }
0x124d   :  { %v10105_v31 = vadd.f32 %v12541_v55, %v10040_v10  ;;  %v12544_v32 = vadd.f32 %v12543_v49, %v12542_v21  ;;  %v10165_v48 = vadd.f32 %v10164_v40, %v10100_v15  ;;  %v10180_v51 = vmax.f32 %v10162_v61, 0.0 }
0x124f   :  { %v10170_v24 = vadd.f32 %v13859_v0, %v10105_v31  ;;  %v10108_v45 = vadd.f32 %v12544_v32, %v10043_v25  ;;  %v10181_v41 = vmax.f32 %v10165_v48, 0.0 }
0x1251   :  { %v10173_v59 = vadd.f32 %v13860_v34, %v10108_v45  ;;  %v10190_v23 = vpack.c.bf16 %v10181_v41, %v10180_v51  ;;  %v10182_v18 = vmax.f32 %v10170_v24, 0.0 }
0x1253   :  { %v10183_v4 = vmax.f32 %v10173_v59, 0.0  ;;  %13869 = vmatprep.mubr.msk.bf16.mxu1 %vm4210_vm5, %v10190_v23 }
0x1255   :  { %v10191_v36 = vpack.c.bf16 %v10183_v4, %v10182_v18 }
0x1257   :  { %13870 = vmatmul.mubr.msk.bf16.gmra.mrb[164].mxu1 %vm4210_vm5, %v10191_v36 }
0x131f   :  { %v13867_v20 = vpop.f32.mrb[160].mxu1 }
0x1320   :  { %v10266_v2 = vadd.f32 %v13867_v20, %v11465_v38  ;;  %v10257_v62 = vpop.f32.mrb[161].mxu1 }
0x1321   :  { %v10258_v44 = vadd.f32 %v11465_v38, %v10257_v62  ;;  %v13868_v9 = vpop.f32.mrb[162].mxu1 }
0x1322   :  { %10290 = vst.msk [vmem:[%s10337_s21 + $0x10] sm:$0xff] %vm563_vm2, %v10266_v2  ;;  %v10269_v13 = vadd.f32 %v13868_v9, %v11465_v38  ;;  %v10260_v43 = vpop.f32.mrb[163].mxu1 }
0x1323   :  { %10288 = vst.msk [vmem:[%s10337_s21] sm:$0xff] %vm563_vm2, %v10258_v44  ;;  %v10261_v29 = vadd.f32 %v11465_v38, %v10260_v43 }
0x1324   :  { %10291 = vst.msk [vmem:[%s10337_s21 + $0x18] sm:$0xff] %vm563_vm2, %v10269_v13 }
0x1325   :  { %10289 = vst.msk [vmem:[%s10337_s21 + $0x8] sm:$0xff] %vm563_vm2, %v10261_v29 }
0x132a   :  { %v13871_v42 = vpop.f32.mrb[164].mxu1 }
0x132b   :  { %v10282_v3 = vadd.f32 %v13871_v42, %v11465_v38  ;;  %v10273_v35 = vpop.f32.mrb[165].mxu1 }
0x132c   :  { %v10274_v53 = vadd.f32 %v11465_v38, %v10273_v35  ;;  %v13872_v14 = vpop.f32.mrb[166].mxu1 }
0x132d   :  { %10294 = vst.msk [vmem:[%s10337_s21 + $0x30] sm:$0xff] %vm563_vm2, %v10282_v3  ;;  %v10285_v11 = vadd.f32 %v13872_v14, %v11465_v38  ;;  %v10276_v16 = vpop.f32.mrb[167].mxu1 }
0x132e   :  { %10292 = vst.msk [vmem:[%s10337_s21 + $0x20] sm:$0xff] %vm563_vm2, %v10274_v53  ;;  %v10277_v33 = vadd.f32 %v11465_v38, %v10276_v16 }
0x132f   :  { %10295 = vst.msk [vmem:[%s10337_s21 + $0x38] sm:$0xff] %vm563_vm2, %v10285_v11 }
0x1330   :  { %10293 = vst.msk [vmem:[%s10337_s21 + $0x28] sm:$0xff] %vm563_vm2, %v10277_v33 }

</bundles_post_ra>
